<compile_context>
chip_gen: v7x
topology: tpu7x:2x2x1
jax: 0.10.0
libtpu: 0.0.40
codegen_flags: <defaults>
</compile_context>

<pallas_src>
import functools
import math

import jax
import jax.numpy as jnp
from jax.experimental import pallas as pl
from jax.experimental.pallas import tpu as pltpu

NEG_INF = -1e30     # stands in for -inf in the causal mask (same softmax result)
LN_EPS = 1e-5       # PyTorch LayerNorm default


# ---------------- in-kernel helpers (operate on loaded values) ----------------

def _layer_norm(x, g, b):
    mean = jnp.mean(x, axis=-1, keepdims=True)
    var = jnp.mean((x - mean) ** 2, axis=-1, keepdims=True)
    return (x - mean) * jax.lax.rsqrt(var + LN_EPS) * g + b


def _softmax_rows(s):
    s = s - jnp.max(s, axis=-1, keepdims=True)
    p = jnp.exp(s)
    return p * pl.reciprocal(jnp.sum(p, axis=-1, keepdims=True), approx=True)


def _attention(q, kv, w_o, b_o, n_head, causal):
    # q: [Sq, D]; kv: [Skv, 2D] (K cols [:D], V cols [D:]); w_o: [D, D]; b_o: [1, D]
    # Per-head attention with the output projection folded into the head loop
    # (avoids materializing a concatenated [Sq, D] head tensor).
    Sq, D = q.shape
    Skv = kv.shape[0]
    Dh = D // n_head
    scale = 1.0 / math.sqrt(Dh)
    out = jnp.zeros((Sq, D), jnp.float32)
    for h in range(n_head):
        qh = q[:, h * Dh:(h + 1) * Dh]
        kh = kv[:, h * Dh:(h + 1) * Dh]
        vh = kv[:, D + h * Dh:D + (h + 1) * Dh]
        # contract on the feature dim without materializing k.T
        s = jax.lax.dot_general(qh, kh, (((1,), (1,)), ((), ())),
                                preferred_element_type=jnp.float32) * scale
        if causal:
            ii = jax.lax.broadcasted_iota(jnp.int32, (Sq, Skv), 0)
            jj = jax.lax.broadcasted_iota(jnp.int32, (Sq, Skv), 1)
            s = jnp.where(jj > ii, NEG_INF, s)
        p = _softmax_rows(s)
        oh = jnp.dot(p, vh, preferred_element_type=jnp.float32)         # [Sq, Dh]
        out = out + jnp.dot(oh, w_o[h * Dh:(h + 1) * Dh, :],
                            preferred_element_type=jnp.float32)
    return out + b_o


# ---------------- fused per-layer kernels ----------------

def _encoder_layer_kernel(x_ref, w_qkv_ref, b_qkv_ref, w_o_ref, b_o_ref,
                          g1_ref, bb1_ref, w1_ref, bf1_ref, w2_ref, bf2_ref,
                          g2_ref, bb2_ref, o_ref, *, n_head):
    # one grid step == one batch element; x_ref is [S, D]
    x = x_ref[...]
    D = x.shape[-1]
    qkv = jnp.dot(x, w_qkv_ref[...],
                  preferred_element_type=jnp.float32) + b_qkv_ref[...]   # [S, 3D]
    attn = _attention(qkv[:, :D], qkv[:, D:], w_o_ref[...], b_o_ref[...],
                      n_head, causal=False)
    y = _layer_norm(x + attn, g1_ref[...], bb1_ref[...])
    h = jnp.maximum(jnp.dot(y, w1_ref[...],
                            preferred_element_type=jnp.float32) + bf1_ref[...], 0.0)
    h = jnp.dot(h, w2_ref[...], preferred_element_type=jnp.float32) + bf2_ref[...]
    o_ref[...] = _layer_norm(y + h, g2_ref[...], bb2_ref[...])


def _decoder_layer_kernel(y_ref, mem_ref,
                          sw_qkv_ref, sb_qkv_ref, sw_o_ref, sb_o_ref,
                          g1_ref, bb1_ref,
                          cw_q_ref, cb_q_ref, cw_kv_ref, cb_kv_ref,
                          cw_o_ref, cb_o_ref, g2_ref, bb2_ref,
                          w1_ref, bf1_ref, w2_ref, bf2_ref, g3_ref, bb3_ref,
                          o_ref, *, n_head):
    y = y_ref[...]            # [St, D]
    mem = mem_ref[...]        # [Ss, D]
    D = y.shape[-1]
    # causal self-attention (mask generated in-kernel, no mask DMA)
    qkv = jnp.dot(y, sw_qkv_ref[...],
                  preferred_element_type=jnp.float32) + sb_qkv_ref[...]
    a = _attention(qkv[:, :D], qkv[:, D:], sw_o_ref[...], sb_o_ref[...],
                   n_head, causal=True)
    y = _layer_norm(y + a, g1_ref[...], bb1_ref[...])
    # cross-attention with encoder memory
    q = jnp.dot(y, cw_q_ref[...], preferred_element_type=jnp.float32) + cb_q_ref[...]
    kv = jnp.dot(mem, cw_kv_ref[...],
                 preferred_element_type=jnp.float32) + cb_kv_ref[...]
    a = _attention(q, kv, cw_o_ref[...], cb_o_ref[...], n_head, causal=False)
    y = _layer_norm(y + a, g2_ref[...], bb2_ref[...])
    # feed-forward
    h = jnp.maximum(jnp.dot(y, w1_ref[...],
                            preferred_element_type=jnp.float32) + bf1_ref[...], 0.0)
    h = jnp.dot(h, w2_ref[...], preferred_element_type=jnp.float32) + bf2_ref[...]
    o_ref[...] = _layer_norm(y + h, g3_ref[...], bb3_ref[...])


def _layernorm_kernel(x_ref, g_ref, b_ref, o_ref):
    o_ref[...] = _layer_norm(x_ref[...], g_ref[...], b_ref[...])


def _ln_lm_head_kernel(y_ref, g_ref, b_ref, w_ref, o_ref):
    # final decoder LayerNorm fused with bias-free lm_head matmul
    yn = _layer_norm(y_ref[...], g_ref[...], b_ref[...])
    o_ref[...] = jnp.dot(yn, w_ref[...], preferred_element_type=jnp.float32)


# ---------------- pallas_call wrappers ----------------

def _bcast_spec(shape):
    nd = len(shape)
    return pl.BlockSpec(shape, lambda *_: (0,) * nd)


def _encoder_layer(x, p, n_head):
    B, S, D = x.shape
    F = p["w1"].shape[1]
    act_spec = pl.BlockSpec((pl.Squeezed(), S, D), lambda b: (b, 0, 0))
    return pl.pallas_call(
        functools.partial(_encoder_layer_kernel, n_head=n_head),
        out_shape=jax.ShapeDtypeStruct((B, S, D), jnp.float32),
        grid=(B,),
        in_specs=[act_spec,
                  _bcast_spec((D, 3 * D)), _bcast_spec((1, 3 * D)),
                  _bcast_spec((D, D)), _bcast_spec((1, D)),
                  _bcast_spec((1, D)), _bcast_spec((1, D)),
                  _bcast_spec((D, F)), _bcast_spec((1, F)),
                  _bcast_spec((F, D)), _bcast_spec((1, D)),
                  _bcast_spec((1, D)), _bcast_spec((1, D))],
        out_specs=act_spec,
        compiler_params=pltpu.CompilerParams(dimension_semantics=("parallel",)),
    )(x,
      p["w_qkv"], p["b_qkv"], p["w_o"], p["b_o"],
      p["ln1_g"], p["ln1_b"],
      p["w1"], p["bf1"], p["w2"], p["bf2"],
      p["ln2_g"], p["ln2_b"])


def _decoder_layer(y, memory, p, n_head):
    B, St, D = y.shape
    Ss = memory.shape[1]
    F = p["w1"].shape[1]
    y_spec = pl.BlockSpec((pl.Squeezed(), St, D), lambda b: (b, 0, 0))
    m_spec = pl.BlockSpec((pl.Squeezed(), Ss, D), lambda b: (b, 0, 0))
    return pl.pallas_call(
        functools.partial(_decoder_layer_kernel, n_head=n_head),
        out_shape=jax.ShapeDtypeStruct((B, St, D), jnp.float32),
        grid=(B,),
        in_specs=[y_spec, m_spec,
                  _bcast_spec((D, 3 * D)), _bcast_spec((1, 3 * D)),
                  _bcast_spec((D, D)), _bcast_spec((1, D)),
                  _bcast_spec((1, D)), _bcast_spec((1, D)),
                  _bcast_spec((D, D)), _bcast_spec((1, D)),
                  _bcast_spec((D, 2 * D)), _bcast_spec((1, 2 * D)),
                  _bcast_spec((D, D)), _bcast_spec((1, D)),
                  _bcast_spec((1, D)), _bcast_spec((1, D)),
                  _bcast_spec((D, F)), _bcast_spec((1, F)),
                  _bcast_spec((F, D)), _bcast_spec((1, D)),
                  _bcast_spec((1, D)), _bcast_spec((1, D))],
        out_specs=y_spec,
        compiler_params=pltpu.CompilerParams(dimension_semantics=("parallel",)),
    )(y, memory,
      p["sw_qkv"], p["sb_qkv"], p["sw_o"], p["sb_o"], p["ln1_g"], p["ln1_b"],
      p["cw_q"], p["cb_q"], p["cw_kv"], p["cb_kv"], p["cw_o"], p["cb_o"],
      p["ln2_g"], p["ln2_b"],
      p["w1"], p["bf1"], p["w2"], p["bf2"], p["ln3_g"], p["ln3_b"])


def _final_norm(x, g, b):
    # plain LayerNorm (no residual, no zero buffers), grid over batch
    B, S, D = x.shape
    act_spec = pl.BlockSpec((pl.Squeezed(), S, D), lambda i: (i, 0, 0))
    return pl.pallas_call(
        _layernorm_kernel,
        out_shape=jax.ShapeDtypeStruct((B, S, D), jnp.float32),
        grid=(B,),
        in_specs=[act_spec, _bcast_spec((1, D)), _bcast_spec((1, D))],
        out_specs=act_spec,
        compiler_params=pltpu.CompilerParams(dimension_semantics=("parallel",)),
    )(x, g, b)


def _ln_lm_head(y2d, g, b, w_lm, *, tm_max=128, tn_max=512):
    # fused final LayerNorm + bias-free lm_head, tiled over (rows, vocab).
    # At demo sizes the grid degenerates to (1, 1); for realistic vocab it
    # tiles vocab in 512-wide lane-dense blocks with both axes "parallel"
    # (v7x can shard across its two TensorCores).  Edge blocks are masked by
    # Pallas; LN is row-wise so partial-row padding never contaminates results.
    M, D = y2d.shape
    V = w_lm.shape[1]
    tm = M if M <= tm_max else tm_max
    tn = V if V <= tn_max else tn_max
    grid = (pl.cdiv(M, tm), pl.cdiv(V, tn))
    return pl.pallas_call(
        _ln_lm_head_kernel,
        out_shape=jax.ShapeDtypeStruct((M, V), jnp.float32),
        grid=grid,
        in_specs=[pl.BlockSpec((tm, D), lambda i, j: (i, 0)),
                  pl.BlockSpec((1, D), lambda i, j: (0, 0)),
                  pl.BlockSpec((1, D), lambda i, j: (0, 0)),
                  pl.BlockSpec((D, tn), lambda i, j: (0, j))],
        out_specs=pl.BlockSpec((tm, tn), lambda i, j: (i, j)),
        compiler_params=pltpu.CompilerParams(
            dimension_semantics=("parallel", "parallel")),
    )(y2d, g, b, w_lm)


# ---------------- params / embedding glue (plain JAX) ----------------

def positional_encoding_table(max_len, d_model):
    pos = jnp.arange(max_len, dtype=jnp.float32)[:, None]
    div = jnp.exp(jnp.arange(0, d_model, 2, dtype=jnp.float32)
                  * (-math.log(10000.0) / d_model))
    pe = jnp.zeros((max_len, d_model), jnp.float32)
    pe = pe.at[:, 0::2].set(jnp.sin(pos * div))
    pe = pe.at[:, 1::2].set(jnp.cos(pos * div))
    return pe


def init_params(key, cfg):
    d, dff, v = cfg["d_model"], cfg["dim_feedforward"], cfg["vocab_size"]
    keys = iter(jax.random.split(key, 512))

    def w(shape):
        return 0.02 * jax.random.normal(next(keys), shape, jnp.float32)

    def zrow(n):
        return jnp.zeros((1, n), jnp.float32)

    def ln_pair():
        return jnp.ones((1, d), jnp.float32), jnp.zeros((1, d), jnp.float32)

    def enc_layer():
        g1, b1 = ln_pair()
        g2, b2 = ln_pair()
        return dict(w_qkv=w((d, 3 * d)), b_qkv=zrow(3 * d),
                    w_o=w((d, d)), b_o=zrow(d),
                    ln1_g=g1, ln1_b=b1,
                    w1=w((d, dff)), bf1=zrow(dff),
                    w2=w((dff, d)), bf2=zrow(d),
                    ln2_g=g2, ln2_b=b2)

    def dec_layer():
        g1, b1 = ln_pair()
        g2, b2 = ln_pair()
        g3, b3 = ln_pair()
        return dict(sw_qkv=w((d, 3 * d)), sb_qkv=zrow(3 * d),
                    sw_o=w((d, d)), sb_o=zrow(d),
                    ln1_g=g1, ln1_b=b1,
                    cw_q=w((d, d)), cb_q=zrow(d),
                    cw_kv=w((d, 2 * d)), cb_kv=zrow(2 * d),
                    cw_o=w((d, d)), cb_o=zrow(d),
                    ln2_g=g2, ln2_b=b2,
                    w1=w((d, dff)), bf1=zrow(dff),
                    w2=w((dff, d)), bf2=zrow(d),
                    ln3_g=g3, ln3_b=b3)

    eg, eb = ln_pair()
    dg, db = ln_pair()
    return dict(
        shared=w((v, d)),           # nn.Embedding(vocab, d_model)
        lm_head=w((d, v)),          # nn.Linear(d_model, vocab, bias=False), transposed
        encoder=[enc_layer() for _ in range(cfg["num_encoder_layers"])],
        decoder=[dec_layer() for _ in range(cfg["num_decoder_layers"])],
        enc_norm_g=eg, enc_norm_b=eb,
        dec_norm_g=dg, dec_norm_b=db,
    )


def forward(params, cfg, input_ids, decoder_input_ids):
    B, Ss = input_ids.shape
    St = decoder_input_ids.shape[1]
    d, H, V = cfg["d_model"], cfg["n_head"], cfg["vocab_size"]

    # embedding gathers + PE table: plain JAX glue
    src = params["shared"][input_ids]                       # [B, Ss, D]
    pe = positional_encoding_table(cfg["max_len"], d)
    # reference quirk: PE indexed by the batch dimension; no PE on decoder embeds
    src = src + pe[:B][:, None, :]
    tgt = params["shared"][decoder_input_ids]               # [B, St, D]

    # ---- encoder: one fused pallas_call per layer ----
    x = src
    for p in params["encoder"]:
        x = _encoder_layer(x, p, H)
    memory = _final_norm(x, params["enc_norm_g"], params["enc_norm_b"])

    # ---- decoder: one fused pallas_call per layer (causal mask in-kernel) ----
    y = tgt
    for p in params["decoder"]:
        y = _decoder_layer(y, memory, p, H)

    # ---- final decoder norm fused with bias-free lm_head ----
    logits = _ln_lm_head(y.reshape(B * St, d),
                         params["dec_norm_g"], params["dec_norm_b"],
                         params["lm_head"])
    return logits.reshape(B, St, V)


if __name__ == "__main__":
    cfg = dict(d_model=32, n_head=4, num_encoder_layers=2, num_decoder_layers=2,
               dim_feedforward=64, vocab_size=64, pad_token=0, eos_token=1,
               max_len=5000)

    key = jax.random.PRNGKey(0)
    pkey, ikey, dkey = jax.random.split(key, 3)
    params = init_params(pkey, cfg)

    B, Ss, St = 2, 8, 8
    input_ids = jax.random.randint(ikey, (B, Ss), 0, cfg["vocab_size"],
                                   dtype=jnp.int32)
    decoder_input_ids = jax.random.randint(dkey, (B, St), 0, cfg["vocab_size"],
                                           dtype=jnp.int32)

    fwd = jax.jit(lambda prm, a, b: forward(prm, cfg, a, b))
    logits = jax.block_until_ready(fwd(params, input_ids, decoder_input_ids))

    assert logits.shape == (B, St, cfg["vocab_size"]), logits.shape
    assert bool(jnp.all(jnp.isfinite(logits)))
    print("KERNEL_OK")
</pallas_src>

<mosaic_0001>
module attributes {stable_mosaic.version = 11 : i64} {
  func.func @_encoder_layer_kernel(%arg0: i32, %arg1: memref<1x8x32xf32, #tpu.memory_space<vmem>>, %arg2: memref<32x96xf32, #tpu.memory_space<vmem>>, %arg3: memref<1x96xf32, #tpu.memory_space<vmem>>, %arg4: memref<32x32xf32, #tpu.memory_space<vmem>>, %arg5: memref<1x32xf32, #tpu.memory_space<vmem>>, %arg6: memref<1x32xf32, #tpu.memory_space<vmem>>, %arg7: memref<1x32xf32, #tpu.memory_space<vmem>>, %arg8: memref<32x64xf32, #tpu.memory_space<vmem>>, %arg9: memref<1x64xf32, #tpu.memory_space<vmem>>, %arg10: memref<64x32xf32, #tpu.memory_space<vmem>>, %arg11: memref<1x32xf32, #tpu.memory_space<vmem>>, %arg12: memref<1x32xf32, #tpu.memory_space<vmem>>, %arg13: memref<1x32xf32, #tpu.memory_space<vmem>>, %arg14: memref<1x8x32xf32, #tpu.memory_space<vmem>>) attributes {dimension_semantics = [#tpu.dimension_semantics<parallel>], iteration_bounds = array<i64: 2>, scalar_prefetch = 0 : i64, scratch_operands = 0 : i64, tpu.core_type = #tpu.core_type<tc>, window_params = [{transform_indices = @transform_0, window_bounds = array<i64: 1, 8, 32>}, {pipeline_mode = #tpu.pipeline_mode<synchronous>, transform_indices = @transform_1, window_bounds = array<i64: 32, 96>}, {pipeline_mode = #tpu.pipeline_mode<synchronous>, transform_indices = @transform_2, window_bounds = array<i64: 1, 96>}, {pipeline_mode = #tpu.pipeline_mode<synchronous>, transform_indices = @transform_3, window_bounds = array<i64: 32, 32>}, {pipeline_mode = #tpu.pipeline_mode<synchronous>, transform_indices = @transform_4, window_bounds = array<i64: 1, 32>}, {pipeline_mode = #tpu.pipeline_mode<synchronous>, transform_indices = @transform_5, window_bounds = array<i64: 1, 32>}, {pipeline_mode = #tpu.pipeline_mode<synchronous>, transform_indices = @transform_6, window_bounds = array<i64: 1, 32>}, {pipeline_mode = #tpu.pipeline_mode<synchronous>, transform_indices = @transform_7, window_bounds = array<i64: 32, 64>}, {pipeline_mode = #tpu.pipeline_mode<synchronous>, transform_indices = @transform_8, window_bounds = array<i64: 1, 64>}, {pipeline_mode = #tpu.pipeline_mode<synchronous>, transform_indices = @transform_9, window_bounds = array<i64: 64, 32>}, {pipeline_mode = #tpu.pipeline_mode<synchronous>, transform_indices = @transform_10, window_bounds = array<i64: 1, 32>}, {pipeline_mode = #tpu.pipeline_mode<synchronous>, transform_indices = @transform_11, window_bounds = array<i64: 1, 32>}, {pipeline_mode = #tpu.pipeline_mode<synchronous>, transform_indices = @transform_12, window_bounds = array<i64: 1, 32>}, {transform_indices = @transform_13, window_bounds = array<i64: 1, 8, 32>}]} {
    %c0 = arith.constant 0 : index
    %c0_0 = arith.constant 0 : index
    %c0_1 = arith.constant 0 : index
    %0 = vector.load %arg1[%c0, %c0_0, %c0_1] : memref<1x8x32xf32, #tpu.memory_space<vmem>>, vector<1x8x32xf32>
    %1 = vector.shape_cast %0 : vector<1x8x32xf32> to vector<8x32xf32>
    %c0_2 = arith.constant 0 : index
    %c0_3 = arith.constant 0 : index
    %2 = vector.load %arg2[%c0_2, %c0_3] : memref<32x96xf32, #tpu.memory_space<vmem>>, vector<32x96xf32>
    %cst = arith.constant dense<0.000000e+00> : vector<8x96xf32>
    %3 = tpu.matmul %1, %2, %cst {dimension_numbers = #tpu.dot_dimension_numbers<[1], [0], [0], [1], [0, 0, 1, 1], [], []>} : vector<8x32xf32>, vector<32x96xf32>, vector<8x96xf32> -> vector<8x96xf32>
    %c0_4 = arith.constant 0 : index
    %c0_5 = arith.constant 0 : index
    %4 = vector.load %arg3[%c0_4, %c0_5] : memref<1x96xf32, #tpu.memory_space<vmem>>, vector<1x96xf32>
    %5 = vector.broadcast %4 : vector<1x96xf32> to vector<8x96xf32>
    %6 = arith.addf %3, %5 : vector<8x96xf32>
    %7 = vector.extract_strided_slice %6 {offsets = [0, 0], sizes = [8, 32], strides = [1, 1]} : vector<8x96xf32> to vector<8x32xf32>
    %8 = vector.extract_strided_slice %6 {offsets = [0, 32], sizes = [8, 64], strides = [1, 1]} : vector<8x96xf32> to vector<8x64xf32>
    %c0_6 = arith.constant 0 : index
    %c0_7 = arith.constant 0 : index
    %9 = vector.load %arg4[%c0_6, %c0_7] : memref<32x32xf32, #tpu.memory_space<vmem>>, vector<32x32xf32>
    %c0_8 = arith.constant 0 : index
    %c0_9 = arith.constant 0 : index
    %10 = vector.load %arg5[%c0_8, %c0_9] : memref<1x32xf32, #tpu.memory_space<vmem>>, vector<1x32xf32>
    %cst_10 = arith.constant 0.000000e+00 : f32
    %11 = vector.broadcast %cst_10 : f32 to vector<8x32xf32>
    %12 = vector.extract_strided_slice %7 {offsets = [0, 0], sizes = [8, 8], strides = [1, 1]} : vector<8x32xf32> to vector<8x8xf32>
    %13 = vector.extract_strided_slice %8 {offsets = [0, 0], sizes = [8, 8], strides = [1, 1]} : vector<8x64xf32> to vector<8x8xf32>
    %14 = vector.extract_strided_slice %8 {offsets = [0, 32], sizes = [8, 8], strides = [1, 1]} : vector<8x64xf32> to vector<8x8xf32>
    %cst_11 = arith.constant dense<0.000000e+00> : vector<8x8xf32>
    %15 = tpu.matmul %12, %13, %cst_11 {dimension_numbers = #tpu.dot_dimension_numbers<[1], [1], [0], [0], [0, 0, 1, 0], [], []>} : vector<8x8xf32>, vector<8x8xf32>, vector<8x8xf32> -> vector<8x8xf32>
    %cst_12 = arith.constant 0.353553385 : f32
    %16 = vector.broadcast %cst_12 : f32 to vector<8x8xf32>
    %17 = arith.mulf %15, %16 : vector<8x8xf32>
    %cst_13 = arith.constant dense<0xFF800000> : vector<8xf32>
    %18 = vector.multi_reduction <maximumf>, %17, %cst_13 [1] : vector<8x8xf32> to vector<8xf32>
    %19 = vector.shape_cast %18 : vector<8xf32> to vector<8x1xf32>
    %20 = vector.broadcast %19 : vector<8x1xf32> to vector<8x8xf32>
    %21 = arith.subf %17, %20 : vector<8x8xf32>
    %22 = math.exp %21 : vector<8x8xf32>
    %cst_14 = arith.constant dense<0.000000e+00> : vector<8xf32>
    %23 = vector.multi_reduction <add>, %22, %cst_14 [1] : vector<8x8xf32> to vector<8xf32>
    %24 = vector.shape_cast %23 : vector<8xf32> to vector<8x1xf32>
    %25 = tpu.reciprocal %24 {approx = true} : vector<8x1xf32> -> vector<8x1xf32>
    %26 = vector.broadcast %25 : vector<8x1xf32> to vector<8x8xf32>
    %27 = arith.mulf %22, %26 : vector<8x8xf32>
    %cst_15 = arith.constant dense<0.000000e+00> : vector<8x8xf32>
    %28 = tpu.matmul %27, %14, %cst_15 {dimension_numbers = #tpu.dot_dimension_numbers<[1], [0], [0], [1], [0, 0, 1, 1], [], []>} : vector<8x8xf32>, vector<8x8xf32>, vector<8x8xf32> -> vector<8x8xf32>
    %29 = vector.extract_strided_slice %9 {offsets = [0, 0], sizes = [8, 32], strides = [1, 1]} : vector<32x32xf32> to vector<8x32xf32>
    %cst_16 = arith.constant dense<0.000000e+00> : vector<8x32xf32>
    %30 = tpu.matmul %28, %29, %cst_16 {dimension_numbers = #tpu.dot_dimension_numbers<[1], [0], [0], [1], [0, 0, 1, 1], [], []>} : vector<8x8xf32>, vector<8x32xf32>, vector<8x32xf32> -> vector<8x32xf32>
    %31 = arith.addf %11, %30 : vector<8x32xf32>
    %32 = vector.extract_strided_slice %7 {offsets = [0, 8], sizes = [8, 8], strides = [1, 1]} : vector<8x32xf32> to vector<8x8xf32>
    %33 = vector.extract_strided_slice %8 {offsets = [0, 8], sizes = [8, 8], strides = [1, 1]} : vector<8x64xf32> to vector<8x8xf32>
    %34 = vector.extract_strided_slice %8 {offsets = [0, 40], sizes = [8, 8], strides = [1, 1]} : vector<8x64xf32> to vector<8x8xf32>
    %cst_17 = arith.constant dense<0.000000e+00> : vector<8x8xf32>
    %35 = tpu.matmul %32, %33, %cst_17 {dimension_numbers = #tpu.dot_dimension_numbers<[1], [1], [0], [0], [0, 0, 1, 0], [], []>} : vector<8x8xf32>, vector<8x8xf32>, vector<8x8xf32> -> vector<8x8xf32>
    %cst_18 = arith.constant 0.353553385 : f32
    %36 = vector.broadcast %cst_18 : f32 to vector<8x8xf32>
    %37 = arith.mulf %35, %36 : vector<8x8xf32>
    %cst_19 = arith.constant dense<0xFF800000> : vector<8xf32>
    %38 = vector.multi_reduction <maximumf>, %37, %cst_19 [1] : vector<8x8xf32> to vector<8xf32>
    %39 = vector.shape_cast %38 : vector<8xf32> to vector<8x1xf32>
    %40 = vector.broadcast %39 : vector<8x1xf32> to vector<8x8xf32>
    %41 = arith.subf %37, %40 : vector<8x8xf32>
    %42 = math.exp %41 : vector<8x8xf32>
    %cst_20 = arith.constant dense<0.000000e+00> : vector<8xf32>
    %43 = vector.multi_reduction <add>, %42, %cst_20 [1] : vector<8x8xf32> to vector<8xf32>
    %44 = vector.shape_cast %43 : vector<8xf32> to vector<8x1xf32>
    %45 = tpu.reciprocal %44 {approx = true} : vector<8x1xf32> -> vector<8x1xf32>
    %46 = vector.broadcast %45 : vector<8x1xf32> to vector<8x8xf32>
    %47 = arith.mulf %42, %46 : vector<8x8xf32>
    %cst_21 = arith.constant dense<0.000000e+00> : vector<8x8xf32>
    %48 = tpu.matmul %47, %34, %cst_21 {dimension_numbers = #tpu.dot_dimension_numbers<[1], [0], [0], [1], [0, 0, 1, 1], [], []>} : vector<8x8xf32>, vector<8x8xf32>, vector<8x8xf32> -> vector<8x8xf32>
    %49 = vector.extract_strided_slice %9 {offsets = [8, 0], sizes = [8, 32], strides = [1, 1]} : vector<32x32xf32> to vector<8x32xf32>
    %cst_22 = arith.constant dense<0.000000e+00> : vector<8x32xf32>
    %50 = tpu.matmul %48, %49, %cst_22 {dimension_numbers = #tpu.dot_dimension_numbers<[1], [0], [0], [1], [0, 0, 1, 1], [], []>} : vector<8x8xf32>, vector<8x32xf32>, vector<8x32xf32> -> vector<8x32xf32>
    %51 = arith.addf %31, %50 : vector<8x32xf32>
    %52 = vector.extract_strided_slice %7 {offsets = [0, 16], sizes = [8, 8], strides = [1, 1]} : vector<8x32xf32> to vector<8x8xf32>
    %53 = vector.extract_strided_slice %8 {offsets = [0, 16], sizes = [8, 8], strides = [1, 1]} : vector<8x64xf32> to vector<8x8xf32>
    %54 = vector.extract_strided_slice %8 {offsets = [0, 48], sizes = [8, 8], strides = [1, 1]} : vector<8x64xf32> to vector<8x8xf32>
    %cst_23 = arith.constant dense<0.000000e+00> : vector<8x8xf32>
    %55 = tpu.matmul %52, %53, %cst_23 {dimension_numbers = #tpu.dot_dimension_numbers<[1], [1], [0], [0], [0, 0, 1, 0], [], []>} : vector<8x8xf32>, vector<8x8xf32>, vector<8x8xf32> -> vector<8x8xf32>
    %cst_24 = arith.constant 0.353553385 : f32
    %56 = vector.broadcast %cst_24 : f32 to vector<8x8xf32>
    %57 = arith.mulf %55, %56 : vector<8x8xf32>
    %cst_25 = arith.constant dense<0xFF800000> : vector<8xf32>
    %58 = vector.multi_reduction <maximumf>, %57, %cst_25 [1] : vector<8x8xf32> to vector<8xf32>
    %59 = vector.shape_cast %58 : vector<8xf32> to vector<8x1xf32>
    %60 = vector.broadcast %59 : vector<8x1xf32> to vector<8x8xf32>
    %61 = arith.subf %57, %60 : vector<8x8xf32>
    %62 = math.exp %61 : vector<8x8xf32>
    %cst_26 = arith.constant dense<0.000000e+00> : vector<8xf32>
    %63 = vector.multi_reduction <add>, %62, %cst_26 [1] : vector<8x8xf32> to vector<8xf32>
    %64 = vector.shape_cast %63 : vector<8xf32> to vector<8x1xf32>
    %65 = tpu.reciprocal %64 {approx = true} : vector<8x1xf32> -> vector<8x1xf32>
    %66 = vector.broadcast %65 : vector<8x1xf32> to vector<8x8xf32>
    %67 = arith.mulf %62, %66 : vector<8x8xf32>
    %cst_27 = arith.constant dense<0.000000e+00> : vector<8x8xf32>
    %68 = tpu.matmul %67, %54, %cst_27 {dimension_numbers = #tpu.dot_dimension_numbers<[1], [0], [0], [1], [0, 0, 1, 1], [], []>} : vector<8x8xf32>, vector<8x8xf32>, vector<8x8xf32> -> vector<8x8xf32>
    %69 = vector.extract_strided_slice %9 {offsets = [16, 0], sizes = [8, 32], strides = [1, 1]} : vector<32x32xf32> to vector<8x32xf32>
    %cst_28 = arith.constant dense<0.000000e+00> : vector<8x32xf32>
    %70 = tpu.matmul %68, %69, %cst_28 {dimension_numbers = #tpu.dot_dimension_numbers<[1], [0], [0], [1], [0, 0, 1, 1], [], []>} : vector<8x8xf32>, vector<8x32xf32>, vector<8x32xf32> -> vector<8x32xf32>
    %71 = arith.addf %51, %70 : vector<8x32xf32>
    %72 = vector.extract_strided_slice %7 {offsets = [0, 24], sizes = [8, 8], strides = [1, 1]} : vector<8x32xf32> to vector<8x8xf32>
    %73 = vector.extract_strided_slice %8 {offsets = [0, 24], sizes = [8, 8], strides = [1, 1]} : vector<8x64xf32> to vector<8x8xf32>
    %74 = vector.extract_strided_slice %8 {offsets = [0, 56], sizes = [8, 8], strides = [1, 1]} : vector<8x64xf32> to vector<8x8xf32>
    %cst_29 = arith.constant dense<0.000000e+00> : vector<8x8xf32>
    %75 = tpu.matmul %72, %73, %cst_29 {dimension_numbers = #tpu.dot_dimension_numbers<[1], [1], [0], [0], [0, 0, 1, 0], [], []>} : vector<8x8xf32>, vector<8x8xf32>, vector<8x8xf32> -> vector<8x8xf32>
    %cst_30 = arith.constant 0.353553385 : f32
    %76 = vector.broadcast %cst_30 : f32 to vector<8x8xf32>
    %77 = arith.mulf %75, %76 : vector<8x8xf32>
    %cst_31 = arith.constant dense<0xFF800000> : vector<8xf32>
    %78 = vector.multi_reduction <maximumf>, %77, %cst_31 [1] : vector<8x8xf32> to vector<8xf32>
    %79 = vector.shape_cast %78 : vector<8xf32> to vector<8x1xf32>
    %80 = vector.broadcast %79 : vector<8x1xf32> to vector<8x8xf32>
    %81 = arith.subf %77, %80 : vector<8x8xf32>
    %82 = math.exp %81 : vector<8x8xf32>
    %cst_32 = arith.constant dense<0.000000e+00> : vector<8xf32>
    %83 = vector.multi_reduction <add>, %82, %cst_32 [1] : vector<8x8xf32> to vector<8xf32>
    %84 = vector.shape_cast %83 : vector<8xf32> to vector<8x1xf32>
    %85 = tpu.reciprocal %84 {approx = true} : vector<8x1xf32> -> vector<8x1xf32>
    %86 = vector.broadcast %85 : vector<8x1xf32> to vector<8x8xf32>
    %87 = arith.mulf %82, %86 : vector<8x8xf32>
    %cst_33 = arith.constant dense<0.000000e+00> : vector<8x8xf32>
    %88 = tpu.matmul %87, %74, %cst_33 {dimension_numbers = #tpu.dot_dimension_numbers<[1], [0], [0], [1], [0, 0, 1, 1], [], []>} : vector<8x8xf32>, vector<8x8xf32>, vector<8x8xf32> -> vector<8x8xf32>
    %89 = vector.extract_strided_slice %9 {offsets = [24, 0], sizes = [8, 32], strides = [1, 1]} : vector<32x32xf32> to vector<8x32xf32>
    %cst_34 = arith.constant dense<0.000000e+00> : vector<8x32xf32>
    %90 = tpu.matmul %88, %89, %cst_34 {dimension_numbers = #tpu.dot_dimension_numbers<[1], [0], [0], [1], [0, 0, 1, 1], [], []>} : vector<8x8xf32>, vector<8x32xf32>, vector<8x32xf32> -> vector<8x32xf32>
    %91 = arith.addf %71, %90 : vector<8x32xf32>
    %92 = vector.broadcast %10 : vector<1x32xf32> to vector<8x32xf32>
    %93 = arith.addf %91, %92 : vector<8x32xf32>
    %94 = arith.addf %1, %93 : vector<8x32xf32>
    %c0_35 = arith.constant 0 : index
    %c0_36 = arith.constant 0 : index
    %95 = vector.load %arg6[%c0_35, %c0_36] : memref<1x32xf32, #tpu.memory_space<vmem>>, vector<1x32xf32>
    %c0_37 = arith.constant 0 : index
    %c0_38 = arith.constant 0 : index
    %96 = vector.load %arg7[%c0_37, %c0_38] : memref<1x32xf32, #tpu.memory_space<vmem>>, vector<1x32xf32>
    %cst_39 = arith.constant dense<0.000000e+00> : vector<8xf32>
    %97 = vector.multi_reduction <add>, %94, %cst_39 [1] : vector<8x32xf32> to vector<8xf32>
    %98 = vector.shape_cast %97 : vector<8xf32> to vector<8x1xf32>
    %cst_40 = arith.constant 3.200000e+01 : f32
    %99 = vector.broadcast %cst_40 : f32 to vector<8x1xf32>
    %100 = arith.divf %98, %99 : vector<8x1xf32>
    %101 = vector.broadcast %100 : vector<8x1xf32> to vector<8x32xf32>
    %102 = arith.subf %94, %101 : vector<8x32xf32>
    %103 = arith.mulf %102, %102 : vector<8x32xf32>
    %cst_41 = arith.constant dense<0.000000e+00> : vector<8xf32>
    %104 = vector.multi_reduction <add>, %103, %cst_41 [1] : vector<8x32xf32> to vector<8xf32>
    %105 = vector.shape_cast %104 : vector<8xf32> to vector<8x1xf32>
    %cst_42 = arith.constant 3.200000e+01 : f32
    %106 = vector.broadcast %cst_42 : f32 to vector<8x1xf32>
    %107 = arith.divf %105, %106 : vector<8x1xf32>
    %108 = vector.broadcast %100 : vector<8x1xf32> to vector<8x32xf32>
    %109 = arith.subf %94, %108 : vector<8x32xf32>
    %cst_43 = arith.constant 9.99999974E-6 : f32
    %110 = vector.broadcast %cst_43 : f32 to vector<8x1xf32>
    %111 = arith.addf %107, %110 : vector<8x1xf32>
    %112 = math.rsqrt %111 : vector<8x1xf32>
    %113 = vector.broadcast %112 : vector<8x1xf32> to vector<8x32xf32>
    %114 = arith.mulf %109, %113 : vector<8x32xf32>
    %115 = vector.broadcast %95 : vector<1x32xf32> to vector<8x32xf32>
    %116 = arith.mulf %114, %115 : vector<8x32xf32>
    %117 = vector.broadcast %96 : vector<1x32xf32> to vector<8x32xf32>
    %118 = arith.addf %116, %117 : vector<8x32xf32>
    %c0_44 = arith.constant 0 : index
    %c0_45 = arith.constant 0 : index
    %119 = vector.load %arg8[%c0_44, %c0_45] : memref<32x64xf32, #tpu.memory_space<vmem>>, vector<32x64xf32>
    %cst_46 = arith.constant dense<0.000000e+00> : vector<8x64xf32>
    %120 = tpu.matmul %118, %119, %cst_46 {dimension_numbers = #tpu.dot_dimension_numbers<[1], [0], [0], [1], [0, 0, 1, 1], [], []>} : vector<8x32xf32>, vector<32x64xf32>, vector<8x64xf32> -> vector<8x64xf32>
    %c0_47 = arith.constant 0 : index
    %c0_48 = arith.constant 0 : index
    %121 = vector.load %arg9[%c0_47, %c0_48] : memref<1x64xf32, #tpu.memory_space<vmem>>, vector<1x64xf32>
    %122 = vector.broadcast %121 : vector<1x64xf32> to vector<8x64xf32>
    %123 = arith.addf %120, %122 : vector<8x64xf32>
    %cst_49 = arith.constant 0.000000e+00 : f32
    %124 = vector.broadcast %cst_49 : f32 to vector<8x64xf32>
    %125 = arith.maximumf %123, %124 : vector<8x64xf32>
    %c0_50 = arith.constant 0 : index
    %c0_51 = arith.constant 0 : index
    %126 = vector.load %arg10[%c0_50, %c0_51] : memref<64x32xf32, #tpu.memory_space<vmem>>, vector<64x32xf32>
    %cst_52 = arith.constant dense<0.000000e+00> : vector<8x32xf32>
    %127 = tpu.matmul %125, %126, %cst_52 {dimension_numbers = #tpu.dot_dimension_numbers<[1], [0], [0], [1], [0, 0, 1, 1], [], []>} : vector<8x64xf32>, vector<64x32xf32>, vector<8x32xf32> -> vector<8x32xf32>
    %c0_53 = arith.constant 0 : index
    %c0_54 = arith.constant 0 : index
    %128 = vector.load %arg11[%c0_53, %c0_54] : memref<1x32xf32, #tpu.memory_space<vmem>>, vector<1x32xf32>
    %129 = vector.broadcast %128 : vector<1x32xf32> to vector<8x32xf32>
    %130 = arith.addf %127, %129 : vector<8x32xf32>
    %131 = arith.addf %118, %130 : vector<8x32xf32>
    %c0_55 = arith.constant 0 : index
    %c0_56 = arith.constant 0 : index
    %132 = vector.load %arg12[%c0_55, %c0_56] : memref<1x32xf32, #tpu.memory_space<vmem>>, vector<1x32xf32>
    %c0_57 = arith.constant 0 : index
    %c0_58 = arith.constant 0 : index
    %133 = vector.load %arg13[%c0_57, %c0_58] : memref<1x32xf32, #tpu.memory_space<vmem>>, vector<1x32xf32>
    %cst_59 = arith.constant dense<0.000000e+00> : vector<8xf32>
    %134 = vector.multi_reduction <add>, %131, %cst_59 [1] : vector<8x32xf32> to vector<8xf32>
    %135 = vector.shape_cast %134 : vector<8xf32> to vector<8x1xf32>
    %cst_60 = arith.constant 3.200000e+01 : f32
    %136 = vector.broadcast %cst_60 : f32 to vector<8x1xf32>
    %137 = arith.divf %135, %136 : vector<8x1xf32>
    %138 = vector.broadcast %137 : vector<8x1xf32> to vector<8x32xf32>
    %139 = arith.subf %131, %138 : vector<8x32xf32>
    %140 = arith.mulf %139, %139 : vector<8x32xf32>
    %cst_61 = arith.constant dense<0.000000e+00> : vector<8xf32>
    %141 = vector.multi_reduction <add>, %140, %cst_61 [1] : vector<8x32xf32> to vector<8xf32>
    %142 = vector.shape_cast %141 : vector<8xf32> to vector<8x1xf32>
    %cst_62 = arith.constant 3.200000e+01 : f32
    %143 = vector.broadcast %cst_62 : f32 to vector<8x1xf32>
    %144 = arith.divf %142, %143 : vector<8x1xf32>
    %145 = vector.broadcast %137 : vector<8x1xf32> to vector<8x32xf32>
    %146 = arith.subf %131, %145 : vector<8x32xf32>
    %cst_63 = arith.constant 9.99999974E-6 : f32
    %147 = vector.broadcast %cst_63 : f32 to vector<8x1xf32>
    %148 = arith.addf %144, %147 : vector<8x1xf32>
    %149 = math.rsqrt %148 : vector<8x1xf32>
    %150 = vector.broadcast %149 : vector<8x1xf32> to vector<8x32xf32>
    %151 = arith.mulf %146, %150 : vector<8x32xf32>
    %152 = vector.broadcast %132 : vector<1x32xf32> to vector<8x32xf32>
    %153 = arith.mulf %151, %152 : vector<8x32xf32>
    %154 = vector.broadcast %133 : vector<1x32xf32> to vector<8x32xf32>
    %155 = arith.addf %153, %154 : vector<8x32xf32>
    %c0_64 = arith.constant 0 : index
    %c0_65 = arith.constant 0 : index
    %c0_66 = arith.constant 0 : index
    %156 = vector.load %arg14[%c0_64, %c0_65, %c0_66] : memref<1x8x32xf32, #tpu.memory_space<vmem>>, vector<1x8x32xf32>
    %157 = vector.shape_cast %156 : vector<1x8x32xf32> to vector<8x32xf32>
    %158 = vector.shape_cast %155 : vector<8x32xf32> to vector<1x8x32xf32>
    tpu.vector_store %arg14[%c0_64, %c0_65, %c0_66], %158 {strides = array<i32>} : memref<1x8x32xf32, #tpu.memory_space<vmem>>, vector<1x8x32xf32>,
    return
  }
  func.func @transform_0(%arg0: i32) -> (i32, i32, i32) {
    %c0_i32 = arith.constant 0 : i32
    %c0_i32_0 = arith.constant 0 : i32
    %c0_i32_1 = arith.constant 0 : i32
    return %arg0, %c0_i32, %c0_i32_0 : i32, i32, i32
  }
  func.func @transform_1(%arg0: i32) -> (i32, i32) {
    %c0_i32 = arith.constant 0 : i32
    %c0_i32_0 = arith.constant 0 : i32
    %c0_i32_1 = arith.constant 0 : i32
    return %c0_i32, %c0_i32_0 : i32, i32
  }
  func.func @transform_2(%arg0: i32) -> (i32, i32) {
    %c0_i32 = arith.constant 0 : i32
    %c0_i32_0 = arith.constant 0 : i32
    %c0_i32_1 = arith.constant 0 : i32
    return %c0_i32, %c0_i32_0 : i32, i32
  }
  func.func @transform_3(%arg0: i32) -> (i32, i32) {
    %c0_i32 = arith.constant 0 : i32
    %c0_i32_0 = arith.constant 0 : i32
    %c0_i32_1 = arith.constant 0 : i32
    return %c0_i32, %c0_i32_0 : i32, i32
  }
  func.func @transform_4(%arg0: i32) -> (i32, i32) {
    %c0_i32 = arith.constant 0 : i32
    %c0_i32_0 = arith.constant 0 : i32
    %c0_i32_1 = arith.constant 0 : i32
    return %c0_i32, %c0_i32_0 : i32, i32
  }
  func.func @transform_5(%arg0: i32) -> (i32, i32) {
    %c0_i32 = arith.constant 0 : i32
    %c0_i32_0 = arith.constant 0 : i32
    %c0_i32_1 = arith.constant 0 : i32
    return %c0_i32, %c0_i32_0 : i32, i32
  }
  func.func @transform_6(%arg0: i32) -> (i32, i32) {
    %c0_i32 = arith.constant 0 : i32
    %c0_i32_0 = arith.constant 0 : i32
    %c0_i32_1 = arith.constant 0 : i32
    return %c0_i32, %c0_i32_0 : i32, i32
  }
  func.func @transform_7(%arg0: i32) -> (i32, i32) {
    %c0_i32 = arith.constant 0 : i32
    %c0_i32_0 = arith.constant 0 : i32
    %c0_i32_1 = arith.constant 0 : i32
    return %c0_i32, %c0_i32_0 : i32, i32
  }
  func.func @transform_8(%arg0: i32) -> (i32, i32) {
    %c0_i32 = arith.constant 0 : i32
    %c0_i32_0 = arith.constant 0 : i32
    %c0_i32_1 = arith.constant 0 : i32
    return %c0_i32, %c0_i32_0 : i32, i32
  }
  func.func @transform_9(%arg0: i32) -> (i32, i32) {
    %c0_i32 = arith.constant 0 : i32
    %c0_i32_0 = arith.constant 0 : i32
    %c0_i32_1 = arith.constant 0 : i32
    return %c0_i32, %c0_i32_0 : i32, i32
  }
  func.func @transform_10(%arg0: i32) -> (i32, i32) {
    %c0_i32 = arith.constant 0 : i32
    %c0_i32_0 = arith.constant 0 : i32
    %c0_i32_1 = arith.constant 0 : i32
    return %c0_i32, %c0_i32_0 : i32, i32
  }
  func.func @transform_11(%arg0: i32) -> (i32, i32) {
    %c0_i32 = arith.constant 0 : i32
    %c0_i32_0 = arith.constant 0 : i32
    %c0_i32_1 = arith.constant 0 : i32
    return %c0_i32, %c0_i32_0 : i32, i32
  }
  func.func @transform_12(%arg0: i32) -> (i32, i32) {
    %c0_i32 = arith.constant 0 : i32
    %c0_i32_0 = arith.constant 0 : i32
    %c0_i32_1 = arith.constant 0 : i32
    return %c0_i32, %c0_i32_0 : i32, i32
  }
  func.func @transform_13(%arg0: i32) -> (i32, i32, i32) {
    %c0_i32 = arith.constant 0 : i32
    %c0_i32_0 = arith.constant 0 : i32
    %c0_i32_1 = arith.constant 0 : i32
    return %arg0, %c0_i32, %c0_i32_0 : i32, i32, i32
  }
}

module attributes {stable_mosaic.version = 11 : i64} {
  func.func @_encoder_layer_kernel(%arg0: i32, %arg1: memref<1x8x32xf32, #tpu.memory_space<vmem>>, %arg2: memref<32x96xf32, #tpu.memory_space<vmem>>, %arg3: memref<1x96xf32, #tpu.memory_space<vmem>>, %arg4: memref<32x32xf32, #tpu.memory_space<vmem>>, %arg5: memref<1x32xf32, #tpu.memory_space<vmem>>, %arg6: memref<1x32xf32, #tpu.memory_space<vmem>>, %arg7: memref<1x32xf32, #tpu.memory_space<vmem>>, %arg8: memref<32x64xf32, #tpu.memory_space<vmem>>, %arg9: memref<1x64xf32, #tpu.memory_space<vmem>>, %arg10: memref<64x32xf32, #tpu.memory_space<vmem>>, %arg11: memref<1x32xf32, #tpu.memory_space<vmem>>, %arg12: memref<1x32xf32, #tpu.memory_space<vmem>>, %arg13: memref<1x32xf32, #tpu.memory_space<vmem>>, %arg14: memref<1x8x32xf32, #tpu.memory_space<vmem>>) attributes {dimension_semantics = [#tpu.dimension_semantics<parallel>], iteration_bounds = array<i64: 2>, scalar_prefetch = 0 : i64, scratch_operands = 0 : i64, tpu.core_type = #tpu.core_type<tc>, window_params = [{transform_indices = @transform_0, window_bounds = array<i64: 1, 8, 32>}, {pipeline_mode = #tpu.pipeline_mode<synchronous>, transform_indices = @transform_1, window_bounds = array<i64: 32, 96>}, {pipeline_mode = #tpu.pipeline_mode<synchronous>, transform_indices = @transform_2, window_bounds = array<i64: 1, 96>}, {pipeline_mode = #tpu.pipeline_mode<synchronous>, transform_indices = @transform_3, window_bounds = array<i64: 32, 32>}, {pipeline_mode = #tpu.pipeline_mode<synchronous>, transform_indices = @transform_4, window_bounds = array<i64: 1, 32>}, {pipeline_mode = #tpu.pipeline_mode<synchronous>, transform_indices = @transform_5, window_bounds = array<i64: 1, 32>}, {pipeline_mode = #tpu.pipeline_mode<synchronous>, transform_indices = @transform_6, window_bounds = array<i64: 1, 32>}, {pipeline_mode = #tpu.pipeline_mode<synchronous>, transform_indices = @transform_7, window_bounds = array<i64: 32, 64>}, {pipeline_mode = #tpu.pipeline_mode<synchronous>, transform_indices = @transform_8, window_bounds = array<i64: 1, 64>}, {pipeline_mode = #tpu.pipeline_mode<synchronous>, transform_indices = @transform_9, window_bounds = array<i64: 64, 32>}, {pipeline_mode = #tpu.pipeline_mode<synchronous>, transform_indices = @transform_10, window_bounds = array<i64: 1, 32>}, {pipeline_mode = #tpu.pipeline_mode<synchronous>, transform_indices = @transform_11, window_bounds = array<i64: 1, 32>}, {pipeline_mode = #tpu.pipeline_mode<synchronous>, transform_indices = @transform_12, window_bounds = array<i64: 1, 32>}, {transform_indices = @transform_13, window_bounds = array<i64: 1, 8, 32>}]} {
    %c0 = arith.constant 0 : index
    %c0_0 = arith.constant 0 : index
    %c0_1 = arith.constant 0 : index
    %0 = vector.load %arg1[%c0, %c0_0, %c0_1] : memref<1x8x32xf32, #tpu.memory_space<vmem>>, vector<1x8x32xf32>
    %1 = vector.shape_cast %0 : vector<1x8x32xf32> to vector<8x32xf32>
    %c0_2 = arith.constant 0 : index
    %c0_3 = arith.constant 0 : index
    %2 = vector.load %arg2[%c0_2, %c0_3] : memref<32x96xf32, #tpu.memory_space<vmem>>, vector<32x96xf32>
    %cst = arith.constant dense<0.000000e+00> : vector<8x96xf32>
    %3 = tpu.matmul %1, %2, %cst {dimension_numbers = #tpu.dot_dimension_numbers<[1], [0], [0], [1], [0, 0, 1, 1], [], []>} : vector<8x32xf32>, vector<32x96xf32>, vector<8x96xf32> -> vector<8x96xf32>
    %c0_4 = arith.constant 0 : index
    %c0_5 = arith.constant 0 : index
    %4 = vector.load %arg3[%c0_4, %c0_5] : memref<1x96xf32, #tpu.memory_space<vmem>>, vector<1x96xf32>
    %5 = vector.broadcast %4 : vector<1x96xf32> to vector<8x96xf32>
    %6 = arith.addf %3, %5 : vector<8x96xf32>
    %7 = vector.extract_strided_slice %6 {offsets = [0, 0], sizes = [8, 32], strides = [1, 1]} : vector<8x96xf32> to vector<8x32xf32>
    %8 = vector.extract_strided_slice %6 {offsets = [0, 32], sizes = [8, 64], strides = [1, 1]} : vector<8x96xf32> to vector<8x64xf32>
    %c0_6 = arith.constant 0 : index
    %c0_7 = arith.constant 0 : index
    %9 = vector.load %arg4[%c0_6, %c0_7] : memref<32x32xf32, #tpu.memory_space<vmem>>, vector<32x32xf32>
    %c0_8 = arith.constant 0 : index
    %c0_9 = arith.constant 0 : index
    %10 = vector.load %arg5[%c0_8, %c0_9] : memref<1x32xf32, #tpu.memory_space<vmem>>, vector<1x32xf32>
    %cst_10 = arith.constant 0.000000e+00 : f32
    %11 = vector.broadcast %cst_10 : f32 to vector<8x32xf32>
    %12 = vector.extract_strided_slice %7 {offsets = [0, 0], sizes = [8, 8], strides = [1, 1]} : vector<8x32xf32> to vector<8x8xf32>
    %13 = vector.extract_strided_slice %8 {offsets = [0, 0], sizes = [8, 8], strides = [1, 1]} : vector<8x64xf32> to vector<8x8xf32>
    %14 = vector.extract_strided_slice %8 {offsets = [0, 32], sizes = [8, 8], strides = [1, 1]} : vector<8x64xf32> to vector<8x8xf32>
    %cst_11 = arith.constant dense<0.000000e+00> : vector<8x8xf32>
    %15 = tpu.matmul %12, %13, %cst_11 {dimension_numbers = #tpu.dot_dimension_numbers<[1], [1], [0], [0], [0, 0, 1, 0], [], []>} : vector<8x8xf32>, vector<8x8xf32>, vector<8x8xf32> -> vector<8x8xf32>
    %cst_12 = arith.constant 0.353553385 : f32
    %16 = vector.broadcast %cst_12 : f32 to vector<8x8xf32>
    %17 = arith.mulf %15, %16 : vector<8x8xf32>
    %cst_13 = arith.constant dense<0xFF800000> : vector<8xf32>
    %18 = vector.multi_reduction <maximumf>, %17, %cst_13 [1] : vector<8x8xf32> to vector<8xf32>
    %19 = vector.shape_cast %18 : vector<8xf32> to vector<8x1xf32>
    %20 = vector.broadcast %19 : vector<8x1xf32> to vector<8x8xf32>
    %21 = arith.subf %17, %20 : vector<8x8xf32>
    %22 = math.exp %21 : vector<8x8xf32>
    %cst_14 = arith.constant dense<0.000000e+00> : vector<8xf32>
    %23 = vector.multi_reduction <add>, %22, %cst_14 [1] : vector<8x8xf32> to vector<8xf32>
    %24 = vector.shape_cast %23 : vector<8xf32> to vector<8x1xf32>
    %25 = tpu.reciprocal %24 {approx = true} : vector<8x1xf32> -> vector<8x1xf32>
    %26 = vector.broadcast %25 : vector<8x1xf32> to vector<8x8xf32>
    %27 = arith.mulf %22, %26 : vector<8x8xf32>
    %cst_15 = arith.constant dense<0.000000e+00> : vector<8x8xf32>
    %28 = tpu.matmul %27, %14, %cst_15 {dimension_numbers = #tpu.dot_dimension_numbers<[1], [0], [0], [1], [0, 0, 1, 1], [], []>} : vector<8x8xf32>, vector<8x8xf32>, vector<8x8xf32> -> vector<8x8xf32>
    %29 = vector.extract_strided_slice %9 {offsets = [0, 0], sizes = [8, 32], strides = [1, 1]} : vector<32x32xf32> to vector<8x32xf32>
    %cst_16 = arith.constant dense<0.000000e+00> : vector<8x32xf32>
    %30 = tpu.matmul %28, %29, %cst_16 {dimension_numbers = #tpu.dot_dimension_numbers<[1], [0], [0], [1], [0, 0, 1, 1], [], []>} : vector<8x8xf32>, vector<8x32xf32>, vector<8x32xf32> -> vector<8x32xf32>
    %31 = arith.addf %11, %30 : vector<8x32xf32>
    %32 = vector.extract_strided_slice %7 {offsets = [0, 8], sizes = [8, 8], strides = [1, 1]} : vector<8x32xf32> to vector<8x8xf32>
    %33 = vector.extract_strided_slice %8 {offsets = [0, 8], sizes = [8, 8], strides = [1, 1]} : vector<8x64xf32> to vector<8x8xf32>
    %34 = vector.extract_strided_slice %8 {offsets = [0, 40], sizes = [8, 8], strides = [1, 1]} : vector<8x64xf32> to vector<8x8xf32>
    %cst_17 = arith.constant dense<0.000000e+00> : vector<8x8xf32>
    %35 = tpu.matmul %32, %33, %cst_17 {dimension_numbers = #tpu.dot_dimension_numbers<[1], [1], [0], [0], [0, 0, 1, 0], [], []>} : vector<8x8xf32>, vector<8x8xf32>, vector<8x8xf32> -> vector<8x8xf32>
    %cst_18 = arith.constant 0.353553385 : f32
    %36 = vector.broadcast %cst_18 : f32 to vector<8x8xf32>
    %37 = arith.mulf %35, %36 : vector<8x8xf32>
    %cst_19 = arith.constant dense<0xFF800000> : vector<8xf32>
    %38 = vector.multi_reduction <maximumf>, %37, %cst_19 [1] : vector<8x8xf32> to vector<8xf32>
    %39 = vector.shape_cast %38 : vector<8xf32> to vector<8x1xf32>
    %40 = vector.broadcast %39 : vector<8x1xf32> to vector<8x8xf32>
    %41 = arith.subf %37, %40 : vector<8x8xf32>
    %42 = math.exp %41 : vector<8x8xf32>
    %cst_20 = arith.constant dense<0.000000e+00> : vector<8xf32>
    %43 = vector.multi_reduction <add>, %42, %cst_20 [1] : vector<8x8xf32> to vector<8xf32>
    %44 = vector.shape_cast %43 : vector<8xf32> to vector<8x1xf32>
    %45 = tpu.reciprocal %44 {approx = true} : vector<8x1xf32> -> vector<8x1xf32>
    %46 = vector.broadcast %45 : vector<8x1xf32> to vector<8x8xf32>
    %47 = arith.mulf %42, %46 : vector<8x8xf32>
    %cst_21 = arith.constant dense<0.000000e+00> : vector<8x8xf32>
    %48 = tpu.matmul %47, %34, %cst_21 {dimension_numbers = #tpu.dot_dimension_numbers<[1], [0], [0], [1], [0, 0, 1, 1], [], []>} : vector<8x8xf32>, vector<8x8xf32>, vector<8x8xf32> -> vector<8x8xf32>
    %49 = vector.extract_strided_slice %9 {offsets = [8, 0], sizes = [8, 32], strides = [1, 1]} : vector<32x32xf32> to vector<8x32xf32>
    %cst_22 = arith.constant dense<0.000000e+00> : vector<8x32xf32>
    %50 = tpu.matmul %48, %49, %cst_22 {dimension_numbers = #tpu.dot_dimension_numbers<[1], [0], [0], [1], [0, 0, 1, 1], [], []>} : vector<8x8xf32>, vector<8x32xf32>, vector<8x32xf32> -> vector<8x32xf32>
    %51 = arith.addf %31, %50 : vector<8x32xf32>
    %52 = vector.extract_strided_slice %7 {offsets = [0, 16], sizes = [8, 8], strides = [1, 1]} : vector<8x32xf32> to vector<8x8xf32>
    %53 = vector.extract_strided_slice %8 {offsets = [0, 16], sizes = [8, 8], strides = [1, 1]} : vector<8x64xf32> to vector<8x8xf32>
    %54 = vector.extract_strided_slice %8 {offsets = [0, 48], sizes = [8, 8], strides = [1, 1]} : vector<8x64xf32> to vector<8x8xf32>
    %cst_23 = arith.constant dense<0.000000e+00> : vector<8x8xf32>
    %55 = tpu.matmul %52, %53, %cst_23 {dimension_numbers = #tpu.dot_dimension_numbers<[1], [1], [0], [0], [0, 0, 1, 0], [], []>} : vector<8x8xf32>, vector<8x8xf32>, vector<8x8xf32> -> vector<8x8xf32>
    %cst_24 = arith.constant 0.353553385 : f32
    %56 = vector.broadcast %cst_24 : f32 to vector<8x8xf32>
    %57 = arith.mulf %55, %56 : vector<8x8xf32>
    %cst_25 = arith.constant dense<0xFF800000> : vector<8xf32>
    %58 = vector.multi_reduction <maximumf>, %57, %cst_25 [1] : vector<8x8xf32> to vector<8xf32>
    %59 = vector.shape_cast %58 : vector<8xf32> to vector<8x1xf32>
    %60 = vector.broadcast %59 : vector<8x1xf32> to vector<8x8xf32>
    %61 = arith.subf %57, %60 : vector<8x8xf32>
    %62 = math.exp %61 : vector<8x8xf32>
    %cst_26 = arith.constant dense<0.000000e+00> : vector<8xf32>
    %63 = vector.multi_reduction <add>, %62, %cst_26 [1] : vector<8x8xf32> to vector<8xf32>
    %64 = vector.shape_cast %63 : vector<8xf32> to vector<8x1xf32>
    %65 = tpu.reciprocal %64 {approx = true} : vector<8x1xf32> -> vector<8x1xf32>
    %66 = vector.broadcast %65 : vector<8x1xf32> to vector<8x8xf32>
    %67 = arith.mulf %62, %66 : vector<8x8xf32>
    %cst_27 = arith.constant dense<0.000000e+00> : vector<8x8xf32>
    %68 = tpu.matmul %67, %54, %cst_27 {dimension_numbers = #tpu.dot_dimension_numbers<[1], [0], [0], [1], [0, 0, 1, 1], [], []>} : vector<8x8xf32>, vector<8x8xf32>, vector<8x8xf32> -> vector<8x8xf32>
    %69 = vector.extract_strided_slice %9 {offsets = [16, 0], sizes = [8, 32], strides = [1, 1]} : vector<32x32xf32> to vector<8x32xf32>
    %cst_28 = arith.constant dense<0.000000e+00> : vector<8x32xf32>
    %70 = tpu.matmul %68, %69, %cst_28 {dimension_numbers = #tpu.dot_dimension_numbers<[1], [0], [0], [1], [0, 0, 1, 1], [], []>} : vector<8x8xf32>, vector<8x32xf32>, vector<8x32xf32> -> vector<8x32xf32>
    %71 = arith.addf %51, %70 : vector<8x32xf32>
    %72 = vector.extract_strided_slice %7 {offsets = [0, 24], sizes = [8, 8], strides = [1, 1]} : vector<8x32xf32> to vector<8x8xf32>
    %73 = vector.extract_strided_slice %8 {offsets = [0, 24], sizes = [8, 8], strides = [1, 1]} : vector<8x64xf32> to vector<8x8xf32>
    %74 = vector.extract_strided_slice %8 {offsets = [0, 56], sizes = [8, 8], strides = [1, 1]} : vector<8x64xf32> to vector<8x8xf32>
    %cst_29 = arith.constant dense<0.000000e+00> : vector<8x8xf32>
    %75 = tpu.matmul %72, %73, %cst_29 {dimension_numbers = #tpu.dot_dimension_numbers<[1], [1], [0], [0], [0, 0, 1, 0], [], []>} : vector<8x8xf32>, vector<8x8xf32>, vector<8x8xf32> -> vector<8x8xf32>
    %cst_30 = arith.constant 0.353553385 : f32
    %76 = vector.broadcast %cst_30 : f32 to vector<8x8xf32>
    %77 = arith.mulf %75, %76 : vector<8x8xf32>
    %cst_31 = arith.constant dense<0xFF800000> : vector<8xf32>
    %78 = vector.multi_reduction <maximumf>, %77, %cst_31 [1] : vector<8x8xf32> to vector<8xf32>
    %79 = vector.shape_cast %78 : vector<8xf32> to vector<8x1xf32>
    %80 = vector.broadcast %79 : vector<8x1xf32> to vector<8x8xf32>
    %81 = arith.subf %77, %80 : vector<8x8xf32>
    %82 = math.exp %81 : vector<8x8xf32>
    %cst_32 = arith.constant dense<0.000000e+00> : vector<8xf32>
    %83 = vector.multi_reduction <add>, %82, %cst_32 [1] : vector<8x8xf32> to vector<8xf32>
    %84 = vector.shape_cast %83 : vector<8xf32> to vector<8x1xf32>
    %85 = tpu.reciprocal %84 {approx = true} : vector<8x1xf32> -> vector<8x1xf32>
    %86 = vector.broadcast %85 : vector<8x1xf32> to vector<8x8xf32>
    %87 = arith.mulf %82, %86 : vector<8x8xf32>
    %cst_33 = arith.constant dense<0.000000e+00> : vector<8x8xf32>
    %88 = tpu.matmul %87, %74, %cst_33 {dimension_numbers = #tpu.dot_dimension_numbers<[1], [0], [0], [1], [0, 0, 1, 1], [], []>} : vector<8x8xf32>, vector<8x8xf32>, vector<8x8xf32> -> vector<8x8xf32>
    %89 = vector.extract_strided_slice %9 {offsets = [24, 0], sizes = [8, 32], strides = [1, 1]} : vector<32x32xf32> to vector<8x32xf32>
    %cst_34 = arith.constant dense<0.000000e+00> : vector<8x32xf32>
    %90 = tpu.matmul %88, %89, %cst_34 {dimension_numbers = #tpu.dot_dimension_numbers<[1], [0], [0], [1], [0, 0, 1, 1], [], []>} : vector<8x8xf32>, vector<8x32xf32>, vector<8x32xf32> -> vector<8x32xf32>
    %91 = arith.addf %71, %90 : vector<8x32xf32>
    %92 = vector.broadcast %10 : vector<1x32xf32> to vector<8x32xf32>
    %93 = arith.addf %91, %92 : vector<8x32xf32>
    %94 = arith.addf %1, %93 : vector<8x32xf32>
    %c0_35 = arith.constant 0 : index
    %c0_36 = arith.constant 0 : index
    %95 = vector.load %arg6[%c0_35, %c0_36] : memref<1x32xf32, #tpu.memory_space<vmem>>, vector<1x32xf32>
    %c0_37 = arith.constant 0 : index
    %c0_38 = arith.constant 0 : index
    %96 = vector.load %arg7[%c0_37, %c0_38] : memref<1x32xf32, #tpu.memory_space<vmem>>, vector<1x32xf32>
    %cst_39 = arith.constant dense<0.000000e+00> : vector<8xf32>
    %97 = vector.multi_reduction <add>, %94, %cst_39 [1] : vector<8x32xf32> to vector<8xf32>
    %98 = vector.shape_cast %97 : vector<8xf32> to vector<8x1xf32>
    %cst_40 = arith.constant 3.200000e+01 : f32
    %99 = vector.broadcast %cst_40 : f32 to vector<8x1xf32>
    %100 = arith.divf %98, %99 : vector<8x1xf32>
    %101 = vector.broadcast %100 : vector<8x1xf32> to vector<8x32xf32>
    %102 = arith.subf %94, %101 : vector<8x32xf32>
    %103 = arith.mulf %102, %102 : vector<8x32xf32>
    %cst_41 = arith.constant dense<0.000000e+00> : vector<8xf32>
    %104 = vector.multi_reduction <add>, %103, %cst_41 [1] : vector<8x32xf32> to vector<8xf32>
    %105 = vector.shape_cast %104 : vector<8xf32> to vector<8x1xf32>
    %cst_42 = arith.constant 3.200000e+01 : f32
    %106 = vector.broadcast %cst_42 : f32 to vector<8x1xf32>
    %107 = arith.divf %105, %106 : vector<8x1xf32>
    %108 = vector.broadcast %100 : vector<8x1xf32> to vector<8x32xf32>
    %109 = arith.subf %94, %108 : vector<8x32xf32>
    %cst_43 = arith.constant 9.99999974E-6 : f32
    %110 = vector.broadcast %cst_43 : f32 to vector<8x1xf32>
    %111 = arith.addf %107, %110 : vector<8x1xf32>
    %112 = math.rsqrt %111 : vector<8x1xf32>
    %113 = vector.broadcast %112 : vector<8x1xf32> to vector<8x32xf32>
    %114 = arith.mulf %109, %113 : vector<8x32xf32>
    %115 = vector.broadcast %95 : vector<1x32xf32> to vector<8x32xf32>
    %116 = arith.mulf %114, %115 : vector<8x32xf32>
    %117 = vector.broadcast %96 : vector<1x32xf32> to vector<8x32xf32>
    %118 = arith.addf %116, %117 : vector<8x32xf32>
    %c0_44 = arith.constant 0 : index
    %c0_45 = arith.constant 0 : index
    %119 = vector.load %arg8[%c0_44, %c0_45] : memref<32x64xf32, #tpu.memory_space<vmem>>, vector<32x64xf32>
    %cst_46 = arith.constant dense<0.000000e+00> : vector<8x64xf32>
    %120 = tpu.matmul %118, %119, %cst_46 {dimension_numbers = #tpu.dot_dimension_numbers<[1], [0], [0], [1], [0, 0, 1, 1], [], []>} : vector<8x32xf32>, vector<32x64xf32>, vector<8x64xf32> -> vector<8x64xf32>
    %c0_47 = arith.constant 0 : index
    %c0_48 = arith.constant 0 : index
    %121 = vector.load %arg9[%c0_47, %c0_48] : memref<1x64xf32, #tpu.memory_space<vmem>>, vector<1x64xf32>
    %122 = vector.broadcast %121 : vector<1x64xf32> to vector<8x64xf32>
    %123 = arith.addf %120, %122 : vector<8x64xf32>
    %cst_49 = arith.constant 0.000000e+00 : f32
    %124 = vector.broadcast %cst_49 : f32 to vector<8x64xf32>
    %125 = arith.maximumf %123, %124 : vector<8x64xf32>
    %c0_50 = arith.constant 0 : index
    %c0_51 = arith.constant 0 : index
    %126 = vector.load %arg10[%c0_50, %c0_51] : memref<64x32xf32, #tpu.memory_space<vmem>>, vector<64x32xf32>
    %cst_52 = arith.constant dense<0.000000e+00> : vector<8x32xf32>
    %127 = tpu.matmul %125, %126, %cst_52 {dimension_numbers = #tpu.dot_dimension_numbers<[1], [0], [0], [1], [0, 0, 1, 1], [], []>} : vector<8x64xf32>, vector<64x32xf32>, vector<8x32xf32> -> vector<8x32xf32>
    %c0_53 = arith.constant 0 : index
    %c0_54 = arith.constant 0 : index
    %128 = vector.load %arg11[%c0_53, %c0_54] : memref<1x32xf32, #tpu.memory_space<vmem>>, vector<1x32xf32>
    %129 = vector.broadcast %128 : vector<1x32xf32> to vector<8x32xf32>
    %130 = arith.addf %127, %129 : vector<8x32xf32>
    %131 = arith.addf %118, %130 : vector<8x32xf32>
    %c0_55 = arith.constant 0 : index
    %c0_56 = arith.constant 0 : index
    %132 = vector.load %arg12[%c0_55, %c0_56] : memref<1x32xf32, #tpu.memory_space<vmem>>, vector<1x32xf32>
    %c0_57 = arith.constant 0 : index
    %c0_58 = arith.constant 0 : index
    %133 = vector.load %arg13[%c0_57, %c0_58] : memref<1x32xf32, #tpu.memory_space<vmem>>, vector<1x32xf32>
    %cst_59 = arith.constant dense<0.000000e+00> : vector<8xf32>
    %134 = vector.multi_reduction <add>, %131, %cst_59 [1] : vector<8x32xf32> to vector<8xf32>
    %135 = vector.shape_cast %134 : vector<8xf32> to vector<8x1xf32>
    %cst_60 = arith.constant 3.200000e+01 : f32
    %136 = vector.broadcast %cst_60 : f32 to vector<8x1xf32>
    %137 = arith.divf %135, %136 : vector<8x1xf32>
    %138 = vector.broadcast %137 : vector<8x1xf32> to vector<8x32xf32>
    %139 = arith.subf %131, %138 : vector<8x32xf32>
    %140 = arith.mulf %139, %139 : vector<8x32xf32>
    %cst_61 = arith.constant dense<0.000000e+00> : vector<8xf32>
    %141 = vector.multi_reduction <add>, %140, %cst_61 [1] : vector<8x32xf32> to vector<8xf32>
    %142 = vector.shape_cast %141 : vector<8xf32> to vector<8x1xf32>
    %cst_62 = arith.constant 3.200000e+01 : f32
    %143 = vector.broadcast %cst_62 : f32 to vector<8x1xf32>
    %144 = arith.divf %142, %143 : vector<8x1xf32>
    %145 = vector.broadcast %137 : vector<8x1xf32> to vector<8x32xf32>
    %146 = arith.subf %131, %145 : vector<8x32xf32>
    %cst_63 = arith.constant 9.99999974E-6 : f32
    %147 = vector.broadcast %cst_63 : f32 to vector<8x1xf32>
    %148 = arith.addf %144, %147 : vector<8x1xf32>
    %149 = math.rsqrt %148 : vector<8x1xf32>
    %150 = vector.broadcast %149 : vector<8x1xf32> to vector<8x32xf32>
    %151 = arith.mulf %146, %150 : vector<8x32xf32>
    %152 = vector.broadcast %132 : vector<1x32xf32> to vector<8x32xf32>
    %153 = arith.mulf %151, %152 : vector<8x32xf32>
    %154 = vector.broadcast %133 : vector<1x32xf32> to vector<8x32xf32>
    %155 = arith.addf %153, %154 : vector<8x32xf32>
    %c0_64 = arith.constant 0 : index
    %c0_65 = arith.constant 0 : index
    %c0_66 = arith.constant 0 : index
    %156 = vector.load %arg14[%c0_64, %c0_65, %c0_66] : memref<1x8x32xf32, #tpu.memory_space<vmem>>, vector<1x8x32xf32>
    %157 = vector.shape_cast %156 : vector<1x8x32xf32> to vector<8x32xf32>
    %158 = vector.shape_cast %155 : vector<8x32xf32> to vector<1x8x32xf32>
    tpu.vector_store %arg14[%c0_64, %c0_65, %c0_66], %158 {strides = array<i32>} : memref<1x8x32xf32, #tpu.memory_space<vmem>>, vector<1x8x32xf32>,
    return
  }
  func.func @transform_0(%arg0: i32) -> (i32, i32, i32) {
    %c0_i32 = arith.constant 0 : i32
    %c0_i32_0 = arith.constant 0 : i32
    %c0_i32_1 = arith.constant 0 : i32
    return %arg0, %c0_i32, %c0_i32_0 : i32, i32, i32
  }
  func.func @transform_1(%arg0: i32) -> (i32, i32) {
    %c0_i32 = arith.constant 0 : i32
    %c0_i32_0 = arith.constant 0 : i32
    %c0_i32_1 = arith.constant 0 : i32
    return %c0_i32, %c0_i32_0 : i32, i32
  }
  func.func @transform_2(%arg0: i32) -> (i32, i32) {
    %c0_i32 = arith.constant 0 : i32
    %c0_i32_0 = arith.constant 0 : i32
    %c0_i32_1 = arith.constant 0 : i32
    return %c0_i32, %c0_i32_0 : i32, i32
  }
  func.func @transform_3(%arg0: i32) -> (i32, i32) {
    %c0_i32 = arith.constant 0 : i32
    %c0_i32_0 = arith.constant 0 : i32
    %c0_i32_1 = arith.constant 0 : i32
    return %c0_i32, %c0_i32_0 : i32, i32
  }
  func.func @transform_4(%arg0: i32) -> (i32, i32) {
    %c0_i32 = arith.constant 0 : i32
    %c0_i32_0 = arith.constant 0 : i32
    %c0_i32_1 = arith.constant 0 : i32
    return %c0_i32, %c0_i32_0 : i32, i32
  }
  func.func @transform_5(%arg0: i32) -> (i32, i32) {
    %c0_i32 = arith.constant 0 : i32
    %c0_i32_0 = arith.constant 0 : i32
    %c0_i32_1 = arith.constant 0 : i32
    return %c0_i32, %c0_i32_0 : i32, i32
  }
  func.func @transform_6(%arg0: i32) -> (i32, i32) {
    %c0_i32 = arith.constant 0 : i32
    %c0_i32_0 = arith.constant 0 : i32
    %c0_i32_1 = arith.constant 0 : i32
    return %c0_i32, %c0_i32_0 : i32, i32
  }
  func.func @transform_7(%arg0: i32) -> (i32, i32) {
    %c0_i32 = arith.constant 0 : i32
    %c0_i32_0 = arith.constant 0 : i32
    %c0_i32_1 = arith.constant 0 : i32
    return %c0_i32, %c0_i32_0 : i32, i32
  }
  func.func @transform_8(%arg0: i32) -> (i32, i32) {
    %c0_i32 = arith.constant 0 : i32
    %c0_i32_0 = arith.constant 0 : i32
    %c0_i32_1 = arith.constant 0 : i32
    return %c0_i32, %c0_i32_0 : i32, i32
  }
  func.func @transform_9(%arg0: i32) -> (i32, i32) {
    %c0_i32 = arith.constant 0 : i32
    %c0_i32_0 = arith.constant 0 : i32
    %c0_i32_1 = arith.constant 0 : i32
    return %c0_i32, %c0_i32_0 : i32, i32
  }
  func.func @transform_10(%arg0: i32) -> (i32, i32) {
    %c0_i32 = arith.constant 0 : i32
    %c0_i32_0 = arith.constant 0 : i32
    %c0_i32_1 = arith.constant 0 : i32
    return %c0_i32, %c0_i32_0 : i32, i32
  }
  func.func @transform_11(%arg0: i32) -> (i32, i32) {
    %c0_i32 = arith.constant 0 : i32
    %c0_i32_0 = arith.constant 0 : i32
    %c0_i32_1 = arith.constant 0 : i32
    return %c0_i32, %c0_i32_0 : i32, i32
  }
  func.func @transform_12(%arg0: i32) -> (i32, i32) {
    %c0_i32 = arith.constant 0 : i32
    %c0_i32_0 = arith.constant 0 : i32
    %c0_i32_1 = arith.constant 0 : i32
    return %c0_i32, %c0_i32_0 : i32, i32
  }
  func.func @transform_13(%arg0: i32) -> (i32, i32, i32) {
    %c0_i32 = arith.constant 0 : i32
    %c0_i32_0 = arith.constant 0 : i32
    %c0_i32_1 = arith.constant 0 : i32
    return %arg0, %c0_i32, %c0_i32_0 : i32, i32, i32
  }
}

module attributes {stable_mosaic.version = 11 : i64} {
  func.func @_layernorm_kernel(%arg0: i32, %arg1: memref<1x8x32xf32, #tpu.memory_space<vmem>>, %arg2: memref<1x32xf32, #tpu.memory_space<vmem>>, %arg3: memref<1x32xf32, #tpu.memory_space<vmem>>, %arg4: memref<1x8x32xf32, #tpu.memory_space<vmem>>) attributes {dimension_semantics = [#tpu.dimension_semantics<parallel>], iteration_bounds = array<i64: 2>, scalar_prefetch = 0 : i64, scratch_operands = 0 : i64, tpu.core_type = #tpu.core_type<tc>, window_params = [{transform_indices = @transform_0, window_bounds = array<i64: 1, 8, 32>}, {pipeline_mode = #tpu.pipeline_mode<synchronous>, transform_indices = @transform_1, window_bounds = array<i64: 1, 32>}, {pipeline_mode = #tpu.pipeline_mode<synchronous>, transform_indices = @transform_2, window_bounds = array<i64: 1, 32>}, {transform_indices = @transform_3, window_bounds = array<i64: 1, 8, 32>}]} {
    %c0 = arith.constant 0 : index
    %c0_0 = arith.constant 0 : index
    %c0_1 = arith.constant 0 : index
    %0 = vector.load %arg1[%c0, %c0_0, %c0_1] : memref<1x8x32xf32, #tpu.memory_space<vmem>>, vector<1x8x32xf32>
    %1 = vector.shape_cast %0 : vector<1x8x32xf32> to vector<8x32xf32>
    %c0_2 = arith.constant 0 : index
    %c0_3 = arith.constant 0 : index
    %2 = vector.load %arg2[%c0_2, %c0_3] : memref<1x32xf32, #tpu.memory_space<vmem>>, vector<1x32xf32>
    %c0_4 = arith.constant 0 : index
    %c0_5 = arith.constant 0 : index
    %3 = vector.load %arg3[%c0_4, %c0_5] : memref<1x32xf32, #tpu.memory_space<vmem>>, vector<1x32xf32>
    %cst = arith.constant dense<0.000000e+00> : vector<8xf32>
    %4 = vector.multi_reduction <add>, %1, %cst [1] : vector<8x32xf32> to vector<8xf32>
    %5 = vector.shape_cast %4 : vector<8xf32> to vector<8x1xf32>
    %cst_6 = arith.constant 3.200000e+01 : f32
    %6 = vector.broadcast %cst_6 : f32 to vector<8x1xf32>
    %7 = arith.divf %5, %6 : vector<8x1xf32>
    %8 = vector.broadcast %7 : vector<8x1xf32> to vector<8x32xf32>
    %9 = arith.subf %1, %8 : vector<8x32xf32>
    %10 = arith.mulf %9, %9 : vector<8x32xf32>
    %cst_7 = arith.constant dense<0.000000e+00> : vector<8xf32>
    %11 = vector.multi_reduction <add>, %10, %cst_7 [1] : vector<8x32xf32> to vector<8xf32>
    %12 = vector.shape_cast %11 : vector<8xf32> to vector<8x1xf32>
    %cst_8 = arith.constant 3.200000e+01 : f32
    %13 = vector.broadcast %cst_8 : f32 to vector<8x1xf32>
    %14 = arith.divf %12, %13 : vector<8x1xf32>
    %15 = vector.broadcast %7 : vector<8x1xf32> to vector<8x32xf32>
    %16 = arith.subf %1, %15 : vector<8x32xf32>
    %cst_9 = arith.constant 9.99999974E-6 : f32
    %17 = vector.broadcast %cst_9 : f32 to vector<8x1xf32>
    %18 = arith.addf %14, %17 : vector<8x1xf32>
    %19 = math.rsqrt %18 : vector<8x1xf32>
    %20 = vector.broadcast %19 : vector<8x1xf32> to vector<8x32xf32>
    %21 = arith.mulf %16, %20 : vector<8x32xf32>
    %22 = vector.broadcast %2 : vector<1x32xf32> to vector<8x32xf32>
    %23 = arith.mulf %21, %22 : vector<8x32xf32>
    %24 = vector.broadcast %3 : vector<1x32xf32> to vector<8x32xf32>
    %25 = arith.addf %23, %24 : vector<8x32xf32>
    %c0_10 = arith.constant 0 : index
    %c0_11 = arith.constant 0 : index
    %c0_12 = arith.constant 0 : index
    %26 = vector.load %arg4[%c0_10, %c0_11, %c0_12] : memref<1x8x32xf32, #tpu.memory_space<vmem>>, vector<1x8x32xf32>
    %27 = vector.shape_cast %26 : vector<1x8x32xf32> to vector<8x32xf32>
    %28 = vector.shape_cast %25 : vector<8x32xf32> to vector<1x8x32xf32>
    tpu.vector_store %arg4[%c0_10, %c0_11, %c0_12], %28 {strides = array<i32>} : memref<1x8x32xf32, #tpu.memory_space<vmem>>, vector<1x8x32xf32>,
    return
  }
  func.func @transform_0(%arg0: i32) -> (i32, i32, i32) {
    %c0_i32 = arith.constant 0 : i32
    %c0_i32_0 = arith.constant 0 : i32
    %c0_i32_1 = arith.constant 0 : i32
    return %arg0, %c0_i32, %c0_i32_0 : i32, i32, i32
  }
  func.func @transform_1(%arg0: i32) -> (i32, i32) {
    %c0_i32 = arith.constant 0 : i32
    %c0_i32_0 = arith.constant 0 : i32
    %c0_i32_1 = arith.constant 0 : i32
    return %c0_i32, %c0_i32_0 : i32, i32
  }
  func.func @transform_2(%arg0: i32) -> (i32, i32) {
    %c0_i32 = arith.constant 0 : i32
    %c0_i32_0 = arith.constant 0 : i32
    %c0_i32_1 = arith.constant 0 : i32
    return %c0_i32, %c0_i32_0 : i32, i32
  }
  func.func @transform_3(%arg0: i32) -> (i32, i32, i32) {
    %c0_i32 = arith.constant 0 : i32
    %c0_i32_0 = arith.constant 0 : i32
    %c0_i32_1 = arith.constant 0 : i32
    return %arg0, %c0_i32, %c0_i32_0 : i32, i32, i32
  }
}

module attributes {stable_mosaic.version = 11 : i64} {
  func.func @_decoder_layer_kernel(%arg0: i32, %arg1: memref<1x8x32xf32, #tpu.memory_space<vmem>>, %arg2: memref<1x8x32xf32, #tpu.memory_space<vmem>>, %arg3: memref<32x96xf32, #tpu.memory_space<vmem>>, %arg4: memref<1x96xf32, #tpu.memory_space<vmem>>, %arg5: memref<32x32xf32, #tpu.memory_space<vmem>>, %arg6: memref<1x32xf32, #tpu.memory_space<vmem>>, %arg7: memref<1x32xf32, #tpu.memory_space<vmem>>, %arg8: memref<1x32xf32, #tpu.memory_space<vmem>>, %arg9: memref<32x32xf32, #tpu.memory_space<vmem>>, %arg10: memref<1x32xf32, #tpu.memory_space<vmem>>, %arg11: memref<32x64xf32, #tpu.memory_space<vmem>>, %arg12: memref<1x64xf32, #tpu.memory_space<vmem>>, %arg13: memref<32x32xf32, #tpu.memory_space<vmem>>, %arg14: memref<1x32xf32, #tpu.memory_space<vmem>>, %arg15: memref<1x32xf32, #tpu.memory_space<vmem>>, %arg16: memref<1x32xf32, #tpu.memory_space<vmem>>, %arg17: memref<32x64xf32, #tpu.memory_space<vmem>>, %arg18: memref<1x64xf32, #tpu.memory_space<vmem>>, %arg19: memref<64x32xf32, #tpu.memory_space<vmem>>, %arg20: memref<1x32xf32, #tpu.memory_space<vmem>>, %arg21: memref<1x32xf32, #tpu.memory_space<vmem>>, %arg22: memref<1x32xf32, #tpu.memory_space<vmem>>, %arg23: memref<1x8x32xf32, #tpu.memory_space<vmem>>) attributes {dimension_semantics = [#tpu.dimension_semantics<parallel>], iteration_bounds = array<i64: 2>, scalar_prefetch = 0 : i64, scratch_operands = 0 : i64, tpu.core_type = #tpu.core_type<tc>, window_params = [{transform_indices = @transform_0, window_bounds = array<i64: 1, 8, 32>}, {transform_indices = @transform_1, window_bounds = array<i64: 1, 8, 32>}, {pipeline_mode = #tpu.pipeline_mode<synchronous>, transform_indices = @transform_2, window_bounds = array<i64: 32, 96>}, {pipeline_mode = #tpu.pipeline_mode<synchronous>, transform_indices = @transform_3, window_bounds = array<i64: 1, 96>}, {pipeline_mode = #tpu.pipeline_mode<synchronous>, transform_indices = @transform_4, window_bounds = array<i64: 32, 32>}, {pipeline_mode = #tpu.pipeline_mode<synchronous>, transform_indices = @transform_5, window_bounds = array<i64: 1, 32>}, {pipeline_mode = #tpu.pipeline_mode<synchronous>, transform_indices = @transform_6, window_bounds = array<i64: 1, 32>}, {pipeline_mode = #tpu.pipeline_mode<synchronous>, transform_indices = @transform_7, window_bounds = array<i64: 1, 32>}, {pipeline_mode = #tpu.pipeline_mode<synchronous>, transform_indices = @transform_8, window_bounds = array<i64: 32, 32>}, {pipeline_mode = #tpu.pipeline_mode<synchronous>, transform_indices = @transform_9, window_bounds = array<i64: 1, 32>}, {pipeline_mode = #tpu.pipeline_mode<synchronous>, transform_indices = @transform_10, window_bounds = array<i64: 32, 64>}, {pipeline_mode = #tpu.pipeline_mode<synchronous>, transform_indices = @transform_11, window_bounds = array<i64: 1, 64>}, {pipeline_mode = #tpu.pipeline_mode<synchronous>, transform_indices = @transform_12, window_bounds = array<i64: 32, 32>}, {pipeline_mode = #tpu.pipeline_mode<synchronous>, transform_indices = @transform_13, window_bounds = array<i64: 1, 32>}, {pipeline_mode = #tpu.pipeline_mode<synchronous>, transform_indices = @transform_14, window_bounds = array<i64: 1, 32>}, {pipeline_mode = #tpu.pipeline_mode<synchronous>, transform_indices = @transform_15, window_bounds = array<i64: 1, 32>}, {pipeline_mode = #tpu.pipeline_mode<synchronous>, transform_indices = @transform_16, window_bounds = array<i64: 32, 64>}, {pipeline_mode = #tpu.pipeline_mode<synchronous>, transform_indices = @transform_17, window_bounds = array<i64: 1, 64>}, {pipeline_mode = #tpu.pipeline_mode<synchronous>, transform_indices = @transform_18, window_bounds = array<i64: 64, 32>}, {pipeline_mode = #tpu.pipeline_mode<synchronous>, transform_indices = @transform_19, window_bounds = array<i64: 1, 32>}, {pipeline_mode = #tpu.pipeline_mode<synchronous>, transform_indices = @transform_20, window_bounds = array<i64: 1, 32>}, {pipeline_mode = #tpu.pipeline_mode<synchronous>, transform_indices = @transform_21, window_bounds = array<i64: 1, 32>}, {transform_indices = @transform_22, window_bounds = array<i64: 1, 8, 32>}]} {
    %c0 = arith.constant 0 : index
    %c0_0 = arith.constant 0 : index
    %c0_1 = arith.constant 0 : index
    %0 = vector.load %arg1[%c0, %c0_0, %c0_1] : memref<1x8x32xf32, #tpu.memory_space<vmem>>, vector<1x8x32xf32>
    %1 = vector.shape_cast %0 : vector<1x8x32xf32> to vector<8x32xf32>
    %c0_2 = arith.constant 0 : index
    %c0_3 = arith.constant 0 : index
    %c0_4 = arith.constant 0 : index
    %2 = vector.load %arg2[%c0_2, %c0_3, %c0_4] : memref<1x8x32xf32, #tpu.memory_space<vmem>>, vector<1x8x32xf32>
    %3 = vector.shape_cast %2 : vector<1x8x32xf32> to vector<8x32xf32>
    %c0_5 = arith.constant 0 : index
    %c0_6 = arith.constant 0 : index
    %4 = vector.load %arg3[%c0_5, %c0_6] : memref<32x96xf32, #tpu.memory_space<vmem>>, vector<32x96xf32>
    %cst = arith.constant dense<0.000000e+00> : vector<8x96xf32>
    %5 = tpu.matmul %1, %4, %cst {dimension_numbers = #tpu.dot_dimension_numbers<[1], [0], [0], [1], [0, 0, 1, 1], [], []>} : vector<8x32xf32>, vector<32x96xf32>, vector<8x96xf32> -> vector<8x96xf32>
    %c0_7 = arith.constant 0 : index
    %c0_8 = arith.constant 0 : index
    %6 = vector.load %arg4[%c0_7, %c0_8] : memref<1x96xf32, #tpu.memory_space<vmem>>, vector<1x96xf32>
    %7 = vector.broadcast %6 : vector<1x96xf32> to vector<8x96xf32>
    %8 = arith.addf %5, %7 : vector<8x96xf32>
    %9 = vector.extract_strided_slice %8 {offsets = [0, 0], sizes = [8, 32], strides = [1, 1]} : vector<8x96xf32> to vector<8x32xf32>
    %10 = vector.extract_strided_slice %8 {offsets = [0, 32], sizes = [8, 64], strides = [1, 1]} : vector<8x96xf32> to vector<8x64xf32>
    %c0_9 = arith.constant 0 : index
    %c0_10 = arith.constant 0 : index
    %11 = vector.load %arg5[%c0_9, %c0_10] : memref<32x32xf32, #tpu.memory_space<vmem>>, vector<32x32xf32>
    %c0_11 = arith.constant 0 : index
    %c0_12 = arith.constant 0 : index
    %12 = vector.load %arg6[%c0_11, %c0_12] : memref<1x32xf32, #tpu.memory_space<vmem>>, vector<1x32xf32>
    %cst_13 = arith.constant 0.000000e+00 : f32
    %13 = vector.broadcast %cst_13 : f32 to vector<8x32xf32>
    %14 = vector.extract_strided_slice %9 {offsets = [0, 0], sizes = [8, 8], strides = [1, 1]} : vector<8x32xf32> to vector<8x8xf32>
    %15 = vector.extract_strided_slice %10 {offsets = [0, 0], sizes = [8, 8], strides = [1, 1]} : vector<8x64xf32> to vector<8x8xf32>
    %16 = vector.extract_strided_slice %10 {offsets = [0, 32], sizes = [8, 8], strides = [1, 1]} : vector<8x64xf32> to vector<8x8xf32>
    %cst_14 = arith.constant dense<0.000000e+00> : vector<8x8xf32>
    %17 = tpu.matmul %14, %15, %cst_14 {dimension_numbers = #tpu.dot_dimension_numbers<[1], [1], [0], [0], [0, 0, 1, 0], [], []>} : vector<8x8xf32>, vector<8x8xf32>, vector<8x8xf32> -> vector<8x8xf32>
    %cst_15 = arith.constant 0.353553385 : f32
    %18 = vector.broadcast %cst_15 : f32 to vector<8x8xf32>
    %19 = arith.mulf %17, %18 : vector<8x8xf32>
    %20 = tpu.iota {dimensions = array<i32: 0>} : vector<8x8xi32>
    %21 = tpu.iota {dimensions = array<i32: 1>} : vector<8x8xi32>
    %22 = arith.cmpi sgt, %21, %20 : vector<8x8xi32>
    %cst_16 = arith.constant -1.000000e+30 : f32
    %23 = vector.broadcast %cst_16 : f32 to vector<8x8xf32>
    %24 = arith.select %22, %23, %19 : vector<8x8xi1>, vector<8x8xf32>
    %cst_17 = arith.constant dense<0xFF800000> : vector<8xf32>
    %25 = vector.multi_reduction <maximumf>, %24, %cst_17 [1] : vector<8x8xf32> to vector<8xf32>
    %26 = vector.shape_cast %25 : vector<8xf32> to vector<8x1xf32>
    %27 = vector.broadcast %26 : vector<8x1xf32> to vector<8x8xf32>
    %28 = arith.subf %24, %27 : vector<8x8xf32>
    %29 = math.exp %28 : vector<8x8xf32>
    %cst_18 = arith.constant dense<0.000000e+00> : vector<8xf32>
    %30 = vector.multi_reduction <add>, %29, %cst_18 [1] : vector<8x8xf32> to vector<8xf32>
    %31 = vector.shape_cast %30 : vector<8xf32> to vector<8x1xf32>
    %32 = tpu.reciprocal %31 {approx = true} : vector<8x1xf32> -> vector<8x1xf32>
    %33 = vector.broadcast %32 : vector<8x1xf32> to vector<8x8xf32>
    %34 = arith.mulf %29, %33 : vector<8x8xf32>
    %cst_19 = arith.constant dense<0.000000e+00> : vector<8x8xf32>
    %35 = tpu.matmul %34, %16, %cst_19 {dimension_numbers = #tpu.dot_dimension_numbers<[1], [0], [0], [1], [0, 0, 1, 1], [], []>} : vector<8x8xf32>, vector<8x8xf32>, vector<8x8xf32> -> vector<8x8xf32>
    %36 = vector.extract_strided_slice %11 {offsets = [0, 0], sizes = [8, 32], strides = [1, 1]} : vector<32x32xf32> to vector<8x32xf32>
    %cst_20 = arith.constant dense<0.000000e+00> : vector<8x32xf32>
    %37 = tpu.matmul %35, %36, %cst_20 {dimension_numbers = #tpu.dot_dimension_numbers<[1], [0], [0], [1], [0, 0, 1, 1], [], []>} : vector<8x8xf32>, vector<8x32xf32>, vector<8x32xf32> -> vector<8x32xf32>
    %38 = arith.addf %13, %37 : vector<8x32xf32>
    %39 = vector.extract_strided_slice %9 {offsets = [0, 8], sizes = [8, 8], strides = [1, 1]} : vector<8x32xf32> to vector<8x8xf32>
    %40 = vector.extract_strided_slice %10 {offsets = [0, 8], sizes = [8, 8], strides = [1, 1]} : vector<8x64xf32> to vector<8x8xf32>
    %41 = vector.extract_strided_slice %10 {offsets = [0, 40], sizes = [8, 8], strides = [1, 1]} : vector<8x64xf32> to vector<8x8xf32>
    %cst_21 = arith.constant dense<0.000000e+00> : vector<8x8xf32>
    %42 = tpu.matmul %39, %40, %cst_21 {dimension_numbers = #tpu.dot_dimension_numbers<[1], [1], [0], [0], [0, 0, 1, 0], [], []>} : vector<8x8xf32>, vector<8x8xf32>, vector<8x8xf32> -> vector<8x8xf32>
    %cst_22 = arith.constant 0.353553385 : f32
    %43 = vector.broadcast %cst_22 : f32 to vector<8x8xf32>
    %44 = arith.mulf %42, %43 : vector<8x8xf32>
    %45 = tpu.iota {dimensions = array<i32: 0>} : vector<8x8xi32>
    %46 = tpu.iota {dimensions = array<i32: 1>} : vector<8x8xi32>
    %47 = arith.cmpi sgt, %46, %45 : vector<8x8xi32>
    %cst_23 = arith.constant -1.000000e+30 : f32
    %48 = vector.broadcast %cst_23 : f32 to vector<8x8xf32>
    %49 = arith.select %47, %48, %44 : vector<8x8xi1>, vector<8x8xf32>
    %cst_24 = arith.constant dense<0xFF800000> : vector<8xf32>
    %50 = vector.multi_reduction <maximumf>, %49, %cst_24 [1] : vector<8x8xf32> to vector<8xf32>
    %51 = vector.shape_cast %50 : vector<8xf32> to vector<8x1xf32>
    %52 = vector.broadcast %51 : vector<8x1xf32> to vector<8x8xf32>
    %53 = arith.subf %49, %52 : vector<8x8xf32>
    %54 = math.exp %53 : vector<8x8xf32>
    %cst_25 = arith.constant dense<0.000000e+00> : vector<8xf32>
    %55 = vector.multi_reduction <add>, %54, %cst_25 [1] : vector<8x8xf32> to vector<8xf32>
    %56 = vector.shape_cast %55 : vector<8xf32> to vector<8x1xf32>
    %57 = tpu.reciprocal %56 {approx = true} : vector<8x1xf32> -> vector<8x1xf32>
    %58 = vector.broadcast %57 : vector<8x1xf32> to vector<8x8xf32>
    %59 = arith.mulf %54, %58 : vector<8x8xf32>
    %cst_26 = arith.constant dense<0.000000e+00> : vector<8x8xf32>
    %60 = tpu.matmul %59, %41, %cst_26 {dimension_numbers = #tpu.dot_dimension_numbers<[1], [0], [0], [1], [0, 0, 1, 1], [], []>} : vector<8x8xf32>, vector<8x8xf32>, vector<8x8xf32> -> vector<8x8xf32>
    %61 = vector.extract_strided_slice %11 {offsets = [8, 0], sizes = [8, 32], strides = [1, 1]} : vector<32x32xf32> to vector<8x32xf32>
    %cst_27 = arith.constant dense<0.000000e+00> : vector<8x32xf32>
    %62 = tpu.matmul %60, %61, %cst_27 {dimension_numbers = #tpu.dot_dimension_numbers<[1], [0], [0], [1], [0, 0, 1, 1], [], []>} : vector<8x8xf32>, vector<8x32xf32>, vector<8x32xf32> -> vector<8x32xf32>
    %63 = arith.addf %38, %62 : vector<8x32xf32>
    %64 = vector.extract_strided_slice %9 {offsets = [0, 16], sizes = [8, 8], strides = [1, 1]} : vector<8x32xf32> to vector<8x8xf32>
    %65 = vector.extract_strided_slice %10 {offsets = [0, 16], sizes = [8, 8], strides = [1, 1]} : vector<8x64xf32> to vector<8x8xf32>
    %66 = vector.extract_strided_slice %10 {offsets = [0, 48], sizes = [8, 8], strides = [1, 1]} : vector<8x64xf32> to vector<8x8xf32>
    %cst_28 = arith.constant dense<0.000000e+00> : vector<8x8xf32>
    %67 = tpu.matmul %64, %65, %cst_28 {dimension_numbers = #tpu.dot_dimension_numbers<[1], [1], [0], [0], [0, 0, 1, 0], [], []>} : vector<8x8xf32>, vector<8x8xf32>, vector<8x8xf32> -> vector<8x8xf32>
    %cst_29 = arith.constant 0.353553385 : f32
    %68 = vector.broadcast %cst_29 : f32 to vector<8x8xf32>
    %69 = arith.mulf %67, %68 : vector<8x8xf32>
    %70 = tpu.iota {dimensions = array<i32: 0>} : vector<8x8xi32>
    %71 = tpu.iota {dimensions = array<i32: 1>} : vector<8x8xi32>
    %72 = arith.cmpi sgt, %71, %70 : vector<8x8xi32>
    %cst_30 = arith.constant -1.000000e+30 : f32
    %73 = vector.broadcast %cst_30 : f32 to vector<8x8xf32>
    %74 = arith.select %72, %73, %69 : vector<8x8xi1>, vector<8x8xf32>
    %cst_31 = arith.constant dense<0xFF800000> : vector<8xf32>
    %75 = vector.multi_reduction <maximumf>, %74, %cst_31 [1] : vector<8x8xf32> to vector<8xf32>
    %76 = vector.shape_cast %75 : vector<8xf32> to vector<8x1xf32>
    %77 = vector.broadcast %76 : vector<8x1xf32> to vector<8x8xf32>
    %78 = arith.subf %74, %77 : vector<8x8xf32>
    %79 = math.exp %78 : vector<8x8xf32>
    %cst_32 = arith.constant dense<0.000000e+00> : vector<8xf32>
    %80 = vector.multi_reduction <add>, %79, %cst_32 [1] : vector<8x8xf32> to vector<8xf32>
    %81 = vector.shape_cast %80 : vector<8xf32> to vector<8x1xf32>
    %82 = tpu.reciprocal %81 {approx = true} : vector<8x1xf32> -> vector<8x1xf32>
    %83 = vector.broadcast %82 : vector<8x1xf32> to vector<8x8xf32>
    %84 = arith.mulf %79, %83 : vector<8x8xf32>
    %cst_33 = arith.constant dense<0.000000e+00> : vector<8x8xf32>
    %85 = tpu.matmul %84, %66, %cst_33 {dimension_numbers = #tpu.dot_dimension_numbers<[1], [0], [0], [1], [0, 0, 1, 1], [], []>} : vector<8x8xf32>, vector<8x8xf32>, vector<8x8xf32> -> vector<8x8xf32>
    %86 = vector.extract_strided_slice %11 {offsets = [16, 0], sizes = [8, 32], strides = [1, 1]} : vector<32x32xf32> to vector<8x32xf32>
    %cst_34 = arith.constant dense<0.000000e+00> : vector<8x32xf32>
    %87 = tpu.matmul %85, %86, %cst_34 {dimension_numbers = #tpu.dot_dimension_numbers<[1], [0], [0], [1], [0, 0, 1, 1], [], []>} : vector<8x8xf32>, vector<8x32xf32>, vector<8x32xf32> -> vector<8x32xf32>
    %88 = arith.addf %63, %87 : vector<8x32xf32>
    %89 = vector.extract_strided_slice %9 {offsets = [0, 24], sizes = [8, 8], strides = [1, 1]} : vector<8x32xf32> to vector<8x8xf32>
    %90 = vector.extract_strided_slice %10 {offsets = [0, 24], sizes = [8, 8], strides = [1, 1]} : vector<8x64xf32> to vector<8x8xf32>
    %91 = vector.extract_strided_slice %10 {offsets = [0, 56], sizes = [8, 8], strides = [1, 1]} : vector<8x64xf32> to vector<8x8xf32>
    %cst_35 = arith.constant dense<0.000000e+00> : vector<8x8xf32>
    %92 = tpu.matmul %89, %90, %cst_35 {dimension_numbers = #tpu.dot_dimension_numbers<[1], [1], [0], [0], [0, 0, 1, 0], [], []>} : vector<8x8xf32>, vector<8x8xf32>, vector<8x8xf32> -> vector<8x8xf32>
    %cst_36 = arith.constant 0.353553385 : f32
    %93 = vector.broadcast %cst_36 : f32 to vector<8x8xf32>
    %94 = arith.mulf %92, %93 : vector<8x8xf32>
    %95 = tpu.iota {dimensions = array<i32: 0>} : vector<8x8xi32>
    %96 = tpu.iota {dimensions = array<i32: 1>} : vector<8x8xi32>
    %97 = arith.cmpi sgt, %96, %95 : vector<8x8xi32>
    %cst_37 = arith.constant -1.000000e+30 : f32
    %98 = vector.broadcast %cst_37 : f32 to vector<8x8xf32>
    %99 = arith.select %97, %98, %94 : vector<8x8xi1>, vector<8x8xf32>
    %cst_38 = arith.constant dense<0xFF800000> : vector<8xf32>
    %100 = vector.multi_reduction <maximumf>, %99, %cst_38 [1] : vector<8x8xf32> to vector<8xf32>
    %101 = vector.shape_cast %100 : vector<8xf32> to vector<8x1xf32>
    %102 = vector.broadcast %101 : vector<8x1xf32> to vector<8x8xf32>
    %103 = arith.subf %99, %102 : vector<8x8xf32>
    %104 = math.exp %103 : vector<8x8xf32>
    %cst_39 = arith.constant dense<0.000000e+00> : vector<8xf32>
    %105 = vector.multi_reduction <add>, %104, %cst_39 [1] : vector<8x8xf32> to vector<8xf32>
    %106 = vector.shape_cast %105 : vector<8xf32> to vector<8x1xf32>
    %107 = tpu.reciprocal %106 {approx = true} : vector<8x1xf32> -> vector<8x1xf32>
    %108 = vector.broadcast %107 : vector<8x1xf32> to vector<8x8xf32>
    %109 = arith.mulf %104, %108 : vector<8x8xf32>
    %cst_40 = arith.constant dense<0.000000e+00> : vector<8x8xf32>
    %110 = tpu.matmul %109, %91, %cst_40 {dimension_numbers = #tpu.dot_dimension_numbers<[1], [0], [0], [1], [0, 0, 1, 1], [], []>} : vector<8x8xf32>, vector<8x8xf32>, vector<8x8xf32> -> vector<8x8xf32>
    %111 = vector.extract_strided_slice %11 {offsets = [24, 0], sizes = [8, 32], strides = [1, 1]} : vector<32x32xf32> to vector<8x32xf32>
    %cst_41 = arith.constant dense<0.000000e+00> : vector<8x32xf32>
    %112 = tpu.matmul %110, %111, %cst_41 {dimension_numbers = #tpu.dot_dimension_numbers<[1], [0], [0], [1], [0, 0, 1, 1], [], []>} : vector<8x8xf32>, vector<8x32xf32>, vector<8x32xf32> -> vector<8x32xf32>
    %113 = arith.addf %88, %112 : vector<8x32xf32>
    %114 = vector.broadcast %12 : vector<1x32xf32> to vector<8x32xf32>
    %115 = arith.addf %113, %114 : vector<8x32xf32>
    %116 = arith.addf %1, %115 : vector<8x32xf32>
    %c0_42 = arith.constant 0 : index
    %c0_43 = arith.constant 0 : index
    %117 = vector.load %arg7[%c0_42, %c0_43] : memref<1x32xf32, #tpu.memory_space<vmem>>, vector<1x32xf32>
    %c0_44 = arith.constant 0 : index
    %c0_45 = arith.constant 0 : index
    %118 = vector.load %arg8[%c0_44, %c0_45] : memref<1x32xf32, #tpu.memory_space<vmem>>, vector<1x32xf32>
    %cst_46 = arith.constant dense<0.000000e+00> : vector<8xf32>
    %119 = vector.multi_reduction <add>, %116, %cst_46 [1] : vector<8x32xf32> to vector<8xf32>
    %120 = vector.shape_cast %119 : vector<8xf32> to vector<8x1xf32>
    %cst_47 = arith.constant 3.200000e+01 : f32
    %121 = vector.broadcast %cst_47 : f32 to vector<8x1xf32>
    %122 = arith.divf %120, %121 : vector<8x1xf32>
    %123 = vector.broadcast %122 : vector<8x1xf32> to vector<8x32xf32>
    %124 = arith.subf %116, %123 : vector<8x32xf32>
    %125 = arith.mulf %124, %124 : vector<8x32xf32>
    %cst_48 = arith.constant dense<0.000000e+00> : vector<8xf32>
    %126 = vector.multi_reduction <add>, %125, %cst_48 [1] : vector<8x32xf32> to vector<8xf32>
    %127 = vector.shape_cast %126 : vector<8xf32> to vector<8x1xf32>
    %cst_49 = arith.constant 3.200000e+01 : f32
    %128 = vector.broadcast %cst_49 : f32 to vector<8x1xf32>
    %129 = arith.divf %127, %128 : vector<8x1xf32>
    %130 = vector.broadcast %122 : vector<8x1xf32> to vector<8x32xf32>
    %131 = arith.subf %116, %130 : vector<8x32xf32>
    %cst_50 = arith.constant 9.99999974E-6 : f32
    %132 = vector.broadcast %cst_50 : f32 to vector<8x1xf32>
    %133 = arith.addf %129, %132 : vector<8x1xf32>
    %134 = math.rsqrt %133 : vector<8x1xf32>
    %135 = vector.broadcast %134 : vector<8x1xf32> to vector<8x32xf32>
    %136 = arith.mulf %131, %135 : vector<8x32xf32>
    %137 = vector.broadcast %117 : vector<1x32xf32> to vector<8x32xf32>
    %138 = arith.mulf %136, %137 : vector<8x32xf32>
    %139 = vector.broadcast %118 : vector<1x32xf32> to vector<8x32xf32>
    %140 = arith.addf %138, %139 : vector<8x32xf32>
    %c0_51 = arith.constant 0 : index
    %c0_52 = arith.constant 0 : index
    %141 = vector.load %arg9[%c0_51, %c0_52] : memref<32x32xf32, #tpu.memory_space<vmem>>, vector<32x32xf32>
    %cst_53 = arith.constant dense<0.000000e+00> : vector<8x32xf32>
    %142 = tpu.matmul %140, %141, %cst_53 {dimension_numbers = #tpu.dot_dimension_numbers<[1], [0], [0], [1], [0, 0, 1, 1], [], []>} : vector<8x32xf32>, vector<32x32xf32>, vector<8x32xf32> -> vector<8x32xf32>
    %c0_54 = arith.constant 0 : index
    %c0_55 = arith.constant 0 : index
    %143 = vector.load %arg10[%c0_54, %c0_55] : memref<1x32xf32, #tpu.memory_space<vmem>>, vector<1x32xf32>
    %144 = vector.broadcast %143 : vector<1x32xf32> to vector<8x32xf32>
    %145 = arith.addf %142, %144 : vector<8x32xf32>
    %c0_56 = arith.constant 0 : index
    %c0_57 = arith.constant 0 : index
    %146 = vector.load %arg11[%c0_56, %c0_57] : memref<32x64xf32, #tpu.memory_space<vmem>>, vector<32x64xf32>
    %cst_58 = arith.constant dense<0.000000e+00> : vector<8x64xf32>
    %147 = tpu.matmul %3, %146, %cst_58 {dimension_numbers = #tpu.dot_dimension_numbers<[1], [0], [0], [1], [0, 0, 1, 1], [], []>} : vector<8x32xf32>, vector<32x64xf32>, vector<8x64xf32> -> vector<8x64xf32>
    %c0_59 = arith.constant 0 : index
    %c0_60 = arith.constant 0 : index
    %148 = vector.load %arg12[%c0_59, %c0_60] : memref<1x64xf32, #tpu.memory_space<vmem>>, vector<1x64xf32>
    %149 = vector.broadcast %148 : vector<1x64xf32> to vector<8x64xf32>
    %150 = arith.addf %147, %149 : vector<8x64xf32>
    %c0_61 = arith.constant 0 : index
    %c0_62 = arith.constant 0 : index
    %151 = vector.load %arg13[%c0_61, %c0_62] : memref<32x32xf32, #tpu.memory_space<vmem>>, vector<32x32xf32>
    %c0_63 = arith.constant 0 : index
    %c0_64 = arith.constant 0 : index
    %152 = vector.load %arg14[%c0_63, %c0_64] : memref<1x32xf32, #tpu.memory_space<vmem>>, vector<1x32xf32>
    %cst_65 = arith.constant 0.000000e+00 : f32
    %153 = vector.broadcast %cst_65 : f32 to vector<8x32xf32>
    %154 = vector.extract_strided_slice %145 {offsets = [0, 0], sizes = [8, 8], strides = [1, 1]} : vector<8x32xf32> to vector<8x8xf32>
    %155 = vector.extract_strided_slice %150 {offsets = [0, 0], sizes = [8, 8], strides = [1, 1]} : vector<8x64xf32> to vector<8x8xf32>
    %156 = vector.extract_strided_slice %150 {offsets = [0, 32], sizes = [8, 8], strides = [1, 1]} : vector<8x64xf32> to vector<8x8xf32>
    %cst_66 = arith.constant dense<0.000000e+00> : vector<8x8xf32>
    %157 = tpu.matmul %154, %155, %cst_66 {dimension_numbers = #tpu.dot_dimension_numbers<[1], [1], [0], [0], [0, 0, 1, 0], [], []>} : vector<8x8xf32>, vector<8x8xf32>, vector<8x8xf32> -> vector<8x8xf32>
    %cst_67 = arith.constant 0.353553385 : f32
    %158 = vector.broadcast %cst_67 : f32 to vector<8x8xf32>
    %159 = arith.mulf %157, %158 : vector<8x8xf32>
    %cst_68 = arith.constant dense<0xFF800000> : vector<8xf32>
    %160 = vector.multi_reduction <maximumf>, %159, %cst_68 [1] : vector<8x8xf32> to vector<8xf32>
    %161 = vector.shape_cast %160 : vector<8xf32> to vector<8x1xf32>
    %162 = vector.broadcast %161 : vector<8x1xf32> to vector<8x8xf32>
    %163 = arith.subf %159, %162 : vector<8x8xf32>
    %164 = math.exp %163 : vector<8x8xf32>
    %cst_69 = arith.constant dense<0.000000e+00> : vector<8xf32>
    %165 = vector.multi_reduction <add>, %164, %cst_69 [1] : vector<8x8xf32> to vector<8xf32>
    %166 = vector.shape_cast %165 : vector<8xf32> to vector<8x1xf32>
    %167 = tpu.reciprocal %166 {approx = true} : vector<8x1xf32> -> vector<8x1xf32>
    %168 = vector.broadcast %167 : vector<8x1xf32> to vector<8x8xf32>
    %169 = arith.mulf %164, %168 : vector<8x8xf32>
    %cst_70 = arith.constant dense<0.000000e+00> : vector<8x8xf32>
    %170 = tpu.matmul %169, %156, %cst_70 {dimension_numbers = #tpu.dot_dimension_numbers<[1], [0], [0], [1], [0, 0, 1, 1], [], []>} : vector<8x8xf32>, vector<8x8xf32>, vector<8x8xf32> -> vector<8x8xf32>
    %171 = vector.extract_strided_slice %151 {offsets = [0, 0], sizes = [8, 32], strides = [1, 1]} : vector<32x32xf32> to vector<8x32xf32>
    %cst_71 = arith.constant dense<0.000000e+00> : vector<8x32xf32>
    %172 = tpu.matmul %170, %171, %cst_71 {dimension_numbers = #tpu.dot_dimension_numbers<[1], [0], [0], [1], [0, 0, 1, 1], [], []>} : vector<8x8xf32>, vector<8x32xf32>, vector<8x32xf32> -> vector<8x32xf32>
    %173 = arith.addf %153, %172 : vector<8x32xf32>
    %174 = vector.extract_strided_slice %145 {offsets = [0, 8], sizes = [8, 8], strides = [1, 1]} : vector<8x32xf32> to vector<8x8xf32>
    %175 = vector.extract_strided_slice %150 {offsets = [0, 8], sizes = [8, 8], strides = [1, 1]} : vector<8x64xf32> to vector<8x8xf32>
    %176 = vector.extract_strided_slice %150 {offsets = [0, 40], sizes = [8, 8], strides = [1, 1]} : vector<8x64xf32> to vector<8x8xf32>
    %cst_72 = arith.constant dense<0.000000e+00> : vector<8x8xf32>
    %177 = tpu.matmul %174, %175, %cst_72 {dimension_numbers = #tpu.dot_dimension_numbers<[1], [1], [0], [0], [0, 0, 1, 0], [], []>} : vector<8x8xf32>, vector<8x8xf32>, vector<8x8xf32> -> vector<8x8xf32>
    %cst_73 = arith.constant 0.353553385 : f32
    %178 = vector.broadcast %cst_73 : f32 to vector<8x8xf32>
    %179 = arith.mulf %177, %178 : vector<8x8xf32>
    %cst_74 = arith.constant dense<0xFF800000> : vector<8xf32>
    %180 = vector.multi_reduction <maximumf>, %179, %cst_74 [1] : vector<8x8xf32> to vector<8xf32>
    %181 = vector.shape_cast %180 : vector<8xf32> to vector<8x1xf32>
    %182 = vector.broadcast %181 : vector<8x1xf32> to vector<8x8xf32>
    %183 = arith.subf %179, %182 : vector<8x8xf32>
    %184 = math.exp %183 : vector<8x8xf32>
    %cst_75 = arith.constant dense<0.000000e+00> : vector<8xf32>
    %185 = vector.multi_reduction <add>, %184, %cst_75 [1] : vector<8x8xf32> to vector<8xf32>
    %186 = vector.shape_cast %185 : vector<8xf32> to vector<8x1xf32>
    %187 = tpu.reciprocal %186 {approx = true} : vector<8x1xf32> -> vector<8x1xf32>
    %188 = vector.broadcast %187 : vector<8x1xf32> to vector<8x8xf32>
    %189 = arith.mulf %184, %188 : vector<8x8xf32>
    %cst_76 = arith.constant dense<0.000000e+00> : vector<8x8xf32>
    %190 = tpu.matmul %189, %176, %cst_76 {dimension_numbers = #tpu.dot_dimension_numbers<[1], [0], [0], [1], [0, 0, 1, 1], [], []>} : vector<8x8xf32>, vector<8x8xf32>, vector<8x8xf32> -> vector<8x8xf32>
    %191 = vector.extract_strided_slice %151 {offsets = [8, 0], sizes = [8, 32], strides = [1, 1]} : vector<32x32xf32> to vector<8x32xf32>
    %cst_77 = arith.constant dense<0.000000e+00> : vector<8x32xf32>
    %192 = tpu.matmul %190, %191, %cst_77 {dimension_numbers = #tpu.dot_dimension_numbers<[1], [0], [0], [1], [0, 0, 1, 1], [], []>} : vector<8x8xf32>, vector<8x32xf32>, vector<8x32xf32> -> vector<8x32xf32>
    %193 = arith.addf %173, %192 : vector<8x32xf32>
    %194 = vector.extract_strided_slice %145 {offsets = [0, 16], sizes = [8, 8], strides = [1, 1]} : vector<8x32xf32> to vector<8x8xf32>
    %195 = vector.extract_strided_slice %150 {offsets = [0, 16], sizes = [8, 8], strides = [1, 1]} : vector<8x64xf32> to vector<8x8xf32>
    %196 = vector.extract_strided_slice %150 {offsets = [0, 48], sizes = [8, 8], strides = [1, 1]} : vector<8x64xf32> to vector<8x8xf32>
    %cst_78 = arith.constant dense<0.000000e+00> : vector<8x8xf32>
    %197 = tpu.matmul %194, %195, %cst_78 {dimension_numbers = #tpu.dot_dimension_numbers<[1], [1], [0], [0], [0, 0, 1, 0], [], []>} : vector<8x8xf32>, vector<8x8xf32>, vector<8x8xf32> -> vector<8x8xf32>
    %cst_79 = arith.constant 0.353553385 : f32
    %198 = vector.broadcast %cst_79 : f32 to vector<8x8xf32>
    %199 = arith.mulf %197, %198 : vector<8x8xf32>
    %cst_80 = arith.constant dense<0xFF800000> : vector<8xf32>
    %200 = vector.multi_reduction <maximumf>, %199, %cst_80 [1] : vector<8x8xf32> to vector<8xf32>
    %201 = vector.shape_cast %200 : vector<8xf32> to vector<8x1xf32>
    %202 = vector.broadcast %201 : vector<8x1xf32> to vector<8x8xf32>
    %203 = arith.subf %199, %202 : vector<8x8xf32>
    %204 = math.exp %203 : vector<8x8xf32>
    %cst_81 = arith.constant dense<0.000000e+00> : vector<8xf32>
    %205 = vector.multi_reduction <add>, %204, %cst_81 [1] : vector<8x8xf32> to vector<8xf32>
    %206 = vector.shape_cast %205 : vector<8xf32> to vector<8x1xf32>
    %207 = tpu.reciprocal %206 {approx = true} : vector<8x1xf32> -> vector<8x1xf32>
    %208 = vector.broadcast %207 : vector<8x1xf32> to vector<8x8xf32>
    %209 = arith.mulf %204, %208 : vector<8x8xf32>
    %cst_82 = arith.constant dense<0.000000e+00> : vector<8x8xf32>
    %210 = tpu.matmul %209, %196, %cst_82 {dimension_numbers = #tpu.dot_dimension_numbers<[1], [0], [0], [1], [0, 0, 1, 1], [], []>} : vector<8x8xf32>, vector<8x8xf32>, vector<8x8xf32> -> vector<8x8xf32>
    %211 = vector.extract_strided_slice %151 {offsets = [16, 0], sizes = [8, 32], strides = [1, 1]} : vector<32x32xf32> to vector<8x32xf32>
    %cst_83 = arith.constant dense<0.000000e+00> : vector<8x32xf32>
    %212 = tpu.matmul %210, %211, %cst_83 {dimension_numbers = #tpu.dot_dimension_numbers<[1], [0], [0], [1], [0, 0, 1, 1], [], []>} : vector<8x8xf32>, vector<8x32xf32>, vector<8x32xf32> -> vector<8x32xf32>
    %213 = arith.addf %193, %212 : vector<8x32xf32>
    %214 = vector.extract_strided_slice %145 {offsets = [0, 24], sizes = [8, 8], strides = [1, 1]} : vector<8x32xf32> to vector<8x8xf32>
    %215 = vector.extract_strided_slice %150 {offsets = [0, 24], sizes = [8, 8], strides = [1, 1]} : vector<8x64xf32> to vector<8x8xf32>
    %216 = vector.extract_strided_slice %150 {offsets = [0, 56], sizes = [8, 8], strides = [1, 1]} : vector<8x64xf32> to vector<8x8xf32>
    %cst_84 = arith.constant dense<0.000000e+00> : vector<8x8xf32>
    %217 = tpu.matmul %214, %215, %cst_84 {dimension_numbers = #tpu.dot_dimension_numbers<[1], [1], [0], [0], [0, 0, 1, 0], [], []>} : vector<8x8xf32>, vector<8x8xf32>, vector<8x8xf32> -> vector<8x8xf32>
    %cst_85 = arith.constant 0.353553385 : f32
    %218 = vector.broadcast %cst_85 : f32 to vector<8x8xf32>
    %219 = arith.mulf %217, %218 : vector<8x8xf32>
    %cst_86 = arith.constant dense<0xFF800000> : vector<8xf32>
    %220 = vector.multi_reduction <maximumf>, %219, %cst_86 [1] : vector<8x8xf32> to vector<8xf32>
    %221 = vector.shape_cast %220 : vector<8xf32> to vector<8x1xf32>
    %222 = vector.broadcast %221 : vector<8x1xf32> to vector<8x8xf32>
    %223 = arith.subf %219, %222 : vector<8x8xf32>
    %224 = math.exp %223 : vector<8x8xf32>
    %cst_87 = arith.constant dense<0.000000e+00> : vector<8xf32>
    %225 = vector.multi_reduction <add>, %224, %cst_87 [1] : vector<8x8xf32> to vector<8xf32>
    %226 = vector.shape_cast %225 : vector<8xf32> to vector<8x1xf32>
    %227 = tpu.reciprocal %226 {approx = true} : vector<8x1xf32> -> vector<8x1xf32>
    %228 = vector.broadcast %227 : vector<8x1xf32> to vector<8x8xf32>
    %229 = arith.mulf %224, %228 : vector<8x8xf32>
    %cst_88 = arith.constant dense<0.000000e+00> : vector<8x8xf32>
    %230 = tpu.matmul %229, %216, %cst_88 {dimension_numbers = #tpu.dot_dimension_numbers<[1], [0], [0], [1], [0, 0, 1, 1], [], []>} : vector<8x8xf32>, vector<8x8xf32>, vector<8x8xf32> -> vector<8x8xf32>
    %231 = vector.extract_strided_slice %151 {offsets = [24, 0], sizes = [8, 32], strides = [1, 1]} : vector<32x32xf32> to vector<8x32xf32>
    %cst_89 = arith.constant dense<0.000000e+00> : vector<8x32xf32>
    %232 = tpu.matmul %230, %231, %cst_89 {dimension_numbers = #tpu.dot_dimension_numbers<[1], [0], [0], [1], [0, 0, 1, 1], [], []>} : vector<8x8xf32>, vector<8x32xf32>, vector<8x32xf32> -> vector<8x32xf32>
    %233 = arith.addf %213, %232 : vector<8x32xf32>
    %234 = vector.broadcast %152 : vector<1x32xf32> to vector<8x32xf32>
    %235 = arith.addf %233, %234 : vector<8x32xf32>
    %236 = arith.addf %140, %235 : vector<8x32xf32>
    %c0_90 = arith.constant 0 : index
    %c0_91 = arith.constant 0 : index
    %237 = vector.load %arg15[%c0_90, %c0_91] : memref<1x32xf32, #tpu.memory_space<vmem>>, vector<1x32xf32>
    %c0_92 = arith.constant 0 : index
    %c0_93 = arith.constant 0 : index
    %238 = vector.load %arg16[%c0_92, %c0_93] : memref<1x32xf32, #tpu.memory_space<vmem>>, vector<1x32xf32>
    %cst_94 = arith.constant dense<0.000000e+00> : vector<8xf32>
    %239 = vector.multi_reduction <add>, %236, %cst_94 [1] : vector<8x32xf32> to vector<8xf32>
    %240 = vector.shape_cast %239 : vector<8xf32> to vector<8x1xf32>
    %cst_95 = arith.constant 3.200000e+01 : f32
    %241 = vector.broadcast %cst_95 : f32 to vector<8x1xf32>
    %242 = arith.divf %240, %241 : vector<8x1xf32>
    %243 = vector.broadcast %242 : vector<8x1xf32> to vector<8x32xf32>
    %244 = arith.subf %236, %243 : vector<8x32xf32>
    %245 = arith.mulf %244, %244 : vector<8x32xf32>
    %cst_96 = arith.constant dense<0.000000e+00> : vector<8xf32>
    %246 = vector.multi_reduction <add>, %245, %cst_96 [1] : vector<8x32xf32> to vector<8xf32>
    %247 = vector.shape_cast %246 : vector<8xf32> to vector<8x1xf32>
    %cst_97 = arith.constant 3.200000e+01 : f32
    %248 = vector.broadcast %cst_97 : f32 to vector<8x1xf32>
    %249 = arith.divf %247, %248 : vector<8x1xf32>
    %250 = vector.broadcast %242 : vector<8x1xf32> to vector<8x32xf32>
    %251 = arith.subf %236, %250 : vector<8x32xf32>
    %cst_98 = arith.constant 9.99999974E-6 : f32
    %252 = vector.broadcast %cst_98 : f32 to vector<8x1xf32>
    %253 = arith.addf %249, %252 : vector<8x1xf32>
    %254 = math.rsqrt %253 : vector<8x1xf32>
    %255 = vector.broadcast %254 : vector<8x1xf32> to vector<8x32xf32>
    %256 = arith.mulf %251, %255 : vector<8x32xf32>
    %257 = vector.broadcast %237 : vector<1x32xf32> to vector<8x32xf32>
    %258 = arith.mulf %256, %257 : vector<8x32xf32>
    %259 = vector.broadcast %238 : vector<1x32xf32> to vector<8x32xf32>
    %260 = arith.addf %258, %259 : vector<8x32xf32>
    %c0_99 = arith.constant 0 : index
    %c0_100 = arith.constant 0 : index
    %261 = vector.load %arg17[%c0_99, %c0_100] : memref<32x64xf32, #tpu.memory_space<vmem>>, vector<32x64xf32>
    %cst_101 = arith.constant dense<0.000000e+00> : vector<8x64xf32>
    %262 = tpu.matmul %260, %261, %cst_101 {dimension_numbers = #tpu.dot_dimension_numbers<[1], [0], [0], [1], [0, 0, 1, 1], [], []>} : vector<8x32xf32>, vector<32x64xf32>, vector<8x64xf32> -> vector<8x64xf32>
    %c0_102 = arith.constant 0 : index
    %c0_103 = arith.constant 0 : index
    %263 = vector.load %arg18[%c0_102, %c0_103] : memref<1x64xf32, #tpu.memory_space<vmem>>, vector<1x64xf32>
    %264 = vector.broadcast %263 : vector<1x64xf32> to vector<8x64xf32>
    %265 = arith.addf %262, %264 : vector<8x64xf32>
    %cst_104 = arith.constant 0.000000e+00 : f32
    %266 = vector.broadcast %cst_104 : f32 to vector<8x64xf32>
    %267 = arith.maximumf %265, %266 : vector<8x64xf32>
    %c0_105 = arith.constant 0 : index
    %c0_106 = arith.constant 0 : index
    %268 = vector.load %arg19[%c0_105, %c0_106] : memref<64x32xf32, #tpu.memory_space<vmem>>, vector<64x32xf32>
    %cst_107 = arith.constant dense<0.000000e+00> : vector<8x32xf32>
    %269 = tpu.matmul %267, %268, %cst_107 {dimension_numbers = #tpu.dot_dimension_numbers<[1], [0], [0], [1], [0, 0, 1, 1], [], []>} : vector<8x64xf32>, vector<64x32xf32>, vector<8x32xf32> -> vector<8x32xf32>
    %c0_108 = arith.constant 0 : index
    %c0_109 = arith.constant 0 : index
    %270 = vector.load %arg20[%c0_108, %c0_109] : memref<1x32xf32, #tpu.memory_space<vmem>>, vector<1x32xf32>
    %271 = vector.broadcast %270 : vector<1x32xf32> to vector<8x32xf32>
    %272 = arith.addf %269, %271 : vector<8x32xf32>
    %273 = arith.addf %260, %272 : vector<8x32xf32>
    %c0_110 = arith.constant 0 : index
    %c0_111 = arith.constant 0 : index
    %274 = vector.load %arg21[%c0_110, %c0_111] : memref<1x32xf32, #tpu.memory_space<vmem>>, vector<1x32xf32>
    %c0_112 = arith.constant 0 : index
    %c0_113 = arith.constant 0 : index
    %275 = vector.load %arg22[%c0_112, %c0_113] : memref<1x32xf32, #tpu.memory_space<vmem>>, vector<1x32xf32>
    %cst_114 = arith.constant dense<0.000000e+00> : vector<8xf32>
    %276 = vector.multi_reduction <add>, %273, %cst_114 [1] : vector<8x32xf32> to vector<8xf32>
    %277 = vector.shape_cast %276 : vector<8xf32> to vector<8x1xf32>
    %cst_115 = arith.constant 3.200000e+01 : f32
    %278 = vector.broadcast %cst_115 : f32 to vector<8x1xf32>
    %279 = arith.divf %277, %278 : vector<8x1xf32>
    %280 = vector.broadcast %279 : vector<8x1xf32> to vector<8x32xf32>
    %281 = arith.subf %273, %280 : vector<8x32xf32>
    %282 = arith.mulf %281, %281 : vector<8x32xf32>
    %cst_116 = arith.constant dense<0.000000e+00> : vector<8xf32>
    %283 = vector.multi_reduction <add>, %282, %cst_116 [1] : vector<8x32xf32> to vector<8xf32>
    %284 = vector.shape_cast %283 : vector<8xf32> to vector<8x1xf32>
    %cst_117 = arith.constant 3.200000e+01 : f32
    %285 = vector.broadcast %cst_117 : f32 to vector<8x1xf32>
    %286 = arith.divf %284, %285 : vector<8x1xf32>
    %287 = vector.broadcast %279 : vector<8x1xf32> to vector<8x32xf32>
    %288 = arith.subf %273, %287 : vector<8x32xf32>
    %cst_118 = arith.constant 9.99999974E-6 : f32
    %289 = vector.broadcast %cst_118 : f32 to vector<8x1xf32>
    %290 = arith.addf %286, %289 : vector<8x1xf32>
    %291 = math.rsqrt %290 : vector<8x1xf32>
    %292 = vector.broadcast %291 : vector<8x1xf32> to vector<8x32xf32>
    %293 = arith.mulf %288, %292 : vector<8x32xf32>
    %294 = vector.broadcast %274 : vector<1x32xf32> to vector<8x32xf32>
    %295 = arith.mulf %293, %294 : vector<8x32xf32>
    %296 = vector.broadcast %275 : vector<1x32xf32> to vector<8x32xf32>
    %297 = arith.addf %295, %296 : vector<8x32xf32>
    %c0_119 = arith.constant 0 : index
    %c0_120 = arith.constant 0 : index
    %c0_121 = arith.constant 0 : index
    %298 = vector.load %arg23[%c0_119, %c0_120, %c0_121] : memref<1x8x32xf32, #tpu.memory_space<vmem>>, vector<1x8x32xf32>
    %299 = vector.shape_cast %298 : vector<1x8x32xf32> to vector<8x32xf32>
    %300 = vector.shape_cast %297 : vector<8x32xf32> to vector<1x8x32xf32>
    tpu.vector_store %arg23[%c0_119, %c0_120, %c0_121], %300 {strides = array<i32>} : memref<1x8x32xf32, #tpu.memory_space<vmem>>, vector<1x8x32xf32>,
    return
  }
  func.func @transform_0(%arg0: i32) -> (i32, i32, i32) {
    %c0_i32 = arith.constant 0 : i32
    %c0_i32_0 = arith.constant 0 : i32
    %c0_i32_1 = arith.constant 0 : i32
    return %arg0, %c0_i32, %c0_i32_0 : i32, i32, i32
  }
  func.func @transform_1(%arg0: i32) -> (i32, i32, i32) {
    %c0_i32 = arith.constant 0 : i32
    %c0_i32_0 = arith.constant 0 : i32
    %c0_i32_1 = arith.constant 0 : i32
    return %arg0, %c0_i32, %c0_i32_0 : i32, i32, i32
  }
  func.func @transform_2(%arg0: i32) -> (i32, i32) {
    %c0_i32 = arith.constant 0 : i32
    %c0_i32_0 = arith.constant 0 : i32
    %c0_i32_1 = arith.constant 0 : i32
    return %c0_i32, %c0_i32_0 : i32, i32
  }
  func.func @transform_3(%arg0: i32) -> (i32, i32) {
    %c0_i32 = arith.constant 0 : i32
    %c0_i32_0 = arith.constant 0 : i32
    %c0_i32_1 = arith.constant 0 : i32
    return %c0_i32, %c0_i32_0 : i32, i32
  }
  func.func @transform_4(%arg0: i32) -> (i32, i32) {
    %c0_i32 = arith.constant 0 : i32
    %c0_i32_0 = arith.constant 0 : i32
    %c0_i32_1 = arith.constant 0 : i32
    return %c0_i32, %c0_i32_0 : i32, i32
  }
  func.func @transform_5(%arg0: i32) -> (i32, i32) {
    %c0_i32 = arith.constant 0 : i32
    %c0_i32_0 = arith.constant 0 : i32
    %c0_i32_1 = arith.constant 0 : i32
    return %c0_i32, %c0_i32_0 : i32, i32
  }
  func.func @transform_6(%arg0: i32) -> (i32, i32) {
    %c0_i32 = arith.constant 0 : i32
    %c0_i32_0 = arith.constant 0 : i32
    %c0_i32_1 = arith.constant 0 : i32
    return %c0_i32, %c0_i32_0 : i32, i32
  }
  func.func @transform_7(%arg0: i32) -> (i32, i32) {
    %c0_i32 = arith.constant 0 : i32
    %c0_i32_0 = arith.constant 0 : i32
    %c0_i32_1 = arith.constant 0 : i32
    return %c0_i32, %c0_i32_0 : i32, i32
  }
  func.func @transform_8(%arg0: i32) -> (i32, i32) {
    %c0_i32 = arith.constant 0 : i32
    %c0_i32_0 = arith.constant 0 : i32
    %c0_i32_1 = arith.constant 0 : i32
    return %c0_i32, %c0_i32_0 : i32, i32
  }
  func.func @transform_9(%arg0: i32) -> (i32, i32) {
    %c0_i32 = arith.constant 0 : i32
    %c0_i32_0 = arith.constant 0 : i32
    %c0_i32_1 = arith.constant 0 : i32
    return %c0_i32, %c0_i32_0 : i32, i32
  }
  func.func @transform_10(%arg0: i32) -> (i32, i32) {
    %c0_i32 = arith.constant 0 : i32
    %c0_i32_0 = arith.constant 0 : i32
    %c0_i32_1 = arith.constant 0 : i32
    return %c0_i32, %c0_i32_0 : i32, i32
  }
  func.func @transform_11(%arg0: i32) -> (i32, i32) {
    %c0_i32 = arith.constant 0 : i32
    %c0_i32_0 = arith.constant 0 : i32
    %c0_i32_1 = arith.constant 0 : i32
    return %c0_i32, %c0_i32_0 : i32, i32
  }
  func.func @transform_12(%arg0: i32) -> (i32, i32) {
    %c0_i32 = arith.constant 0 : i32
    %c0_i32_0 = arith.constant 0 : i32
    %c0_i32_1 = arith.constant 0 : i32
    return %c0_i32, %c0_i32_0 : i32, i32
  }
  func.func @transform_13(%arg0: i32) -> (i32, i32) {
    %c0_i32 = arith.constant 0 : i32
    %c0_i32_0 = arith.constant 0 : i32
    %c0_i32_1 = arith.constant 0 : i32
    return %c0_i32, %c0_i32_0 : i32, i32
  }
  func.func @transform_14(%arg0: i32) -> (i32, i32) {
    %c0_i32 = arith.constant 0 : i32
    %c0_i32_0 = arith.constant 0 : i32
    %c0_i32_1 = arith.constant 0 : i32
    return %c0_i32, %c0_i32_0 : i32, i32
  }
  func.func @transform_15(%arg0: i32) -> (i32, i32) {
    %c0_i32 = arith.constant 0 : i32
    %c0_i32_0 = arith.constant 0 : i32
    %c0_i32_1 = arith.constant 0 : i32
    return %c0_i32, %c0_i32_0 : i32, i32
  }
  func.func @transform_16(%arg0: i32) -> (i32, i32) {
    %c0_i32 = arith.constant 0 : i32
    %c0_i32_0 = arith.constant 0 : i32
    %c0_i32_1 = arith.constant 0 : i32
    return %c0_i32, %c0_i32_0 : i32, i32
  }
  func.func @transform_17(%arg0: i32) -> (i32, i32) {
    %c0_i32 = arith.constant 0 : i32
    %c0_i32_0 = arith.constant 0 : i32
    %c0_i32_1 = arith.constant 0 : i32
    return %c0_i32, %c0_i32_0 : i32, i32
  }
  func.func @transform_18(%arg0: i32) -> (i32, i32) {
    %c0_i32 = arith.constant 0 : i32
    %c0_i32_0 = arith.constant 0 : i32
    %c0_i32_1 = arith.constant 0 : i32
    return %c0_i32, %c0_i32_0 : i32, i32
  }
  func.func @transform_19(%arg0: i32) -> (i32, i32) {
    %c0_i32 = arith.constant 0 : i32
    %c0_i32_0 = arith.constant 0 : i32
    %c0_i32_1 = arith.constant 0 : i32
    return %c0_i32, %c0_i32_0 : i32, i32
  }
  func.func @transform_20(%arg0: i32) -> (i32, i32) {
    %c0_i32 = arith.constant 0 : i32
    %c0_i32_0 = arith.constant 0 : i32
    %c0_i32_1 = arith.constant 0 : i32
    return %c0_i32, %c0_i32_0 : i32, i32
  }
  func.func @transform_21(%arg0: i32) -> (i32, i32) {
    %c0_i32 = arith.constant 0 : i32
    %c0_i32_0 = arith.constant 0 : i32
    %c0_i32_1 = arith.constant 0 : i32
    return %c0_i32, %c0_i32_0 : i32, i32
  }
  func.func @transform_22(%arg0: i32) -> (i32, i32, i32) {
    %c0_i32 = arith.constant 0 : i32
    %c0_i32_0 = arith.constant 0 : i32
    %c0_i32_1 = arith.constant 0 : i32
    return %arg0, %c0_i32, %c0_i32_0 : i32, i32, i32
  }
}

module attributes {stable_mosaic.version = 11 : i64} {
  func.func @_decoder_layer_kernel(%arg0: i32, %arg1: memref<1x8x32xf32, #tpu.memory_space<vmem>>, %arg2: memref<1x8x32xf32, #tpu.memory_space<vmem>>, %arg3: memref<32x96xf32, #tpu.memory_space<vmem>>, %arg4: memref<1x96xf32, #tpu.memory_space<vmem>>, %arg5: memref<32x32xf32, #tpu.memory_space<vmem>>, %arg6: memref<1x32xf32, #tpu.memory_space<vmem>>, %arg7: memref<1x32xf32, #tpu.memory_space<vmem>>, %arg8: memref<1x32xf32, #tpu.memory_space<vmem>>, %arg9: memref<32x32xf32, #tpu.memory_space<vmem>>, %arg10: memref<1x32xf32, #tpu.memory_space<vmem>>, %arg11: memref<32x64xf32, #tpu.memory_space<vmem>>, %arg12: memref<1x64xf32, #tpu.memory_space<vmem>>, %arg13: memref<32x32xf32, #tpu.memory_space<vmem>>, %arg14: memref<1x32xf32, #tpu.memory_space<vmem>>, %arg15: memref<1x32xf32, #tpu.memory_space<vmem>>, %arg16: memref<1x32xf32, #tpu.memory_space<vmem>>, %arg17: memref<32x64xf32, #tpu.memory_space<vmem>>, %arg18: memref<1x64xf32, #tpu.memory_space<vmem>>, %arg19: memref<64x32xf32, #tpu.memory_space<vmem>>, %arg20: memref<1x32xf32, #tpu.memory_space<vmem>>, %arg21: memref<1x32xf32, #tpu.memory_space<vmem>>, %arg22: memref<1x32xf32, #tpu.memory_space<vmem>>, %arg23: memref<1x8x32xf32, #tpu.memory_space<vmem>>) attributes {dimension_semantics = [#tpu.dimension_semantics<parallel>], iteration_bounds = array<i64: 2>, scalar_prefetch = 0 : i64, scratch_operands = 0 : i64, tpu.core_type = #tpu.core_type<tc>, window_params = [{transform_indices = @transform_0, window_bounds = array<i64: 1, 8, 32>}, {transform_indices = @transform_1, window_bounds = array<i64: 1, 8, 32>}, {pipeline_mode = #tpu.pipeline_mode<synchronous>, transform_indices = @transform_2, window_bounds = array<i64: 32, 96>}, {pipeline_mode = #tpu.pipeline_mode<synchronous>, transform_indices = @transform_3, window_bounds = array<i64: 1, 96>}, {pipeline_mode = #tpu.pipeline_mode<synchronous>, transform_indices = @transform_4, window_bounds = array<i64: 32, 32>}, {pipeline_mode = #tpu.pipeline_mode<synchronous>, transform_indices = @transform_5, window_bounds = array<i64: 1, 32>}, {pipeline_mode = #tpu.pipeline_mode<synchronous>, transform_indices = @transform_6, window_bounds = array<i64: 1, 32>}, {pipeline_mode = #tpu.pipeline_mode<synchronous>, transform_indices = @transform_7, window_bounds = array<i64: 1, 32>}, {pipeline_mode = #tpu.pipeline_mode<synchronous>, transform_indices = @transform_8, window_bounds = array<i64: 32, 32>}, {pipeline_mode = #tpu.pipeline_mode<synchronous>, transform_indices = @transform_9, window_bounds = array<i64: 1, 32>}, {pipeline_mode = #tpu.pipeline_mode<synchronous>, transform_indices = @transform_10, window_bounds = array<i64: 32, 64>}, {pipeline_mode = #tpu.pipeline_mode<synchronous>, transform_indices = @transform_11, window_bounds = array<i64: 1, 64>}, {pipeline_mode = #tpu.pipeline_mode<synchronous>, transform_indices = @transform_12, window_bounds = array<i64: 32, 32>}, {pipeline_mode = #tpu.pipeline_mode<synchronous>, transform_indices = @transform_13, window_bounds = array<i64: 1, 32>}, {pipeline_mode = #tpu.pipeline_mode<synchronous>, transform_indices = @transform_14, window_bounds = array<i64: 1, 32>}, {pipeline_mode = #tpu.pipeline_mode<synchronous>, transform_indices = @transform_15, window_bounds = array<i64: 1, 32>}, {pipeline_mode = #tpu.pipeline_mode<synchronous>, transform_indices = @transform_16, window_bounds = array<i64: 32, 64>}, {pipeline_mode = #tpu.pipeline_mode<synchronous>, transform_indices = @transform_17, window_bounds = array<i64: 1, 64>}, {pipeline_mode = #tpu.pipeline_mode<synchronous>, transform_indices = @transform_18, window_bounds = array<i64: 64, 32>}, {pipeline_mode = #tpu.pipeline_mode<synchronous>, transform_indices = @transform_19, window_bounds = array<i64: 1, 32>}, {pipeline_mode = #tpu.pipeline_mode<synchronous>, transform_indices = @transform_20, window_bounds = array<i64: 1, 32>}, {pipeline_mode = #tpu.pipeline_mode<synchronous>, transform_indices = @transform_21, window_bounds = array<i64: 1, 32>}, {transform_indices = @transform_22, window_bounds = array<i64: 1, 8, 32>}]} {
    %c0 = arith.constant 0 : index
    %c0_0 = arith.constant 0 : index
    %c0_1 = arith.constant 0 : index
    %0 = vector.load %arg1[%c0, %c0_0, %c0_1] : memref<1x8x32xf32, #tpu.memory_space<vmem>>, vector<1x8x32xf32>
    %1 = vector.shape_cast %0 : vector<1x8x32xf32> to vector<8x32xf32>
    %c0_2 = arith.constant 0 : index
    %c0_3 = arith.constant 0 : index
    %c0_4 = arith.constant 0 : index
    %2 = vector.load %arg2[%c0_2, %c0_3, %c0_4] : memref<1x8x32xf32, #tpu.memory_space<vmem>>, vector<1x8x32xf32>
    %3 = vector.shape_cast %2 : vector<1x8x32xf32> to vector<8x32xf32>
    %c0_5 = arith.constant 0 : index
    %c0_6 = arith.constant 0 : index
    %4 = vector.load %arg3[%c0_5, %c0_6] : memref<32x96xf32, #tpu.memory_space<vmem>>, vector<32x96xf32>
    %cst = arith.constant dense<0.000000e+00> : vector<8x96xf32>
    %5 = tpu.matmul %1, %4, %cst {dimension_numbers = #tpu.dot_dimension_numbers<[1], [0], [0], [1], [0, 0, 1, 1], [], []>} : vector<8x32xf32>, vector<32x96xf32>, vector<8x96xf32> -> vector<8x96xf32>
    %c0_7 = arith.constant 0 : index
    %c0_8 = arith.constant 0 : index
    %6 = vector.load %arg4[%c0_7, %c0_8] : memref<1x96xf32, #tpu.memory_space<vmem>>, vector<1x96xf32>
    %7 = vector.broadcast %6 : vector<1x96xf32> to vector<8x96xf32>
    %8 = arith.addf %5, %7 : vector<8x96xf32>
    %9 = vector.extract_strided_slice %8 {offsets = [0, 0], sizes = [8, 32], strides = [1, 1]} : vector<8x96xf32> to vector<8x32xf32>
    %10 = vector.extract_strided_slice %8 {offsets = [0, 32], sizes = [8, 64], strides = [1, 1]} : vector<8x96xf32> to vector<8x64xf32>
    %c0_9 = arith.constant 0 : index
    %c0_10 = arith.constant 0 : index
    %11 = vector.load %arg5[%c0_9, %c0_10] : memref<32x32xf32, #tpu.memory_space<vmem>>, vector<32x32xf32>
    %c0_11 = arith.constant 0 : index
    %c0_12 = arith.constant 0 : index
    %12 = vector.load %arg6[%c0_11, %c0_12] : memref<1x32xf32, #tpu.memory_space<vmem>>, vector<1x32xf32>
    %cst_13 = arith.constant 0.000000e+00 : f32
    %13 = vector.broadcast %cst_13 : f32 to vector<8x32xf32>
    %14 = vector.extract_strided_slice %9 {offsets = [0, 0], sizes = [8, 8], strides = [1, 1]} : vector<8x32xf32> to vector<8x8xf32>
    %15 = vector.extract_strided_slice %10 {offsets = [0, 0], sizes = [8, 8], strides = [1, 1]} : vector<8x64xf32> to vector<8x8xf32>
    %16 = vector.extract_strided_slice %10 {offsets = [0, 32], sizes = [8, 8], strides = [1, 1]} : vector<8x64xf32> to vector<8x8xf32>
    %cst_14 = arith.constant dense<0.000000e+00> : vector<8x8xf32>
    %17 = tpu.matmul %14, %15, %cst_14 {dimension_numbers = #tpu.dot_dimension_numbers<[1], [1], [0], [0], [0, 0, 1, 0], [], []>} : vector<8x8xf32>, vector<8x8xf32>, vector<8x8xf32> -> vector<8x8xf32>
    %cst_15 = arith.constant 0.353553385 : f32
    %18 = vector.broadcast %cst_15 : f32 to vector<8x8xf32>
    %19 = arith.mulf %17, %18 : vector<8x8xf32>
    %20 = tpu.iota {dimensions = array<i32: 0>} : vector<8x8xi32>
    %21 = tpu.iota {dimensions = array<i32: 1>} : vector<8x8xi32>
    %22 = arith.cmpi sgt, %21, %20 : vector<8x8xi32>
    %cst_16 = arith.constant -1.000000e+30 : f32
    %23 = vector.broadcast %cst_16 : f32 to vector<8x8xf32>
    %24 = arith.select %22, %23, %19 : vector<8x8xi1>, vector<8x8xf32>
    %cst_17 = arith.constant dense<0xFF800000> : vector<8xf32>
    %25 = vector.multi_reduction <maximumf>, %24, %cst_17 [1] : vector<8x8xf32> to vector<8xf32>
    %26 = vector.shape_cast %25 : vector<8xf32> to vector<8x1xf32>
    %27 = vector.broadcast %26 : vector<8x1xf32> to vector<8x8xf32>
    %28 = arith.subf %24, %27 : vector<8x8xf32>
    %29 = math.exp %28 : vector<8x8xf32>
    %cst_18 = arith.constant dense<0.000000e+00> : vector<8xf32>
    %30 = vector.multi_reduction <add>, %29, %cst_18 [1] : vector<8x8xf32> to vector<8xf32>
    %31 = vector.shape_cast %30 : vector<8xf32> to vector<8x1xf32>
    %32 = tpu.reciprocal %31 {approx = true} : vector<8x1xf32> -> vector<8x1xf32>
    %33 = vector.broadcast %32 : vector<8x1xf32> to vector<8x8xf32>
    %34 = arith.mulf %29, %33 : vector<8x8xf32>
    %cst_19 = arith.constant dense<0.000000e+00> : vector<8x8xf32>
    %35 = tpu.matmul %34, %16, %cst_19 {dimension_numbers = #tpu.dot_dimension_numbers<[1], [0], [0], [1], [0, 0, 1, 1], [], []>} : vector<8x8xf32>, vector<8x8xf32>, vector<8x8xf32> -> vector<8x8xf32>
    %36 = vector.extract_strided_slice %11 {offsets = [0, 0], sizes = [8, 32], strides = [1, 1]} : vector<32x32xf32> to vector<8x32xf32>
    %cst_20 = arith.constant dense<0.000000e+00> : vector<8x32xf32>
    %37 = tpu.matmul %35, %36, %cst_20 {dimension_numbers = #tpu.dot_dimension_numbers<[1], [0], [0], [1], [0, 0, 1, 1], [], []>} : vector<8x8xf32>, vector<8x32xf32>, vector<8x32xf32> -> vector<8x32xf32>
    %38 = arith.addf %13, %37 : vector<8x32xf32>
    %39 = vector.extract_strided_slice %9 {offsets = [0, 8], sizes = [8, 8], strides = [1, 1]} : vector<8x32xf32> to vector<8x8xf32>
    %40 = vector.extract_strided_slice %10 {offsets = [0, 8], sizes = [8, 8], strides = [1, 1]} : vector<8x64xf32> to vector<8x8xf32>
    %41 = vector.extract_strided_slice %10 {offsets = [0, 40], sizes = [8, 8], strides = [1, 1]} : vector<8x64xf32> to vector<8x8xf32>
    %cst_21 = arith.constant dense<0.000000e+00> : vector<8x8xf32>
    %42 = tpu.matmul %39, %40, %cst_21 {dimension_numbers = #tpu.dot_dimension_numbers<[1], [1], [0], [0], [0, 0, 1, 0], [], []>} : vector<8x8xf32>, vector<8x8xf32>, vector<8x8xf32> -> vector<8x8xf32>
    %cst_22 = arith.constant 0.353553385 : f32
    %43 = vector.broadcast %cst_22 : f32 to vector<8x8xf32>
    %44 = arith.mulf %42, %43 : vector<8x8xf32>
    %45 = tpu.iota {dimensions = array<i32: 0>} : vector<8x8xi32>
    %46 = tpu.iota {dimensions = array<i32: 1>} : vector<8x8xi32>
    %47 = arith.cmpi sgt, %46, %45 : vector<8x8xi32>
    %cst_23 = arith.constant -1.000000e+30 : f32
    %48 = vector.broadcast %cst_23 : f32 to vector<8x8xf32>
    %49 = arith.select %47, %48, %44 : vector<8x8xi1>, vector<8x8xf32>
    %cst_24 = arith.constant dense<0xFF800000> : vector<8xf32>
    %50 = vector.multi_reduction <maximumf>, %49, %cst_24 [1] : vector<8x8xf32> to vector<8xf32>
    %51 = vector.shape_cast %50 : vector<8xf32> to vector<8x1xf32>
    %52 = vector.broadcast %51 : vector<8x1xf32> to vector<8x8xf32>
    %53 = arith.subf %49, %52 : vector<8x8xf32>
    %54 = math.exp %53 : vector<8x8xf32>
    %cst_25 = arith.constant dense<0.000000e+00> : vector<8xf32>
    %55 = vector.multi_reduction <add>, %54, %cst_25 [1] : vector<8x8xf32> to vector<8xf32>
    %56 = vector.shape_cast %55 : vector<8xf32> to vector<8x1xf32>
    %57 = tpu.reciprocal %56 {approx = true} : vector<8x1xf32> -> vector<8x1xf32>
    %58 = vector.broadcast %57 : vector<8x1xf32> to vector<8x8xf32>
    %59 = arith.mulf %54, %58 : vector<8x8xf32>
    %cst_26 = arith.constant dense<0.000000e+00> : vector<8x8xf32>
    %60 = tpu.matmul %59, %41, %cst_26 {dimension_numbers = #tpu.dot_dimension_numbers<[1], [0], [0], [1], [0, 0, 1, 1], [], []>} : vector<8x8xf32>, vector<8x8xf32>, vector<8x8xf32> -> vector<8x8xf32>
    %61 = vector.extract_strided_slice %11 {offsets = [8, 0], sizes = [8, 32], strides = [1, 1]} : vector<32x32xf32> to vector<8x32xf32>
    %cst_27 = arith.constant dense<0.000000e+00> : vector<8x32xf32>
    %62 = tpu.matmul %60, %61, %cst_27 {dimension_numbers = #tpu.dot_dimension_numbers<[1], [0], [0], [1], [0, 0, 1, 1], [], []>} : vector<8x8xf32>, vector<8x32xf32>, vector<8x32xf32> -> vector<8x32xf32>
    %63 = arith.addf %38, %62 : vector<8x32xf32>
    %64 = vector.extract_strided_slice %9 {offsets = [0, 16], sizes = [8, 8], strides = [1, 1]} : vector<8x32xf32> to vector<8x8xf32>
    %65 = vector.extract_strided_slice %10 {offsets = [0, 16], sizes = [8, 8], strides = [1, 1]} : vector<8x64xf32> to vector<8x8xf32>
    %66 = vector.extract_strided_slice %10 {offsets = [0, 48], sizes = [8, 8], strides = [1, 1]} : vector<8x64xf32> to vector<8x8xf32>
    %cst_28 = arith.constant dense<0.000000e+00> : vector<8x8xf32>
    %67 = tpu.matmul %64, %65, %cst_28 {dimension_numbers = #tpu.dot_dimension_numbers<[1], [1], [0], [0], [0, 0, 1, 0], [], []>} : vector<8x8xf32>, vector<8x8xf32>, vector<8x8xf32> -> vector<8x8xf32>
    %cst_29 = arith.constant 0.353553385 : f32
    %68 = vector.broadcast %cst_29 : f32 to vector<8x8xf32>
    %69 = arith.mulf %67, %68 : vector<8x8xf32>
    %70 = tpu.iota {dimensions = array<i32: 0>} : vector<8x8xi32>
    %71 = tpu.iota {dimensions = array<i32: 1>} : vector<8x8xi32>
    %72 = arith.cmpi sgt, %71, %70 : vector<8x8xi32>
    %cst_30 = arith.constant -1.000000e+30 : f32
    %73 = vector.broadcast %cst_30 : f32 to vector<8x8xf32>
    %74 = arith.select %72, %73, %69 : vector<8x8xi1>, vector<8x8xf32>
    %cst_31 = arith.constant dense<0xFF800000> : vector<8xf32>
    %75 = vector.multi_reduction <maximumf>, %74, %cst_31 [1] : vector<8x8xf32> to vector<8xf32>
    %76 = vector.shape_cast %75 : vector<8xf32> to vector<8x1xf32>
    %77 = vector.broadcast %76 : vector<8x1xf32> to vector<8x8xf32>
    %78 = arith.subf %74, %77 : vector<8x8xf32>
    %79 = math.exp %78 : vector<8x8xf32>
    %cst_32 = arith.constant dense<0.000000e+00> : vector<8xf32>
    %80 = vector.multi_reduction <add>, %79, %cst_32 [1] : vector<8x8xf32> to vector<8xf32>
    %81 = vector.shape_cast %80 : vector<8xf32> to vector<8x1xf32>
    %82 = tpu.reciprocal %81 {approx = true} : vector<8x1xf32> -> vector<8x1xf32>
    %83 = vector.broadcast %82 : vector<8x1xf32> to vector<8x8xf32>
    %84 = arith.mulf %79, %83 : vector<8x8xf32>
    %cst_33 = arith.constant dense<0.000000e+00> : vector<8x8xf32>
    %85 = tpu.matmul %84, %66, %cst_33 {dimension_numbers = #tpu.dot_dimension_numbers<[1], [0], [0], [1], [0, 0, 1, 1], [], []>} : vector<8x8xf32>, vector<8x8xf32>, vector<8x8xf32> -> vector<8x8xf32>
    %86 = vector.extract_strided_slice %11 {offsets = [16, 0], sizes = [8, 32], strides = [1, 1]} : vector<32x32xf32> to vector<8x32xf32>
    %cst_34 = arith.constant dense<0.000000e+00> : vector<8x32xf32>
    %87 = tpu.matmul %85, %86, %cst_34 {dimension_numbers = #tpu.dot_dimension_numbers<[1], [0], [0], [1], [0, 0, 1, 1], [], []>} : vector<8x8xf32>, vector<8x32xf32>, vector<8x32xf32> -> vector<8x32xf32>
    %88 = arith.addf %63, %87 : vector<8x32xf32>
    %89 = vector.extract_strided_slice %9 {offsets = [0, 24], sizes = [8, 8], strides = [1, 1]} : vector<8x32xf32> to vector<8x8xf32>
    %90 = vector.extract_strided_slice %10 {offsets = [0, 24], sizes = [8, 8], strides = [1, 1]} : vector<8x64xf32> to vector<8x8xf32>
    %91 = vector.extract_strided_slice %10 {offsets = [0, 56], sizes = [8, 8], strides = [1, 1]} : vector<8x64xf32> to vector<8x8xf32>
    %cst_35 = arith.constant dense<0.000000e+00> : vector<8x8xf32>
    %92 = tpu.matmul %89, %90, %cst_35 {dimension_numbers = #tpu.dot_dimension_numbers<[1], [1], [0], [0], [0, 0, 1, 0], [], []>} : vector<8x8xf32>, vector<8x8xf32>, vector<8x8xf32> -> vector<8x8xf32>
    %cst_36 = arith.constant 0.353553385 : f32
    %93 = vector.broadcast %cst_36 : f32 to vector<8x8xf32>
    %94 = arith.mulf %92, %93 : vector<8x8xf32>
    %95 = tpu.iota {dimensions = array<i32: 0>} : vector<8x8xi32>
    %96 = tpu.iota {dimensions = array<i32: 1>} : vector<8x8xi32>
    %97 = arith.cmpi sgt, %96, %95 : vector<8x8xi32>
    %cst_37 = arith.constant -1.000000e+30 : f32
    %98 = vector.broadcast %cst_37 : f32 to vector<8x8xf32>
    %99 = arith.select %97, %98, %94 : vector<8x8xi1>, vector<8x8xf32>
    %cst_38 = arith.constant dense<0xFF800000> : vector<8xf32>
    %100 = vector.multi_reduction <maximumf>, %99, %cst_38 [1] : vector<8x8xf32> to vector<8xf32>
    %101 = vector.shape_cast %100 : vector<8xf32> to vector<8x1xf32>
    %102 = vector.broadcast %101 : vector<8x1xf32> to vector<8x8xf32>
    %103 = arith.subf %99, %102 : vector<8x8xf32>
    %104 = math.exp %103 : vector<8x8xf32>
    %cst_39 = arith.constant dense<0.000000e+00> : vector<8xf32>
    %105 = vector.multi_reduction <add>, %104, %cst_39 [1] : vector<8x8xf32> to vector<8xf32>
    %106 = vector.shape_cast %105 : vector<8xf32> to vector<8x1xf32>
    %107 = tpu.reciprocal %106 {approx = true} : vector<8x1xf32> -> vector<8x1xf32>
    %108 = vector.broadcast %107 : vector<8x1xf32> to vector<8x8xf32>
    %109 = arith.mulf %104, %108 : vector<8x8xf32>
    %cst_40 = arith.constant dense<0.000000e+00> : vector<8x8xf32>
    %110 = tpu.matmul %109, %91, %cst_40 {dimension_numbers = #tpu.dot_dimension_numbers<[1], [0], [0], [1], [0, 0, 1, 1], [], []>} : vector<8x8xf32>, vector<8x8xf32>, vector<8x8xf32> -> vector<8x8xf32>
    %111 = vector.extract_strided_slice %11 {offsets = [24, 0], sizes = [8, 32], strides = [1, 1]} : vector<32x32xf32> to vector<8x32xf32>
    %cst_41 = arith.constant dense<0.000000e+00> : vector<8x32xf32>
    %112 = tpu.matmul %110, %111, %cst_41 {dimension_numbers = #tpu.dot_dimension_numbers<[1], [0], [0], [1], [0, 0, 1, 1], [], []>} : vector<8x8xf32>, vector<8x32xf32>, vector<8x32xf32> -> vector<8x32xf32>
    %113 = arith.addf %88, %112 : vector<8x32xf32>
    %114 = vector.broadcast %12 : vector<1x32xf32> to vector<8x32xf32>
    %115 = arith.addf %113, %114 : vector<8x32xf32>
    %116 = arith.addf %1, %115 : vector<8x32xf32>
    %c0_42 = arith.constant 0 : index
    %c0_43 = arith.constant 0 : index
    %117 = vector.load %arg7[%c0_42, %c0_43] : memref<1x32xf32, #tpu.memory_space<vmem>>, vector<1x32xf32>
    %c0_44 = arith.constant 0 : index
    %c0_45 = arith.constant 0 : index
    %118 = vector.load %arg8[%c0_44, %c0_45] : memref<1x32xf32, #tpu.memory_space<vmem>>, vector<1x32xf32>
    %cst_46 = arith.constant dense<0.000000e+00> : vector<8xf32>
    %119 = vector.multi_reduction <add>, %116, %cst_46 [1] : vector<8x32xf32> to vector<8xf32>
    %120 = vector.shape_cast %119 : vector<8xf32> to vector<8x1xf32>
    %cst_47 = arith.constant 3.200000e+01 : f32
    %121 = vector.broadcast %cst_47 : f32 to vector<8x1xf32>
    %122 = arith.divf %120, %121 : vector<8x1xf32>
    %123 = vector.broadcast %122 : vector<8x1xf32> to vector<8x32xf32>
    %124 = arith.subf %116, %123 : vector<8x32xf32>
    %125 = arith.mulf %124, %124 : vector<8x32xf32>
    %cst_48 = arith.constant dense<0.000000e+00> : vector<8xf32>
    %126 = vector.multi_reduction <add>, %125, %cst_48 [1] : vector<8x32xf32> to vector<8xf32>
    %127 = vector.shape_cast %126 : vector<8xf32> to vector<8x1xf32>
    %cst_49 = arith.constant 3.200000e+01 : f32
    %128 = vector.broadcast %cst_49 : f32 to vector<8x1xf32>
    %129 = arith.divf %127, %128 : vector<8x1xf32>
    %130 = vector.broadcast %122 : vector<8x1xf32> to vector<8x32xf32>
    %131 = arith.subf %116, %130 : vector<8x32xf32>
    %cst_50 = arith.constant 9.99999974E-6 : f32
    %132 = vector.broadcast %cst_50 : f32 to vector<8x1xf32>
    %133 = arith.addf %129, %132 : vector<8x1xf32>
    %134 = math.rsqrt %133 : vector<8x1xf32>
    %135 = vector.broadcast %134 : vector<8x1xf32> to vector<8x32xf32>
    %136 = arith.mulf %131, %135 : vector<8x32xf32>
    %137 = vector.broadcast %117 : vector<1x32xf32> to vector<8x32xf32>
    %138 = arith.mulf %136, %137 : vector<8x32xf32>
    %139 = vector.broadcast %118 : vector<1x32xf32> to vector<8x32xf32>
    %140 = arith.addf %138, %139 : vector<8x32xf32>
    %c0_51 = arith.constant 0 : index
    %c0_52 = arith.constant 0 : index
    %141 = vector.load %arg9[%c0_51, %c0_52] : memref<32x32xf32, #tpu.memory_space<vmem>>, vector<32x32xf32>
    %cst_53 = arith.constant dense<0.000000e+00> : vector<8x32xf32>
    %142 = tpu.matmul %140, %141, %cst_53 {dimension_numbers = #tpu.dot_dimension_numbers<[1], [0], [0], [1], [0, 0, 1, 1], [], []>} : vector<8x32xf32>, vector<32x32xf32>, vector<8x32xf32> -> vector<8x32xf32>
    %c0_54 = arith.constant 0 : index
    %c0_55 = arith.constant 0 : index
    %143 = vector.load %arg10[%c0_54, %c0_55] : memref<1x32xf32, #tpu.memory_space<vmem>>, vector<1x32xf32>
    %144 = vector.broadcast %143 : vector<1x32xf32> to vector<8x32xf32>
    %145 = arith.addf %142, %144 : vector<8x32xf32>
    %c0_56 = arith.constant 0 : index
    %c0_57 = arith.constant 0 : index
    %146 = vector.load %arg11[%c0_56, %c0_57] : memref<32x64xf32, #tpu.memory_space<vmem>>, vector<32x64xf32>
    %cst_58 = arith.constant dense<0.000000e+00> : vector<8x64xf32>
    %147 = tpu.matmul %3, %146, %cst_58 {dimension_numbers = #tpu.dot_dimension_numbers<[1], [0], [0], [1], [0, 0, 1, 1], [], []>} : vector<8x32xf32>, vector<32x64xf32>, vector<8x64xf32> -> vector<8x64xf32>
    %c0_59 = arith.constant 0 : index
    %c0_60 = arith.constant 0 : index
    %148 = vector.load %arg12[%c0_59, %c0_60] : memref<1x64xf32, #tpu.memory_space<vmem>>, vector<1x64xf32>
    %149 = vector.broadcast %148 : vector<1x64xf32> to vector<8x64xf32>
    %150 = arith.addf %147, %149 : vector<8x64xf32>
    %c0_61 = arith.constant 0 : index
    %c0_62 = arith.constant 0 : index
    %151 = vector.load %arg13[%c0_61, %c0_62] : memref<32x32xf32, #tpu.memory_space<vmem>>, vector<32x32xf32>
    %c0_63 = arith.constant 0 : index
    %c0_64 = arith.constant 0 : index
    %152 = vector.load %arg14[%c0_63, %c0_64] : memref<1x32xf32, #tpu.memory_space<vmem>>, vector<1x32xf32>
    %cst_65 = arith.constant 0.000000e+00 : f32
    %153 = vector.broadcast %cst_65 : f32 to vector<8x32xf32>
    %154 = vector.extract_strided_slice %145 {offsets = [0, 0], sizes = [8, 8], strides = [1, 1]} : vector<8x32xf32> to vector<8x8xf32>
    %155 = vector.extract_strided_slice %150 {offsets = [0, 0], sizes = [8, 8], strides = [1, 1]} : vector<8x64xf32> to vector<8x8xf32>
    %156 = vector.extract_strided_slice %150 {offsets = [0, 32], sizes = [8, 8], strides = [1, 1]} : vector<8x64xf32> to vector<8x8xf32>
    %cst_66 = arith.constant dense<0.000000e+00> : vector<8x8xf32>
    %157 = tpu.matmul %154, %155, %cst_66 {dimension_numbers = #tpu.dot_dimension_numbers<[1], [1], [0], [0], [0, 0, 1, 0], [], []>} : vector<8x8xf32>, vector<8x8xf32>, vector<8x8xf32> -> vector<8x8xf32>
    %cst_67 = arith.constant 0.353553385 : f32
    %158 = vector.broadcast %cst_67 : f32 to vector<8x8xf32>
    %159 = arith.mulf %157, %158 : vector<8x8xf32>
    %cst_68 = arith.constant dense<0xFF800000> : vector<8xf32>
    %160 = vector.multi_reduction <maximumf>, %159, %cst_68 [1] : vector<8x8xf32> to vector<8xf32>
    %161 = vector.shape_cast %160 : vector<8xf32> to vector<8x1xf32>
    %162 = vector.broadcast %161 : vector<8x1xf32> to vector<8x8xf32>
    %163 = arith.subf %159, %162 : vector<8x8xf32>
    %164 = math.exp %163 : vector<8x8xf32>
    %cst_69 = arith.constant dense<0.000000e+00> : vector<8xf32>
    %165 = vector.multi_reduction <add>, %164, %cst_69 [1] : vector<8x8xf32> to vector<8xf32>
    %166 = vector.shape_cast %165 : vector<8xf32> to vector<8x1xf32>
    %167 = tpu.reciprocal %166 {approx = true} : vector<8x1xf32> -> vector<8x1xf32>
    %168 = vector.broadcast %167 : vector<8x1xf32> to vector<8x8xf32>
    %169 = arith.mulf %164, %168 : vector<8x8xf32>
    %cst_70 = arith.constant dense<0.000000e+00> : vector<8x8xf32>
    %170 = tpu.matmul %169, %156, %cst_70 {dimension_numbers = #tpu.dot_dimension_numbers<[1], [0], [0], [1], [0, 0, 1, 1], [], []>} : vector<8x8xf32>, vector<8x8xf32>, vector<8x8xf32> -> vector<8x8xf32>
    %171 = vector.extract_strided_slice %151 {offsets = [0, 0], sizes = [8, 32], strides = [1, 1]} : vector<32x32xf32> to vector<8x32xf32>
    %cst_71 = arith.constant dense<0.000000e+00> : vector<8x32xf32>
    %172 = tpu.matmul %170, %171, %cst_71 {dimension_numbers = #tpu.dot_dimension_numbers<[1], [0], [0], [1], [0, 0, 1, 1], [], []>} : vector<8x8xf32>, vector<8x32xf32>, vector<8x32xf32> -> vector<8x32xf32>
    %173 = arith.addf %153, %172 : vector<8x32xf32>
    %174 = vector.extract_strided_slice %145 {offsets = [0, 8], sizes = [8, 8], strides = [1, 1]} : vector<8x32xf32> to vector<8x8xf32>
    %175 = vector.extract_strided_slice %150 {offsets = [0, 8], sizes = [8, 8], strides = [1, 1]} : vector<8x64xf32> to vector<8x8xf32>
    %176 = vector.extract_strided_slice %150 {offsets = [0, 40], sizes = [8, 8], strides = [1, 1]} : vector<8x64xf32> to vector<8x8xf32>
    %cst_72 = arith.constant dense<0.000000e+00> : vector<8x8xf32>
    %177 = tpu.matmul %174, %175, %cst_72 {dimension_numbers = #tpu.dot_dimension_numbers<[1], [1], [0], [0], [0, 0, 1, 0], [], []>} : vector<8x8xf32>, vector<8x8xf32>, vector<8x8xf32> -> vector<8x8xf32>
    %cst_73 = arith.constant 0.353553385 : f32
    %178 = vector.broadcast %cst_73 : f32 to vector<8x8xf32>
    %179 = arith.mulf %177, %178 : vector<8x8xf32>
    %cst_74 = arith.constant dense<0xFF800000> : vector<8xf32>
    %180 = vector.multi_reduction <maximumf>, %179, %cst_74 [1] : vector<8x8xf32> to vector<8xf32>
    %181 = vector.shape_cast %180 : vector<8xf32> to vector<8x1xf32>
    %182 = vector.broadcast %181 : vector<8x1xf32> to vector<8x8xf32>
    %183 = arith.subf %179, %182 : vector<8x8xf32>
    %184 = math.exp %183 : vector<8x8xf32>
    %cst_75 = arith.constant dense<0.000000e+00> : vector<8xf32>
    %185 = vector.multi_reduction <add>, %184, %cst_75 [1] : vector<8x8xf32> to vector<8xf32>
    %186 = vector.shape_cast %185 : vector<8xf32> to vector<8x1xf32>
    %187 = tpu.reciprocal %186 {approx = true} : vector<8x1xf32> -> vector<8x1xf32>
    %188 = vector.broadcast %187 : vector<8x1xf32> to vector<8x8xf32>
    %189 = arith.mulf %184, %188 : vector<8x8xf32>
    %cst_76 = arith.constant dense<0.000000e+00> : vector<8x8xf32>
    %190 = tpu.matmul %189, %176, %cst_76 {dimension_numbers = #tpu.dot_dimension_numbers<[1], [0], [0], [1], [0, 0, 1, 1], [], []>} : vector<8x8xf32>, vector<8x8xf32>, vector<8x8xf32> -> vector<8x8xf32>
    %191 = vector.extract_strided_slice %151 {offsets = [8, 0], sizes = [8, 32], strides = [1, 1]} : vector<32x32xf32> to vector<8x32xf32>
    %cst_77 = arith.constant dense<0.000000e+00> : vector<8x32xf32>
    %192 = tpu.matmul %190, %191, %cst_77 {dimension_numbers = #tpu.dot_dimension_numbers<[1], [0], [0], [1], [0, 0, 1, 1], [], []>} : vector<8x8xf32>, vector<8x32xf32>, vector<8x32xf32> -> vector<8x32xf32>
    %193 = arith.addf %173, %192 : vector<8x32xf32>
    %194 = vector.extract_strided_slice %145 {offsets = [0, 16], sizes = [8, 8], strides = [1, 1]} : vector<8x32xf32> to vector<8x8xf32>
    %195 = vector.extract_strided_slice %150 {offsets = [0, 16], sizes = [8, 8], strides = [1, 1]} : vector<8x64xf32> to vector<8x8xf32>
    %196 = vector.extract_strided_slice %150 {offsets = [0, 48], sizes = [8, 8], strides = [1, 1]} : vector<8x64xf32> to vector<8x8xf32>
    %cst_78 = arith.constant dense<0.000000e+00> : vector<8x8xf32>
    %197 = tpu.matmul %194, %195, %cst_78 {dimension_numbers = #tpu.dot_dimension_numbers<[1], [1], [0], [0], [0, 0, 1, 0], [], []>} : vector<8x8xf32>, vector<8x8xf32>, vector<8x8xf32> -> vector<8x8xf32>
    %cst_79 = arith.constant 0.353553385 : f32
    %198 = vector.broadcast %cst_79 : f32 to vector<8x8xf32>
    %199 = arith.mulf %197, %198 : vector<8x8xf32>
    %cst_80 = arith.constant dense<0xFF800000> : vector<8xf32>
    %200 = vector.multi_reduction <maximumf>, %199, %cst_80 [1] : vector<8x8xf32> to vector<8xf32>
    %201 = vector.shape_cast %200 : vector<8xf32> to vector<8x1xf32>
    %202 = vector.broadcast %201 : vector<8x1xf32> to vector<8x8xf32>
    %203 = arith.subf %199, %202 : vector<8x8xf32>
    %204 = math.exp %203 : vector<8x8xf32>
    %cst_81 = arith.constant dense<0.000000e+00> : vector<8xf32>
    %205 = vector.multi_reduction <add>, %204, %cst_81 [1] : vector<8x8xf32> to vector<8xf32>
    %206 = vector.shape_cast %205 : vector<8xf32> to vector<8x1xf32>
    %207 = tpu.reciprocal %206 {approx = true} : vector<8x1xf32> -> vector<8x1xf32>
    %208 = vector.broadcast %207 : vector<8x1xf32> to vector<8x8xf32>
    %209 = arith.mulf %204, %208 : vector<8x8xf32>
    %cst_82 = arith.constant dense<0.000000e+00> : vector<8x8xf32>
    %210 = tpu.matmul %209, %196, %cst_82 {dimension_numbers = #tpu.dot_dimension_numbers<[1], [0], [0], [1], [0, 0, 1, 1], [], []>} : vector<8x8xf32>, vector<8x8xf32>, vector<8x8xf32> -> vector<8x8xf32>
    %211 = vector.extract_strided_slice %151 {offsets = [16, 0], sizes = [8, 32], strides = [1, 1]} : vector<32x32xf32> to vector<8x32xf32>
    %cst_83 = arith.constant dense<0.000000e+00> : vector<8x32xf32>
    %212 = tpu.matmul %210, %211, %cst_83 {dimension_numbers = #tpu.dot_dimension_numbers<[1], [0], [0], [1], [0, 0, 1, 1], [], []>} : vector<8x8xf32>, vector<8x32xf32>, vector<8x32xf32> -> vector<8x32xf32>
    %213 = arith.addf %193, %212 : vector<8x32xf32>
    %214 = vector.extract_strided_slice %145 {offsets = [0, 24], sizes = [8, 8], strides = [1, 1]} : vector<8x32xf32> to vector<8x8xf32>
    %215 = vector.extract_strided_slice %150 {offsets = [0, 24], sizes = [8, 8], strides = [1, 1]} : vector<8x64xf32> to vector<8x8xf32>
    %216 = vector.extract_strided_slice %150 {offsets = [0, 56], sizes = [8, 8], strides = [1, 1]} : vector<8x64xf32> to vector<8x8xf32>
    %cst_84 = arith.constant dense<0.000000e+00> : vector<8x8xf32>
    %217 = tpu.matmul %214, %215, %cst_84 {dimension_numbers = #tpu.dot_dimension_numbers<[1], [1], [0], [0], [0, 0, 1, 0], [], []>} : vector<8x8xf32>, vector<8x8xf32>, vector<8x8xf32> -> vector<8x8xf32>
    %cst_85 = arith.constant 0.353553385 : f32
    %218 = vector.broadcast %cst_85 : f32 to vector<8x8xf32>
    %219 = arith.mulf %217, %218 : vector<8x8xf32>
    %cst_86 = arith.constant dense<0xFF800000> : vector<8xf32>
    %220 = vector.multi_reduction <maximumf>, %219, %cst_86 [1] : vector<8x8xf32> to vector<8xf32>
    %221 = vector.shape_cast %220 : vector<8xf32> to vector<8x1xf32>
    %222 = vector.broadcast %221 : vector<8x1xf32> to vector<8x8xf32>
    %223 = arith.subf %219, %222 : vector<8x8xf32>
    %224 = math.exp %223 : vector<8x8xf32>
    %cst_87 = arith.constant dense<0.000000e+00> : vector<8xf32>
    %225 = vector.multi_reduction <add>, %224, %cst_87 [1] : vector<8x8xf32> to vector<8xf32>
    %226 = vector.shape_cast %225 : vector<8xf32> to vector<8x1xf32>
    %227 = tpu.reciprocal %226 {approx = true} : vector<8x1xf32> -> vector<8x1xf32>
    %228 = vector.broadcast %227 : vector<8x1xf32> to vector<8x8xf32>
    %229 = arith.mulf %224, %228 : vector<8x8xf32>
    %cst_88 = arith.constant dense<0.000000e+00> : vector<8x8xf32>
    %230 = tpu.matmul %229, %216, %cst_88 {dimension_numbers = #tpu.dot_dimension_numbers<[1], [0], [0], [1], [0, 0, 1, 1], [], []>} : vector<8x8xf32>, vector<8x8xf32>, vector<8x8xf32> -> vector<8x8xf32>
    %231 = vector.extract_strided_slice %151 {offsets = [24, 0], sizes = [8, 32], strides = [1, 1]} : vector<32x32xf32> to vector<8x32xf32>
    %cst_89 = arith.constant dense<0.000000e+00> : vector<8x32xf32>
    %232 = tpu.matmul %230, %231, %cst_89 {dimension_numbers = #tpu.dot_dimension_numbers<[1], [0], [0], [1], [0, 0, 1, 1], [], []>} : vector<8x8xf32>, vector<8x32xf32>, vector<8x32xf32> -> vector<8x32xf32>
    %233 = arith.addf %213, %232 : vector<8x32xf32>
    %234 = vector.broadcast %152 : vector<1x32xf32> to vector<8x32xf32>
    %235 = arith.addf %233, %234 : vector<8x32xf32>
    %236 = arith.addf %140, %235 : vector<8x32xf32>
    %c0_90 = arith.constant 0 : index
    %c0_91 = arith.constant 0 : index
    %237 = vector.load %arg15[%c0_90, %c0_91] : memref<1x32xf32, #tpu.memory_space<vmem>>, vector<1x32xf32>
    %c0_92 = arith.constant 0 : index
    %c0_93 = arith.constant 0 : index
    %238 = vector.load %arg16[%c0_92, %c0_93] : memref<1x32xf32, #tpu.memory_space<vmem>>, vector<1x32xf32>
    %cst_94 = arith.constant dense<0.000000e+00> : vector<8xf32>
    %239 = vector.multi_reduction <add>, %236, %cst_94 [1] : vector<8x32xf32> to vector<8xf32>
    %240 = vector.shape_cast %239 : vector<8xf32> to vector<8x1xf32>
    %cst_95 = arith.constant 3.200000e+01 : f32
    %241 = vector.broadcast %cst_95 : f32 to vector<8x1xf32>
    %242 = arith.divf %240, %241 : vector<8x1xf32>
    %243 = vector.broadcast %242 : vector<8x1xf32> to vector<8x32xf32>
    %244 = arith.subf %236, %243 : vector<8x32xf32>
    %245 = arith.mulf %244, %244 : vector<8x32xf32>
    %cst_96 = arith.constant dense<0.000000e+00> : vector<8xf32>
    %246 = vector.multi_reduction <add>, %245, %cst_96 [1] : vector<8x32xf32> to vector<8xf32>
    %247 = vector.shape_cast %246 : vector<8xf32> to vector<8x1xf32>
    %cst_97 = arith.constant 3.200000e+01 : f32
    %248 = vector.broadcast %cst_97 : f32 to vector<8x1xf32>
    %249 = arith.divf %247, %248 : vector<8x1xf32>
    %250 = vector.broadcast %242 : vector<8x1xf32> to vector<8x32xf32>
    %251 = arith.subf %236, %250 : vector<8x32xf32>
    %cst_98 = arith.constant 9.99999974E-6 : f32
    %252 = vector.broadcast %cst_98 : f32 to vector<8x1xf32>
    %253 = arith.addf %249, %252 : vector<8x1xf32>
    %254 = math.rsqrt %253 : vector<8x1xf32>
    %255 = vector.broadcast %254 : vector<8x1xf32> to vector<8x32xf32>
    %256 = arith.mulf %251, %255 : vector<8x32xf32>
    %257 = vector.broadcast %237 : vector<1x32xf32> to vector<8x32xf32>
    %258 = arith.mulf %256, %257 : vector<8x32xf32>
    %259 = vector.broadcast %238 : vector<1x32xf32> to vector<8x32xf32>
    %260 = arith.addf %258, %259 : vector<8x32xf32>
    %c0_99 = arith.constant 0 : index
    %c0_100 = arith.constant 0 : index
    %261 = vector.load %arg17[%c0_99, %c0_100] : memref<32x64xf32, #tpu.memory_space<vmem>>, vector<32x64xf32>
    %cst_101 = arith.constant dense<0.000000e+00> : vector<8x64xf32>
    %262 = tpu.matmul %260, %261, %cst_101 {dimension_numbers = #tpu.dot_dimension_numbers<[1], [0], [0], [1], [0, 0, 1, 1], [], []>} : vector<8x32xf32>, vector<32x64xf32>, vector<8x64xf32> -> vector<8x64xf32>
    %c0_102 = arith.constant 0 : index
    %c0_103 = arith.constant 0 : index
    %263 = vector.load %arg18[%c0_102, %c0_103] : memref<1x64xf32, #tpu.memory_space<vmem>>, vector<1x64xf32>
    %264 = vector.broadcast %263 : vector<1x64xf32> to vector<8x64xf32>
    %265 = arith.addf %262, %264 : vector<8x64xf32>
    %cst_104 = arith.constant 0.000000e+00 : f32
    %266 = vector.broadcast %cst_104 : f32 to vector<8x64xf32>
    %267 = arith.maximumf %265, %266 : vector<8x64xf32>
    %c0_105 = arith.constant 0 : index
    %c0_106 = arith.constant 0 : index
    %268 = vector.load %arg19[%c0_105, %c0_106] : memref<64x32xf32, #tpu.memory_space<vmem>>, vector<64x32xf32>
    %cst_107 = arith.constant dense<0.000000e+00> : vector<8x32xf32>
    %269 = tpu.matmul %267, %268, %cst_107 {dimension_numbers = #tpu.dot_dimension_numbers<[1], [0], [0], [1], [0, 0, 1, 1], [], []>} : vector<8x64xf32>, vector<64x32xf32>, vector<8x32xf32> -> vector<8x32xf32>
    %c0_108 = arith.constant 0 : index
    %c0_109 = arith.constant 0 : index
    %270 = vector.load %arg20[%c0_108, %c0_109] : memref<1x32xf32, #tpu.memory_space<vmem>>, vector<1x32xf32>
    %271 = vector.broadcast %270 : vector<1x32xf32> to vector<8x32xf32>
    %272 = arith.addf %269, %271 : vector<8x32xf32>
    %273 = arith.addf %260, %272 : vector<8x32xf32>
    %c0_110 = arith.constant 0 : index
    %c0_111 = arith.constant 0 : index
    %274 = vector.load %arg21[%c0_110, %c0_111] : memref<1x32xf32, #tpu.memory_space<vmem>>, vector<1x32xf32>
    %c0_112 = arith.constant 0 : index
    %c0_113 = arith.constant 0 : index
    %275 = vector.load %arg22[%c0_112, %c0_113] : memref<1x32xf32, #tpu.memory_space<vmem>>, vector<1x32xf32>
    %cst_114 = arith.constant dense<0.000000e+00> : vector<8xf32>
    %276 = vector.multi_reduction <add>, %273, %cst_114 [1] : vector<8x32xf32> to vector<8xf32>
    %277 = vector.shape_cast %276 : vector<8xf32> to vector<8x1xf32>
    %cst_115 = arith.constant 3.200000e+01 : f32
    %278 = vector.broadcast %cst_115 : f32 to vector<8x1xf32>
    %279 = arith.divf %277, %278 : vector<8x1xf32>
    %280 = vector.broadcast %279 : vector<8x1xf32> to vector<8x32xf32>
    %281 = arith.subf %273, %280 : vector<8x32xf32>
    %282 = arith.mulf %281, %281 : vector<8x32xf32>
    %cst_116 = arith.constant dense<0.000000e+00> : vector<8xf32>
    %283 = vector.multi_reduction <add>, %282, %cst_116 [1] : vector<8x32xf32> to vector<8xf32>
    %284 = vector.shape_cast %283 : vector<8xf32> to vector<8x1xf32>
    %cst_117 = arith.constant 3.200000e+01 : f32
    %285 = vector.broadcast %cst_117 : f32 to vector<8x1xf32>
    %286 = arith.divf %284, %285 : vector<8x1xf32>
    %287 = vector.broadcast %279 : vector<8x1xf32> to vector<8x32xf32>
    %288 = arith.subf %273, %287 : vector<8x32xf32>
    %cst_118 = arith.constant 9.99999974E-6 : f32
    %289 = vector.broadcast %cst_118 : f32 to vector<8x1xf32>
    %290 = arith.addf %286, %289 : vector<8x1xf32>
    %291 = math.rsqrt %290 : vector<8x1xf32>
    %292 = vector.broadcast %291 : vector<8x1xf32> to vector<8x32xf32>
    %293 = arith.mulf %288, %292 : vector<8x32xf32>
    %294 = vector.broadcast %274 : vector<1x32xf32> to vector<8x32xf32>
    %295 = arith.mulf %293, %294 : vector<8x32xf32>
    %296 = vector.broadcast %275 : vector<1x32xf32> to vector<8x32xf32>
    %297 = arith.addf %295, %296 : vector<8x32xf32>
    %c0_119 = arith.constant 0 : index
    %c0_120 = arith.constant 0 : index
    %c0_121 = arith.constant 0 : index
    %298 = vector.load %arg23[%c0_119, %c0_120, %c0_121] : memref<1x8x32xf32, #tpu.memory_space<vmem>>, vector<1x8x32xf32>
    %299 = vector.shape_cast %298 : vector<1x8x32xf32> to vector<8x32xf32>
    %300 = vector.shape_cast %297 : vector<8x32xf32> to vector<1x8x32xf32>
    tpu.vector_store %arg23[%c0_119, %c0_120, %c0_121], %300 {strides = array<i32>} : memref<1x8x32xf32, #tpu.memory_space<vmem>>, vector<1x8x32xf32>,
    return
  }
  func.func @transform_0(%arg0: i32) -> (i32, i32, i32) {
    %c0_i32 = arith.constant 0 : i32
    %c0_i32_0 = arith.constant 0 : i32
    %c0_i32_1 = arith.constant 0 : i32
    return %arg0, %c0_i32, %c0_i32_0 : i32, i32, i32
  }
  func.func @transform_1(%arg0: i32) -> (i32, i32, i32) {
    %c0_i32 = arith.constant 0 : i32
    %c0_i32_0 = arith.constant 0 : i32
    %c0_i32_1 = arith.constant 0 : i32
    return %arg0, %c0_i32, %c0_i32_0 : i32, i32, i32
  }
  func.func @transform_2(%arg0: i32) -> (i32, i32) {
    %c0_i32 = arith.constant 0 : i32
    %c0_i32_0 = arith.constant 0 : i32
    %c0_i32_1 = arith.constant 0 : i32
    return %c0_i32, %c0_i32_0 : i32, i32
  }
  func.func @transform_3(%arg0: i32) -> (i32, i32) {
    %c0_i32 = arith.constant 0 : i32
    %c0_i32_0 = arith.constant 0 : i32
    %c0_i32_1 = arith.constant 0 : i32
    return %c0_i32, %c0_i32_0 : i32, i32
  }
  func.func @transform_4(%arg0: i32) -> (i32, i32) {
    %c0_i32 = arith.constant 0 : i32
    %c0_i32_0 = arith.constant 0 : i32
    %c0_i32_1 = arith.constant 0 : i32
    return %c0_i32, %c0_i32_0 : i32, i32
  }
  func.func @transform_5(%arg0: i32) -> (i32, i32) {
    %c0_i32 = arith.constant 0 : i32
    %c0_i32_0 = arith.constant 0 : i32
    %c0_i32_1 = arith.constant 0 : i32
    return %c0_i32, %c0_i32_0 : i32, i32
  }
  func.func @transform_6(%arg0: i32) -> (i32, i32) {
    %c0_i32 = arith.constant 0 : i32
    %c0_i32_0 = arith.constant 0 : i32
    %c0_i32_1 = arith.constant 0 : i32
    return %c0_i32, %c0_i32_0 : i32, i32
  }
  func.func @transform_7(%arg0: i32) -> (i32, i32) {
    %c0_i32 = arith.constant 0 : i32
    %c0_i32_0 = arith.constant 0 : i32
    %c0_i32_1 = arith.constant 0 : i32
    return %c0_i32, %c0_i32_0 : i32, i32
  }
  func.func @transform_8(%arg0: i32) -> (i32, i32) {
    %c0_i32 = arith.constant 0 : i32
    %c0_i32_0 = arith.constant 0 : i32
    %c0_i32_1 = arith.constant 0 : i32
    return %c0_i32, %c0_i32_0 : i32, i32
  }
  func.func @transform_9(%arg0: i32) -> (i32, i32) {
    %c0_i32 = arith.constant 0 : i32
    %c0_i32_0 = arith.constant 0 : i32
    %c0_i32_1 = arith.constant 0 : i32
    return %c0_i32, %c0_i32_0 : i32, i32
  }
  func.func @transform_10(%arg0: i32) -> (i32, i32) {
    %c0_i32 = arith.constant 0 : i32
    %c0_i32_0 = arith.constant 0 : i32
    %c0_i32_1 = arith.constant 0 : i32
    return %c0_i32, %c0_i32_0 : i32, i32
  }
  func.func @transform_11(%arg0: i32) -> (i32, i32) {
    %c0_i32 = arith.constant 0 : i32
    %c0_i32_0 = arith.constant 0 : i32
    %c0_i32_1 = arith.constant 0 : i32
    return %c0_i32, %c0_i32_0 : i32, i32
  }
  func.func @transform_12(%arg0: i32) -> (i32, i32) {
    %c0_i32 = arith.constant 0 : i32
    %c0_i32_0 = arith.constant 0 : i32
    %c0_i32_1 = arith.constant 0 : i32
    return %c0_i32, %c0_i32_0 : i32, i32
  }
  func.func @transform_13(%arg0: i32) -> (i32, i32) {
    %c0_i32 = arith.constant 0 : i32
    %c0_i32_0 = arith.constant 0 : i32
    %c0_i32_1 = arith.constant 0 : i32
    return %c0_i32, %c0_i32_0 : i32, i32
  }
  func.func @transform_14(%arg0: i32) -> (i32, i32) {
    %c0_i32 = arith.constant 0 : i32
    %c0_i32_0 = arith.constant 0 : i32
    %c0_i32_1 = arith.constant 0 : i32
    return %c0_i32, %c0_i32_0 : i32, i32
  }
  func.func @transform_15(%arg0: i32) -> (i32, i32) {
    %c0_i32 = arith.constant 0 : i32
    %c0_i32_0 = arith.constant 0 : i32
    %c0_i32_1 = arith.constant 0 : i32
    return %c0_i32, %c0_i32_0 : i32, i32
  }
  func.func @transform_16(%arg0: i32) -> (i32, i32) {
    %c0_i32 = arith.constant 0 : i32
    %c0_i32_0 = arith.constant 0 : i32
    %c0_i32_1 = arith.constant 0 : i32
    return %c0_i32, %c0_i32_0 : i32, i32
  }
  func.func @transform_17(%arg0: i32) -> (i32, i32) {
    %c0_i32 = arith.constant 0 : i32
    %c0_i32_0 = arith.constant 0 : i32
    %c0_i32_1 = arith.constant 0 : i32
    return %c0_i32, %c0_i32_0 : i32, i32
  }
  func.func @transform_18(%arg0: i32) -> (i32, i32) {
    %c0_i32 = arith.constant 0 : i32
    %c0_i32_0 = arith.constant 0 : i32
    %c0_i32_1 = arith.constant 0 : i32
    return %c0_i32, %c0_i32_0 : i32, i32
  }
  func.func @transform_19(%arg0: i32) -> (i32, i32) {
    %c0_i32 = arith.constant 0 : i32
    %c0_i32_0 = arith.constant 0 : i32
    %c0_i32_1 = arith.constant 0 : i32
    return %c0_i32, %c0_i32_0 : i32, i32
  }
  func.func @transform_20(%arg0: i32) -> (i32, i32) {
    %c0_i32 = arith.constant 0 : i32
    %c0_i32_0 = arith.constant 0 : i32
    %c0_i32_1 = arith.constant 0 : i32
    return %c0_i32, %c0_i32_0 : i32, i32
  }
  func.func @transform_21(%arg0: i32) -> (i32, i32) {
    %c0_i32 = arith.constant 0 : i32
    %c0_i32_0 = arith.constant 0 : i32
    %c0_i32_1 = arith.constant 0 : i32
    return %c0_i32, %c0_i32_0 : i32, i32
  }
  func.func @transform_22(%arg0: i32) -> (i32, i32, i32) {
    %c0_i32 = arith.constant 0 : i32
    %c0_i32_0 = arith.constant 0 : i32
    %c0_i32_1 = arith.constant 0 : i32
    return %arg0, %c0_i32, %c0_i32_0 : i32, i32, i32
  }
}

module attributes {stable_mosaic.version = 11 : i64} {
  func.func @_ln_lm_head_kernel(%arg0: i32, %arg1: i32, %arg2: memref<16x32xf32, #tpu.memory_space<vmem>>, %arg3: memref<1x32xf32, #tpu.memory_space<vmem>>, %arg4: memref<1x32xf32, #tpu.memory_space<vmem>>, %arg5: memref<32x64xf32, #tpu.memory_space<vmem>>, %arg6: memref<16x64xf32, #tpu.memory_space<vmem>>) attributes {dimension_semantics = [#tpu.dimension_semantics<parallel>, #tpu.dimension_semantics<parallel>], iteration_bounds = array<i64: 1, 1>, scalar_prefetch = 0 : i64, scratch_operands = 0 : i64, tpu.core_type = #tpu.core_type<tc>, window_params = [{transform_indices = @transform_0, window_bounds = array<i64: 16, 32>}, {pipeline_mode = #tpu.pipeline_mode<synchronous>, transform_indices = @transform_1, window_bounds = array<i64: 1, 32>}, {pipeline_mode = #tpu.pipeline_mode<synchronous>, transform_indices = @transform_2, window_bounds = array<i64: 1, 32>}, {transform_indices = @transform_3, window_bounds = array<i64: 32, 64>}, {transform_indices = @transform_4, window_bounds = array<i64: 16, 64>}]} {
    %c0 = arith.constant 0 : index
    %c0_0 = arith.constant 0 : index
    %0 = vector.load %arg2[%c0, %c0_0] : memref<16x32xf32, #tpu.memory_space<vmem>>, vector<16x32xf32>
    %c0_1 = arith.constant 0 : index
    %c0_2 = arith.constant 0 : index
    %1 = vector.load %arg3[%c0_1, %c0_2] : memref<1x32xf32, #tpu.memory_space<vmem>>, vector<1x32xf32>
    %c0_3 = arith.constant 0 : index
    %c0_4 = arith.constant 0 : index
    %2 = vector.load %arg4[%c0_3, %c0_4] : memref<1x32xf32, #tpu.memory_space<vmem>>, vector<1x32xf32>
    %cst = arith.constant dense<0.000000e+00> : vector<16xf32>
    %3 = vector.multi_reduction <add>, %0, %cst [1] : vector<16x32xf32> to vector<16xf32>
    %4 = vector.shape_cast %3 : vector<16xf32> to vector<16x1xf32>
    %cst_5 = arith.constant 3.200000e+01 : f32
    %5 = vector.broadcast %cst_5 : f32 to vector<16x1xf32>
    %6 = arith.divf %4, %5 : vector<16x1xf32>
    %7 = vector.broadcast %6 : vector<16x1xf32> to vector<16x32xf32>
    %8 = arith.subf %0, %7 : vector<16x32xf32>
    %9 = arith.mulf %8, %8 : vector<16x32xf32>
    %cst_6 = arith.constant dense<0.000000e+00> : vector<16xf32>
    %10 = vector.multi_reduction <add>, %9, %cst_6 [1] : vector<16x32xf32> to vector<16xf32>
    %11 = vector.shape_cast %10 : vector<16xf32> to vector<16x1xf32>
    %cst_7 = arith.constant 3.200000e+01 : f32
    %12 = vector.broadcast %cst_7 : f32 to vector<16x1xf32>
    %13 = arith.divf %11, %12 : vector<16x1xf32>
    %14 = vector.broadcast %6 : vector<16x1xf32> to vector<16x32xf32>
    %15 = arith.subf %0, %14 : vector<16x32xf32>
    %cst_8 = arith.constant 9.99999974E-6 : f32
    %16 = vector.broadcast %cst_8 : f32 to vector<16x1xf32>
    %17 = arith.addf %13, %16 : vector<16x1xf32>
    %18 = math.rsqrt %17 : vector<16x1xf32>
    %19 = vector.broadcast %18 : vector<16x1xf32> to vector<16x32xf32>
    %20 = arith.mulf %15, %19 : vector<16x32xf32>
    %21 = vector.broadcast %1 : vector<1x32xf32> to vector<16x32xf32>
    %22 = arith.mulf %20, %21 : vector<16x32xf32>
    %23 = vector.broadcast %2 : vector<1x32xf32> to vector<16x32xf32>
    %24 = arith.addf %22, %23 : vector<16x32xf32>
    %c0_9 = arith.constant 0 : index
    %c0_10 = arith.constant 0 : index
    %25 = vector.load %arg5[%c0_9, %c0_10] : memref<32x64xf32, #tpu.memory_space<vmem>>, vector<32x64xf32>
    %cst_11 = arith.constant dense<0.000000e+00> : vector<16x64xf32>
    %26 = tpu.matmul %24, %25, %cst_11 {dimension_numbers = #tpu.dot_dimension_numbers<[1], [0], [0], [1], [0, 0, 1, 1], [], []>} : vector<16x32xf32>, vector<32x64xf32>, vector<16x64xf32> -> vector<16x64xf32>
    %c0_12 = arith.constant 0 : index
    %c0_13 = arith.constant 0 : index
    %27 = vector.load %arg6[%c0_12, %c0_13] : memref<16x64xf32, #tpu.memory_space<vmem>>, vector<16x64xf32>
    tpu.vector_store %arg6[%c0_12, %c0_13], %26 {strides = array<i32>} : memref<16x64xf32, #tpu.memory_space<vmem>>, vector<16x64xf32>,
    return
  }
  func.func @transform_0(%arg0: i32, %arg1: i32) -> (i32, i32) {
    %c0_i32 = arith.constant 0 : i32
    %c0_i32_0 = arith.constant 0 : i32
    return %arg0, %c0_i32 : i32, i32
  }
  func.func @transform_1(%arg0: i32, %arg1: i32) -> (i32, i32) {
    %c0_i32 = arith.constant 0 : i32
    %c0_i32_0 = arith.constant 0 : i32
    %c0_i32_1 = arith.constant 0 : i32
    return %c0_i32, %c0_i32_0 : i32, i32
  }
  func.func @transform_2(%arg0: i32, %arg1: i32) -> (i32, i32) {
    %c0_i32 = arith.constant 0 : i32
    %c0_i32_0 = arith.constant 0 : i32
    %c0_i32_1 = arith.constant 0 : i32
    return %c0_i32, %c0_i32_0 : i32, i32
  }
  func.func @transform_3(%arg0: i32, %arg1: i32) -> (i32, i32) {
    %c0_i32 = arith.constant 0 : i32
    %c0_i32_0 = arith.constant 0 : i32
    return %c0_i32, %arg1 : i32, i32
  }
  func.func @transform_4(%arg0: i32, %arg1: i32) -> (i32, i32) {
    %c0_i32 = arith.constant 0 : i32
    return %arg0, %arg1 : i32, i32
  }
}

</mosaic_0001>

<bundles_post_ra>
// kernel: _lambda_.7
= control target key start
LH: loop header
LB: loop body
LE: loop exit
PB: predicated region body
PF: predicated region fallthrough
CT: control target
= control target key end

     0   :  { %18 = vsyncpa [#allocation3], 0  ;;  %s2539_s0 = inlined_call_operand.vmem [shape: f32[2,8,32], index: 0, kind: input, shape index: {}]   ;;  %s2540_s1 = inlined_call_operand.vmem [shape: f32[32,96], index: 1, kind: input, shape index: {}]   ;;  %s2541_s2 = inlined_call_operand.vmem [shape: f32[1,96], index: 2, kind: input, shape index: {}]   ;;  %s2542_s3 = inlined_call_operand.vmem [shape: f32[32,32], index: 3, kind: input, shape index: {}]   ;;  %s2543_s4 = inlined_call_operand.vmem [shape: f32[1,32], index: 4, kind: input, shape index: {}]   ;;  %s2544_s5 = inlined_call_operand.vmem [shape: f32[1,32], index: 5, kind: input, shape index: {}]   ;;  %s2545_s6 = inlined_call_operand.vmem [shape: f32[1,32], index: 6, kind: input, shape index: {}]   ;;  %s2546_s7 = inlined_call_operand.vmem [shape: f32[32,64], index: 7, kind: input, shape index: {}]   ;;  %s2547_s8 = inlined_call_operand.vmem [shape: f32[1,64], index: 8, kind: input, shape index: {}]   ;;  %s2548_s9 = inlined_call_operand.vmem [shape: f32[64,32], index: 9, kind: input, shape index: {}]   ;;  %s2549_s10 = inlined_call_operand.vmem [shape: f32[1,32], index: 10, kind: input, shape index: {}]   ;;  %s2550_s11 = inlined_call_operand.hbm [shape: f32[1,32], index: 11, kind: input, shape index: {}]   ;;  %s2551_s12 = inlined_call_operand.hbm [shape: f32[1,32], index: 12, kind: input, shape index: {}]   ;;  %s2552_s13 = inlined_call_operand.vmem [shape: f32[2,8,32], index: 13, kind: output, shape index: {}]  }
   0x1   :  { %19 = vsyncpa [#allocation5], 0  ;;  %s2258_s25 = smov 0  }
   0x2 LB: > { %s2264_s26 = sadd.s32 4294967295, %s2170_s25   ;;  %p1831_p0 = scmp.ge.s32.totalorder %s2170_s25, 1  ;;  %s2170_s25 = sphi %s2258_s25, %s25_s25  }
   0x3   : > { %p334_p1 = scmp.lt.s32.totalorder %s2170_s25, 3  ;;  %p2553_p2 = scmp.eq.s32.totalorder %s2264_s26, 0 }
   0x4   : > { %s2172_s28 = smov [#allocation2]   ;;  %s2173_s30 = smov [#allocation4]  }
   0x5   : > { %p2269_p3 = pnand %p1831_p0, %p334_p1  ;;  %s377_s29 = sshll.u32 %s2172_s28, 4  ;;  %s378_s29 = int_to_ptr.vmem [resolvable:$true] %s377_s29 }
   0x6   : > { %s388_s14 = sshll.u32 %s2173_s30, 4  ;;  %s2100_s18 = scalar_lea.hbm %s2550_s11, 16  ;;  %s2281_s14 = int_to_ptr.vmem [resolvable:$true] %s388_s14 }
   0x7   : > { %s2555_s27 = scalar_select %p2269_p3, 1, 0 }
   0x8   : > { %p2045_p4 = pneg %p2269_p3  ;;  %p2101_p6 = scmp.ne.s32.totalorder %s2550_s11, %s2100_s18 }
   0x9   : > { %p2107_p10 = scmp.lt.u32.totalorder %s2100_s18, %s2550_s11 }
   0xa   : > { %p2277_p5 = pnand %p2553_p2, %p2045_p4 }
   0xc   : > { %p2102_p7 = pneg %p2277_p5 }
   0xe   : > { %p2103_p8 = pnand %p2102_p7, %p2101_p6 }
  0x10   : > { %p2104_p9 = pneg %p2103_p8 }
  0x12   : > { %p2109_p11 = pnand %p2107_p10, %p2104_p9 }
  0x14   : > { %2112 = shalt.err (!%p2109_p11)
}
  0x15   : > { %s2113_s23 = scalar_lea.vmem %s378_s29, 16  ;;  %s2120_s24 = scalar_lea.vmem %s378_s29, 32 }
  0x16   : > { %p2114_p12 = scmp.ne.s32.totalorder %s378_s29, %s2113_s23  ;;  %p2121_p1 = scmp.lt.s32.totalorder %s378_s29, %s378_s29 }
  0x17   : > { %p2122_p4 = scmp.lt.s32.totalorder %s2120_s24, %s2113_s23 }
  0x18   : > { %p2116_p13 = pnand %p2114_p12, %p2102_p7 }
  0x19   : > { %p2123_p2 = por %p2122_p4, %p2121_p1 }
  0x1a   : > { %p2117_p0 = pneg %p2116_p13 }
  0x1c   : > { %p2124_p3 = pnand %p2123_p2, %p2117_p0 }
  0x1e   : > { %2127 = shalt.err (!%p2124_p3)
}
  0x1f   : > { %2048 = dma.hbm_to_vmem [thread:$0]  (!%p2277_p5), %s2550_s11, 16, %s378_s29, [#allocation3]  }
  0x20   : > { %s2128_s18 = scalar_lea.hbm %s2551_s12, 16 }
  0x21   : > { %p2129_p6 = scmp.ne.s32.totalorder %s2551_s12, %s2128_s18  ;;  %p2135_p3 = scmp.lt.u32.totalorder %s2128_s18, %s2551_s12 }
  0x23   : > { %p2131_p8 = pnand %p2129_p6, %p2102_p7 }
  0x25   : > { %p2132_p2 = pneg %p2131_p8 }
  0x27   : > { %p2137_p9 = pnand %p2135_p3, %p2132_p2 }
  0x29   : > { %2140 = shalt.err (!%p2137_p9)
}
  0x2a   : > { %s2141_s29 = scalar_lea.vmem %s2281_s14, 16  ;;  %s2148_s23 = scalar_lea.vmem %s2281_s14, 32 }
  0x2b   : > { %p2142_p10 = scmp.ne.s32.totalorder %s2281_s14, %s2141_s29  ;;  %p2149_p13 = scmp.lt.s32.totalorder %s2281_s14, %s2281_s14 }
  0x2c   : > { %p2150_p0 = scmp.lt.s32.totalorder %s2148_s23, %s2141_s29 }
  0x2d   : > { %p2144_p11 = pnand %p2142_p10, %p2102_p7 }
  0x2e   : > { %p2151_p1 = por %p2150_p0, %p2149_p13 }
  0x2f   : > { %p2145_p12 = pneg %p2144_p11 }
  0x31   : > { %p2152_p4 = pnand %p2151_p1, %p2145_p12 }
  0x33   : > { %2155 = shalt.err (!%p2152_p4)
}
  0x34   : > { %2051 = dma.hbm_to_vmem [thread:$0]  (!%p2277_p5), %s2551_s12, 16, %s2281_s14, [#allocation5]  }
  0x35   : > { %p2557_p6 = scmp.ne.s32.totalorder %s2555_s27, 0 }
  0x36   : > { %p2558_p7 = scmp.eq.s32.totalorder (!%p2557_p6), %s2264_s26, 0 }
  0x37   : > { %408 = sbr.rel (%p2557_p6) target bundleno = 3705 (0xe79), region = 72 }
  0x3e   : > { %2161 = dma.done.wait (%p2558_p7), [#allocation3], 16   ;;  %p2559_p8 = pmov %p2558_p7 }
  0x3f   : > { %p2560_p2 = pmov %p2558_p7 }
  0x40   : > { %2163 = vsyncadd (%p2559_p8), [#allocation3], 4294967280 }
  0x41   : > { %2165 = dma.done.wait (%p2560_p2), [#allocation5], 16   ;;  %p2561_p3 = pmov %p2560_p2 }
  0x42   : > { %p454_p9 = scmp.lt.s32.totalorder %s2264_s26, 1  ;;  %v2174_v0 = vmov 0.0|0.0   ;;  %vm2175_vm0 = vmmov 0   ;;  %v2176_v1 = vmov 0.0   ;;  %v463_v2 = vld [vmem:[%s2540_s1] sm:$0xff]  ;;  %v464_v3 = vld [vmem:[%s2540_s1 + $0x8] sm:$0xff] }
  0x43   : > { %2167 = vsyncadd (%p2561_p3), [#allocation5], 4294967280  ;;  %2013 = vmatprep.subr.bf16.mxu0 %v2174_v0  ;;  %1920 = vmatprep.mubr.msk.f32.mxu0 %vm2175_vm0, %v2176_v1  ;;  %v465_v4 = vld [vmem:[%s2540_s1 + $0x10] sm:$0xff]  ;;  %v2014_v5 = vpack.c.bf16 %v464_v3, %v463_v2  ;;  %v466_v6 = vld [vmem:[%s2540_s1 + $0x18] sm:$0xff]  ;;  %vm474_vm1 = vcmask 261120   ;;  %s2177_s28 = smov 120  }
  0x44   : > { %1928 = vmatprep.subr.mxu1 %v2176_v1  ;;  %1930 = vmatprep.mubr.msk.f32.mxu1 %vm2175_vm0, %v2176_v1  ;;  %s2563_s26 = smov (!%p454_p9, %s2264_s26), 1  ;;  %v2017_v7 = vpack.c.bf16 %v466_v6, %v465_v4  ;;  %v1840_v9 = vld [vmem:[%s2541_s2] ss:$0 sm:$0xff]  ;;  %s2178_s27 = smov 96   ;;  %vm556_vm2 = vcmask 64512   ;;  %v549_v34 = vld [vmem:[%s2542_s3 + $0x8] sm:$0xff] }
  0x45   : > { %s1838_s20 = sshll.u32 %s2563_s26, 3  ;;  %2015 = vmatpush3.bf16.msra.mxu0 %v2014_v5  ;;  %s2179_s14 = smov 88   ;;  %v548_v43 = vld [vmem:[%s2542_s3] sm:$0xff]  ;;  %vm1649_vm3 = vcmask 523264  }
  0x46   : > { %2016 = vmatprep.subr.bf16.mxu0 %v2174_v0  ;;  %s457_s29 = scalar_lea.vmem %s2539_s0, %s1838_s20  ;;  %s2180_s15 = smov 56  }
  0x47   : > { %v2370_v8 = vld [vmem:[%s457_s29] sm:$0xff]  ;;  %s2181_s30 = smov 64   ;;  %s2182_s16 = smov 80  }
  0x48   : > { %s2183_s17 = smov 112   ;;  %s2184_s29 = smov 72  }
  0x49   : > { %2018 = vmatpush3.bf16.msra.mxu0 %v2017_v7  ;;  %s2185_s23 = smov 104   ;;  %s2186_s24 = smov 48  }
  0x4a   : > { %1923 = vmatprep.subr.mxu0 %v2176_v1 }
  0x4c   : > { %1921 = vmatmul.mubr.msk.f32.vlgmr.msra.gmra.mrb[0].mxu0 %vm474_vm1, %v2370_v8 }
  0x4d   : > { %1925 = vmatprep.mubr.msk.f32.mxu0 %vm2175_vm0, %v2176_v1 }
 0x11f   : > { %v544_v10 = vpop.f32.mrb[0].mxu0 }
 0x120   : > { %v2380_v11 = vadd.f32 %v1840_v9, %v544_v10  ;;  %v1922_v12 = vpop.f32.mrb[1].mxu0  ;;  %v550_v9 = vld [vmem:[%s2542_s3 + $0x10] sm:$0xff] }
 0x122   : > { %719 = vrot.lane.b32.xlu1 %v2380_v11, %s2177_s28  ;;  %554 = vrot.lane.b32.xlu0 %v2380_v11, %s2178_s27 }
 0x126   : > { %721 = vrot.lane.b32.xlu0 %v2380_v11, %s2179_s14  ;;  %s2187_s14 = smov 40  }
 0x194   : > { %v555_v13 = vpop.permute.xlu0 %554  ;;  %v720_v15 = vpop.permute.xlu1 %719 }
 0x195   : > { %1924 = vmatpush3.xpose.msk.msra.mxu0 %vm556_vm2, %v555_v13 }
 0x196   : > { %1933 = vmatprep.subr.mxu0 %v2176_v1 }
 0x198   : > { %1926 = vmatmul.mubr.msk.f32.vlgmr.msra.gmra.mrb[2].mxu0 %vm556_vm2, %v2380_v11  ;;  %v722_v14 = vpop.permute.xlu0 %721 }
 0x199   : > { %1934 = vmatpush3.xpose.msk.msra.mxu0 %vm556_vm2, %v722_v14  ;;  %1935 = vmatprep.mubr.msk.f32.mxu0 %vm2175_vm0, %v2176_v1 }
 0x19a   : > { %1943 = vmatprep.subr.mxu0 %v2176_v1 }
 0x19c   : > { %1936 = vmatmul.mubr.msk.f32.vlgmr.msra.gmra.mrb[4].mxu0 %vm556_vm2, %v720_v15 }
 0x19d   : > { %1945 = vmatprep.mubr.msk.f32.mxu0 %vm2175_vm0, %v2176_v1  ;;  %1944 = vmatpush3.msra.mxu0 %v549_v34 }
 0x19e   : > { %1953 = vmatprep.subr.mxu0 %v2176_v1 }
 0x26b   : > { %v627_v16 = vpop.f32.mrb[2].mxu0 }
 0x26c   : > { %v631_v17 = vmul.f32 0.35355338, %v627_v16  ;;  %v1927_v18 = vpop.f32.mrb[3].mxu0 }
 0x26e   : > { %v632_v19 = vsel %vm556_vm2, %v631_v17, -inf }
 0x26f   : > { %633 = vmax.xlane.f32.xlu1 %v632_v19  ;;  %v793_v20 = vpop.f32.mrb[4].mxu0 }
 0x270   : > { %v797_v21 = vmul.f32 0.35355338, %v793_v20  ;;  %v1937_v22 = vpop.f32.mrb[5].mxu0 }
 0x272   : > { %v798_v23 = vsel %vm556_vm2, %v797_v21, -inf }
 0x273   : > { %799 = vmax.xlane.f32.xlu0 %v798_v23  ;;  %v551_v23 = vld [vmem:[%s2542_s3 + $0x18] sm:$0xff] }
 0x2fc   : > { %v634_v24 = vpop.xlane.xlu1 %633 }
 0x2fd   : > { %v635_v25 = vsub.f32 %v631_v17, %v634_v24 }
 0x2ff   : > { %v636_v26 = vmul.f32 1.442695, %v635_v25 }
 0x300   : > { %v800_v27 = vpop.xlane.xlu0 %799 }
 0x301   : > { %2080 = vpow2.f32 %v636_v26  ;;  %v801_v28 = vsub.f32 %v797_v21, %v800_v27 }
 0x303   : > { %v802_v29 = vmul.f32 1.442695, %v801_v28 }
 0x305   : > { %2082 = vpow2.f32 %v802_v29 }
 0x30b   : > { %v2081_v30 = vpop.eup %2080 }
 0x30c   : > { %v638_v31 = vsel %vm556_vm2, %v2081_v30, 0.0 }
 0x30d   : > { %639 = vadd.xlane.f32.xlu0 %v638_v31  ;;  %v1858_v31 = vld [vmem:[%s2543_s4] ss:$0 sm:$0xff] }
 0x30f   : > { %v2083_v32 = vpop.eup %2082 }
 0x310   : > { %v804_v33 = vsel %vm556_vm2, %v2083_v32, 0.0 }
 0x311   : > { %805 = vadd.xlane.f32.xlu1 %v804_v33 }
 0x322   : > { %809 = vrot.lane.b32.xlu1 %v2380_v11, %s2180_s15 }
 0x323   : > { %643 = vrot.lane.b32.xlu0 %v2380_v11, %s2181_s30 }
 0x326   : > { %1033 = vrot.lane.b32.xlu1 %v2380_v11, %s2182_s16 }
 0x327   : > { %1031 = vrot.lane.b32.xlu0 %v2380_v11, %s2183_s17 }
 0x39a   : > { %v640_v35 = vpop.xlane.xlu0 %639 }
 0x39b   : > { %2084 = vrcp.f32 %v640_v35 }
 0x39e   : > { %v806_v36 = vpop.xlane.xlu1 %805  ;;  %v644_v37 = vpop.permute.xlu0 %643 }
 0x39f   : > { %2086 = vrcp.f32 %v806_v36  ;;  %1929 = vmatpush3.msra.mxu1 %v644_v37 }
 0x3a0   : > { %1938 = vmatprep.subr.mxu1 %v2176_v1 }
 0x3a2   : > { %v810_v40 = vpop.permute.xlu1 %809  ;;  %v1032_v49 = vpop.permute.xlu0 %1031 }
 0x3a5   : > { %v2085_v38 = vpop.eup %2084 }
 0x3a6   : > { %v642_v39 = vmul.f32 %v2085_v38, %v2081_v30  ;;  %v1034_v47 = vpop.permute.xlu1 %1033 }
 0x3a8   : > { %1931 = vmatmul.mubr.msk.f32.vlgmr.msra.gmra.mrb[0].mxu1 %vm556_vm2, %v642_v39 }
 0x3a9   : > { %v2087_v41 = vpop.eup %2086  ;;  %1939 = vmatpush3.msra.mxu1 %v810_v40  ;;  %1940 = vmatprep.mubr.msk.f32.mxu1 %vm2175_vm0, %v2176_v1 }
 0x3aa   : > { %v808_v42 = vmul.f32 %v2087_v41, %v2083_v32  ;;  %1948 = vmatprep.subr.mxu1 %v2176_v1 }
 0x3ac   : > { %1941 = vmatmul.mubr.msk.f32.vlgmr.msra.gmra.mrb[2].mxu1 %vm556_vm2, %v808_v42 }
 0x3ad   : > { %1950 = vmatprep.mubr.msk.f32.mxu1 %vm2175_vm0, %v2176_v1  ;;  %1949 = vmatpush3.msra.mxu1 %v548_v43  ;;  %v1550_v43 = vld [vmem:[%s2546_s7 + $0x8] sm:$0xff] }
 0x3ae   : > { %1958 = vmatprep.subr.mxu1 %v2176_v1 }
 0x47b   : > { %v715_v44 = vpop.f32.mrb[0].mxu1 }
 0x47c   : > { %v1932_v45 = vpop.f32.mrb[1].mxu1  ;;  %1951 = vmatmul.mubr.msk.f32.vlgmr.msra.gmra.mrb[4].mxu1 %vm556_vm2, %v715_v44 }
 0x47d   : > { %1960 = vmatprep.mubr.msk.f32.mxu1 %vm2175_vm0, %v2176_v1  ;;  %v1552_v45 = vld [vmem:[%s2546_s7 + $0x18] sm:$0xff] }
 0x47f   : > { %v881_v46 = vpop.f32.mrb[2].mxu1 }
 0x480   : > { %v1942_v48 = vpop.f32.mrb[3].mxu1  ;;  %1946 = vmatmul.mubr.msk.f32.vlgmr.msra.gmra.mrb[6].mxu0 %vm556_vm2, %v881_v46 }
 0x481   : > { %1954 = vmatpush3.xpose.msk.msra.mxu0 %vm556_vm2, %v1034_v47  ;;  %1955 = vmatprep.mubr.msk.f32.mxu0 %vm2175_vm0, %v2176_v1  ;;  %v1634_v47 = vld [vmem:[%s2548_s9] sm:$0xff]  ;;  %v1635_v48 = vld [vmem:[%s2548_s9 + $0x8] sm:$0xff] }
 0x482   : > { %1963 = vmatprep.subr.mxu0 %v2176_v1 }
 0x484   : > { %1956 = vmatmul.mubr.msk.f32.vlgmr.msra.gmra.mrb[8].mxu0 %vm556_vm2, %v1032_v49  ;;  %v1636_v49 = vld [vmem:[%s2548_s9 + $0x10] sm:$0xff] }
 0x485   : > { %1965 = vmatprep.mubr.msk.f32.mxu0 %vm2175_vm0, %v2176_v1  ;;  %1964 = vmatpush3.msra.mxu0 %v550_v9 }
 0x486   : > { %1973 = vmatprep.subr.mxu0 %v2176_v1 }
 0x54f   : > { %v1027_v50 = vpop.f32.mrb[4].mxu1 }
 0x550   : > { %v1952_v51 = vpop.f32.mrb[5].mxu1 }
 0x551   : > { %v1637_v51 = vld [vmem:[%s2548_s9 + $0x18] sm:$0xff] }
 0x553   : > { %v954_v52 = vpop.f32.mrb[6].mxu0 }
 0x554   : > { %v2431_v53 = vadd.f32 %v1027_v50, %v954_v52  ;;  %v1947_v54 = vpop.f32.mrb[7].mxu0  ;;  %v2026_v50 = vpack.c.bf16 %v1635_v48, %v1634_v47  ;;  %v2029_v52 = vpack.c.bf16 %v1637_v51, %v1636_v49 }
 0x555   : > { %v1639_v54 = vld [vmem:[%s2548_s9 + $0x28] sm:$0xff] }
 0x557   : > { %v1105_v55 = vpop.f32.mrb[8].mxu0 }
 0x558   : > { %v1109_v56 = vmul.f32 0.35355338, %v1105_v55  ;;  %v1957_v57 = vpop.f32.mrb[9].mxu0 }
 0x55a   : > { %v1110_v58 = vsel %vm556_vm2, %v1109_v56, -inf }
 0x55b   : > { %1111 = vmax.xlane.f32.xlu1 %v1110_v58 }
 0x56c   : > { %1273 = vrot.lane.b32.xlu1 %v2380_v11, %s2184_s29 }
 0x570   : > { %1271 = vrot.lane.b32.xlu1 %v2380_v11, %s2185_s23 }
 0x5e8   : > { %v1112_v59 = vpop.xlane.xlu1 %1111 }
 0x5e9   : > { %v1113_v60 = vsub.f32 %v1109_v56, %v1112_v59 }
 0x5eb   : > { %v1114_v61 = vmul.f32 1.442695, %v1113_v60  ;;  %v1859_v60 = vld [vmem:[%s2544_s5] ss:$0 sm:$0xff] }
 0x5ec   : > { %v1274_v5 = vpop.permute.xlu1 %1273 }
 0x5ed   : > { %2088 = vpow2.f32 %v1114_v61 }
 0x5f0   : > { %v1272_v7 = vpop.permute.xlu1 %1271 }
 0x5f7   : > { %v2089_v62 = vpop.eup %2088 }
 0x5f8   : > { %v1116_v63 = vsel %vm556_vm2, %v2089_v62, 0.0 }
 0x5f9   : > { %1117 = vadd.xlane.f32.xlu0 %v1116_v63 }
 0x60f   : > { %1121 = vrot.lane.b32.xlu0 %v2380_v11, %s2186_s24  ;;  %s461_s24 = scalar_lea.vmem %s2552_s13, %s1838_s20 }
 0x686   : > { %v1118_v2 = vpop.xlane.xlu0 %1117 }
 0x687   : > { %2090 = vrcp.f32 %v1118_v2 }
 0x68a   : > { %v1122_v3 = vpop.permute.xlu0 %1121 }
 0x68b   : > { %1959 = vmatpush3.msra.mxu1 %v1122_v3  ;;  %v1641_v3 = vld [vmem:[%s2548_s9 + $0x38] sm:$0xff] }
 0x68c   : > { %1968 = vmatprep.subr.mxu1 %v2176_v1 }
 0x691   : > { %v2091_v4 = vpop.eup %2090 }
 0x692   : > { %v1120_v6 = vmul.f32 %v2091_v4, %v2089_v62  ;;  %v1860_v62 = vld [vmem:[%s2545_s6] ss:$0 sm:$0xff] }
 0x694   : > { %1961 = vmatmul.mubr.msk.f32.vlgmr.msra.gmra.mrb[6].mxu1 %vm556_vm2, %v1120_v6 }
 0x695   : > { %1969 = vmatpush3.xpose.msk.msra.mxu1 %vm556_vm2, %v1274_v5  ;;  %1970 = vmatprep.mubr.msk.f32.mxu1 %vm2175_vm0, %v2176_v1  ;;  %v1861_v5 = vld [vmem:[%s2547_s8] ss:$0 sm:$0xff] }
 0x696   : > { %1978 = vmatprep.subr.mxu1 %v2176_v1 }
 0x698   : > { %1971 = vmatmul.mubr.msk.f32.vlgmr.msra.gmra.mrb[8].mxu1 %vm556_vm2, %v1272_v7 }
 0x699   : > { %1980 = vmatprep.mubr.msk.f32.mxu1 %vm2175_vm0, %v2176_v1  ;;  %1979 = vmatpush3.msra.mxu1 %v551_v23 }
 0x69a   : > { %2025 = vmatprep.subr.bf16.mxu1 %v2174_v0 }
 0x767   : > { %v1193_v10 = vpop.f32.mrb[6].mxu1 }
 0x768   : > { %v1962_v12 = vpop.f32.mrb[7].mxu1  ;;  %1966 = vmatmul.mubr.msk.f32.vlgmr.msra.gmra.mrb[10].mxu0 %vm556_vm2, %v1193_v10 }
 0x769   : > { %1975 = vmatprep.mubr.msk.f32.mxu0 %vm2175_vm0, %v2176_v1  ;;  %v1863_v12 = vld [vmem:[%s2549_s10] ss:$0 sm:$0xff] }
 0x76b   : > { %v1345_v13 = vpop.f32.mrb[8].mxu1 }
 0x76c   : > { %v1349_v14 = vmul.f32 0.35355338, %v1345_v13  ;;  %v1972_v15 = vpop.f32.mrb[9].mxu1 }
 0x76e   : > { %v1350_v16 = vsel %vm556_vm2, %v1349_v14, -inf }
 0x76f   : > { %1351 = vmax.xlane.f32.xlu0 %v1350_v16 }
 0x785   : > { %1361 = vrot.lane.b32.xlu0 %v2380_v11, %s2187_s14 }
 0x7fc   : > { %v1352_v17 = vpop.xlane.xlu0 %1351 }
 0x7fd   : > { %v1353_v18 = vsub.f32 %v1349_v14, %v1352_v17 }
 0x7ff   : > { %v1354_v19 = vmul.f32 1.442695, %v1353_v18 }
 0x800   : > { %v1362_v20 = vpop.permute.xlu0 %1361 }
 0x801   : > { %2092 = vpow2.f32 %v1354_v19  ;;  %1974 = vmatpush3.msra.mxu0 %v1362_v20 }
 0x802   : > { %2019 = vmatprep.subr.bf16.mxu0 %v2174_v0 }
 0x80b   : > { %v2093_v21 = vpop.eup %2092 }
 0x80c   : > { %v1356_v22 = vsel %vm556_vm2, %v2093_v21, 0.0 }
 0x80d   : > { %1357 = vadd.xlane.f32.xlu1 %v1356_v22 }
 0x83b   : > { %v1266_v11 = vpop.f32.mrb[10].mxu0 }
 0x83c   : > { %v1270_v24 = vadd.f32 %v1266_v11, %v2431_v53  ;;  %v1967_v25 = vpop.f32.mrb[11].mxu0  ;;  %v1638_v53 = vld [vmem:[%s2548_s9 + $0x20] sm:$0xff] }
 0x83d   : > { %v2032_v55 = vpack.c.bf16 %v1639_v54, %v1638_v53 }
 0x89a   : > { %v1358_v26 = vpop.xlane.xlu1 %1357 }
 0x89b   : > { %2094 = vrcp.f32 %v1358_v26  ;;  %v1865_v26 = vld [vmem:[#allocation2] ss:$0 sm:$0xff] }
 0x8a5   : > { %v2095_v27 = vpop.eup %2094 }
 0x8a6   : > { %v1360_v28 = vmul.f32 %v2095_v27, %v2093_v21 }
 0x8a8   : > { %1976 = vmatmul.mubr.msk.f32.vlgmr.msra.gmra.mrb[12].mxu0 %vm556_vm2, %v1360_v28  ;;  %v1866_v28 = vld [vmem:[#allocation4] ss:$0 sm:$0xff] }
 0x8a9   : > { %1991 = vmatprep.mubr.msk.f32.mxu0 %vm2175_vm0, %v2176_v1 }
 0x97b   : > { %v1433_v29 = vpop.f32.mrb[12].mxu0 }
 0x97c   : > { %v1977_v30 = vpop.f32.mrb[13].mxu0  ;;  %1981 = vmatmul.mubr.msk.f32.vlgmr.msra.gmra.mrb[10].mxu1 %vm556_vm2, %v1433_v29 }
 0x97d   : > { %2010 = vmatprep.mubr.msk.f32.mxu1 %vm2175_vm0, %v2176_v1  ;;  %v1549_v1 = vld [vmem:[%s2546_s7] sm:$0xff]  ;;  %2027 = vmatpush3.bf16.msra.mxu1 %v2026_v50 }
 0x97e   : > { %v2020_v44 = vpack.c.bf16 %v1550_v43, %v1549_v1  ;;  %2028 = vmatprep.subr.bf16.mxu1 %v2174_v0 }
 0x980   : > { %2021 = vmatpush3.bf16.msra.mxu0 %v2020_v44 }
 0x981   : > { %2022 = vmatprep.subr.bf16.mxu0 %v2174_v0  ;;  %2030 = vmatpush3.bf16.msra.mxu1 %v2029_v52 }
 0x982   : > { %2031 = vmatprep.subr.bf16.mxu1 %v2174_v0 }
 0x985   : > { %2033 = vmatpush3.bf16.msra.mxu1 %v2032_v55 }
 0x986   : > { %2034 = vmatprep.subr.bf16.mxu1 %v2174_v0  ;;  %v1640_v0 = vld [vmem:[%s2548_s9 + $0x30] sm:$0xff] }
 0x987   : > { %v2035_v4 = vpack.c.bf16 %v1641_v3, %v1640_v0 }
 0x989   : > { %2036 = vmatpush3.bf16.msra.mxu1 %v2035_v4 }
 0xa4f   : > { %v1506_v32 = vpop.f32.mrb[10].mxu1 }
 0xa50   : > { %v1510_v33 = vadd.f32 %v1506_v32, %v1270_v24  ;;  %v1982_v34 = vpop.f32.mrb[11].mxu1 }
 0xa52   : > { %v1517_v35 = vadd.f32 %v1858_v31, %v1510_v33 }
 0xa54   : > { %v1518_v36 = vadd.f32 %v1517_v35, %v2370_v8  ;;  %v1551_v8 = vld [vmem:[%s2546_s7 + $0x10] sm:$0xff] }
 0xa55   : > { %v2023_v46 = vpack.c.bf16 %v1552_v45, %v1551_v8 }
 0xa56   : > { %v1521_v37 = vsel %vm474_vm1, %v1518_v36, 0.0 }
 0xa57   : > { %1522 = vadd.xlane.f32.xlu1 %v1521_v37  ;;  %2024 = vmatpush3.bf16.msra.mxu0 %v2023_v46 }
 0xae4   : > { %v1523_v38 = vpop.xlane.xlu1 %1522 }
 0xae5   : > { %v1525_v39 = vmul.f32 0.03125, %v1523_v38 }
 0xae7   : > { %v1526_v40 = vsub.f32 %v1518_v36, %v1525_v39 }
 0xae9   : > { %v1527_v41 = vmul.f32 %v1526_v40, %v1526_v40 }
 0xaeb   : > { %v1528_v42 = vsel %vm474_vm1, %v1527_v41, 0.0 }
 0xaec   : > { %1529 = vadd.xlane.f32.xlu1 %v1528_v42 }
 0xb79   : > { %v1530_v56 = vpop.xlane.xlu1 %1529 }
 0xb7a   : > { %v1531_v57 = vmul.f32 0.03125, %v1530_v56 }
 0xb7c   : > { %v1532_v58 = vadd.f32 1e-05, %v1531_v57 }
 0xb7e   : > { %2096 = vrsqrt.f32 %v1532_v58 }
 0xb88   : > { %v2097_v59 = vpop.eup %2096 }
 0xb89   : > { %v1534_v61 = vmul.f32 %v2097_v59, %v1526_v40 }
 0xb8b   : > { %v1541_v63 = vmul.f32 %v1859_v60, %v1534_v61 }
 0xb8d   : > { %v1548_v2 = vadd.f32 %v1860_v62, %v1541_v63 }
 0xb8f   : > { %1992 = vmatmul.mubr.msk.f32.vlgmr.msra.gmra.mrb[14].mxu0 %vm474_vm1, %v1548_v2 }
 0xc62   : > { %v1629_v6 = vpop.f32.mrb[14].mxu0 }
 0xc63   : > { %v1630_v7 = vadd.f32 %v1861_v5, %v1629_v6  ;;  %v1993_v9 = vpop.f32.mrb[15].mxu0 }
 0xc65   : > { %v1633_v10 = vmax.f32 %v1630_v7, 0.0 }
 0xc67   : > { %2011 = vmatmul.mubr.msk.f32.vlgmr.msra.gmra.mrb[12].mxu1 %vm1649_vm3, %v1633_v10 }
 0xd3a   : > { %v1719_v13 = vpop.f32.mrb[12].mxu1 }
 0xd3b   : > { %v1720_v14 = vadd.f32 %v1863_v12, %v1719_v13  ;;  %v2012_v15 = vpop.f32.mrb[13].mxu1 }
 0xd3d   : > { %v1723_v16 = vadd.f32 %v1720_v14, %v1548_v2 }
 0xd3f   : > { %v1726_v17 = vsel %vm474_vm1, %v1723_v16, 0.0 }
 0xd40   : > { %1727 = vadd.xlane.f32.xlu1 %v1726_v17 }
 0xdcd   : > { %v1728_v18 = vpop.xlane.xlu1 %1727 }
 0xdce   : > { %v1729_v19 = vmul.f32 0.03125, %v1728_v18 }
 0xdd0   : > { %v1730_v20 = vsub.f32 %v1723_v16, %v1729_v19 }
 0xdd2   : > { %v1731_v21 = vmul.f32 %v1730_v20, %v1730_v20 }
 0xdd4   : > { %v1732_v22 = vsel %vm474_vm1, %v1731_v21, 0.0 }
 0xdd5   : > { %1733 = vadd.xlane.f32.xlu1 %v1732_v22 }
 0xe62   : > { %v1734_v23 = vpop.xlane.xlu1 %1733 }
 0xe63   : > { %v1735_v11 = vmul.f32 0.03125, %v1734_v23 }
 0xe65   : > { %v1736_v24 = vadd.f32 1e-05, %v1735_v11 }
 0xe67   : > { %2098 = vrsqrt.f32 %v1736_v24 }
 0xe71   : > { %v2099_v25 = vpop.eup %2098 }
 0xe72   : > { %v1738_v27 = vmul.f32 %v2099_v25, %v1730_v20 }
 0xe74   : > { %v1745_v29 = vmul.f32 %v1865_v26, %v1738_v27 }
 0xe76   : > { %v1752_v30 = vadd.f32 %v1866_v28, %v1745_v29 }
 0xe78   : > { %1753 = vst.msk [vmem:[%s461_s24] sm:$0xff] %vm474_vm1, %v1752_v30 }
 0xe79 PF: > { %s25_s25 = sadd.s32 1, %s2170_s25  }
 0xe7a   : > { %p22_p5 = scmp.ge.s32.totalorder %s25_s25, 4  }
 0xe7c   :  { %24 = sbr.rel (!%p22_p5) target bundleno = 2 (0x2), region = 111 }
 0xe83   :  { %1773 = vsyncpa [#allocation3], 1 }
 0xe84   :  { %1775 = vsyncpa [#allocation3 + $0x1], 1 }
 0xe85   :  { %1776 = vsyncpa [#allocation5], 1 }

// kernel: _lambda_.6
= control target key start
LH: loop header
LB: loop body
LE: loop exit
PB: predicated region body
PF: predicated region fallthrough
CT: control target
= control target key end

     0   :  { %s2119_s25 = smov 0   ;;  %s2329_s0 = inlined_call_operand.vmem [shape: f32[2,8,32], index: 0, kind: input, shape index: {}]   ;;  %s2330_s1 = inlined_call_operand.vmem [shape: f32[32,96], index: 1, kind: input, shape index: {}]   ;;  %s2331_s2 = inlined_call_operand.vmem [shape: f32[1,96], index: 2, kind: input, shape index: {}]   ;;  %s2332_s3 = inlined_call_operand.vmem [shape: f32[32,32], index: 3, kind: input, shape index: {}]   ;;  %s2333_s4 = inlined_call_operand.vmem [shape: f32[1,32], index: 4, kind: input, shape index: {}]   ;;  %s2334_s5 = inlined_call_operand.vmem [shape: f32[1,32], index: 5, kind: input, shape index: {}]   ;;  %s2335_s6 = inlined_call_operand.vmem [shape: f32[1,32], index: 6, kind: input, shape index: {}]   ;;  %s2336_s7 = inlined_call_operand.vmem [shape: f32[32,64], index: 7, kind: input, shape index: {}]   ;;  %s2337_s8 = inlined_call_operand.vmem [shape: f32[1,64], index: 8, kind: input, shape index: {}]   ;;  %s2338_s9 = inlined_call_operand.vmem [shape: f32[64,32], index: 9, kind: input, shape index: {}]   ;;  %s2339_s10 = inlined_call_operand.vmem [shape: f32[1,32], index: 10, kind: input, shape index: {}]   ;;  %s2340_s11 = inlined_call_operand.vmem [shape: f32[1,32], index: 11, kind: input, shape index: {}]   ;;  %s2341_s12 = inlined_call_operand.vmem [shape: f32[1,32], index: 12, kind: input, shape index: {}]   ;;  %s2342_s13 = inlined_call_operand.vmem [shape: f32[2,8,32], index: 13, kind: output, shape index: {}]  }
   0x1 LB: > { %s1781_s26 = sadd.s32 4294967295, %s2033_s25   ;;  %p1785_p0 = scmp.ge.s32.totalorder %s2033_s25, 1  ;;  %s2033_s25 = sphi %s2119_s25, %s23_s25  }
   0x2   : > { %p386_p1 = scmp.lt.s32.totalorder %s2033_s25, 3 }
   0x4   : > { %p387_p2 = pnand %p1785_p0, %p386_p1 }
   0x5   : > { %v437_v0 = vld [vmem:[%s2330_s1] sm:$0xff] (!%p387_p2)  ;;  %v438_v1 = vld [vmem:[%s2330_s1 + $0x8] sm:$0xff] (!%p387_p2)  ;;  %v439_v2 = vld [vmem:[%s2330_s1 + $0x10] sm:$0xff] (!%p387_p2)  ;;  %v2035_v3 = vmov (!%p387_p2), 0.0|0.0   ;;  %vm2036_vm0 = vmmov (!%p387_p2), 0   ;;  %v2037_v6 = vmov (!%p387_p2), 0.0  }
   0x6   : > { %390 = sbr.rel (%p387_p2) target bundleno = 3646 (0xe3e), region = 72  ;;  %1961 = vmatprep.subr.bf16.mxu0 (!%p387_p2), %v2035_v3  ;;  %v1962_v4 = vpack.c.bf16 (!%p387_p2), %v438_v1, %v437_v0  ;;  %v440_v5 = vld [vmem:[%s2330_s1 + $0x18] sm:$0xff] (!%p387_p2)  ;;  %1868 = vmatprep.mubr.msk.f32.mxu0 (!%p387_p2), %vm2036_vm0, %v2037_v6  ;;  %p428_p3 = scmp.lt.s32.totalorder (!%p387_p2), %s1781_s26, 1  ;;  %vm448_vm1 = vcmask (!%p387_p2), 261120   ;;  %v1788_v9 = vld [vmem:[%s2331_s2] ss:$0 sm:$0xff] (!%p387_p2) }
   0x7   : > { %1876 = vmatprep.subr.mxu1 (!%p387_p2), %v2037_v6  ;;  %1878 = vmatprep.mubr.msk.f32.mxu1 (!%p387_p2), %vm2036_vm0, %v2037_v6  ;;  %v1965_v7 = vpack.c.bf16 (!%p387_p2), %v440_v5, %v439_v2  ;;  %s2038_s24 = smov (!%p387_p2), 120   ;;  %s2039_s27 = smov (!%p387_p2), 96   ;;  %vm530_vm2 = vcmask (!%p387_p2), 64512   ;;  %v523_v34 = vld [vmem:[%s2332_s3 + $0x8] sm:$0xff] (!%p387_p2)  ;;  %v522_v43 = vld [vmem:[%s2332_s3] sm:$0xff] (!%p387_p2)  ;;  %vm1623_vm3 = vcmask (!%p387_p2), 523264  }
   0x8   : > { %1963 = vmatpush3.bf16.msra.mxu0 (!%p387_p2), %v1962_v4  ;;  %s2040_s28 = smov (!%p387_p2), 88   ;;  %s2041_s29 = smov (!%p387_p2), 56  }
   0x9   : > { %1964 = vmatprep.subr.bf16.mxu0 (!%p387_p2), %v2035_v3  ;;  %s2042_s30 = smov (!%p387_p2), 64   ;;  %s2043_s14 = smov (!%p387_p2), 80  }
   0xa   : > { %s2044_s15 = smov (!%p387_p2), 112   ;;  %s2046_s22 = smov (!%p387_p2), 104  }
   0xb   : > { %s2047_s23 = smov (!%p387_p2), 48  }
   0xc   : > { %1966 = vmatpush3.bf16.msra.mxu0 (!%p387_p2), %v1965_v7 }
   0xd   : > { %s2344_s26 = smov (!%p428_p3, %s1781_s26), 1  ;;  %1871 = vmatprep.subr.mxu0 %v2037_v6 }
   0xe   : > { %s1786_s18 = sshll.u32 %s2344_s26, 3 }
   0xf   : > { %s431_s21 = scalar_lea.vmem %s2329_s0, %s1786_s18 }
  0x10   : > { %v2154_v8 = vld [vmem:[%s431_s21] sm:$0xff]  ;;  %s2045_s21 = smov 72  }
  0x11   : > { %1869 = vmatmul.mubr.msk.f32.vlgmr.msra.gmra.mrb[0].mxu0 %vm448_vm1, %v2154_v8 }
  0x12   : > { %1873 = vmatprep.mubr.msk.f32.mxu0 %vm2036_vm0, %v2037_v6 }
  0xe4   : > { %v518_v10 = vpop.f32.mrb[0].mxu0 }
  0xe5   : > { %v2164_v11 = vadd.f32 %v1788_v9, %v518_v10  ;;  %v1870_v12 = vpop.f32.mrb[1].mxu0  ;;  %v524_v9 = vld [vmem:[%s2332_s3 + $0x10] sm:$0xff] }
  0xe7   : > { %693 = vrot.lane.b32.xlu1 %v2164_v11, %s2038_s24  ;;  %528 = vrot.lane.b32.xlu0 %v2164_v11, %s2039_s27 }
  0xeb   : > { %695 = vrot.lane.b32.xlu0 %v2164_v11, %s2040_s28  ;;  %s2048_s28 = smov 40  }
 0x159   : > { %v529_v13 = vpop.permute.xlu0 %528  ;;  %v694_v15 = vpop.permute.xlu1 %693 }
 0x15a   : > { %1872 = vmatpush3.xpose.msk.msra.mxu0 %vm530_vm2, %v529_v13 }
 0x15b   : > { %1881 = vmatprep.subr.mxu0 %v2037_v6 }
 0x15d   : > { %1874 = vmatmul.mubr.msk.f32.vlgmr.msra.gmra.mrb[2].mxu0 %vm530_vm2, %v2164_v11  ;;  %v696_v14 = vpop.permute.xlu0 %695 }
 0x15e   : > { %1882 = vmatpush3.xpose.msk.msra.mxu0 %vm530_vm2, %v696_v14  ;;  %1883 = vmatprep.mubr.msk.f32.mxu0 %vm2036_vm0, %v2037_v6 }
 0x15f   : > { %1891 = vmatprep.subr.mxu0 %v2037_v6 }
 0x161   : > { %1884 = vmatmul.mubr.msk.f32.vlgmr.msra.gmra.mrb[4].mxu0 %vm530_vm2, %v694_v15 }
 0x162   : > { %1893 = vmatprep.mubr.msk.f32.mxu0 %vm2036_vm0, %v2037_v6  ;;  %1892 = vmatpush3.msra.mxu0 %v523_v34 }
 0x163   : > { %1901 = vmatprep.subr.mxu0 %v2037_v6 }
 0x230   : > { %v601_v16 = vpop.f32.mrb[2].mxu0 }
 0x231   : > { %v605_v17 = vmul.f32 0.35355338, %v601_v16  ;;  %v1875_v18 = vpop.f32.mrb[3].mxu0 }
 0x233   : > { %v606_v19 = vsel %vm530_vm2, %v605_v17, -inf }
 0x234   : > { %607 = vmax.xlane.f32.xlu1 %v606_v19  ;;  %v767_v20 = vpop.f32.mrb[4].mxu0 }
 0x235   : > { %v771_v21 = vmul.f32 0.35355338, %v767_v20  ;;  %v1885_v22 = vpop.f32.mrb[5].mxu0 }
 0x237   : > { %v772_v23 = vsel %vm530_vm2, %v771_v21, -inf }
 0x238   : > { %773 = vmax.xlane.f32.xlu0 %v772_v23  ;;  %v525_v23 = vld [vmem:[%s2332_s3 + $0x18] sm:$0xff] }
 0x2c1   : > { %v608_v24 = vpop.xlane.xlu1 %607 }
 0x2c2   : > { %v609_v25 = vsub.f32 %v605_v17, %v608_v24 }
 0x2c4   : > { %v610_v26 = vmul.f32 1.442695, %v609_v25 }
 0x2c5   : > { %v774_v27 = vpop.xlane.xlu0 %773 }
 0x2c6   : > { %2007 = vpow2.f32 %v610_v26  ;;  %v775_v28 = vsub.f32 %v771_v21, %v774_v27 }
 0x2c8   : > { %v776_v29 = vmul.f32 1.442695, %v775_v28 }
 0x2ca   : > { %2009 = vpow2.f32 %v776_v29 }
 0x2d0   : > { %v2008_v30 = vpop.eup %2007 }
 0x2d1   : > { %v612_v31 = vsel %vm530_vm2, %v2008_v30, 0.0 }
 0x2d2   : > { %613 = vadd.xlane.f32.xlu0 %v612_v31  ;;  %v1806_v31 = vld [vmem:[%s2333_s4] ss:$0 sm:$0xff] }
 0x2d4   : > { %v2010_v32 = vpop.eup %2009 }
 0x2d5   : > { %v778_v33 = vsel %vm530_vm2, %v2010_v32, 0.0 }
 0x2d6   : > { %779 = vadd.xlane.f32.xlu1 %v778_v33 }
 0x2e7   : > { %783 = vrot.lane.b32.xlu1 %v2164_v11, %s2041_s29  ;;  %s435_s29 = scalar_lea.vmem %s2342_s13, %s1786_s18 }
 0x2e8   : > { %617 = vrot.lane.b32.xlu0 %v2164_v11, %s2042_s30 }
 0x2eb   : > { %1007 = vrot.lane.b32.xlu1 %v2164_v11, %s2043_s14 }
 0x2ec   : > { %1005 = vrot.lane.b32.xlu0 %v2164_v11, %s2044_s15 }
 0x35f   : > { %v614_v35 = vpop.xlane.xlu0 %613 }
 0x360   : > { %2011 = vrcp.f32 %v614_v35 }
 0x363   : > { %v780_v36 = vpop.xlane.xlu1 %779  ;;  %v618_v37 = vpop.permute.xlu0 %617 }
 0x364   : > { %2013 = vrcp.f32 %v780_v36  ;;  %1877 = vmatpush3.msra.mxu1 %v618_v37 }
 0x365   : > { %1886 = vmatprep.subr.mxu1 %v2037_v6 }
 0x367   : > { %v784_v40 = vpop.permute.xlu1 %783  ;;  %v1006_v49 = vpop.permute.xlu0 %1005 }
 0x36a   : > { %v2012_v38 = vpop.eup %2011 }
 0x36b   : > { %v616_v39 = vmul.f32 %v2012_v38, %v2008_v30  ;;  %v1008_v47 = vpop.permute.xlu1 %1007 }
 0x36d   : > { %1879 = vmatmul.mubr.msk.f32.vlgmr.msra.gmra.mrb[0].mxu1 %vm530_vm2, %v616_v39 }
 0x36e   : > { %v2014_v41 = vpop.eup %2013  ;;  %1887 = vmatpush3.msra.mxu1 %v784_v40  ;;  %1888 = vmatprep.mubr.msk.f32.mxu1 %vm2036_vm0, %v2037_v6 }
 0x36f   : > { %v782_v42 = vmul.f32 %v2014_v41, %v2010_v32  ;;  %1896 = vmatprep.subr.mxu1 %v2037_v6 }
 0x371   : > { %1889 = vmatmul.mubr.msk.f32.vlgmr.msra.gmra.mrb[2].mxu1 %vm530_vm2, %v782_v42 }
 0x372   : > { %1898 = vmatprep.mubr.msk.f32.mxu1 %vm2036_vm0, %v2037_v6  ;;  %1897 = vmatpush3.msra.mxu1 %v522_v43  ;;  %v1524_v43 = vld [vmem:[%s2336_s7 + $0x8] sm:$0xff] }
 0x373   : > { %1906 = vmatprep.subr.mxu1 %v2037_v6 }
 0x440   : > { %v689_v44 = vpop.f32.mrb[0].mxu1 }
 0x441   : > { %v1880_v45 = vpop.f32.mrb[1].mxu1  ;;  %1899 = vmatmul.mubr.msk.f32.vlgmr.msra.gmra.mrb[4].mxu1 %vm530_vm2, %v689_v44 }
 0x442   : > { %1908 = vmatprep.mubr.msk.f32.mxu1 %vm2036_vm0, %v2037_v6  ;;  %v1526_v45 = vld [vmem:[%s2336_s7 + $0x18] sm:$0xff] }
 0x444   : > { %v855_v46 = vpop.f32.mrb[2].mxu1 }
 0x445   : > { %v1890_v48 = vpop.f32.mrb[3].mxu1  ;;  %1894 = vmatmul.mubr.msk.f32.vlgmr.msra.gmra.mrb[6].mxu0 %vm530_vm2, %v855_v46 }
 0x446   : > { %1902 = vmatpush3.xpose.msk.msra.mxu0 %vm530_vm2, %v1008_v47  ;;  %1903 = vmatprep.mubr.msk.f32.mxu0 %vm2036_vm0, %v2037_v6  ;;  %v1608_v47 = vld [vmem:[%s2338_s9] sm:$0xff]  ;;  %v1609_v48 = vld [vmem:[%s2338_s9 + $0x8] sm:$0xff] }
 0x447   : > { %1911 = vmatprep.subr.mxu0 %v2037_v6 }
 0x449   : > { %1904 = vmatmul.mubr.msk.f32.vlgmr.msra.gmra.mrb[8].mxu0 %vm530_vm2, %v1006_v49  ;;  %v1610_v49 = vld [vmem:[%s2338_s9 + $0x10] sm:$0xff] }
 0x44a   : > { %1913 = vmatprep.mubr.msk.f32.mxu0 %vm2036_vm0, %v2037_v6  ;;  %1912 = vmatpush3.msra.mxu0 %v524_v9 }
 0x44b   : > { %1921 = vmatprep.subr.mxu0 %v2037_v6 }
 0x514   : > { %v1001_v50 = vpop.f32.mrb[4].mxu1 }
 0x515   : > { %v1900_v51 = vpop.f32.mrb[5].mxu1 }
 0x516   : > { %v1611_v51 = vld [vmem:[%s2338_s9 + $0x18] sm:$0xff] }
 0x518   : > { %v928_v52 = vpop.f32.mrb[6].mxu0 }
 0x519   : > { %v2215_v53 = vadd.f32 %v1001_v50, %v928_v52  ;;  %v1895_v54 = vpop.f32.mrb[7].mxu0  ;;  %v1974_v50 = vpack.c.bf16 %v1609_v48, %v1608_v47  ;;  %v1977_v52 = vpack.c.bf16 %v1611_v51, %v1610_v49 }
 0x51a   : > { %v1613_v54 = vld [vmem:[%s2338_s9 + $0x28] sm:$0xff] }
 0x51c   : > { %v1079_v55 = vpop.f32.mrb[8].mxu0 }
 0x51d   : > { %v1083_v56 = vmul.f32 0.35355338, %v1079_v55  ;;  %v1905_v57 = vpop.f32.mrb[9].mxu0 }
 0x51f   : > { %v1084_v58 = vsel %vm530_vm2, %v1083_v56, -inf }
 0x520   : > { %1085 = vmax.xlane.f32.xlu1 %v1084_v58 }
 0x531   : > { %1247 = vrot.lane.b32.xlu1 %v2164_v11, %s2045_s21 }
 0x535   : > { %1245 = vrot.lane.b32.xlu1 %v2164_v11, %s2046_s22 }
 0x5ad   : > { %v1086_v59 = vpop.xlane.xlu1 %1085 }
 0x5ae   : > { %v1087_v60 = vsub.f32 %v1083_v56, %v1086_v59 }
 0x5b0   : > { %v1088_v61 = vmul.f32 1.442695, %v1087_v60  ;;  %v1807_v60 = vld [vmem:[%s2334_s5] ss:$0 sm:$0xff] }
 0x5b1   : > { %v1248_v4 = vpop.permute.xlu1 %1247 }
 0x5b2   : > { %2015 = vpow2.f32 %v1088_v61 }
 0x5b5   : > { %v1246_v7 = vpop.permute.xlu1 %1245 }
 0x5bc   : > { %v2016_v62 = vpop.eup %2015 }
 0x5bd   : > { %v1090_v63 = vsel %vm530_vm2, %v2016_v62, 0.0 }
 0x5be   : > { %1091 = vadd.xlane.f32.xlu0 %v1090_v63 }
 0x5d4   : > { %1095 = vrot.lane.b32.xlu0 %v2164_v11, %s2047_s23 }
 0x64b   : > { %v1092_v0 = vpop.xlane.xlu0 %1091 }
 0x64c   : > { %2017 = vrcp.f32 %v1092_v0 }
 0x64f   : > { %v1096_v1 = vpop.permute.xlu0 %1095 }
 0x650   : > { %1907 = vmatpush3.msra.mxu1 %v1096_v1  ;;  %v1615_v1 = vld [vmem:[%s2338_s9 + $0x38] sm:$0xff] }
 0x651   : > { %1916 = vmatprep.subr.mxu1 %v2037_v6 }
 0x656   : > { %v2018_v2 = vpop.eup %2017 }
 0x657   : > { %v1094_v5 = vmul.f32 %v2018_v2, %v2016_v62  ;;  %v1808_v62 = vld [vmem:[%s2335_s6] ss:$0 sm:$0xff] }
 0x659   : > { %1909 = vmatmul.mubr.msk.f32.vlgmr.msra.gmra.mrb[6].mxu1 %vm530_vm2, %v1094_v5 }
 0x65a   : > { %1917 = vmatpush3.xpose.msk.msra.mxu1 %vm530_vm2, %v1248_v4  ;;  %1918 = vmatprep.mubr.msk.f32.mxu1 %vm2036_vm0, %v2037_v6  ;;  %v1809_v4 = vld [vmem:[%s2337_s8] ss:$0 sm:$0xff] }
 0x65b   : > { %1926 = vmatprep.subr.mxu1 %v2037_v6 }
 0x65d   : > { %1919 = vmatmul.mubr.msk.f32.vlgmr.msra.gmra.mrb[8].mxu1 %vm530_vm2, %v1246_v7 }
 0x65e   : > { %1928 = vmatprep.mubr.msk.f32.mxu1 %vm2036_vm0, %v2037_v6  ;;  %1927 = vmatpush3.msra.mxu1 %v525_v23 }
 0x65f   : > { %1973 = vmatprep.subr.bf16.mxu1 %v2035_v3 }
 0x72c   : > { %v1167_v10 = vpop.f32.mrb[6].mxu1 }
 0x72d   : > { %v1910_v12 = vpop.f32.mrb[7].mxu1  ;;  %1914 = vmatmul.mubr.msk.f32.vlgmr.msra.gmra.mrb[10].mxu0 %vm530_vm2, %v1167_v10 }
 0x72e   : > { %1923 = vmatprep.mubr.msk.f32.mxu0 %vm2036_vm0, %v2037_v6  ;;  %v1811_v12 = vld [vmem:[%s2339_s10] ss:$0 sm:$0xff] }
 0x730   : > { %v1319_v13 = vpop.f32.mrb[8].mxu1 }
 0x731   : > { %v1323_v14 = vmul.f32 0.35355338, %v1319_v13  ;;  %v1920_v15 = vpop.f32.mrb[9].mxu1 }
 0x733   : > { %v1324_v16 = vsel %vm530_vm2, %v1323_v14, -inf }
 0x734   : > { %1325 = vmax.xlane.f32.xlu0 %v1324_v16 }
 0x74a   : > { %1335 = vrot.lane.b32.xlu0 %v2164_v11, %s2048_s28 }
 0x7c1   : > { %v1326_v17 = vpop.xlane.xlu0 %1325 }
 0x7c2   : > { %v1327_v18 = vsub.f32 %v1323_v14, %v1326_v17 }
 0x7c4   : > { %v1328_v19 = vmul.f32 1.442695, %v1327_v18 }
 0x7c5   : > { %v1336_v20 = vpop.permute.xlu0 %1335 }
 0x7c6   : > { %2019 = vpow2.f32 %v1328_v19  ;;  %1922 = vmatpush3.msra.mxu0 %v1336_v20 }
 0x7c7   : > { %1967 = vmatprep.subr.bf16.mxu0 %v2035_v3 }
 0x7d0   : > { %v2020_v21 = vpop.eup %2019 }
 0x7d1   : > { %v1330_v22 = vsel %vm530_vm2, %v2020_v21, 0.0 }
 0x7d2   : > { %1331 = vadd.xlane.f32.xlu1 %v1330_v22 }
 0x800   : > { %v1240_v11 = vpop.f32.mrb[10].mxu0 }
 0x801   : > { %v1244_v24 = vadd.f32 %v1240_v11, %v2215_v53  ;;  %v1915_v25 = vpop.f32.mrb[11].mxu0  ;;  %v1612_v53 = vld [vmem:[%s2338_s9 + $0x20] sm:$0xff] }
 0x802   : > { %v1980_v55 = vpack.c.bf16 %v1613_v54, %v1612_v53 }
 0x85f   : > { %v1332_v26 = vpop.xlane.xlu1 %1331 }
 0x860   : > { %2021 = vrcp.f32 %v1332_v26  ;;  %v1813_v26 = vld [vmem:[%s2340_s11] ss:$0 sm:$0xff] }
 0x86a   : > { %v2022_v27 = vpop.eup %2021 }
 0x86b   : > { %v1334_v28 = vmul.f32 %v2022_v27, %v2020_v21 }
 0x86d   : > { %1924 = vmatmul.mubr.msk.f32.vlgmr.msra.gmra.mrb[12].mxu0 %vm530_vm2, %v1334_v28  ;;  %v1814_v28 = vld [vmem:[%s2341_s12] ss:$0 sm:$0xff] }
 0x86e   : > { %1939 = vmatprep.mubr.msk.f32.mxu0 %vm2036_vm0, %v2037_v6 }
 0x940   : > { %v1407_v29 = vpop.f32.mrb[12].mxu0 }
 0x941   : > { %v1925_v30 = vpop.f32.mrb[13].mxu0  ;;  %1929 = vmatmul.mubr.msk.f32.vlgmr.msra.gmra.mrb[10].mxu1 %vm530_vm2, %v1407_v29 }
 0x942   : > { %1958 = vmatprep.mubr.msk.f32.mxu1 %vm2036_vm0, %v2037_v6  ;;  %v1523_v6 = vld [vmem:[%s2336_s7] sm:$0xff]  ;;  %1975 = vmatpush3.bf16.msra.mxu1 %v1974_v50 }
 0x943   : > { %v1968_v44 = vpack.c.bf16 %v1524_v43, %v1523_v6  ;;  %1976 = vmatprep.subr.bf16.mxu1 %v2035_v3 }
 0x945   : > { %1969 = vmatpush3.bf16.msra.mxu0 %v1968_v44 }
 0x946   : > { %1970 = vmatprep.subr.bf16.mxu0 %v2035_v3  ;;  %1978 = vmatpush3.bf16.msra.mxu1 %v1977_v52 }
 0x947   : > { %1979 = vmatprep.subr.bf16.mxu1 %v2035_v3 }
 0x94a   : > { %1981 = vmatpush3.bf16.msra.mxu1 %v1980_v55 }
 0x94b   : > { %1982 = vmatprep.subr.bf16.mxu1 %v2035_v3  ;;  %v1614_v3 = vld [vmem:[%s2338_s9 + $0x30] sm:$0xff] }
 0x94c   : > { %v1983_v2 = vpack.c.bf16 %v1615_v1, %v1614_v3 }
 0x94e   : > { %1984 = vmatpush3.bf16.msra.mxu1 %v1983_v2 }
 0xa14   : > { %v1480_v32 = vpop.f32.mrb[10].mxu1 }
 0xa15   : > { %v1484_v33 = vadd.f32 %v1480_v32, %v1244_v24  ;;  %v1930_v34 = vpop.f32.mrb[11].mxu1 }
 0xa17   : > { %v1491_v35 = vadd.f32 %v1806_v31, %v1484_v33 }
 0xa19   : > { %v1492_v36 = vadd.f32 %v1491_v35, %v2154_v8  ;;  %v1525_v8 = vld [vmem:[%s2336_s7 + $0x10] sm:$0xff] }
 0xa1a   : > { %v1971_v46 = vpack.c.bf16 %v1526_v45, %v1525_v8 }
 0xa1b   : > { %v1495_v37 = vsel %vm448_vm1, %v1492_v36, 0.0 }
 0xa1c   : > { %1496 = vadd.xlane.f32.xlu1 %v1495_v37  ;;  %1972 = vmatpush3.bf16.msra.mxu0 %v1971_v46 }
 0xaa9   : > { %v1497_v38 = vpop.xlane.xlu1 %1496 }
 0xaaa   : > { %v1499_v39 = vmul.f32 0.03125, %v1497_v38 }
 0xaac   : > { %v1500_v40 = vsub.f32 %v1492_v36, %v1499_v39 }
 0xaae   : > { %v1501_v41 = vmul.f32 %v1500_v40, %v1500_v40 }
 0xab0   : > { %v1502_v42 = vsel %vm448_vm1, %v1501_v41, 0.0 }
 0xab1   : > { %1503 = vadd.xlane.f32.xlu1 %v1502_v42 }
 0xb3e   : > { %v1504_v56 = vpop.xlane.xlu1 %1503 }
 0xb3f   : > { %v1505_v57 = vmul.f32 0.03125, %v1504_v56 }
 0xb41   : > { %v1506_v58 = vadd.f32 1e-05, %v1505_v57 }
 0xb43   : > { %2023 = vrsqrt.f32 %v1506_v58 }
 0xb4d   : > { %v2024_v59 = vpop.eup %2023 }
 0xb4e   : > { %v1508_v61 = vmul.f32 %v2024_v59, %v1500_v40 }
 0xb50   : > { %v1515_v63 = vmul.f32 %v1807_v60, %v1508_v61 }
 0xb52   : > { %v1522_v0 = vadd.f32 %v1808_v62, %v1515_v63 }
 0xb54   : > { %1940 = vmatmul.mubr.msk.f32.vlgmr.msra.gmra.mrb[14].mxu0 %vm448_vm1, %v1522_v0 }
 0xc27   : > { %v1603_v5 = vpop.f32.mrb[14].mxu0 }
 0xc28   : > { %v1604_v7 = vadd.f32 %v1809_v4, %v1603_v5  ;;  %v1941_v9 = vpop.f32.mrb[15].mxu0 }
 0xc2a   : > { %v1607_v10 = vmax.f32 %v1604_v7, 0.0 }
 0xc2c   : > { %1959 = vmatmul.mubr.msk.f32.vlgmr.msra.gmra.mrb[12].mxu1 %vm1623_vm3, %v1607_v10 }
 0xcff   : > { %v1693_v13 = vpop.f32.mrb[12].mxu1 }
 0xd00   : > { %v1694_v14 = vadd.f32 %v1811_v12, %v1693_v13  ;;  %v1960_v15 = vpop.f32.mrb[13].mxu1 }
 0xd02   : > { %v1697_v16 = vadd.f32 %v1694_v14, %v1522_v0 }
 0xd04   : > { %v1700_v17 = vsel %vm448_vm1, %v1697_v16, 0.0 }
 0xd05   : > { %1701 = vadd.xlane.f32.xlu1 %v1700_v17 }
 0xd92   : > { %v1702_v18 = vpop.xlane.xlu1 %1701 }
 0xd93   : > { %v1703_v19 = vmul.f32 0.03125, %v1702_v18 }
 0xd95   : > { %v1704_v20 = vsub.f32 %v1697_v16, %v1703_v19 }
 0xd97   : > { %v1705_v21 = vmul.f32 %v1704_v20, %v1704_v20 }
 0xd99   : > { %v1706_v22 = vsel %vm448_vm1, %v1705_v21, 0.0 }
 0xd9a   : > { %1707 = vadd.xlane.f32.xlu1 %v1706_v22 }
 0xe27   : > { %v1708_v23 = vpop.xlane.xlu1 %1707 }
 0xe28   : > { %v1709_v11 = vmul.f32 0.03125, %v1708_v23 }
 0xe2a   : > { %v1710_v24 = vadd.f32 1e-05, %v1709_v11 }
 0xe2c   : > { %2025 = vrsqrt.f32 %v1710_v24 }
 0xe36   : > { %v2026_v25 = vpop.eup %2025 }
 0xe37   : > { %v1712_v27 = vmul.f32 %v2026_v25, %v1704_v20 }
 0xe39   : > { %v1719_v29 = vmul.f32 %v1813_v26, %v1712_v27 }
 0xe3b   : > { %v1726_v30 = vadd.f32 %v1814_v28, %v1719_v29 }
 0xe3d   : > { %1727 = vst.msk [vmem:[%s435_s29] sm:$0xff] %vm448_vm1, %v1726_v30 }
 0xe3e PF: > { %s23_s25 = sadd.s32 1, %s2033_s25  }
 0xe3f   : > { %p20_p4 = scmp.ge.s32.totalorder %s23_s25, 4  }
 0xe41   :  { %22 = sbr.rel (!%p20_p4) target bundleno = 1 (0x1), region = 102 }

// kernel: _lambda_.8
= control target key start
LH: loop header
LB: loop body
LE: loop exit
PB: predicated region body
PF: predicated region fallthrough
CT: control target
= control target key end

     0   :  { %8 = vsyncpa [#allocation3], 0  ;;  %s537_s0 = inlined_call_operand.vmem [shape: f32[2,8,32], index: 0, kind: input, shape index: {}]   ;;  %s538_s1 = inlined_call_operand.hbm [shape: f32[1,32], index: 1, kind: input, shape index: {}]   ;;  %s539_s2 = inlined_call_operand.hbm [shape: f32[1,32], index: 2, kind: input, shape index: {}]   ;;  %s540_s3 = inlined_call_operand.vmem [shape: f32[2,8,32], index: 3, kind: output, shape index: {}]  }
   0x1   :  { %9 = vsyncpa [#allocation5], 0  ;;  %s440_s12 = smov 0  }
   0x2 LB: > { %s446_s13 = sadd.s32 4294967295, %s416_s12   ;;  %p302_p0 = scmp.ge.s32.totalorder %s416_s12, 1  ;;  %s416_s12 = sphi %s440_s12, %s15_s12  }
   0x3   : > { %p114_p1 = scmp.lt.s32.totalorder %s416_s12, 3  ;;  %p541_p2 = scmp.eq.s32.totalorder %s446_s13, 0 }
   0x4   : > { %s418_s15 = smov [#allocation2]   ;;  %s419_s17 = smov [#allocation4]  }
   0x5   : > { %p451_p3 = pnand %p302_p0, %p114_p1  ;;  %s127_s16 = sshll.u32 %s418_s15, 4  ;;  %s128_s16 = int_to_ptr.vmem [resolvable:$true] %s127_s16 }
   0x6   : > { %s138_s18 = sshll.u32 %s419_s17, 4  ;;  %s346_s22 = scalar_lea.hbm %s538_s1, 16  ;;  %s463_s18 = int_to_ptr.vmem [resolvable:$true] %s138_s18 }
   0x7   : > { %s543_s14 = scalar_select %p451_p3, 1, 0 }
   0x8   : > { %p323_p4 = pneg %p451_p3  ;;  %p347_p6 = scmp.ne.s32.totalorder %s538_s1, %s346_s22 }
   0x9   : > { %p353_p10 = scmp.lt.u32.totalorder %s346_s22, %s538_s1 }
   0xa   : > { %p459_p5 = pnand %p541_p2, %p323_p4 }
   0xc   : > { %p348_p7 = pneg %p459_p5 }
   0xe   : > { %p349_p8 = pnand %p348_p7, %p347_p6 }
  0x10   : > { %p350_p9 = pneg %p349_p8 }
  0x12   : > { %p355_p11 = pnand %p353_p10, %p350_p9 }
  0x14   : > { %358 = shalt.err (!%p355_p11)
}
  0x15   : > { %s359_s27 = scalar_lea.vmem %s128_s16, 16  ;;  %s366_s28 = scalar_lea.vmem %s128_s16, 32 }
  0x16   : > { %p360_p12 = scmp.ne.s32.totalorder %s128_s16, %s359_s27  ;;  %p367_p1 = scmp.lt.s32.totalorder %s128_s16, %s128_s16 }
  0x17   : > { %p368_p4 = scmp.lt.s32.totalorder %s366_s28, %s359_s27 }
  0x18   : > { %p362_p13 = pnand %p360_p12, %p348_p7 }
  0x19   : > { %p369_p2 = por %p368_p4, %p367_p1 }
  0x1a   : > { %p363_p0 = pneg %p362_p13 }
  0x1c   : > { %p370_p3 = pnand %p369_p2, %p363_p0 }
  0x1e   : > { %373 = shalt.err (!%p370_p3)
}
  0x1f   : > { %326 = dma.hbm_to_vmem [thread:$0]  (!%p459_p5), %s538_s1, 16, %s128_s16, [#allocation3]  }
  0x20   : > { %s374_s6 = scalar_lea.hbm %s539_s2, 16 }
  0x21   : > { %p375_p6 = scmp.ne.s32.totalorder %s539_s2, %s374_s6  ;;  %p381_p3 = scmp.lt.u32.totalorder %s374_s6, %s539_s2 }
  0x23   : > { %p377_p8 = pnand %p375_p6, %p348_p7 }
  0x25   : > { %p378_p2 = pneg %p377_p8 }
  0x27   : > { %p383_p9 = pnand %p381_p3, %p378_p2 }
  0x29   : > { %386 = shalt.err (!%p383_p9)
}
  0x2a   : > { %s387_s11 = scalar_lea.vmem %s463_s18, 16  ;;  %s394_s15 = scalar_lea.vmem %s463_s18, 32 }
  0x2b   : > { %p388_p10 = scmp.ne.s32.totalorder %s463_s18, %s387_s11  ;;  %p395_p13 = scmp.lt.s32.totalorder %s463_s18, %s463_s18 }
  0x2c   : > { %p396_p0 = scmp.lt.s32.totalorder %s394_s15, %s387_s11 }
  0x2d   : > { %p390_p11 = pnand %p388_p10, %p348_p7 }
  0x2e   : > { %p397_p1 = por %p396_p0, %p395_p13 }
  0x2f   : > { %p391_p12 = pneg %p390_p11 }
  0x31   : > { %p398_p4 = pnand %p397_p1, %p391_p12 }
  0x33   : > { %401 = shalt.err (!%p398_p4)
}
  0x34   : > { %329 = dma.hbm_to_vmem [thread:$0]  (!%p459_p5), %s539_s2, 16, %s463_s18, [#allocation5]  }
  0x35   : > { %p545_p6 = scmp.ne.s32.totalorder %s543_s14, 0 }
  0x36   : > { %p546_p7 = scmp.eq.s32.totalorder (!%p545_p6), %s446_s13, 0 }
  0x37   : > { %158 = sbr.rel (%p545_p6) target bundleno = 386 (0x182), region = 32 }
  0x3e   : > { %407 = dma.done.wait (%p546_p7), [#allocation3], 16   ;;  %p547_p8 = pmov %p546_p7 }
  0x3f   : > { %p548_p2 = pmov %p546_p7 }
  0x40   : > { %409 = vsyncadd (%p547_p8), [#allocation3], 4294967280 }
  0x41   : > { %411 = dma.done.wait (%p548_p2), [#allocation5], 16   ;;  %p549_p3 = pmov %p548_p2 }
  0x42   : > { %p184_p9 = scmp.lt.s32.totalorder %s446_s13, 1  ;;  %vm195_vm0 = vcmask 261120   ;;  %v311_v11 = vld [vmem:[#allocation2] ss:$0 sm:$0xff]  ;;  %v312_v13 = vld [vmem:[#allocation4] ss:$0 sm:$0xff] }
  0x43   : > { %413 = vsyncadd (%p549_p3), [#allocation5], 4294967280 }
  0x44   : > { %s551_s13 = smov (!%p184_p9, %s446_s13), 1 }
  0x45   : > { %s309_s18 = sshll.u32 %s551_s13, 3 }
  0x46   : > { %s187_s20 = scalar_lea.vmem %s537_s0, %s309_s18  ;;  %s191_s22 = scalar_lea.vmem %s540_s3, %s309_s18 }
  0x47   : > { %v192_v0 = vld [vmem:[%s187_s20] sm:$0xff] }
  0x48   : > { %v196_v1 = vsel %vm195_vm0, %v192_v0, 0.0 }
  0x49   : > { %197 = vadd.xlane.f32.xlu0 %v196_v1 }
  0xd6   : > { %v198_v2 = vpop.xlane.xlu0 %197 }
  0xd7   : > { %v200_v3 = vmul.f32 0.03125, %v198_v2 }
  0xd9   : > { %v201_v4 = vsub.f32 %v192_v0, %v200_v3 }
  0xdb   : > { %v202_v5 = vmul.f32 %v201_v4, %v201_v4 }
  0xdd   : > { %v203_v6 = vsel %vm195_vm0, %v202_v5, 0.0 }
  0xde   : > { %204 = vadd.xlane.f32.xlu0 %v203_v6 }
 0x16b   : > { %v205_v7 = vpop.xlane.xlu0 %204 }
 0x16c   : > { %v206_v8 = vmul.f32 0.03125, %v205_v7 }
 0x16e   : > { %v207_v9 = vadd.f32 1e-05, %v206_v8 }
 0x170   : > { %344 = vrsqrt.f32 %v207_v9 }
 0x17a   : > { %v345_v10 = vpop.eup %344 }
 0x17b   : > { %v209_v12 = vmul.f32 %v345_v10, %v201_v4 }
 0x17d   : > { %v216_v14 = vmul.f32 %v311_v11, %v209_v12 }
 0x17f   : > { %v223_v15 = vadd.f32 %v312_v13, %v216_v14 }
 0x181   : > { %224 = vst.msk [vmem:[%s191_s22] sm:$0xff] %vm195_vm0, %v223_v15 }
 0x182 PF: > { %s15_s12 = sadd.s32 1, %s416_s12  }
 0x183   : > { %p12_p5 = scmp.ge.s32.totalorder %s15_s12, 4  }
 0x185   :  { %14 = sbr.rel (!%p12_p5) target bundleno = 2 (0x2), region = 71 }
 0x18c   :  { %244 = vsyncpa [#allocation3], 1 }
 0x18d   :  { %246 = vsyncpa [#allocation3 + $0x1], 1 }
 0x18e   :  { %247 = vsyncpa [#allocation5], 1 }

// kernel: _lambda_.9
= control target key start
LH: loop header
LB: loop body
LE: loop exit
PB: predicated region body
PF: predicated region fallthrough
CT: control target
= control target key end

     0   :  { %s5302_s0 = inlined_call_operand.vmem [shape: f32[2,8,32], index: 0, kind: input, shape index: {}]   ;;  %s5303_s1 = inlined_call_operand.vmem [shape: f32[2,8,32], index: 1, kind: input, shape index: {}]   ;;  %s5304_s2 = inlined_call_operand.vmem [shape: f32[32,96], index: 2, kind: input, shape index: {}]   ;;  %s5305_s3 = inlined_call_operand.hbm [shape: f32[1,96], index: 3, kind: input, shape index: {}]   ;;  %s5306_s4 = inlined_call_operand.vmem [shape: f32[32,32], index: 4, kind: input, shape index: {}]   ;;  %s5307_s5 = inlined_call_operand.hbm [shape: f32[1,32], index: 5, kind: input, shape index: {}]   ;;  %s5308_s6 = inlined_call_operand.hbm [shape: f32[1,32], index: 6, kind: input, shape index: {}]   ;;  %s5309_s7 = inlined_call_operand.hbm [shape: f32[1,32], index: 7, kind: input, shape index: {}]   ;;  %s5310_s8 = inlined_call_operand.vmem [shape: f32[32,32], index: 8, kind: input, shape index: {}]   ;;  %s5311_s9 = inlined_call_operand.hbm [shape: f32[1,32], index: 9, kind: input, shape index: {}]   ;;  %s5312_s10 = inlined_call_operand.vmem [shape: f32[32,64], index: 10, kind: input, shape index: {}]   ;;  %s5313_s11 = inlined_call_operand.hbm [shape: f32[1,64], index: 11, kind: input, shape index: {}]   ;;  %s5314_s12 = inlined_call_operand.vmem [shape: f32[32,32], index: 12, kind: input, shape index: {}]   ;;  %s5315_s13 = inlined_call_operand.hbm [shape: f32[1,32], index: 13, kind: input, shape index: {}]   ;;  %s5316_s14 = inlined_call_operand.hbm [shape: f32[1,32], index: 14, kind: input, shape index: {}]   ;;  %s5317_s15 = inlined_call_operand.hbm [shape: f32[1,32], index: 15, kind: input, shape index: {}]   ;;  %s5318_s16 = inlined_call_operand.vmem [shape: f32[32,64], index: 16, kind: input, shape index: {}]   ;;  %s5319_s17 = inlined_call_operand.hbm [shape: f32[1,64], index: 17, kind: input, shape index: {}]   ;;  %s5320_s18 = inlined_call_operand.vmem [shape: f32[64,32], index: 18, kind: input, shape index: {}]   ;;  %s5321_s19 = inlined_call_operand.hbm [shape: f32[1,32], index: 19, kind: input, shape index: {}]   ;;  %s5322_s20 = inlined_call_operand.hbm [shape: f32[1,32], index: 20, kind: input, shape index: {}]   ;;  %s5323_s21 = inlined_call_operand.hbm [shape: f32[1,32], index: 21, kind: input, shape index: {}]   ;;  %s5324_s22 = inlined_call_operand.vmem [shape: f32[2,8,32], index: 22, kind: output, shape index: {}]  }
   0x1   :  { %5342 = sst [smem:[#allocation30_spill]] %s5302_s0 }
   0x2   :  { %5343 = sst [smem:[#allocation31_spill]] %s5303_s1 }
   0x3   :  { %5344 = sst [smem:[#allocation32_spill]] %s5304_s2 }
   0x4   :  { %5345 = sst [smem:[#allocation33_spill]] %s5305_s3 }
   0x5   :  { %5346 = sst [smem:[#allocation34_spill]] %s5306_s4 }
   0x6   :  { %5347 = sst [smem:[#allocation35_spill]] %s5307_s5 }
   0x7   :  { %5348 = sst [smem:[#allocation36_spill]] %s5308_s6 }
   0x8   :  { %5349 = sst [smem:[#allocation37_spill]] %s5309_s7 }
   0x9   :  { %5350 = sst [smem:[#allocation38_spill]] %s5313_s11 }
   0xa   :  { %5351 = sst [smem:[#allocation39_spill]] %s5318_s16 }
   0xb   :  { %5352 = sst [smem:[#allocation40_spill]] %s5320_s18 }
   0xc   :  { %5353 = sst [smem:[#allocation41_spill]] %s5324_s22 }
   0xd   :  { %27 = vsyncpa [#allocation3], 0 }
   0xe   :  { %28 = vsyncpa [#allocation5], 0 }
   0xf   :  { %29 = vsyncpa [#allocation8], 0 }
  0x10   :  { %30 = vsyncpa [#allocation11], 0 }
  0x11   :  { %31 = vsyncpa [#allocation14], 0 }
  0x12   :  { %32 = vsyncpa [#allocation17], 0 }
  0x13   :  { %33 = vsyncpa [#allocation20], 0  ;;  %s4633_s3 = smov 0  }
  0x14 LB: > { %5354 = sst [smem:[#allocation29_spill]] %s4489_s3  ;;  %s4491_s28 = smov [#allocation4]   ;;  %s4489_s3 = sphi %s4633_s3, %s39_s3  }
  0x15   : > { %s572_s29 = sshll.u32 %s4491_s28, 4  ;;  %s4639_s30 = sadd.s32 4294967295, %s4489_s3   ;;  %s4644_s29 = int_to_ptr.vmem [resolvable:$true] %s572_s29 }
  0x16   : > { %p3520_p0 = scmp.ge.s32.totalorder %s4489_s3, 1  ;;  %p542_p1 = scmp.lt.s32.totalorder %s4489_s3, 3 }
  0x17   : > { %p5333_p2 = scmp.eq.s32.totalorder %s4639_s30, 0  ;;  %s4492_s0 = smov [#allocation7]  }
  0x18   : > { %p4646_p3 = pnand %p3520_p0, %p542_p1  ;;  %s594_s23 = sshll.u32 %s4492_s0, 4  ;;  %s4652_s23 = int_to_ptr.vmem [resolvable:$true] %s594_s23 }
  0x19   : > { %s4493_s1 = smov [#allocation10]   ;;  %s4494_s6 = smov [#allocation13]  }
  0x1a   : > { %s5355_s4 = scalar_select %p4646_p3, 1, 0 }
  0x1b   : > { %p3952_p4 = pneg %p4646_p3  ;;  %s622_s5 = sshll.u32 %s4493_s1, 4  ;;  %s4660_s5 = int_to_ptr.vmem [resolvable:$true] %s622_s5 }
  0x1c   : > { %s647_s25 = sshll.u32 %s4494_s6, 4  ;;  %s5357_s27 = sld [smem:[#allocation35_spill]]  ;;  %s4662_s25 = int_to_ptr.vmem [resolvable:$true] %s647_s25 }
  0x1d   : > { %p4656_p5 = pnand %p5333_p2, %p3952_p4 }
  0x1f   : > { %p4672_p7 = pneg %p4656_p5 }
  0x22   : > { %s4091_s28 = scalar_lea.hbm %s5357_s27, 16 }
  0x23   : > { %p4092_p6 = scmp.ne.s32.totalorder %s5357_s27, %s4091_s28  ;;  %p4098_p10 = scmp.lt.u32.totalorder %s4091_s28, %s5357_s27 }
  0x25   : > { %p4094_p8 = pnand %p4672_p7, %p4092_p6 }
  0x27   : > { %p4095_p9 = pneg %p4094_p8 }
  0x29   : > { %p4100_p11 = pnand %p4098_p10, %p4095_p9 }
  0x2b   : > { %4103 = shalt.err (!%p4100_p11)
}
  0x2c   : > { %s4104_s3 = scalar_lea.vmem %s4644_s29, 16  ;;  %s4111_s26 = scalar_lea.vmem %s4644_s29, 32 }
  0x2d   : > { %p4105_p12 = scmp.ne.s32.totalorder %s4644_s29, %s4104_s3  ;;  %p4112_p1 = scmp.lt.s32.totalorder %s4644_s29, %s4644_s29 }
  0x2e   : > { %p4113_p4 = scmp.lt.s32.totalorder %s4111_s26, %s4104_s3 }
  0x2f   : > { %p4107_p13 = pnand %p4105_p12, %p4672_p7 }
  0x30   : > { %p4114_p6 = por %p4113_p4, %p4112_p1 }
  0x31   : > { %p4108_p0 = pneg %p4107_p13 }
  0x33   : > { %p4115_p8 = pnand %p4114_p6, %p4108_p0 }
  0x35   : > { %4118 = shalt.err (!%p4115_p8)
}
  0x36   : > { %3958 = dma.hbm_to_vmem [thread:$0]  (!%p4656_p5), %s5357_s27, 16, %s4644_s29, [#allocation5]  }
  0x37   : > { %s5359_s7 = sld [smem:[#allocation37_spill]] }
  0x3d   : > { %s4119_s6 = scalar_lea.hbm %s5359_s7, 16 }
  0x3e   : > { %p4120_p9 = scmp.ne.s32.totalorder %s5359_s7, %s4119_s6  ;;  %p4126_p12 = scmp.lt.u32.totalorder %s4119_s6, %s5359_s7 }
  0x40   : > { %p4122_p10 = pnand %p4120_p9, %p4672_p7 }
  0x42   : > { %p4123_p11 = pneg %p4122_p10 }
  0x44   : > { %p4128_p13 = pnand %p4126_p12, %p4123_p11 }
  0x46   : > { %4131 = shalt.err (!%p4128_p13)
}
  0x47   : > { %s4132_s29 = scalar_lea.vmem %s4652_s23, 16  ;;  %s4139_s16 = scalar_lea.vmem %s4652_s23, 32 }
  0x48   : > { %p4133_p0 = scmp.ne.s32.totalorder %s4652_s23, %s4132_s29  ;;  %p4140_p6 = scmp.lt.s32.totalorder %s4652_s23, %s4652_s23 }
  0x49   : > { %p4141_p8 = scmp.lt.s32.totalorder %s4139_s16, %s4132_s29 }
  0x4a   : > { %p4135_p1 = pnand %p4133_p0, %p4672_p7 }
  0x4b   : > { %p4142_p9 = por %p4141_p8, %p4140_p6 }
  0x4c   : > { %p4136_p4 = pneg %p4135_p1 }
  0x4e   : > { %p4143_p10 = pnand %p4142_p9, %p4136_p4 }
  0x50   : > { %4146 = shalt.err (!%p4143_p10)
}
  0x51   : > { %3964 = dma.hbm_to_vmem [thread:$0]  (!%p4656_p5), %s5359_s7, 16, %s4652_s23, [#allocation8]  }
  0x52   : > { %s5360_s11 = sld [smem:[#allocation38_spill]] }
  0x58   : > { %s4147_s0 = scalar_lea.hbm %s5360_s11, 16 }
  0x59   : > { %p4148_p11 = scmp.ne.s32.totalorder %s5360_s11, %s4147_s0  ;;  %p4154_p0 = scmp.lt.u32.totalorder %s4147_s0, %s5360_s11 }
  0x5b   : > { %p4150_p12 = pnand %p4148_p11, %p4672_p7 }
  0x5d   : > { %p4151_p13 = pneg %p4150_p12 }
  0x5f   : > { %p4156_p1 = pnand %p4154_p0, %p4151_p13 }
  0x61   : > { %4159 = shalt.err (!%p4156_p1)
}
  0x62   : > { %s4160_s23 = scalar_lea.vmem %s4660_s5, 16  ;;  %s4167_s16 = scalar_lea.vmem %s4660_s5, 32 }
  0x63   : > { %p4161_p4 = scmp.ne.s32.totalorder %s4660_s5, %s4160_s23  ;;  %p4168_p9 = scmp.lt.s32.totalorder %s4660_s5, %s4660_s5 }
  0x64   : > { %p4169_p10 = scmp.lt.s32.totalorder %s4167_s16, %s4160_s23 }
  0x65   : > { %p4163_p6 = pnand %p4161_p4, %p4672_p7 }
  0x66   : > { %p4170_p11 = por %p4169_p10, %p4168_p9 }
  0x67   : > { %p4164_p8 = pneg %p4163_p6 }
  0x69   : > { %p4171_p12 = pnand %p4170_p11, %p4164_p8 }
  0x6b   : > { %4174 = shalt.err (!%p4171_p12)
}
  0x6c   : > { %3970 = dma.hbm_to_vmem [thread:$0]  (!%p4656_p5), %s5360_s11, 16, %s4660_s5, [#allocation11]  }
  0x6d   : > { %s4175_s0 = scalar_lea.hbm %s5316_s14, 16 }
  0x6e   : > { %p4176_p13 = scmp.ne.s32.totalorder %s5316_s14, %s4175_s0  ;;  %p4182_p4 = scmp.lt.u32.totalorder %s4175_s0, %s5316_s14 }
  0x70   : > { %p4178_p0 = pnand %p4176_p13, %p4672_p7 }
  0x72   : > { %p4179_p1 = pneg %p4178_p0 }
  0x74   : > { %p4184_p6 = pnand %p4182_p4, %p4179_p1 }
  0x76   : > { %4187 = shalt.err (!%p4184_p6)
}
  0x77   : > { %s4188_s5 = scalar_lea.vmem %s4662_s25, 16  ;;  %s4195_s23 = scalar_lea.vmem %s4662_s25, 32 }
  0x78   : > { %p4189_p8 = scmp.ne.s32.totalorder %s4662_s25, %s4188_s5  ;;  %p4196_p11 = scmp.lt.s32.totalorder %s4662_s25, %s4662_s25 }
  0x79   : > { %p4197_p12 = scmp.lt.s32.totalorder %s4195_s23, %s4188_s5 }
  0x7a   : > { %p4191_p9 = pnand %p4189_p8, %p4672_p7 }
  0x7b   : > { %p4198_p13 = por %p4197_p12, %p4196_p11 }
  0x7c   : > { %p4192_p10 = pneg %p4191_p9 }
  0x7e   : > { %p4199_p0 = pnand %p4198_p13, %p4192_p10 }
  0x80   : > { %4202 = shalt.err (!%p4199_p0)
}
  0x81   : > { %3976 = dma.hbm_to_vmem [thread:$0]  (!%p4656_p5), %s5316_s14, 16, %s4662_s25, [#allocation14]  }
  0x82   : > { %s4495_s22 = smov [#allocation16]   ;;  %s4496_s28 = smov [#allocation19]  }
  0x83   : > { %s672_s2 = sshll.u32 %s4495_s22, 4  ;;  %s697_s0 = sshll.u32 %s4496_s28, 4  ;;  %s673_s2 = int_to_ptr.vmem [resolvable:$true] %s672_s2  ;;  %s698_s0 = int_to_ptr.vmem [resolvable:$true] %s697_s0 }
  0x84   : > { %s4203_s26 = scalar_lea.hbm %s5319_s17, 16 }
  0x85   : > { %p4204_p1 = scmp.ne.s32.totalorder %s5319_s17, %s4203_s26  ;;  %p4210_p8 = scmp.lt.u32.totalorder %s4203_s26, %s5319_s17 }
  0x87   : > { %p4206_p4 = pnand %p4204_p1, %p4672_p7 }
  0x89   : > { %p4207_p6 = pneg %p4206_p4 }
  0x8b   : > { %p4212_p9 = pnand %p4210_p8, %p4207_p6 }
  0x8d   : > { %4215 = shalt.err (!%p4212_p9)
}
  0x8e   : > { %s4216_s25 = scalar_lea.vmem %s673_s2, 16  ;;  %s4223_s18 = scalar_lea.vmem %s673_s2, 32 }
  0x8f   : > { %p4217_p10 = scmp.ne.s32.totalorder %s673_s2, %s4216_s25  ;;  %p4224_p13 = scmp.lt.s32.totalorder %s673_s2, %s673_s2 }
  0x90   : > { %p4225_p0 = scmp.lt.s32.totalorder %s4223_s18, %s4216_s25 }
  0x91   : > { %p4219_p11 = pnand %p4217_p10, %p4672_p7 }
  0x92   : > { %p4226_p2 = por %p4225_p0, %p4224_p13 }
  0x93   : > { %p4220_p12 = pneg %p4219_p11 }
  0x95   : > { %p4227_p3 = pnand %p4226_p2, %p4220_p12 }
  0x97   : > { %4230 = shalt.err (!%p4227_p3)
}
  0x98   : > { %3982 = dma.hbm_to_vmem [thread:$0]  (!%p4656_p5), %s5319_s17, 16, %s673_s2, [#allocation17]  }
  0x99   : > { %s4231_s26 = scalar_lea.hbm %s5322_s20, 16 }
  0x9a   : > { %p4232_p1 = scmp.ne.s32.totalorder %s5322_s20, %s4231_s26  ;;  %p4238_p3 = scmp.lt.u32.totalorder %s4231_s26, %s5322_s20 }
  0x9c   : > { %p4234_p4 = pnand %p4232_p1, %p4672_p7 }
  0x9e   : > { %p4235_p2 = pneg %p4234_p4 }
  0xa0   : > { %p4240_p6 = pnand %p4238_p3, %p4235_p2 }
  0xa2   : > { %4243 = shalt.err (!%p4240_p6)
}
  0xa3   : > { %s4244_s25 = scalar_lea.vmem %s698_s0, 16  ;;  %s4251_s2 = scalar_lea.vmem %s698_s0, 32 }
  0xa4   : > { %p4245_p8 = scmp.ne.s32.totalorder %s698_s0, %s4244_s25  ;;  %p4252_p11 = scmp.lt.s32.totalorder %s698_s0, %s698_s0 }
  0xa5   : > { %p4253_p12 = scmp.lt.s32.totalorder %s4251_s2, %s4244_s25 }
  0xa6   : > { %p4247_p9 = pnand %p4245_p8, %p4672_p7 }
  0xa7   : > { %p4254_p13 = por %p4253_p12, %p4252_p11 }
  0xa8   : > { %p4248_p10 = pneg %p4247_p9 }
  0xaa   : > { %p4255_p0 = pnand %p4254_p13, %p4248_p10 }
  0xac   : > { %4258 = shalt.err (!%p4255_p0)
}
  0xad   : > { %3988 = dma.hbm_to_vmem [thread:$0]  (!%p4656_p5), %s5322_s20, 16, %s698_s0, [#allocation20]  }
  0xae   : > { %s4497_s28 = smov [#allocation2]   ;;  %s4498_s3 = smov [#allocation6]  }
  0xaf   : > { %s558_s6 = sshll.u32 %s4497_s28, 4  ;;  %s583_s26 = sshll.u32 %s4498_s3, 4  ;;  %s559_s6 = int_to_ptr.vmem [resolvable:$true] %s558_s6  ;;  %s584_s26 = int_to_ptr.vmem [resolvable:$true] %s583_s26 }
  0xb0   : > { %s5361_s23 = sld [smem:[#allocation33_spill]] }
  0xb6   : > { %s4259_s16 = scalar_lea.hbm %s5361_s23, 16 }
  0xb7   : > { %p4260_p1 = scmp.ne.s32.totalorder %s5361_s23, %s4259_s16  ;;  %p4266_p3 = scmp.lt.u32.totalorder %s4259_s16, %s5361_s23 }
  0xb9   : > { %p4262_p4 = pnand %p4260_p1, %p4672_p7 }
  0xbb   : > { %p4263_p2 = pneg %p4262_p4 }
  0xbd   : > { %p4268_p6 = pnand %p4266_p3, %p4263_p2 }
  0xbf   : > { %4271 = shalt.err (!%p4268_p6)
}
  0xc0   : > { %s4272_s0 = scalar_lea.vmem %s559_s6, 16  ;;  %s4279_s22 = scalar_lea.vmem %s559_s6, 32 }
  0xc1   : > { %p4273_p8 = scmp.ne.s32.totalorder %s559_s6, %s4272_s0  ;;  %p4280_p11 = scmp.lt.s32.totalorder %s559_s6, %s559_s6 }
  0xc2   : > { %p4281_p12 = scmp.lt.s32.totalorder %s4279_s22, %s4272_s0 }
  0xc3   : > { %p4275_p9 = pnand %p4273_p8, %p4672_p7 }
  0xc4   : > { %p4282_p13 = por %p4281_p12, %p4280_p11 }
  0xc5   : > { %p4276_p10 = pneg %p4275_p9 }
  0xc7   : > { %p4283_p0 = pnand %p4282_p13, %p4276_p10 }
  0xc9   : > { %4286 = shalt.err (!%p4283_p0)
}
  0xca   : > { %3955 = dma.hbm_to_vmem [thread:$0]  (!%p4656_p5), %s5361_s23, 16, %s559_s6, [#allocation3]  }
  0xcb   : > { %s5362_s5 = sld [smem:[#allocation36_spill]] }
  0xd1   : > { %s4287_s16 = scalar_lea.hbm %s5362_s5, 16 }
  0xd2   : > { %p4288_p1 = scmp.ne.s32.totalorder %s5362_s5, %s4287_s16  ;;  %p4294_p3 = scmp.lt.u32.totalorder %s4287_s16, %s5362_s5 }
  0xd4   : > { %p4290_p4 = pnand %p4288_p1, %p4672_p7 }
  0xd6   : > { %p4291_p2 = pneg %p4290_p4 }
  0xd8   : > { %p4296_p6 = pnand %p4294_p3, %p4291_p2 }
  0xda   : > { %4299 = shalt.err (!%p4296_p6)
}
  0xdb   : > { %s4300_s22 = scalar_lea.vmem %s584_s26, 16  ;;  %s4307_s6 = scalar_lea.vmem %s584_s26, 32 }
  0xdc   : > { %p4301_p8 = scmp.ne.s32.totalorder %s584_s26, %s4300_s22  ;;  %p4308_p11 = scmp.lt.s32.totalorder %s584_s26, %s584_s26 }
  0xdd   : > { %p4309_p12 = scmp.lt.s32.totalorder %s4307_s6, %s4300_s22 }
  0xde   : > { %p4303_p9 = pnand %p4301_p8, %p4672_p7 }
  0xdf   : > { %p4310_p13 = por %p4309_p12, %p4308_p11 }
  0xe0   : > { %p4304_p10 = pneg %p4303_p9 }
  0xe2   : > { %p4311_p0 = pnand %p4310_p13, %p4304_p10 }
  0xe4   : > { %4314 = shalt.err (!%p4311_p0)
}
  0xe5   : > { %3961 = dma.hbm_to_vmem [thread:$0]  (!%p4656_p5), %s5362_s5, 16, %s584_s26, [#allocation5]  }
  0xe6   : > { %s4499_s7 = smov [#allocation9]   ;;  %s4500_s16 = smov [#allocation12]  }
  0xe7   : > { %s608_s29 = sshll.u32 %s4499_s7, 4  ;;  %s636_s25 = sshll.u32 %s4500_s16, 4  ;;  %s609_s29 = int_to_ptr.vmem [resolvable:$true] %s608_s29  ;;  %s637_s25 = int_to_ptr.vmem [resolvable:$true] %s636_s25 }
  0xe8   : > { %s4315_s0 = scalar_lea.hbm %s5311_s9, 16 }
  0xe9   : > { %p4316_p1 = scmp.ne.s32.totalorder %s5311_s9, %s4315_s0  ;;  %p4322_p3 = scmp.lt.u32.totalorder %s4315_s0, %s5311_s9 }
  0xeb   : > { %p4318_p4 = pnand %p4316_p1, %p4672_p7 }
  0xed   : > { %p4319_p2 = pneg %p4318_p4 }
  0xef   : > { %p4324_p6 = pnand %p4322_p3, %p4319_p2 }
  0xf1   : > { %4327 = shalt.err (!%p4324_p6)
}
  0xf2   : > { %s4328_s26 = scalar_lea.vmem %s609_s29, 16  ;;  %s4335_s3 = scalar_lea.vmem %s609_s29, 32 }
  0xf3   : > { %p4329_p8 = scmp.ne.s32.totalorder %s609_s29, %s4328_s26  ;;  %p4336_p11 = scmp.lt.s32.totalorder %s609_s29, %s609_s29 }
  0xf4   : > { %p4337_p12 = scmp.lt.s32.totalorder %s4335_s3, %s4328_s26 }
  0xf5   : > { %p4331_p9 = pnand %p4329_p8, %p4672_p7 }
  0xf6   : > { %p4338_p13 = por %p4337_p12, %p4336_p11 }
  0xf7   : > { %p4332_p10 = pneg %p4331_p9 }
  0xf9   : > { %p4339_p0 = pnand %p4338_p13, %p4332_p10 }
  0xfb   : > { %4342 = shalt.err (!%p4339_p0)
}
  0xfc   : > { %3967 = dma.hbm_to_vmem [thread:$0]  (!%p4656_p5), %s5311_s9, 16, %s609_s29, [#allocation8]  }
  0xfd   : > { %s4343_s18 = scalar_lea.hbm %s5315_s13, 16 }
  0xfe   : > { %p4344_p1 = scmp.ne.s32.totalorder %s5315_s13, %s4343_s18  ;;  %p4350_p3 = scmp.lt.u32.totalorder %s4343_s18, %s5315_s13 }
 0x100   : > { %p4346_p4 = pnand %p4344_p1, %p4672_p7 }
 0x102   : > { %p4347_p2 = pneg %p4346_p4 }
 0x104   : > { %p4352_p6 = pnand %p4350_p3, %p4347_p2 }
 0x106   : > { %4355 = shalt.err (!%p4352_p6)
}
 0x107   : > { %s4356_s26 = scalar_lea.vmem %s637_s25, 16  ;;  %s4363_s29 = scalar_lea.vmem %s637_s25, 32 }
 0x108   : > { %p4357_p8 = scmp.ne.s32.totalorder %s637_s25, %s4356_s26  ;;  %p4364_p11 = scmp.lt.s32.totalorder %s637_s25, %s637_s25 }
 0x109   : > { %p4365_p12 = scmp.lt.s32.totalorder %s4363_s29, %s4356_s26 }
 0x10a   : > { %p4359_p9 = pnand %p4357_p8, %p4672_p7 }
 0x10b   : > { %p4366_p13 = por %p4365_p12, %p4364_p11 }
 0x10c   : > { %p4360_p10 = pneg %p4359_p9 }
 0x10e   : > { %p4367_p0 = pnand %p4366_p13, %p4360_p10 }
 0x110   : > { %4370 = shalt.err (!%p4367_p0)
}
 0x111   : > { %3973 = dma.hbm_to_vmem [thread:$0]  (!%p4656_p5), %s5315_s13, 16, %s637_s25, [#allocation11]  }
 0x112   : > { %s4501_s16 = smov [#allocation15]   ;;  %s4502_s2 = smov [#allocation18]  }
 0x113   : > { %s658_s11 = sshll.u32 %s4501_s16, 4  ;;  %s686_s18 = sshll.u32 %s4502_s2, 4  ;;  %s659_s11 = int_to_ptr.vmem [resolvable:$true] %s658_s11  ;;  %s687_s18 = int_to_ptr.vmem [resolvable:$true] %s686_s18 }
 0x114   : > { %s4371_s6 = scalar_lea.hbm %s5317_s15, 16 }
 0x115   : > { %p4372_p1 = scmp.ne.s32.totalorder %s5317_s15, %s4371_s6  ;;  %p4378_p3 = scmp.lt.u32.totalorder %s4371_s6, %s5317_s15 }
 0x117   : > { %p4374_p4 = pnand %p4372_p1, %p4672_p7 }
 0x119   : > { %p4375_p2 = pneg %p4374_p4 }
 0x11b   : > { %p4380_p6 = pnand %p4378_p3, %p4375_p2 }
 0x11d   : > { %4383 = shalt.err (!%p4380_p6)
}
 0x11e   : > { %s4384_s25 = scalar_lea.vmem %s659_s11, 16  ;;  %s4391_s7 = scalar_lea.vmem %s659_s11, 32 }
 0x11f   : > { %p4385_p8 = scmp.ne.s32.totalorder %s659_s11, %s4384_s25  ;;  %p4392_p11 = scmp.lt.s32.totalorder %s659_s11, %s659_s11 }
 0x120   : > { %p4393_p12 = scmp.lt.s32.totalorder %s4391_s7, %s4384_s25 }
 0x121   : > { %p4387_p9 = pnand %p4385_p8, %p4672_p7 }
 0x122   : > { %p4394_p13 = por %p4393_p12, %p4392_p11 }
 0x123   : > { %p4388_p10 = pneg %p4387_p9 }
 0x125   : > { %p4395_p0 = pnand %p4394_p13, %p4388_p10 }
 0x127   : > { %4398 = shalt.err (!%p4395_p0)
}
 0x128   : > { %3979 = dma.hbm_to_vmem [thread:$0]  (!%p4656_p5), %s5317_s15, 16, %s659_s11, [#allocation14]  }
 0x129   : > { %s4399_s6 = scalar_lea.hbm %s5321_s19, 16 }
 0x12a   : > { %p4400_p1 = scmp.ne.s32.totalorder %s5321_s19, %s4399_s6  ;;  %p4406_p3 = scmp.lt.u32.totalorder %s4399_s6, %s5321_s19 }
 0x12c   : > { %p4402_p4 = pnand %p4400_p1, %p4672_p7 }
 0x12e   : > { %p4403_p2 = pneg %p4402_p4 }
 0x130   : > { %p4408_p6 = pnand %p4406_p3, %p4403_p2 }
 0x132   : > { %4411 = shalt.err (!%p4408_p6)
}
 0x133   : > { %s4412_s25 = scalar_lea.vmem %s687_s18, 16  ;;  %s4419_s11 = scalar_lea.vmem %s687_s18, 32 }
 0x134   : > { %p4413_p8 = scmp.ne.s32.totalorder %s687_s18, %s4412_s25  ;;  %p4420_p11 = scmp.lt.s32.totalorder %s687_s18, %s687_s18 }
 0x135   : > { %p4421_p12 = scmp.lt.s32.totalorder %s4419_s11, %s4412_s25 }
 0x136   : > { %p4415_p9 = pnand %p4413_p8, %p4672_p7 }
 0x137   : > { %p4422_p13 = por %p4421_p12, %p4420_p11 }
 0x138   : > { %p4416_p10 = pneg %p4415_p9 }
 0x13a   : > { %p4423_p0 = pnand %p4422_p13, %p4416_p10 }
 0x13c   : > { %4426 = shalt.err (!%p4423_p0)
}
 0x13d   : > { %3985 = dma.hbm_to_vmem [thread:$0]  (!%p4656_p5), %s5321_s19, 16, %s687_s18, [#allocation17]  }
 0x13e   : > { %s4503_s2 = smov [#allocation21]   ;;  %s4427_s28 = scalar_lea.hbm %s5323_s21, 16 }
 0x13f   : > { %s708_s0 = sshll.u32 %s4503_s2, 4  ;;  %p4428_p1 = scmp.ne.s32.totalorder %s5323_s21, %s4427_s28  ;;  %s709_s0 = int_to_ptr.vmem [resolvable:$true] %s708_s0 }
 0x140   : > { %p4434_p3 = scmp.lt.u32.totalorder %s4427_s28, %s5323_s21 }
 0x141   : > { %p4430_p4 = pnand %p4428_p1, %p4672_p7 }
 0x143   : > { %p4431_p2 = pneg %p4430_p4 }
 0x145   : > { %p4436_p6 = pnand %p4434_p3, %p4431_p2 }
 0x147   : > { %4439 = shalt.err (!%p4436_p6)
}
 0x148   : > { %s4440_s18 = scalar_lea.vmem %s709_s0, 16  ;;  %s4447_s11 = scalar_lea.vmem %s709_s0, 32 }
 0x149   : > { %p4441_p8 = scmp.ne.s32.totalorder %s709_s0, %s4440_s18  ;;  %p4448_p11 = scmp.lt.s32.totalorder %s709_s0, %s709_s0 }
 0x14a   : > { %p4449_p12 = scmp.lt.s32.totalorder %s4447_s11, %s4440_s18 }
 0x14b   : > { %p4443_p9 = pnand %p4441_p8, %p4672_p7 }
 0x14c   : > { %p4450_p13 = por %p4449_p12, %p4448_p11 }
 0x14d   : > { %p4444_p10 = pneg %p4443_p9 }
 0x14f   : > { %p4451_p0 = pnand %p4450_p13, %p4444_p10 }
 0x151   : > { %4454 = shalt.err (!%p4451_p0)
}
 0x152   : > { %3991 = dma.hbm_to_vmem [thread:$0]  (!%p4656_p5), %s5323_s21, 16, %s709_s0, [#allocation20]  }
 0x153   : > { %p5363_p1 = scmp.ne.s32.totalorder %s5355_s4, 0 }
 0x154   : > { %p5364_p4 = scmp.eq.s32.totalorder (!%p5363_p1), %s4639_s30, 0 }
 0x155   : > { %735 = sbr.rel (%p5363_p1) target bundleno = 6891 (0x1aeb), region = 108 }
 0x15c   : > { %4460 = dma.done.wait (%p5364_p4), [#allocation3], 16   ;;  %p5365_p7 = pmov %p5364_p4 }
 0x15d   : > { %p5366_p2 = pmov %p5364_p4 }
 0x15e   : > { %4462 = vsyncadd (%p5365_p7), [#allocation3], 4294967280 }
 0x15f   : > { %4464 = dma.done.wait (%p5366_p2), [#allocation5], 32   ;;  %p5367_p3 = pmov %p5366_p2 }
 0x160   : > { %p5368_p6 = pmov %p5366_p2 }
 0x161   : > { %4466 = vsyncadd (%p5367_p3), [#allocation5], 4294967264 }
 0x162   : > { %4468 = dma.done.wait (%p5368_p6), [#allocation8], 32   ;;  %p5369_p5 = pmov %p5366_p2 }
 0x163   : > { %p5370_p8 = pmov %p5366_p2 }
 0x164   : > { %4470 = vsyncadd (%p5369_p5), [#allocation8], 4294967264 }
 0x165   : > { %4472 = dma.done.wait (%p5370_p8), [#allocation11], 32   ;;  %p5371_p9 = pmov %p5366_p2 }
 0x166   : > { %p5372_p10 = pmov %p5366_p2 }
 0x167   : > { %4474 = vsyncadd (%p5371_p9), [#allocation11], 4294967264 }
 0x168   : > { %4476 = dma.done.wait (%p5372_p10), [#allocation14], 32   ;;  %p5373_p11 = pmov %p5366_p2 }
 0x169   : > { %p5374_p12 = pmov %p5366_p2 }
 0x16a   : > { %4478 = vsyncadd (%p5373_p11), [#allocation14], 4294967264 }
 0x16b   : > { %4480 = dma.done.wait (%p5374_p12), [#allocation17], 32   ;;  %p5375_p13 = pmov %p5366_p2 }
 0x16c   : > { %p5376_p0 = pmov %p5366_p2 }
 0x16d   : > { %4482 = vsyncadd (%p5375_p13), [#allocation17], 4294967264 }
 0x16e   : > { %4484 = dma.done.wait (%p5376_p0), [#allocation20], 32   ;;  %p5377_p1 = pmov %p5376_p0 }
 0x16f   : > { %p847_p4 = scmp.lt.s32.totalorder %s4639_s30, 1  ;;  %v4504_v0 = vmov 0.0|0.0   ;;  %vm4505_vm0 = vmmov 0   ;;  %v4506_v1 = vmov 0.0   ;;  %s5378_s1 = sld [smem:[#allocation32_spill]]  ;;  %vm872_vm1 = vcmask 261120  }
 0x170   : > { %4486 = vsyncadd (%p5377_p1), [#allocation20], 4294967264  ;;  %3864 = vmatprep.subr.bf16.mxu0 %v4504_v0  ;;  %3689 = vmatprep.mubr.msk.f32.mxu0 %vm4505_vm0, %v4506_v1  ;;  %s5379_s18 = sld [smem:[#allocation30_spill]]  ;;  %v3552_v9 = vld [vmem:[#allocation2] ss:$0 sm:$0xff]  ;;  %s5339_s7 = smov 96   ;;  %v1030_v16 = vlaneseq }
 0x171   : > { %3697 = vmatprep.subr.mxu1 %v4506_v1  ;;  %3699 = vmatprep.mubr.msk.f32.mxu1 %vm4505_vm0, %v4506_v1  ;;  %s5392_s30 = smov (!%p847_p4, %s4639_s30), 1  ;;  %s4509_s16 = smov 88   ;;  %vm954_vm2 = vcmask 64512   ;;  %vm3222_vm4 = vcmask 523264  }
 0x172   : > { %s4978_s29 = sshll.u32 %s5392_s30, 3  ;;  %s4507_s30 = smov 120   ;;  %v5011_v17 = vshrl.u32 %v1030_v16, 7  ;;  %v5013_v18 = vand.u32 127, %v1030_v16 }
 0x173   : > { %s4510_s4 = smov 56   ;;  %s4511_s24 = smov 64  }
 0x174   : > { %vm1034_vm3 = vcmp.gt.s32.totalorder %v5013_v18, %v5011_v17  ;;  %s5336_s2 = smov 80   ;;  %s5340_s0 = smov 112  }
 0x175   : > { %v861_v2 = vld [vmem:[%s5378_s1] sm:$0xff]  ;;  %v862_v3 = vld [vmem:[%s5378_s1 + $0x8] sm:$0xff]  ;;  %v863_v4 = vld [vmem:[%s5378_s1 + $0x10] sm:$0xff]  ;;  %s5380_s28 = sld [smem:[#allocation34_spill]]  ;;  %s5335_s25 = smov 72  }
 0x176   : > { %v3865_v5 = vpack.c.bf16 %v862_v3, %v861_v2  ;;  %v864_v6 = vld [vmem:[%s5378_s1 + $0x18] sm:$0xff]  ;;  %s850_s11 = scalar_lea.vmem %s5379_s18, %s4978_s29  ;;  %s5337_s18 = smov 104  }
 0x177   : > { %v3868_v7 = vpack.c.bf16 %v864_v6, %v863_v4  ;;  %v4985_v8 = vld [vmem:[%s850_s11] sm:$0xff]  ;;  %s4516_s11 = smov 48   ;;  %s4517_s22 = smov 40  }
 0x178   : > { %3866 = vmatpush3.bf16.msra.mxu0 %v3865_v5  ;;  %s5384_s3 = smov 104  }
 0x179   : > { %3867 = vmatprep.subr.bf16.mxu0 %v4504_v0 }
 0x17b   : > { %v947_v39 = vld [vmem:[%s5380_s28 + $0x8] sm:$0xff]  ;;  %v946_v48 = vld [vmem:[%s5380_s28] sm:$0xff]  ;;  %v948_v16 = vld [vmem:[%s5380_s28 + $0x10] sm:$0xff] }
 0x17c   : > { %3869 = vmatpush3.bf16.msra.mxu0 %v3868_v7  ;;  %v949_v17 = vld [vmem:[%s5380_s28 + $0x18] sm:$0xff] }
 0x17d   : > { %3692 = vmatprep.subr.mxu0 %v4506_v1 }
 0x17f   : > { %3690 = vmatmul.mubr.msk.f32.vlgmr.msra.gmra.mrb[0].mxu0 %vm872_vm1, %v4985_v8 }
 0x180   : > { %3694 = vmatprep.mubr.msk.f32.mxu0 %vm4505_vm0, %v4506_v1 }
 0x252   : > { %v942_v10 = vpop.f32.mrb[0].mxu0 }
 0x253   : > { %v4992_v11 = vadd.f32 %v3552_v9, %v942_v10  ;;  %v3691_v12 = vpop.f32.mrb[1].mxu0 }
 0x255   : > { %1123 = vrot.lane.b32.xlu1 %v4992_v11, %s4507_s30  ;;  %952 = vrot.lane.b32.xlu0 %v4992_v11, %s5339_s7  ;;  %s5381_s7 = sld [smem:[#allocation31_spill]] }
 0x259   : > { %1125 = vrot.lane.b32.xlu0 %v4992_v11, %s4509_s16 }
 0x2c7   : > { %v953_v13 = vpop.permute.xlu0 %952  ;;  %v1124_v15 = vpop.permute.xlu1 %1123 }
 0x2c8   : > { %3693 = vmatpush3.xpose.msk.msra.mxu0 %vm954_vm2, %v953_v13 }
 0x2c9   : > { %3702 = vmatprep.subr.mxu0 %v4506_v1 }
 0x2cb   : > { %3695 = vmatmul.mubr.msk.f32.vlgmr.msra.gmra.mrb[2].mxu0 %vm954_vm2, %v4992_v11  ;;  %v1126_v14 = vpop.permute.xlu0 %1125 }
 0x2cc   : > { %3703 = vmatpush3.xpose.msk.msra.mxu0 %vm954_vm2, %v1126_v14  ;;  %3704 = vmatprep.mubr.msk.f32.mxu0 %vm4505_vm0, %v4506_v1 }
 0x2cd   : > { %3712 = vmatprep.subr.mxu0 %v4506_v1 }
 0x2cf   : > { %3705 = vmatmul.mubr.msk.f32.vlgmr.msra.gmra.mrb[4].mxu0 %vm954_vm2, %v1124_v15 }
 0x2d0   : > { %3714 = vmatprep.mubr.msk.f32.mxu0 %vm4505_vm0, %v4506_v1  ;;  %3713 = vmatpush3.msra.mxu0 %v947_v39 }
 0x2d1   : > { %3722 = vmatprep.subr.mxu0 %v4506_v1 }
 0x39e   : > { %v1025_v19 = vpop.f32.mrb[2].mxu0 }
 0x39f   : > { %v1029_v20 = vmul.f32 0.35355338, %v1025_v19  ;;  %v3696_v21 = vpop.f32.mrb[3].mxu0 }
 0x3a1   : > { %v1035_v22 = vsel %vm1034_vm3, -1e+30, %v1029_v20 }
 0x3a2   : > { %v1197_v23 = vpop.f32.mrb[4].mxu0  ;;  %v1036_v24 = vsel %vm954_vm2, %v1035_v22, -inf }
 0x3a3   : > { %v1201_v25 = vmul.f32 0.35355338, %v1197_v23  ;;  %1037 = vmax.xlane.f32.xlu1 %v1036_v24  ;;  %v3706_v26 = vpop.f32.mrb[5].mxu0 }
 0x3a5   : > { %v1202_v27 = vsel %vm1034_vm3, -1e+30, %v1201_v25 }
 0x3a6   : > { %v1203_v28 = vsel %vm954_vm2, %v1202_v27, -inf }
 0x3a7   : > { %1204 = vmax.xlane.f32.xlu0 %v1203_v28 }
 0x430   : > { %v1038_v29 = vpop.xlane.xlu1 %1037 }
 0x431   : > { %v1039_v30 = vsub.f32 %v1035_v22, %v1038_v29 }
 0x433   : > { %v1040_v31 = vmul.f32 1.442695, %v1039_v30 }
 0x434   : > { %v1205_v32 = vpop.xlane.xlu0 %1204 }
 0x435   : > { %4053 = vpow2.f32 %v1040_v31  ;;  %v1206_v33 = vsub.f32 %v1202_v27, %v1205_v32 }
 0x437   : > { %v1207_v34 = vmul.f32 1.442695, %v1206_v33 }
 0x439   : > { %4055 = vpow2.f32 %v1207_v34 }
 0x43f   : > { %v4054_v35 = vpop.eup %4053 }
 0x440   : > { %v1042_v36 = vsel %vm954_vm2, %v4054_v35, 0.0 }
 0x441   : > { %1043 = vadd.xlane.f32.xlu0 %v1042_v36 }
 0x443   : > { %v4056_v37 = vpop.eup %4055 }
 0x444   : > { %v1209_v38 = vsel %vm954_vm2, %v4056_v37, 0.0 }
 0x445   : > { %1210 = vadd.xlane.f32.xlu1 %v1209_v38  ;;  %v3570_v38 = vld [vmem:[#allocation4] ss:$0 sm:$0xff] }
 0x456   : > { %1214 = vrot.lane.b32.xlu1 %v4992_v11, %s4510_s4 }
 0x457   : > { %1047 = vrot.lane.b32.xlu0 %v4992_v11, %s4511_s24 }
 0x45a   : > { %1438 = vrot.lane.b32.xlu1 %v4992_v11, %s5336_s2 }
 0x45b   : > { %1436 = vrot.lane.b32.xlu0 %v4992_v11, %s5340_s0 }
 0x4ce   : > { %v1044_v40 = vpop.xlane.xlu0 %1043 }
 0x4cf   : > { %4057 = vrcp.f32 %v1044_v40 }
 0x4d2   : > { %v1211_v41 = vpop.xlane.xlu1 %1210  ;;  %v1048_v42 = vpop.permute.xlu0 %1047 }
 0x4d3   : > { %4059 = vrcp.f32 %v1211_v41  ;;  %3698 = vmatpush3.msra.mxu1 %v1048_v42 }
 0x4d4   : > { %3707 = vmatprep.subr.mxu1 %v4506_v1 }
 0x4d6   : > { %v1215_v45 = vpop.permute.xlu1 %1214  ;;  %v1437_v54 = vpop.permute.xlu0 %1436 }
 0x4d9   : > { %v4058_v43 = vpop.eup %4057 }
 0x4da   : > { %v1046_v44 = vmul.f32 %v4058_v43, %v4054_v35  ;;  %v1439_v52 = vpop.permute.xlu1 %1438 }
 0x4dc   : > { %3700 = vmatmul.mubr.msk.f32.vlgmr.msra.gmra.mrb[0].mxu1 %vm954_vm2, %v1046_v44 }
 0x4dd   : > { %v4060_v46 = vpop.eup %4059  ;;  %3708 = vmatpush3.msra.mxu1 %v1215_v45  ;;  %3709 = vmatprep.mubr.msk.f32.mxu1 %vm4505_vm0, %v4506_v1 }
 0x4de   : > { %v1213_v47 = vmul.f32 %v4060_v46, %v4056_v37  ;;  %3717 = vmatprep.subr.mxu1 %v4506_v1 }
 0x4e0   : > { %3710 = vmatmul.mubr.msk.f32.vlgmr.msra.gmra.mrb[2].mxu1 %vm954_vm2, %v1213_v47 }
 0x4e1   : > { %3719 = vmatprep.mubr.msk.f32.mxu1 %vm4505_vm0, %v4506_v1  ;;  %3718 = vmatpush3.msra.mxu1 %v946_v48 }
 0x4e2   : > { %3727 = vmatprep.subr.mxu1 %v4506_v1 }
 0x5af   : > { %v1119_v49 = vpop.f32.mrb[0].mxu1 }
 0x5b0   : > { %v3701_v50 = vpop.f32.mrb[1].mxu1  ;;  %3720 = vmatmul.mubr.msk.f32.vlgmr.msra.gmra.mrb[4].mxu1 %vm954_vm2, %v1119_v49 }
 0x5b1   : > { %3729 = vmatprep.mubr.msk.f32.mxu1 %vm4505_vm0, %v4506_v1  ;;  %v2040_v50 = vld [vmem:[%s5312_s10] sm:$0xff] }
 0x5b3   : > { %v1286_v51 = vpop.f32.mrb[2].mxu1 }
 0x5b4   : > { %v3711_v53 = vpop.f32.mrb[3].mxu1  ;;  %3715 = vmatmul.mubr.msk.f32.vlgmr.msra.gmra.mrb[6].mxu0 %vm954_vm2, %v1286_v51  ;;  %v2041_v51 = vld [vmem:[%s5312_s10 + $0x8] sm:$0xff] }
 0x5b5   : > { %3723 = vmatpush3.xpose.msk.msra.mxu0 %vm954_vm2, %v1439_v52  ;;  %3724 = vmatprep.mubr.msk.f32.mxu0 %vm4505_vm0, %v4506_v1  ;;  %v1956_v52 = vld [vmem:[%s5310_s8] sm:$0xff]  ;;  %v1957_v53 = vld [vmem:[%s5310_s8 + $0x8] sm:$0xff] }
 0x5b6   : > { %3732 = vmatprep.subr.mxu0 %v4506_v1 }
 0x5b8   : > { %3725 = vmatmul.mubr.msk.f32.vlgmr.msra.gmra.mrb[8].mxu0 %vm954_vm2, %v1437_v54  ;;  %v2042_v54 = vld [vmem:[%s5312_s10 + $0x10] sm:$0xff] }
 0x5b9   : > { %3734 = vmatprep.mubr.msk.f32.mxu0 %vm4505_vm0, %v4506_v1  ;;  %3733 = vmatpush3.msra.mxu0 %v948_v16 }
 0x5ba   : > { %3742 = vmatprep.subr.mxu0 %v4506_v1 }
 0x683   : > { %v1432_v55 = vpop.f32.mrb[4].mxu1 }
 0x684   : > { %v3721_v56 = vpop.f32.mrb[5].mxu1 }
 0x685   : > { %v2043_v56 = vld [vmem:[%s5312_s10 + $0x18] sm:$0xff] }
 0x687   : > { %v1359_v57 = vpop.f32.mrb[6].mxu0 }
 0x688   : > { %v5060_v58 = vadd.f32 %v1432_v55, %v1359_v57  ;;  %v3716_v59 = vpop.f32.mrb[7].mxu0  ;;  %v3871_v55 = vpack.c.bf16 %v1957_v53, %v1956_v52  ;;  %v3880_v57 = vpack.c.bf16 %v2043_v56, %v2042_v54 }
 0x689   : > { %v1959_v59 = vld [vmem:[%s5310_s8 + $0x18] sm:$0xff] }
 0x68b   : > { %v1510_v60 = vpop.f32.mrb[8].mxu0 }
 0x68c   : > { %v1514_v61 = vmul.f32 0.35355338, %v1510_v60  ;;  %v3726_v62 = vpop.f32.mrb[9].mxu0 }
 0x68e   : > { %v1515_v63 = vsel %vm1034_vm3, -1e+30, %v1514_v61 }
 0x68f   : > { %v1516_v2 = vsel %vm954_vm2, %v1515_v63, -inf }
 0x690   : > { %1517 = vmax.xlane.f32.xlu1 %v1516_v2 }
 0x6a1   : > { %1679 = vrot.lane.b32.xlu1 %v4992_v11, %s5335_s25 }
 0x6a5   : > { %1677 = vrot.lane.b32.xlu1 %v4992_v11, %s5337_s18 }
 0x71d   : > { %v1518_v3 = vpop.xlane.xlu1 %1517 }
 0x71e   : > { %v1519_v4 = vsub.f32 %v1515_v63, %v1518_v3 }
 0x720   : > { %v1520_v5 = vmul.f32 1.442695, %v1519_v4  ;;  %v3571_v4 = vld [vmem:[#allocation6] ss:$0 sm:$0xff] }
 0x721   : > { %v1680_v13 = vpop.permute.xlu1 %1679 }
 0x722   : > { %4061 = vpow2.f32 %v1520_v5 }
 0x725   : > { %v1678_v15 = vpop.permute.xlu1 %1677 }
 0x72c   : > { %v4062_v6 = vpop.eup %4061 }
 0x72d   : > { %v1522_v7 = vsel %vm954_vm2, %v4062_v6, 0.0 }
 0x72e   : > { %1523 = vadd.xlane.f32.xlu0 %v1522_v7 }
 0x744   : > { %1527 = vrot.lane.b32.xlu0 %v4992_v11, %s4516_s11  ;;  %s5385_s11 = smov 80  }
 0x7bb   : > { %v1524_v9 = vpop.xlane.xlu0 %1523 }
 0x7bc   : > { %4063 = vrcp.f32 %v1524_v9 }
 0x7bf   : > { %v1528_v10 = vpop.permute.xlu0 %1527 }
 0x7c0   : > { %3728 = vmatpush3.msra.mxu1 %v1528_v10  ;;  %v3575_v10 = vld [vmem:[#allocation10] ss:$0 sm:$0xff] }
 0x7c1   : > { %3737 = vmatprep.subr.mxu1 %v4506_v1 }
 0x7c6   : > { %v4064_v12 = vpop.eup %4063 }
 0x7c7   : > { %v1526_v14 = vmul.f32 %v4064_v12, %v4062_v6  ;;  %v3572_v6 = vld [vmem:[#allocation7] ss:$0 sm:$0xff] }
 0x7c9   : > { %3730 = vmatmul.mubr.msk.f32.vlgmr.msra.gmra.mrb[6].mxu1 %vm954_vm2, %v1526_v14 }
 0x7ca   : > { %3738 = vmatpush3.xpose.msk.msra.mxu1 %vm954_vm2, %v1680_v13  ;;  %3739 = vmatprep.mubr.msk.f32.mxu1 %vm4505_vm0, %v4506_v1 }
 0x7cb   : > { %3747 = vmatprep.subr.mxu1 %v4506_v1 }
 0x7cd   : > { %3740 = vmatmul.mubr.msk.f32.vlgmr.msra.gmra.mrb[8].mxu1 %vm954_vm2, %v1678_v15  ;;  %v3573_v15 = vld [vmem:[#allocation9] ss:$0 sm:$0xff] }
 0x7ce   : > { %3749 = vmatprep.mubr.msk.f32.mxu1 %vm4505_vm0, %v4506_v1  ;;  %3748 = vmatpush3.msra.mxu1 %v949_v17 }
 0x7cf   : > { %3876 = vmatprep.subr.bf16.mxu1 %v4504_v0 }
 0x89c   : > { %v1599_v19 = vpop.f32.mrb[6].mxu1 }
 0x89d   : > { %v3731_v20 = vpop.f32.mrb[7].mxu1  ;;  %3735 = vmatmul.mubr.msk.f32.vlgmr.msra.gmra.mrb[10].mxu0 %vm954_vm2, %v1599_v19 }
 0x89e   : > { %3744 = vmatprep.mubr.msk.f32.mxu0 %vm4505_vm0, %v4506_v1 }
 0x8a0   : > { %v1751_v21 = vpop.f32.mrb[8].mxu1 }
 0x8a1   : > { %v1755_v22 = vmul.f32 0.35355338, %v1751_v21  ;;  %v3741_v23 = vpop.f32.mrb[9].mxu1 }
 0x8a3   : > { %v1756_v24 = vsel %vm1034_vm3, -1e+30, %v1755_v22 }
 0x8a4   : > { %v1757_v25 = vsel %vm954_vm2, %v1756_v24, -inf }
 0x8a5   : > { %1758 = vmax.xlane.f32.xlu0 %v1757_v25 }
 0x8bb   : > { %1768 = vrot.lane.b32.xlu0 %v4992_v11, %s4517_s22  ;;  %s854_s22 = scalar_lea.vmem %s5381_s7, %s4978_s29  ;;  %s5383_s7 = smov 96  }
 0x8bc   : > { %v860_v60 = vld [vmem:[%s854_s22] sm:$0xff]  ;;  %s5386_s22 = smov 72  }
 0x932   : > { %v1759_v26 = vpop.xlane.xlu0 %1758 }
 0x933   : > { %v1760_v27 = vsub.f32 %v1756_v24, %v1759_v26 }
 0x935   : > { %v1761_v28 = vmul.f32 1.442695, %v1760_v27 }
 0x936   : > { %v1769_v29 = vpop.permute.xlu0 %1768 }
 0x937   : > { %4065 = vpow2.f32 %v1761_v28  ;;  %3743 = vmatpush3.msra.mxu0 %v1769_v29 }
 0x938   : > { %3870 = vmatprep.subr.bf16.mxu0 %v4504_v0 }
 0x941   : > { %v4066_v30 = vpop.eup %4065 }
 0x942   : > { %v1763_v31 = vsel %vm954_vm2, %v4066_v30, 0.0 }
 0x943   : > { %1764 = vadd.xlane.f32.xlu1 %v1763_v31 }
 0x970   : > { %v1672_v11 = vpop.f32.mrb[10].mxu0 }
 0x971   : > { %v1676_v18 = vadd.f32 %v1672_v11, %v5060_v58  ;;  %v3736_v32 = vpop.f32.mrb[11].mxu0  ;;  %v1958_v58 = vld [vmem:[%s5310_s8 + $0x10] sm:$0xff] }
 0x972   : > { %v3874_v61 = vpack.c.bf16 %v1959_v59, %v1958_v58 }
 0x9d0   : > { %v1765_v33 = vpop.xlane.xlu1 %1764 }
 0x9d1   : > { %4067 = vrcp.f32 %v1765_v33 }
 0x9db   : > { %v4068_v34 = vpop.eup %4067 }
 0x9dc   : > { %v1767_v35 = vmul.f32 %v4068_v34, %v4066_v30 }
 0x9de   : > { %3745 = vmatmul.mubr.msk.f32.vlgmr.msra.gmra.mrb[12].mxu0 %vm954_vm2, %v1767_v35 }
 0x9df   : > { %3760 = vmatprep.mubr.msk.f32.mxu0 %vm4505_vm0, %v4506_v1  ;;  %3872 = vmatpush3.bf16.msra.mxu0 %v3871_v55 }
 0x9e0   : > { %3873 = vmatprep.subr.bf16.mxu0 %v4504_v0 }
 0x9e3   : > { %3875 = vmatpush3.bf16.msra.mxu0 %v3874_v61 }
 0x9e4   : > { %3774 = vmatprep.subr.mxu0 %v4506_v1 }
 0xab1   : > { %v1840_v36 = vpop.f32.mrb[12].mxu0 }
 0xab2   : > { %v3746_v37 = vpop.f32.mrb[13].mxu0  ;;  %3750 = vmatmul.mubr.msk.f32.vlgmr.msra.gmra.mrb[10].mxu1 %vm954_vm2, %v1840_v36 }
 0xab3   : > { %3771 = vmatprep.mubr.msk.f32.mxu1 %vm4505_vm0, %v4506_v1 }
 0xb85   : > { %v1913_v39 = vpop.f32.mrb[10].mxu1 }
 0xb86   : > { %v1917_v40 = vadd.f32 %v1913_v39, %v1676_v18  ;;  %v3751_v41 = vpop.f32.mrb[11].mxu1 }
 0xb88   : > { %v1924_v42 = vadd.f32 %v3570_v38, %v1917_v40 }
 0xb8a   : > { %v1925_v43 = vadd.f32 %v1924_v42, %v4985_v8  ;;  %v3877_v8 = vpack.c.bf16 %v2041_v51, %v2040_v50 }
 0xb8c   : > { %v1928_v44 = vsel %vm872_vm1, %v1925_v43, 0.0  ;;  %3878 = vmatpush3.bf16.msra.mxu1 %v3877_v8 }
 0xb8d   : > { %1929 = vadd.xlane.f32.xlu1 %v1928_v44  ;;  %3879 = vmatprep.subr.bf16.mxu1 %v4504_v0 }
 0xb90   : > { %3881 = vmatpush3.bf16.msra.mxu1 %v3880_v57 }
 0xb91   : > { %3779 = vmatprep.subr.mxu1 %v4506_v1 }
 0xb93   : > { %3772 = vmatmul.mubr.msk.f32.vlgmr.msra.gmra.mrb[12].mxu1 %vm872_vm1, %v860_v60 }
 0xb94   : > { %3781 = vmatprep.mubr.msk.f32.mxu1 %vm4505_vm0, %v4506_v1 }
 0xc1a   : > { %v1930_v45 = vpop.xlane.xlu1 %1929 }
 0xc1b   : > { %v1932_v46 = vmul.f32 0.03125, %v1930_v45 }
 0xc1d   : > { %v1933_v47 = vsub.f32 %v1925_v43, %v1932_v46  ;;  %v2124_v46 = vld [vmem:[%s5314_s12] sm:$0xff] }
 0xc1f   : > { %v1934_v48 = vmul.f32 %v1933_v47, %v1933_v47 }
 0xc21   : > { %v1935_v49 = vsel %vm872_vm1, %v1934_v48, 0.0 }
 0xc22   : > { %1936 = vadd.xlane.f32.xlu1 %v1935_v49 }
 0xc66   : > { %v2120_v12 = vpop.f32.mrb[12].mxu1 }
 0xc67   : > { %v5150_v13 = vadd.f32 %v3575_v10, %v2120_v12  ;;  %v3773_v14 = vpop.f32.mrb[13].mxu1 }
 0xc69   : > { %2295 = vrot.lane.b32.xlu1 %v5150_v13, %s4507_s30 }
 0xcaf   : > { %v1937_v62 = vpop.xlane.xlu1 %1936 }
 0xcb0   : > { %v1938_v63 = vmul.f32 0.03125, %v1937_v62 }
 0xcb2   : > { %v1939_v2 = vadd.f32 1e-05, %v1938_v63 }
 0xcb4   : > { %4069 = vrsqrt.f32 %v1939_v2 }
 0xcbe   : > { %v4070_v3 = vpop.eup %4069 }
 0xcbf   : > { %v1941_v5 = vmul.f32 %v4070_v3, %v1933_v47  ;;  %v2125_v47 = vld [vmem:[%s5314_s12 + $0x8] sm:$0xff] }
 0xcc1   : > { %v1948_v7 = vmul.f32 %v3571_v4, %v1941_v5 }
 0xcc3   : > { %v5144_v9 = vadd.f32 %v3572_v6, %v1948_v7 }
 0xcc5   : > { %3761 = vmatmul.mubr.msk.f32.vlgmr.msra.gmra.mrb[14].mxu0 %vm872_vm1, %v5144_v9 }
 0xcc6   : > { %3776 = vmatprep.mubr.msk.f32.mxu0 %vm4505_vm0, %v4506_v1  ;;  %3775 = vmatpush3.xpose.msk.msra.mxu0 %vm954_vm2, %v5150_v13 }
 0xcc7   : > { %3784 = vmatprep.subr.mxu0 %v4506_v1 }
 0xcdb   : > { %v2296_v21 = vpop.permute.xlu1 %2295 }
 0xd98   : > { %v2036_v16 = vpop.f32.mrb[14].mxu0 }
 0xd99   : > { %v5157_v19 = vadd.f32 %v3573_v15, %v2036_v16  ;;  %v3762_v20 = vpop.f32.mrb[15].mxu0  ;;  %v2126_v15 = vld [vmem:[%s5314_s12 + $0x10] sm:$0xff] }
 0xd9b   : > { %2293 = vrot.lane.b32.xlu0 %v5157_v19, %s4507_s30  ;;  %3777 = vmatmul.mubr.msk.f32.vlgmr.msra.gmra.mrb[16].mxu0 %vm954_vm2, %v5157_v19  ;;  %s5382_s30 = smov 112  }
 0xd9c   : > { %3785 = vmatpush3.xpose.msk.msra.mxu0 %vm954_vm2, %v2296_v21  ;;  %3786 = vmatprep.mubr.msk.f32.mxu0 %vm4505_vm0, %v4506_v1 }
 0xd9d   : > { %3794 = vmatprep.subr.mxu0 %v4506_v1 }
 0xe0d   : > { %v2294_v22 = vpop.permute.xlu0 %2293 }
 0xe0e   : > { %3787 = vmatmul.mubr.msk.f32.vlgmr.msra.gmra.mrb[18].mxu0 %vm954_vm2, %v2294_v22 }
 0xe0f   : > { %3796 = vmatprep.mubr.msk.f32.mxu0 %vm4505_vm0, %v4506_v1  ;;  %3795 = vmatpush3.msra.mxu0 %v2125_v47 }
 0xe10   : > { %3804 = vmatprep.subr.mxu0 %v4506_v1 }
 0xe6e   : > { %v2201_v23 = vpop.f32.mrb[16].mxu0 }
 0xe6f   : > { %v2205_v24 = vmul.f32 0.35355338, %v2201_v23  ;;  %v3778_v25 = vpop.f32.mrb[17].mxu0 }
 0xe71   : > { %v2206_v26 = vsel %vm954_vm2, %v2205_v24, -inf }
 0xe72   : > { %2207 = vmax.xlane.f32.xlu0 %v2206_v26 }
 0xee1   : > { %v2367_v27 = vpop.f32.mrb[18].mxu0 }
 0xee2   : > { %v2371_v28 = vmul.f32 0.35355338, %v2367_v27  ;;  %v3788_v29 = vpop.f32.mrb[19].mxu0 }
 0xee4   : > { %v2372_v30 = vsel %vm954_vm2, %v2371_v28, -inf }
 0xee5   : > { %2373 = vmax.xlane.f32.xlu1 %v2372_v30  ;;  %v2127_v30 = vld [vmem:[%s5314_s12 + $0x18] sm:$0xff] }
 0xef6   : > { %2383 = vrot.lane.b32.xlu1 %v5150_v13, %s4509_s16  ;;  %s5389_s16 = sld [smem:[#allocation41_spill]] }
 0xefa   : > { %2607 = vrot.lane.b32.xlu1 %v5150_v13, %s5382_s30 }
 0xefc   : > { %s858_s2 = scalar_lea.vmem %s5389_s16, %s4978_s29 }
 0xeff   : > { %v2208_v31 = vpop.xlane.xlu0 %2207 }
 0xf00   : > { %v2209_v17 = vsub.f32 %v2205_v24, %v2208_v31 }
 0xf02   : > { %v2210_v11 = vmul.f32 1.442695, %v2209_v17 }
 0xf04   : > { %4071 = vpow2.f32 %v2210_v11 }
 0xf0e   : > { %v4072_v18 = vpop.eup %4071 }
 0xf0f   : > { %v2212_v32 = vsel %vm954_vm2, %v4072_v18, 0.0 }
 0xf10   : > { %2213 = vadd.xlane.f32.xlu0 %v2212_v32 }
 0xf72   : > { %v2374_v33 = vpop.xlane.xlu1 %2373 }
 0xf73   : > { %v2375_v34 = vsub.f32 %v2371_v28, %v2374_v33 }
 0xf75   : > { %v2376_v35 = vmul.f32 1.442695, %v2375_v34 }
 0xf76   : > { %v2384_v43 = vpop.permute.xlu1 %2383 }
 0xf77   : > { %4073 = vpow2.f32 %v2376_v35  ;;  %v3593_v35 = vld [vmem:[#allocation12] ss:$0 sm:$0xff] }
 0xf7a   : > { %v2608_v51 = vpop.permute.xlu1 %2607 }
 0xf81   : > { %v4074_v36 = vpop.eup %4073 }
 0xf82   : > { %v2378_v37 = vsel %vm954_vm2, %v4074_v36, 0.0 }
 0xf83   : > { %2379 = vadd.xlane.f32.xlu0 %v2378_v37 }
 0xf99   : > { %2217 = vrot.lane.b32.xlu0 %v5150_v13, %s5383_s7  ;;  %s5387_s7 = sld [smem:[#allocation39_spill]] }
 0xf9d   : > { %2605 = vrot.lane.b32.xlu0 %v5157_v19, %s5382_s30  ;;  %v2214_v38 = vpop.xlane.xlu0 %2213 }
 0xf9e   : > { %4075 = vrcp.f32 %v2214_v38 }
 0xf9f   : > { %v3123_v47 = vld [vmem:[%s5387_s7 + $0x8] sm:$0xff] }
 0xfa8   : > { %v4076_v40 = vpop.eup %4075 }
 0xfa9   : > { %v2216_v41 = vmul.f32 %v4076_v40, %v4072_v18 }
0x1010   : > { %v2380_v39 = vpop.xlane.xlu0 %2379 }
0x1011   : > { %4077 = vrcp.f32 %v2380_v39 }
0x1014   : > { %v2218_v42 = vpop.permute.xlu0 %2217 }
0x1015   : > { %3780 = vmatpush3.msra.mxu1 %v2218_v42 }
0x1016   : > { %3782 = vmatmul.mubr.msk.f32.vlgmr.msra.gmra.mrb[14].mxu1 %vm954_vm2, %v2216_v41  ;;  %3789 = vmatprep.subr.mxu1 %v4506_v1 }
0x1017   : > { %3790 = vmatpush3.msra.mxu1 %v2384_v43  ;;  %3791 = vmatprep.mubr.msk.f32.mxu1 %vm4505_vm0, %v4506_v1 }
0x1018   : > { %3799 = vmatprep.subr.mxu1 %v4506_v1  ;;  %v2606_v52 = vpop.permute.xlu0 %2605 }
0x101b   : > { %v4078_v44 = vpop.eup %4077 }
0x101c   : > { %v2382_v45 = vmul.f32 %v4078_v44, %v4074_v36 }
0x101e   : > { %3792 = vmatmul.mubr.msk.f32.vlgmr.msra.gmra.mrb[16].mxu1 %vm954_vm2, %v2382_v45 }
0x101f   : > { %3801 = vmatprep.mubr.msk.f32.mxu1 %vm4505_vm0, %v4506_v1  ;;  %3800 = vmatpush3.msra.mxu1 %v2124_v46 }
0x1020   : > { %3809 = vmatprep.subr.mxu1 %v4506_v1 }
0x10e9   : > { %v2289_v48 = vpop.f32.mrb[14].mxu1 }
0x10ea   : > { %v3783_v49 = vpop.f32.mrb[15].mxu1  ;;  %3802 = vmatmul.mubr.msk.f32.vlgmr.msra.gmra.mrb[18].mxu1 %vm954_vm2, %v2289_v48 }
0x10eb   : > { %3811 = vmatprep.mubr.msk.f32.mxu1 %vm4505_vm0, %v4506_v1  ;;  %v3125_v49 = vld [vmem:[%s5387_s7 + $0x18] sm:$0xff] }
0x10f1   : > { %v2455_v50 = vpop.f32.mrb[16].mxu1 }
0x10f2   : > { %v3793_v8 = vpop.f32.mrb[17].mxu1  ;;  %3797 = vmatmul.mubr.msk.f32.vlgmr.msra.gmra.mrb[20].mxu0 %vm954_vm2, %v2455_v50 }
0x10f3   : > { %3805 = vmatpush3.xpose.msk.msra.mxu0 %vm954_vm2, %v2608_v51  ;;  %3806 = vmatprep.mubr.msk.f32.mxu0 %vm4505_vm0, %v4506_v1 }
0x10f4   : > { %3814 = vmatprep.subr.mxu0 %v4506_v1 }
0x10f6   : > { %3807 = vmatmul.mubr.msk.f32.vlgmr.msra.gmra.mrb[22].mxu0 %vm954_vm2, %v2606_v52 }
0x10f7   : > { %3816 = vmatprep.mubr.msk.f32.mxu0 %vm4505_vm0, %v4506_v1  ;;  %3815 = vmatpush3.msra.mxu0 %v2126_v15 }
0x10f8   : > { %3824 = vmatprep.subr.mxu0 %v4506_v1 }
0x11bd   : > { %v2601_v53 = vpop.f32.mrb[18].mxu1 }
0x11be   : > { %v3803_v54 = vpop.f32.mrb[19].mxu1 }
0x11c5   : > { %v2528_v55 = vpop.f32.mrb[20].mxu0 }
0x11c6   : > { %v2602_v56 = vadd.f32 %v2601_v53, %v2528_v55  ;;  %v3798_v57 = vpop.f32.mrb[21].mxu0 }
0x11c9   : > { %v2679_v58 = vpop.f32.mrb[22].mxu0 }
0x11ca   : > { %v2683_v59 = vmul.f32 0.35355338, %v2679_v58  ;;  %v3808_v60 = vpop.f32.mrb[23].mxu0 }
0x11cc   : > { %v2684_v61 = vsel %vm954_vm2, %v2683_v59, -inf }
0x11cd   : > { %2685 = vmax.xlane.f32.xlu1 %v2684_v61 }
0x11de   : > { %2847 = vrot.lane.b32.xlu1 %v5150_v13, %s5384_s3 }
0x11e2   : > { %2845 = vrot.lane.b32.xlu1 %v5157_v19, %s5384_s3 }
0x125a   : > { %v2686_v62 = vpop.xlane.xlu1 %2685 }
0x125b   : > { %v2687_v63 = vsub.f32 %v2683_v59, %v2686_v62 }
0x125d   : > { %v2688_v2 = vmul.f32 1.442695, %v2687_v63  ;;  %v3594_v63 = vld [vmem:[#allocation13] ss:$0 sm:$0xff] }
0x125e   : > { %v2848_v10 = vpop.permute.xlu1 %2847 }
0x125f   : > { %4079 = vpow2.f32 %v2688_v2 }
0x1262   : > { %v2846_v14 = vpop.permute.xlu1 %2845 }
0x1269   : > { %v4080_v3 = vpop.eup %4079 }
0x126a   : > { %v2690_v4 = vsel %vm954_vm2, %v4080_v3, 0.0 }
0x126b   : > { %2691 = vadd.xlane.f32.xlu0 %v2690_v4 }
0x1281   : > { %2695 = vrot.lane.b32.xlu0 %v5150_v13, %s5385_s11 }
0x12f8   : > { %v2692_v5 = vpop.xlane.xlu0 %2691 }
0x12f9   : > { %4081 = vrcp.f32 %v2692_v5 }
0x12fc   : > { %v2696_v6 = vpop.permute.xlu0 %2695 }
0x12fd   : > { %3810 = vmatpush3.msra.mxu1 %v2696_v6 }
0x12fe   : > { %3819 = vmatprep.subr.mxu1 %v4506_v1 }
0x1303   : > { %v4082_v7 = vpop.eup %4081 }
0x1304   : > { %v2694_v12 = vmul.f32 %v4082_v7, %v4080_v3  ;;  %v3595_v3 = vld [vmem:[#allocation15] ss:$0 sm:$0xff] }
0x1306   : > { %3812 = vmatmul.mubr.msk.f32.vlgmr.msra.gmra.mrb[20].mxu1 %vm954_vm2, %v2694_v12 }
0x1307   : > { %3820 = vmatpush3.xpose.msk.msra.mxu1 %vm954_vm2, %v2848_v10  ;;  %3821 = vmatprep.mubr.msk.f32.mxu1 %vm4505_vm0, %v4506_v1  ;;  %v3596_v10 = vld [vmem:[#allocation16] ss:$0 sm:$0xff] }
0x1308   : > { %3829 = vmatprep.subr.mxu1 %v4506_v1 }
0x130a   : > { %3822 = vmatmul.mubr.msk.f32.vlgmr.msra.gmra.mrb[22].mxu1 %vm954_vm2, %v2846_v14 }
0x130b   : > { %3831 = vmatprep.mubr.msk.f32.mxu1 %vm4505_vm0, %v4506_v1  ;;  %3830 = vmatpush3.msra.mxu1 %v2127_v30 }
0x130c   : > { %3888 = vmatprep.subr.bf16.mxu1 %v4504_v0 }
0x13d9   : > { %v2767_v16 = vpop.f32.mrb[20].mxu1 }
0x13da   : > { %v3813_v19 = vpop.f32.mrb[21].mxu1  ;;  %3817 = vmatmul.mubr.msk.f32.vlgmr.msra.gmra.mrb[24].mxu0 %vm954_vm2, %v2767_v16 }
0x13db   : > { %3826 = vmatprep.mubr.msk.f32.mxu0 %vm4505_vm0, %v4506_v1  ;;  %v3598_v19 = vld [vmem:[#allocation18] ss:$0 sm:$0xff] }
0x13dd   : > { %v2919_v20 = vpop.f32.mrb[22].mxu1 }
0x13de   : > { %v2923_v21 = vmul.f32 0.35355338, %v2919_v20  ;;  %v3823_v22 = vpop.f32.mrb[23].mxu1 }
0x13e0   : > { %v2924_v23 = vsel %vm954_vm2, %v2923_v21, -inf }
0x13e1   : > { %2925 = vmax.xlane.f32.xlu0 %v2924_v23 }
0x13f7   : > { %2935 = vrot.lane.b32.xlu0 %v5150_v13, %s5386_s22  ;;  %s5388_s22 = sld [smem:[#allocation40_spill]] }
0x13fd   : > { %v3207_v51 = vld [vmem:[%s5388_s22] sm:$0xff]  ;;  %v3208_v8 = vld [vmem:[%s5388_s22 + $0x8] sm:$0xff]  ;;  %v3209_v52 = vld [vmem:[%s5388_s22 + $0x10] sm:$0xff] }
0x13fe   : > { %v3889_v53 = vpack.c.bf16 %v3208_v8, %v3207_v51  ;;  %v3210_v54 = vld [vmem:[%s5388_s22 + $0x18] sm:$0xff]  ;;  %v3212_v57 = vld [vmem:[%s5388_s22 + $0x28] sm:$0xff]  ;;  %v3213_v6 = vld [vmem:[%s5388_s22 + $0x30] sm:$0xff] }
0x13ff   : > { %v3892_v55 = vpack.c.bf16 %v3210_v54, %v3209_v52 }
0x146e   : > { %v2926_v24 = vpop.xlane.xlu0 %2925 }
0x146f   : > { %v2927_v25 = vsub.f32 %v2923_v21, %v2926_v24 }
0x1471   : > { %v2928_v26 = vmul.f32 1.442695, %v2927_v25 }
0x1472   : > { %v2936_v27 = vpop.permute.xlu0 %2935 }
0x1473   : > { %4083 = vpow2.f32 %v2928_v26  ;;  %3825 = vmatpush3.msra.mxu0 %v2936_v27 }
0x1474   : > { %3882 = vmatprep.subr.bf16.mxu0 %v4504_v0 }
0x147d   : > { %v4084_v28 = vpop.eup %4083 }
0x147e   : > { %v2930_v29 = vsel %vm954_vm2, %v4084_v28, 0.0 }
0x147f   : > { %2931 = vadd.xlane.f32.xlu1 %v2930_v29 }
0x14ad   : > { %v2840_v13 = vpop.f32.mrb[24].mxu0 }
0x14ae   : > { %v2844_v31 = vadd.f32 %v2840_v13, %v2602_v56  ;;  %v3818_v17 = vpop.f32.mrb[25].mxu0  ;;  %v3211_v56 = vld [vmem:[%s5388_s22 + $0x20] sm:$0xff] }
0x14af   : > { %v3895_v58 = vpack.c.bf16 %v3212_v57, %v3211_v56 }
0x150c   : > { %v2932_v11 = vpop.xlane.xlu1 %2931 }
0x150d   : > { %4085 = vrcp.f32 %v2932_v11  ;;  %v3600_v11 = vld [vmem:[#allocation19] ss:$0 sm:$0xff] }
0x1517   : > { %v4086_v18 = vpop.eup %4085 }
0x1518   : > { %v2934_v32 = vmul.f32 %v4086_v18, %v4084_v28 }
0x151a   : > { %3827 = vmatmul.mubr.msk.f32.vlgmr.msra.gmra.mrb[26].mxu0 %vm954_vm2, %v2934_v32  ;;  %v3601_v32 = vld [vmem:[#allocation21] ss:$0 sm:$0xff] }
0x151b   : > { %3842 = vmatprep.mubr.msk.f32.mxu0 %vm4505_vm0, %v4506_v1 }
0x15ed   : > { %v3007_v33 = vpop.f32.mrb[26].mxu0 }
0x15ee   : > { %v3828_v34 = vpop.f32.mrb[27].mxu0  ;;  %3832 = vmatmul.mubr.msk.f32.vlgmr.msra.gmra.mrb[24].mxu1 %vm954_vm2, %v3007_v33 }
0x15ef   : > { %3861 = vmatprep.mubr.msk.f32.mxu1 %vm4505_vm0, %v4506_v1  ;;  %v3122_v1 = vld [vmem:[%s5387_s7] sm:$0xff]  ;;  %3890 = vmatpush3.bf16.msra.mxu1 %v3889_v53 }
0x15f0   : > { %v3883_v48 = vpack.c.bf16 %v3123_v47, %v3122_v1  ;;  %3891 = vmatprep.subr.bf16.mxu1 %v4504_v0 }
0x15f2   : > { %3884 = vmatpush3.bf16.msra.mxu0 %v3883_v48 }
0x15f3   : > { %3885 = vmatprep.subr.bf16.mxu0 %v4504_v0  ;;  %3893 = vmatpush3.bf16.msra.mxu1 %v3892_v55 }
0x15f4   : > { %3894 = vmatprep.subr.bf16.mxu1 %v4504_v0 }
0x15f7   : > { %3896 = vmatpush3.bf16.msra.mxu1 %v3895_v58 }
0x15f8   : > { %3897 = vmatprep.subr.bf16.mxu1 %v4504_v0  ;;  %v3214_v0 = vld [vmem:[%s5388_s22 + $0x38] sm:$0xff] }
0x15f9   : > { %v3898_v7 = vpack.c.bf16 %v3214_v0, %v3213_v6 }
0x15fb   : > { %3899 = vmatpush3.bf16.msra.mxu1 %v3898_v7 }
0x16c1   : > { %v3080_v36 = vpop.f32.mrb[24].mxu1 }
0x16c2   : > { %v3084_v37 = vadd.f32 %v3080_v36, %v2844_v31  ;;  %v3833_v38 = vpop.f32.mrb[25].mxu1 }
0x16c4   : > { %v3091_v39 = vadd.f32 %v3593_v35, %v3084_v37 }
0x16c6   : > { %v3092_v40 = vadd.f32 %v3091_v39, %v5144_v9  ;;  %v3124_v9 = vld [vmem:[%s5387_s7 + $0x10] sm:$0xff] }
0x16c7   : > { %v3886_v50 = vpack.c.bf16 %v3125_v49, %v3124_v9 }
0x16c8   : > { %v3095_v41 = vsel %vm872_vm1, %v3092_v40, 0.0 }
0x16c9   : > { %3096 = vadd.xlane.f32.xlu1 %v3095_v41  ;;  %3887 = vmatpush3.bf16.msra.mxu0 %v3886_v50 }
0x1756   : > { %v3097_v42 = vpop.xlane.xlu1 %3096 }
0x1757   : > { %v3098_v43 = vmul.f32 0.03125, %v3097_v42 }
0x1759   : > { %v3099_v44 = vsub.f32 %v3092_v40, %v3098_v43 }
0x175b   : > { %v3100_v45 = vmul.f32 %v3099_v44, %v3099_v44 }
0x175d   : > { %v3101_v46 = vsel %vm872_vm1, %v3100_v45, 0.0 }
0x175e   : > { %3102 = vadd.xlane.f32.xlu1 %v3101_v46 }
0x17eb   : > { %v3103_v59 = vpop.xlane.xlu1 %3102 }
0x17ec   : > { %v3104_v60 = vmul.f32 0.03125, %v3103_v59 }
0x17ee   : > { %v3105_v61 = vadd.f32 1e-05, %v3104_v60 }
0x17f0   : > { %4087 = vrsqrt.f32 %v3105_v61 }
0x17fa   : > { %v4088_v62 = vpop.eup %4087 }
0x17fb   : > { %v3107_v2 = vmul.f32 %v4088_v62, %v3099_v44 }
0x17fd   : > { %v3114_v4 = vmul.f32 %v3594_v63, %v3107_v2 }
0x17ff   : > { %v3121_v5 = vadd.f32 %v3595_v3, %v3114_v4 }
0x1801   : > { %3843 = vmatmul.mubr.msk.f32.vlgmr.msra.gmra.mrb[28].mxu0 %vm872_vm1, %v3121_v5 }
0x18d4   : > { %v3202_v12 = vpop.f32.mrb[28].mxu0 }
0x18d5   : > { %v3203_v14 = vadd.f32 %v3596_v10, %v3202_v12  ;;  %v3844_v15 = vpop.f32.mrb[29].mxu0 }
0x18d7   : > { %v3206_v16 = vmax.f32 %v3203_v14, 0.0 }
0x18d9   : > { %3862 = vmatmul.mubr.msk.f32.vlgmr.msra.gmra.mrb[26].mxu1 %vm3222_vm4, %v3206_v16 }
0x19ac   : > { %v3292_v20 = vpop.f32.mrb[26].mxu1 }
0x19ad   : > { %v3293_v21 = vadd.f32 %v3598_v19, %v3292_v20  ;;  %v3863_v22 = vpop.f32.mrb[27].mxu1 }
0x19af   : > { %v3296_v23 = vadd.f32 %v3293_v21, %v3121_v5 }
0x19b1   : > { %v3299_v24 = vsel %vm872_vm1, %v3296_v23, 0.0 }
0x19b2   : > { %3300 = vadd.xlane.f32.xlu1 %v3299_v24 }
0x1a3f   : > { %v3301_v25 = vpop.xlane.xlu1 %3300 }
0x1a40   : > { %v3302_v26 = vmul.f32 0.03125, %v3301_v25 }
0x1a42   : > { %v3303_v27 = vsub.f32 %v3296_v23, %v3302_v26 }
0x1a44   : > { %v3304_v28 = vmul.f32 %v3303_v27, %v3303_v27 }
0x1a46   : > { %v3305_v29 = vsel %vm872_vm1, %v3304_v28, 0.0 }
0x1a47   : > { %3306 = vadd.xlane.f32.xlu1 %v3305_v29 }
0x1ad4   : > { %v3307_v30 = vpop.xlane.xlu1 %3306 }
0x1ad5   : > { %v3308_v13 = vmul.f32 0.03125, %v3307_v30 }
0x1ad7   : > { %v3309_v31 = vadd.f32 1e-05, %v3308_v13 }
0x1ad9   : > { %4089 = vrsqrt.f32 %v3309_v31 }
0x1ae3   : > { %v4090_v17 = vpop.eup %4089 }
0x1ae4   : > { %v3311_v18 = vmul.f32 %v4090_v17, %v3303_v27 }
0x1ae6   : > { %v3318_v33 = vmul.f32 %v3600_v11, %v3311_v18 }
0x1ae8   : > { %v3325_v34 = vadd.f32 %v3601_v32, %v3318_v33 }
0x1aea   : > { %3326 = vst.msk [vmem:[%s858_s2] sm:$0xff] %vm872_vm1, %v3325_v34 }
0x1aeb PF: > { %s5390_s0 = sld [smem:[#allocation29_spill]] }
0x1af1   : > { %s39_s3 = sadd.s32 1, %s5390_s0  }
0x1af2   : > { %p36_p7 = scmp.ge.s32.totalorder %s39_s3, 4  }
0x1af4   :  { %38 = sbr.rel (!%p36_p7) target bundleno = 20 (0x14), region = 194 }
0x1afb   :  { %3346 = vsyncpa [#allocation3], 1 }
0x1afc   :  { %3348 = vsyncpa [#allocation3 + $0x1], 1 }
0x1afd   :  { %3349 = vsyncpa [#allocation5], 1 }
0x1afe   :  { %3350 = vsyncpa [#allocation8], 1 }
0x1aff   :  { %3351 = vsyncpa [#allocation11], 1 }
0x1b00   :  { %3352 = vsyncpa [#allocation14], 1 }
0x1b01   :  { %3353 = vsyncpa [#allocation17], 1 }
0x1b02   :  { %3354 = vsyncpa [#allocation20], 1 }

// kernel: _lambda_.10
= control target key start
LH: loop header
LB: loop body
LE: loop exit
PB: predicated region body
PF: predicated region fallthrough
CT: control target
= control target key end

     0   :  { %s5138_s0 = inlined_call_operand.vmem [shape: f32[2,8,32], index: 0, kind: input, shape index: {}]   ;;  %s5139_s1 = inlined_call_operand.vmem [shape: f32[2,8,32], index: 1, kind: input, shape index: {}]   ;;  %s5140_s2 = inlined_call_operand.vmem [shape: f32[32,96], index: 2, kind: input, shape index: {}]   ;;  %s5141_s3 = inlined_call_operand.vmem [shape: f32[1,96], index: 3, kind: input, shape index: {}]   ;;  %s5142_s4 = inlined_call_operand.vmem [shape: f32[32,32], index: 4, kind: input, shape index: {}]   ;;  %s5143_s5 = inlined_call_operand.vmem [shape: f32[1,32], index: 5, kind: input, shape index: {}]   ;;  %s5144_s6 = inlined_call_operand.hbm [shape: f32[1,32], index: 6, kind: input, shape index: {}]   ;;  %s5145_s7 = inlined_call_operand.hbm [shape: f32[1,32], index: 7, kind: input, shape index: {}]   ;;  %s5146_s8 = inlined_call_operand.vmem [shape: f32[32,32], index: 8, kind: input, shape index: {}]   ;;  %s5147_s9 = inlined_call_operand.hbm [shape: f32[1,32], index: 9, kind: input, shape index: {}]   ;;  %s5148_s10 = inlined_call_operand.vmem [shape: f32[32,64], index: 10, kind: input, shape index: {}]   ;;  %s5149_s11 = inlined_call_operand.hbm [shape: f32[1,64], index: 11, kind: input, shape index: {}]   ;;  %s5150_s12 = inlined_call_operand.vmem [shape: f32[32,32], index: 12, kind: input, shape index: {}]   ;;  %s5151_s13 = inlined_call_operand.hbm [shape: f32[1,32], index: 13, kind: input, shape index: {}]   ;;  %s5152_s14 = inlined_call_operand.hbm [shape: f32[1,32], index: 14, kind: input, shape index: {}]   ;;  %s5153_s15 = inlined_call_operand.hbm [shape: f32[1,32], index: 15, kind: input, shape index: {}]   ;;  %s5154_s16 = inlined_call_operand.vmem [shape: f32[32,64], index: 16, kind: input, shape index: {}]   ;;  %s5155_s17 = inlined_call_operand.hbm [shape: f32[1,64], index: 17, kind: input, shape index: {}]   ;;  %s5156_s18 = inlined_call_operand.vmem [shape: f32[64,32], index: 18, kind: input, shape index: {}]   ;;  %s5157_s19 = inlined_call_operand.hbm [shape: f32[1,32], index: 19, kind: input, shape index: {}]   ;;  %s5158_s20 = inlined_call_operand.hbm [shape: f32[1,32], index: 20, kind: input, shape index: {}]   ;;  %s5159_s21 = inlined_call_operand.hbm [shape: f32[1,32], index: 21, kind: input, shape index: {}]   ;;  %s5160_s22 = inlined_call_operand.vmem [shape: f32[2,8,32], index: 22, kind: output, shape index: {}]  }
   0x1   :  { %5175 = sst [smem:[#allocation26_spill]] %s5138_s0 }
   0x2   :  { %5176 = sst [smem:[#allocation27_spill]] %s5139_s1 }
   0x3   :  { %5177 = sst [smem:[#allocation28_spill]] %s5140_s2 }
   0x4   :  { %5178 = sst [smem:[#allocation29_spill]] %s5141_s3 }
   0x5   :  { %5179 = sst [smem:[#allocation30_spill]] %s5142_s4 }
   0x6   :  { %5180 = sst [smem:[#allocation31_spill]] %s5143_s5 }
   0x7   :  { %5181 = sst [smem:[#allocation32_spill]] %s5144_s6 }
   0x8   :  { %5182 = sst [smem:[#allocation33_spill]] %s5145_s7 }
   0x9   :  { %5183 = sst [smem:[#allocation34_spill]] %s5156_s18 }
   0xa   :  { %5184 = sst [smem:[#allocation35_spill]] %s5160_s22 }
   0xb   :  { %27 = vsyncpa [#allocation3], 0 }
   0xc   :  { %28 = vsyncpa [#allocation5], 0 }
   0xd   :  { %29 = vsyncpa [#allocation8], 0 }
   0xe   :  { %30 = vsyncpa [#allocation11], 0 }
   0xf   :  { %31 = vsyncpa [#allocation14], 0 }
  0x10   :  { %32 = vsyncpa [#allocation17], 0  ;;  %s4503_s3 = smov 0  }
  0x11 LB: > { %5185 = sst [smem:[#allocation25_spill]] %s4361_s3  ;;  %s4363_s28 = smov [#allocation4]   ;;  %s4361_s3 = sphi %s4503_s3, %s38_s3  }
  0x12   : > { %s577_s29 = sshll.u32 %s4363_s28, 4  ;;  %s4509_s30 = sadd.s32 4294967295, %s4361_s3   ;;  %s4514_s29 = int_to_ptr.vmem [resolvable:$true] %s577_s29 }
  0x13   : > { %p3476_p0 = scmp.ge.s32.totalorder %s4361_s3, 1  ;;  %p541_p1 = scmp.lt.s32.totalorder %s4361_s3, 3 }
  0x14   : > { %p5166_p2 = scmp.eq.s32.totalorder %s4509_s30, 0  ;;  %s4364_s0 = smov [#allocation7]  }
  0x15   : > { %p4516_p3 = pnand %p3476_p0, %p541_p1  ;;  %s605_s23 = sshll.u32 %s4364_s0, 4  ;;  %s4522_s23 = int_to_ptr.vmem [resolvable:$true] %s605_s23 }
  0x16   : > { %s4365_s1 = smov [#allocation10]   ;;  %s4366_s6 = smov [#allocation13]  }
  0x17   : > { %s5186_s4 = scalar_select %p4516_p3, 1, 0 }
  0x18   : > { %p3896_p4 = pneg %p4516_p3  ;;  %s630_s5 = sshll.u32 %s4365_s1, 4  ;;  %s4530_s5 = int_to_ptr.vmem [resolvable:$true] %s630_s5 }
  0x19   : > { %s655_s25 = sshll.u32 %s4366_s6, 4  ;;  %s5188_s7 = sld [smem:[#allocation33_spill]]  ;;  %s4532_s25 = int_to_ptr.vmem [resolvable:$true] %s655_s25 }
  0x1a   : > { %p4526_p5 = pnand %p5166_p2, %p3896_p4 }
  0x1c   : > { %p4542_p7 = pneg %p4526_p5 }
  0x1f   : > { %s4023_s27 = scalar_lea.hbm %s5188_s7, 16 }
  0x20   : > { %p4024_p6 = scmp.ne.s32.totalorder %s5188_s7, %s4023_s27  ;;  %p4030_p10 = scmp.lt.u32.totalorder %s4023_s27, %s5188_s7 }
  0x22   : > { %p4026_p8 = pnand %p4542_p7, %p4024_p6 }
  0x24   : > { %p4027_p9 = pneg %p4026_p8 }
  0x26   : > { %p4032_p11 = pnand %p4030_p10, %p4027_p9 }
  0x28   : > { %4035 = shalt.err (!%p4032_p11)
}
  0x29   : > { %s4036_s26 = scalar_lea.vmem %s4514_s29, 16  ;;  %s4043_s2 = scalar_lea.vmem %s4514_s29, 32 }
  0x2a   : > { %p4037_p12 = scmp.ne.s32.totalorder %s4514_s29, %s4036_s26  ;;  %p4044_p1 = scmp.lt.s32.totalorder %s4514_s29, %s4514_s29 }
  0x2b   : > { %p4045_p4 = scmp.lt.s32.totalorder %s4043_s2, %s4036_s26 }
  0x2c   : > { %p4039_p13 = pnand %p4037_p12, %p4542_p7 }
  0x2d   : > { %p4046_p6 = por %p4045_p4, %p4044_p1 }
  0x2e   : > { %p4040_p0 = pneg %p4039_p13 }
  0x30   : > { %p4047_p8 = pnand %p4046_p6, %p4040_p0 }
  0x32   : > { %4050 = shalt.err (!%p4047_p8)
}
  0x33   : > { %3902 = dma.hbm_to_vmem [thread:$0]  (!%p4526_p5), %s5188_s7, 16, %s4514_s29, [#allocation5]  }
  0x34   : > { %s4051_s6 = scalar_lea.hbm %s5149_s11, 16 }
  0x35   : > { %p4052_p9 = scmp.ne.s32.totalorder %s5149_s11, %s4051_s6  ;;  %p4058_p12 = scmp.lt.u32.totalorder %s4051_s6, %s5149_s11 }
  0x37   : > { %p4054_p10 = pnand %p4052_p9, %p4542_p7 }
  0x39   : > { %p4055_p11 = pneg %p4054_p10 }
  0x3b   : > { %p4060_p13 = pnand %p4058_p12, %p4055_p11 }
  0x3d   : > { %4063 = shalt.err (!%p4060_p13)
}
  0x3e   : > { %s4064_s29 = scalar_lea.vmem %s4522_s23, 16  ;;  %s4071_s18 = scalar_lea.vmem %s4522_s23, 32 }
  0x3f   : > { %p4065_p0 = scmp.ne.s32.totalorder %s4522_s23, %s4064_s29  ;;  %p4072_p6 = scmp.lt.s32.totalorder %s4522_s23, %s4522_s23 }
  0x40   : > { %p4073_p8 = scmp.lt.s32.totalorder %s4071_s18, %s4064_s29 }
  0x41   : > { %p4067_p1 = pnand %p4065_p0, %p4542_p7 }
  0x42   : > { %p4074_p9 = por %p4073_p8, %p4072_p6 }
  0x43   : > { %p4068_p4 = pneg %p4067_p1 }
  0x45   : > { %p4075_p10 = pnand %p4074_p9, %p4068_p4 }
  0x47   : > { %4078 = shalt.err (!%p4075_p10)
}
  0x48   : > { %3908 = dma.hbm_to_vmem [thread:$0]  (!%p4526_p5), %s5149_s11, 16, %s4522_s23, [#allocation8]  }
  0x49   : > { %s4079_s0 = scalar_lea.hbm %s5152_s14, 16 }
  0x4a   : > { %p4080_p11 = scmp.ne.s32.totalorder %s5152_s14, %s4079_s0  ;;  %p4086_p0 = scmp.lt.u32.totalorder %s4079_s0, %s5152_s14 }
  0x4c   : > { %p4082_p12 = pnand %p4080_p11, %p4542_p7 }
  0x4e   : > { %p4083_p13 = pneg %p4082_p12 }
  0x50   : > { %p4088_p1 = pnand %p4086_p0, %p4083_p13 }
  0x52   : > { %4091 = shalt.err (!%p4088_p1)
}
  0x53   : > { %s4092_s23 = scalar_lea.vmem %s4530_s5, 16  ;;  %s4099_s18 = scalar_lea.vmem %s4530_s5, 32 }
  0x54   : > { %p4093_p4 = scmp.ne.s32.totalorder %s4530_s5, %s4092_s23  ;;  %p4100_p9 = scmp.lt.s32.totalorder %s4530_s5, %s4530_s5 }
  0x55   : > { %p4101_p10 = scmp.lt.s32.totalorder %s4099_s18, %s4092_s23 }
  0x56   : > { %p4095_p6 = pnand %p4093_p4, %p4542_p7 }
  0x57   : > { %p4102_p11 = por %p4101_p10, %p4100_p9 }
  0x58   : > { %p4096_p8 = pneg %p4095_p6 }
  0x5a   : > { %p4103_p12 = pnand %p4102_p11, %p4096_p8 }
  0x5c   : > { %4106 = shalt.err (!%p4103_p12)
}
  0x5d   : > { %3914 = dma.hbm_to_vmem [thread:$0]  (!%p4526_p5), %s5152_s14, 16, %s4530_s5, [#allocation11]  }
  0x5e   : > { %s4107_s0 = scalar_lea.hbm %s5155_s17, 16 }
  0x5f   : > { %p4108_p13 = scmp.ne.s32.totalorder %s5155_s17, %s4107_s0  ;;  %p4114_p4 = scmp.lt.u32.totalorder %s4107_s0, %s5155_s17 }
  0x61   : > { %p4110_p0 = pnand %p4108_p13, %p4542_p7 }
  0x63   : > { %p4111_p1 = pneg %p4110_p0 }
  0x65   : > { %p4116_p6 = pnand %p4114_p4, %p4111_p1 }
  0x67   : > { %4119 = shalt.err (!%p4116_p6)
}
  0x68   : > { %s4120_s5 = scalar_lea.vmem %s4532_s25, 16  ;;  %s4127_s23 = scalar_lea.vmem %s4532_s25, 32 }
  0x69   : > { %p4121_p8 = scmp.ne.s32.totalorder %s4532_s25, %s4120_s5  ;;  %p4128_p11 = scmp.lt.s32.totalorder %s4532_s25, %s4532_s25 }
  0x6a   : > { %p4129_p12 = scmp.lt.s32.totalorder %s4127_s23, %s4120_s5 }
  0x6b   : > { %p4123_p9 = pnand %p4121_p8, %p4542_p7 }
  0x6c   : > { %p4130_p13 = por %p4129_p12, %p4128_p11 }
  0x6d   : > { %p4124_p10 = pneg %p4123_p9 }
  0x6f   : > { %p4131_p0 = pnand %p4130_p13, %p4124_p10 }
  0x71   : > { %4134 = shalt.err (!%p4131_p0)
}
  0x72   : > { %3920 = dma.hbm_to_vmem [thread:$0]  (!%p4526_p5), %s5155_s17, 16, %s4532_s25, [#allocation14]  }
  0x73   : > { %s4367_s3 = smov [#allocation16]   ;;  %s4368_s28 = smov [#allocation2]  }
  0x74   : > { %s680_s27 = sshll.u32 %s4367_s3, 4  ;;  %s566_s0 = sshll.u32 %s4368_s28, 4  ;;  %s681_s27 = int_to_ptr.vmem [resolvable:$true] %s680_s27  ;;  %s567_s0 = int_to_ptr.vmem [resolvable:$true] %s566_s0 }
  0x75   : > { %s4135_s2 = scalar_lea.hbm %s5158_s20, 16 }
  0x76   : > { %p4136_p1 = scmp.ne.s32.totalorder %s5158_s20, %s4135_s2  ;;  %p4142_p8 = scmp.lt.u32.totalorder %s4135_s2, %s5158_s20 }
  0x78   : > { %p4138_p4 = pnand %p4136_p1, %p4542_p7 }
  0x7a   : > { %p4139_p6 = pneg %p4138_p4 }
  0x7c   : > { %p4144_p9 = pnand %p4142_p8, %p4139_p6 }
  0x7e   : > { %4147 = shalt.err (!%p4144_p9)
}
  0x7f   : > { %s4148_s25 = scalar_lea.vmem %s681_s27, 16  ;;  %s4155_s22 = scalar_lea.vmem %s681_s27, 32 }
  0x80   : > { %p4149_p10 = scmp.ne.s32.totalorder %s681_s27, %s4148_s25  ;;  %p4156_p13 = scmp.lt.s32.totalorder %s681_s27, %s681_s27 }
  0x81   : > { %p4157_p0 = scmp.lt.s32.totalorder %s4155_s22, %s4148_s25 }
  0x82   : > { %p4151_p11 = pnand %p4149_p10, %p4542_p7 }
  0x83   : > { %p4158_p2 = por %p4157_p0, %p4156_p13 }
  0x84   : > { %p4152_p12 = pneg %p4151_p11 }
  0x86   : > { %p4159_p3 = pnand %p4158_p2, %p4152_p12 }
  0x88   : > { %4162 = shalt.err (!%p4159_p3)
}
  0x89   : > { %3926 = dma.hbm_to_vmem [thread:$0]  (!%p4526_p5), %s5158_s20, 16, %s681_s27, [#allocation17]  }
  0x8a   : > { %s5190_s2 = sld [smem:[#allocation32_spill]] }
  0x90   : > { %s4163_s29 = scalar_lea.hbm %s5190_s2, 16 }
  0x91   : > { %p4164_p1 = scmp.ne.s32.totalorder %s5190_s2, %s4163_s29  ;;  %p4170_p3 = scmp.lt.u32.totalorder %s4163_s29, %s5190_s2 }
  0x93   : > { %p4166_p4 = pnand %p4164_p1, %p4542_p7 }
  0x95   : > { %p4167_p2 = pneg %p4166_p4 }
  0x97   : > { %p4172_p6 = pnand %p4170_p3, %p4167_p2 }
  0x99   : > { %4175 = shalt.err (!%p4172_p6)
}
  0x9a   : > { %s4176_s22 = scalar_lea.vmem %s567_s0, 16  ;;  %s4183_s27 = scalar_lea.vmem %s567_s0, 32 }
  0x9b   : > { %p4177_p8 = scmp.ne.s32.totalorder %s567_s0, %s4176_s22  ;;  %p4184_p11 = scmp.lt.s32.totalorder %s567_s0, %s567_s0 }
  0x9c   : > { %p4185_p12 = scmp.lt.s32.totalorder %s4183_s27, %s4176_s22 }
  0x9d   : > { %p4179_p9 = pnand %p4177_p8, %p4542_p7 }
  0x9e   : > { %p4186_p13 = por %p4185_p12, %p4184_p11 }
  0x9f   : > { %p4180_p10 = pneg %p4179_p9 }
  0xa1   : > { %p4187_p0 = pnand %p4186_p13, %p4180_p10 }
  0xa3   : > { %4190 = shalt.err (!%p4187_p0)
}
  0xa4   : > { %3899 = dma.hbm_to_vmem [thread:$0]  (!%p4526_p5), %s5190_s2, 16, %s567_s0, [#allocation3]  }
  0xa5   : > { %s4369_s6 = smov [#allocation6]   ;;  %s4370_s29 = smov [#allocation9]  }
  0xa6   : > { %s591_s26 = sshll.u32 %s4369_s6, 4  ;;  %s619_s5 = sshll.u32 %s4370_s29, 4  ;;  %s592_s26 = int_to_ptr.vmem [resolvable:$true] %s591_s26  ;;  %s620_s5 = int_to_ptr.vmem [resolvable:$true] %s619_s5 }
  0xa7   : > { %s4191_s25 = scalar_lea.hbm %s5147_s9, 16 }
  0xa8   : > { %p4192_p1 = scmp.ne.s32.totalorder %s5147_s9, %s4191_s25  ;;  %p4198_p3 = scmp.lt.u32.totalorder %s4191_s25, %s5147_s9 }
  0xaa   : > { %p4194_p4 = pnand %p4192_p1, %p4542_p7 }
  0xac   : > { %p4195_p2 = pneg %p4194_p4 }
  0xae   : > { %p4200_p6 = pnand %p4198_p3, %p4195_p2 }
  0xb0   : > { %4203 = shalt.err (!%p4200_p6)
}
  0xb1   : > { %s4204_s0 = scalar_lea.vmem %s592_s26, 16  ;;  %s4211_s28 = scalar_lea.vmem %s592_s26, 32 }
  0xb2   : > { %p4205_p8 = scmp.ne.s32.totalorder %s592_s26, %s4204_s0  ;;  %p4212_p11 = scmp.lt.s32.totalorder %s592_s26, %s592_s26 }
  0xb3   : > { %p4213_p12 = scmp.lt.s32.totalorder %s4211_s28, %s4204_s0 }
  0xb4   : > { %p4207_p9 = pnand %p4205_p8, %p4542_p7 }
  0xb5   : > { %p4214_p13 = por %p4213_p12, %p4212_p11 }
  0xb6   : > { %p4208_p10 = pneg %p4207_p9 }
  0xb8   : > { %p4215_p0 = pnand %p4214_p13, %p4208_p10 }
  0xba   : > { %4218 = shalt.err (!%p4215_p0)
}
  0xbb   : > { %3905 = dma.hbm_to_vmem [thread:$0]  (!%p4526_p5), %s5147_s9, 16, %s592_s26, [#allocation5]  }
  0xbc   : > { %s4219_s18 = scalar_lea.hbm %s5151_s13, 16 }
  0xbd   : > { %p4220_p1 = scmp.ne.s32.totalorder %s5151_s13, %s4219_s18  ;;  %p4226_p3 = scmp.lt.u32.totalorder %s4219_s18, %s5151_s13 }
  0xbf   : > { %p4222_p4 = pnand %p4220_p1, %p4542_p7 }
  0xc1   : > { %p4223_p2 = pneg %p4222_p4 }
  0xc3   : > { %p4228_p6 = pnand %p4226_p3, %p4223_p2 }
  0xc5   : > { %4231 = shalt.err (!%p4228_p6)
}
  0xc6   : > { %s4232_s0 = scalar_lea.vmem %s620_s5, 16  ;;  %s4239_s26 = scalar_lea.vmem %s620_s5, 32 }
  0xc7   : > { %p4233_p8 = scmp.ne.s32.totalorder %s620_s5, %s4232_s0  ;;  %p4240_p11 = scmp.lt.s32.totalorder %s620_s5, %s620_s5 }
  0xc8   : > { %p4241_p12 = scmp.lt.s32.totalorder %s4239_s26, %s4232_s0 }
  0xc9   : > { %p4235_p9 = pnand %p4233_p8, %p4542_p7 }
  0xca   : > { %p4242_p13 = por %p4241_p12, %p4240_p11 }
  0xcb   : > { %p4236_p10 = pneg %p4235_p9 }
  0xcd   : > { %p4243_p0 = pnand %p4242_p13, %p4236_p10 }
  0xcf   : > { %4246 = shalt.err (!%p4243_p0)
}
  0xd0   : > { %3911 = dma.hbm_to_vmem [thread:$0]  (!%p4526_p5), %s5151_s13, 16, %s620_s5, [#allocation8]  }
  0xd1   : > { %s4371_s29 = smov [#allocation12]   ;;  %s4372_s23 = smov [#allocation15]  }
  0xd2   : > { %s641_s7 = sshll.u32 %s4371_s29, 4  ;;  %s669_s18 = sshll.u32 %s4372_s23, 4  ;;  %s642_s7 = int_to_ptr.vmem [resolvable:$true] %s641_s7  ;;  %s670_s18 = int_to_ptr.vmem [resolvable:$true] %s669_s18 }
  0xd3   : > { %s4247_s27 = scalar_lea.hbm %s5153_s15, 16 }
  0xd4   : > { %p4248_p1 = scmp.ne.s32.totalorder %s5153_s15, %s4247_s27  ;;  %p4254_p3 = scmp.lt.u32.totalorder %s4247_s27, %s5153_s15 }
  0xd6   : > { %p4250_p4 = pnand %p4248_p1, %p4542_p7 }
  0xd8   : > { %p4251_p2 = pneg %p4250_p4 }
  0xda   : > { %p4256_p6 = pnand %p4254_p3, %p4251_p2 }
  0xdc   : > { %4259 = shalt.err (!%p4256_p6)
}
  0xdd   : > { %s4260_s5 = scalar_lea.vmem %s642_s7, 16  ;;  %s4267_s6 = scalar_lea.vmem %s642_s7, 32 }
  0xde   : > { %p4261_p8 = scmp.ne.s32.totalorder %s642_s7, %s4260_s5  ;;  %p4268_p11 = scmp.lt.s32.totalorder %s642_s7, %s642_s7 }
  0xdf   : > { %p4269_p12 = scmp.lt.s32.totalorder %s4267_s6, %s4260_s5 }
  0xe0   : > { %p4263_p9 = pnand %p4261_p8, %p4542_p7 }
  0xe1   : > { %p4270_p13 = por %p4269_p12, %p4268_p11 }
  0xe2   : > { %p4264_p10 = pneg %p4263_p9 }
  0xe4   : > { %p4271_p0 = pnand %p4270_p13, %p4264_p10 }
  0xe6   : > { %4274 = shalt.err (!%p4271_p0)
}
  0xe7   : > { %3917 = dma.hbm_to_vmem [thread:$0]  (!%p4526_p5), %s5153_s15, 16, %s642_s7, [#allocation11]  }
  0xe8   : > { %s4275_s27 = scalar_lea.hbm %s5157_s19, 16 }
  0xe9   : > { %p4276_p1 = scmp.ne.s32.totalorder %s5157_s19, %s4275_s27  ;;  %p4282_p3 = scmp.lt.u32.totalorder %s4275_s27, %s5157_s19 }
  0xeb   : > { %p4278_p4 = pnand %p4276_p1, %p4542_p7 }
  0xed   : > { %p4279_p2 = pneg %p4278_p4 }
  0xef   : > { %p4284_p6 = pnand %p4282_p3, %p4279_p2 }
  0xf1   : > { %4287 = shalt.err (!%p4284_p6)
}
  0xf2   : > { %s4288_s5 = scalar_lea.vmem %s670_s18, 16  ;;  %s4295_s7 = scalar_lea.vmem %s670_s18, 32 }
  0xf3   : > { %p4289_p8 = scmp.ne.s32.totalorder %s670_s18, %s4288_s5  ;;  %p4296_p11 = scmp.lt.s32.totalorder %s670_s18, %s670_s18 }
  0xf4   : > { %p4297_p12 = scmp.lt.s32.totalorder %s4295_s7, %s4288_s5 }
  0xf5   : > { %p4291_p9 = pnand %p4289_p8, %p4542_p7 }
  0xf6   : > { %p4298_p13 = por %p4297_p12, %p4296_p11 }
  0xf7   : > { %p4292_p10 = pneg %p4291_p9 }
  0xf9   : > { %p4299_p0 = pnand %p4298_p13, %p4292_p10 }
  0xfb   : > { %4302 = shalt.err (!%p4299_p0)
}
  0xfc   : > { %3923 = dma.hbm_to_vmem [thread:$0]  (!%p4526_p5), %s5157_s19, 16, %s670_s18, [#allocation14]  }
  0xfd   : > { %s4373_s23 = smov [#allocation18]   ;;  %s4303_s3 = scalar_lea.hbm %s5159_s21, 16 }
  0xfe   : > { %s691_s25 = sshll.u32 %s4373_s23, 4  ;;  %p4304_p1 = scmp.ne.s32.totalorder %s5159_s21, %s4303_s3  ;;  %s692_s25 = int_to_ptr.vmem [resolvable:$true] %s691_s25 }
  0xff   : > { %p4310_p3 = scmp.lt.u32.totalorder %s4303_s3, %s5159_s21 }
 0x100   : > { %p4306_p4 = pnand %p4304_p1, %p4542_p7 }
 0x102   : > { %p4307_p2 = pneg %p4306_p4 }
 0x104   : > { %p4312_p6 = pnand %p4310_p3, %p4307_p2 }
 0x106   : > { %4315 = shalt.err (!%p4312_p6)
}
 0x107   : > { %s4316_s18 = scalar_lea.vmem %s692_s25, 16  ;;  %s4323_s7 = scalar_lea.vmem %s692_s25, 32 }
 0x108   : > { %p4317_p8 = scmp.ne.s32.totalorder %s692_s25, %s4316_s18  ;;  %p4324_p11 = scmp.lt.s32.totalorder %s692_s25, %s692_s25 }
 0x109   : > { %p4325_p12 = scmp.lt.s32.totalorder %s4323_s7, %s4316_s18 }
 0x10a   : > { %p4319_p9 = pnand %p4317_p8, %p4542_p7 }
 0x10b   : > { %p4326_p13 = por %p4325_p12, %p4324_p11 }
 0x10c   : > { %p4320_p10 = pneg %p4319_p9 }
 0x10e   : > { %p4327_p0 = pnand %p4326_p13, %p4320_p10 }
 0x110   : > { %4330 = shalt.err (!%p4327_p0)
}
 0x111   : > { %3929 = dma.hbm_to_vmem [thread:$0]  (!%p4526_p5), %s5159_s21, 16, %s692_s25, [#allocation17]  }
 0x112   : > { %p5191_p1 = scmp.ne.s32.totalorder %s5186_s4, 0 }
 0x113   : > { %p5192_p4 = scmp.eq.s32.totalorder (!%p5191_p1), %s4509_s30, 0 }
 0x114   : > { %718 = sbr.rel (%p5191_p1) target bundleno = 6823 (0x1aa7), region = 108 }
 0x11b   : > { %4336 = dma.done.wait (%p5192_p4), [#allocation3], 16   ;;  %p5193_p7 = pmov %p5192_p4 }
 0x11c   : > { %p5194_p2 = pmov %p5192_p4 }
 0x11d   : > { %4338 = vsyncadd (%p5193_p7), [#allocation3], 4294967280 }
 0x11e   : > { %4340 = dma.done.wait (%p5194_p2), [#allocation5], 32   ;;  %p5195_p3 = pmov %p5194_p2 }
 0x11f   : > { %p5196_p6 = pmov %p5194_p2 }
 0x120   : > { %4342 = vsyncadd (%p5195_p3), [#allocation5], 4294967264 }
 0x121   : > { %4344 = dma.done.wait (%p5196_p6), [#allocation8], 32   ;;  %p5197_p5 = pmov %p5194_p2 }
 0x122   : > { %p5198_p8 = pmov %p5194_p2 }
 0x123   : > { %4346 = vsyncadd (%p5197_p5), [#allocation8], 4294967264 }
 0x124   : > { %4348 = dma.done.wait (%p5198_p8), [#allocation11], 32   ;;  %p5199_p9 = pmov %p5194_p2 }
 0x125   : > { %p5200_p10 = pmov %p5194_p2 }
 0x126   : > { %4350 = vsyncadd (%p5199_p9), [#allocation11], 4294967264 }
 0x127   : > { %4352 = dma.done.wait (%p5200_p10), [#allocation14], 32   ;;  %p5201_p11 = pmov %p5194_p2 }
 0x128   : > { %p5202_p12 = pmov %p5194_p2 }
 0x129   : > { %4354 = vsyncadd (%p5201_p11), [#allocation14], 4294967264 }
 0x12a   : > { %4356 = dma.done.wait (%p5202_p12), [#allocation17], 32   ;;  %p5203_p13 = pmov %p5194_p2 }
 0x12b   : > { %p822_p0 = scmp.lt.s32.totalorder %s4509_s30, 1  ;;  %v4374_v0 = vmov 0.0|0.0   ;;  %vm4375_vm0 = vmmov 0   ;;  %v4376_v1 = vmov 0.0   ;;  %s5204_s1 = sld [smem:[#allocation28_spill]]  ;;  %vm847_vm1 = vcmask 261120  }
 0x12c   : > { %4358 = vsyncadd (%p5203_p13), [#allocation17], 4294967264  ;;  %3816 = vmatprep.subr.bf16.mxu0 %v4374_v0  ;;  %3641 = vmatprep.mubr.msk.f32.mxu0 %vm4375_vm0, %v4376_v1  ;;  %s5205_s18 = sld [smem:[#allocation26_spill]]  ;;  %s5206_s29 = sld [smem:[#allocation29_spill]]  ;;  %vm929_vm2 = vcmask 64512   ;;  %v1005_v16 = vlaneseq  ;;  %vm3197_vm4 = vcmask 523264  }
 0x12d   : > { %3649 = vmatprep.subr.mxu1 %v4376_v1  ;;  %3651 = vmatprep.mubr.msk.f32.mxu1 %vm4375_vm0, %v4376_v1  ;;  %s5219_s30 = smov (!%p822_p0, %s4509_s30), 1  ;;  %s4377_s4 = smov 120  }
 0x12e   : > { %s4808_s26 = sshll.u32 %s5219_s30, 3  ;;  %s5172_s24 = smov 96   ;;  %v4844_v17 = vshrl.u32 %v1005_v16, 7  ;;  %v4846_v18 = vand.u32 127, %v1005_v16 }
 0x12f   : > { %s4379_s23 = smov 88   ;;  %s4380_s25 = smov 56  }
 0x130   : > { %vm1009_vm3 = vcmp.gt.s32.totalorder %v4846_v18, %v4844_v17  ;;  %s4381_s22 = smov 64   ;;  %s5169_s27 = smov 80  }
 0x131   : > { %v836_v2 = vld [vmem:[%s5204_s1] sm:$0xff]  ;;  %v837_v3 = vld [vmem:[%s5204_s1 + $0x8] sm:$0xff]  ;;  %v838_v4 = vld [vmem:[%s5204_s1 + $0x10] sm:$0xff]  ;;  %s5173_s3 = smov 112   ;;  %s5207_s5 = sld [smem:[#allocation30_spill]] }
 0x132   : > { %v3817_v5 = vpack.c.bf16 %v837_v3, %v836_v2  ;;  %v839_v6 = vld [vmem:[%s5204_s1 + $0x18] sm:$0xff]  ;;  %s825_s7 = scalar_lea.vmem %s5205_s18, %s4808_s26  ;;  %v3504_v9 = vld [vmem:[%s5206_s29] ss:$0 sm:$0xff]  ;;  %s5168_s30 = smov 72  }
 0x133   : > { %v3820_v7 = vpack.c.bf16 %v839_v6, %v838_v4  ;;  %v4815_v8 = vld [vmem:[%s825_s7] sm:$0xff]  ;;  %s5170_s6 = smov 104   ;;  %s4386_s29 = smov 48  }
 0x134   : > { %3818 = vmatpush3.bf16.msra.mxu0 %v3817_v5  ;;  %s4387_s0 = smov 40   ;;  %s5215_s18 = sld [smem:[#allocation34_spill]] }
 0x135   : > { %3819 = vmatprep.subr.bf16.mxu0 %v4374_v0 }
 0x137   : > { %v922_v39 = vld [vmem:[%s5207_s5 + $0x8] sm:$0xff]  ;;  %v921_v48 = vld [vmem:[%s5207_s5] sm:$0xff]  ;;  %v923_v16 = vld [vmem:[%s5207_s5 + $0x10] sm:$0xff] }
 0x138   : > { %3821 = vmatpush3.bf16.msra.mxu0 %v3820_v7  ;;  %v924_v17 = vld [vmem:[%s5207_s5 + $0x18] sm:$0xff] }
 0x139   : > { %3644 = vmatprep.subr.mxu0 %v4376_v1 }
 0x13b   : > { %3642 = vmatmul.mubr.msk.f32.vlgmr.msra.gmra.mrb[0].mxu0 %vm847_vm1, %v4815_v8 }
 0x13c   : > { %3646 = vmatprep.mubr.msk.f32.mxu0 %vm4375_vm0, %v4376_v1 }
 0x20e   : > { %v917_v10 = vpop.f32.mrb[0].mxu0 }
 0x20f   : > { %v4825_v11 = vadd.f32 %v3504_v9, %v917_v10  ;;  %v3643_v12 = vpop.f32.mrb[1].mxu0 }
 0x211   : > { %1098 = vrot.lane.b32.xlu1 %v4825_v11, %s4377_s4  ;;  %927 = vrot.lane.b32.xlu0 %v4825_v11, %s5172_s24  ;;  %s5209_s24 = sld [smem:[#allocation27_spill]] }
 0x215   : > { %1100 = vrot.lane.b32.xlu0 %v4825_v11, %s4379_s23 }
 0x217   : > { %s829_s7 = scalar_lea.vmem %s5209_s24, %s4808_s26  ;;  %s5211_s24 = smov 96  }
 0x283   : > { %v928_v13 = vpop.permute.xlu0 %927  ;;  %v1099_v15 = vpop.permute.xlu1 %1098 }
 0x284   : > { %3645 = vmatpush3.xpose.msk.msra.mxu0 %vm929_vm2, %v928_v13 }
 0x285   : > { %3654 = vmatprep.subr.mxu0 %v4376_v1 }
 0x287   : > { %3647 = vmatmul.mubr.msk.f32.vlgmr.msra.gmra.mrb[2].mxu0 %vm929_vm2, %v4825_v11  ;;  %v1101_v14 = vpop.permute.xlu0 %1100 }
 0x288   : > { %3655 = vmatpush3.xpose.msk.msra.mxu0 %vm929_vm2, %v1101_v14  ;;  %3656 = vmatprep.mubr.msk.f32.mxu0 %vm4375_vm0, %v4376_v1 }
 0x289   : > { %3664 = vmatprep.subr.mxu0 %v4376_v1 }
 0x28b   : > { %3657 = vmatmul.mubr.msk.f32.vlgmr.msra.gmra.mrb[4].mxu0 %vm929_vm2, %v1099_v15 }
 0x28c   : > { %3666 = vmatprep.mubr.msk.f32.mxu0 %vm4375_vm0, %v4376_v1  ;;  %3665 = vmatpush3.msra.mxu0 %v922_v39 }
 0x28d   : > { %3674 = vmatprep.subr.mxu0 %v4376_v1 }
 0x35a   : > { %v1000_v19 = vpop.f32.mrb[2].mxu0 }
 0x35b   : > { %v1004_v20 = vmul.f32 0.35355338, %v1000_v19  ;;  %v3648_v21 = vpop.f32.mrb[3].mxu0 }
 0x35d   : > { %v1010_v22 = vsel %vm1009_vm3, -1e+30, %v1004_v20 }
 0x35e   : > { %v1172_v23 = vpop.f32.mrb[4].mxu0  ;;  %v1011_v24 = vsel %vm929_vm2, %v1010_v22, -inf }
 0x35f   : > { %v1176_v25 = vmul.f32 0.35355338, %v1172_v23  ;;  %1012 = vmax.xlane.f32.xlu1 %v1011_v24  ;;  %v3658_v26 = vpop.f32.mrb[5].mxu0 }
 0x361   : > { %v1177_v27 = vsel %vm1009_vm3, -1e+30, %v1176_v25 }
 0x362   : > { %v1178_v28 = vsel %vm929_vm2, %v1177_v27, -inf }
 0x363   : > { %1179 = vmax.xlane.f32.xlu0 %v1178_v28 }
 0x3ec   : > { %v1013_v29 = vpop.xlane.xlu1 %1012 }
 0x3ed   : > { %v1014_v30 = vsub.f32 %v1010_v22, %v1013_v29 }
 0x3ef   : > { %v1015_v31 = vmul.f32 1.442695, %v1014_v30 }
 0x3f0   : > { %v1180_v32 = vpop.xlane.xlu0 %1179 }
 0x3f1   : > { %3985 = vpow2.f32 %v1015_v31  ;;  %v1181_v33 = vsub.f32 %v1177_v27, %v1180_v32 }
 0x3f3   : > { %v1182_v34 = vmul.f32 1.442695, %v1181_v33 }
 0x3f5   : > { %3987 = vpow2.f32 %v1182_v34 }
 0x3fb   : > { %v3986_v35 = vpop.eup %3985 }
 0x3fc   : > { %v1017_v36 = vsel %vm929_vm2, %v3986_v35, 0.0 }
 0x3fd   : > { %1018 = vadd.xlane.f32.xlu0 %v1017_v36 }
 0x3ff   : > { %v3988_v37 = vpop.eup %3987 }
 0x400   : > { %v1184_v38 = vsel %vm929_vm2, %v3988_v37, 0.0 }
 0x401   : > { %1185 = vadd.xlane.f32.xlu1 %v1184_v38 }
 0x412   : > { %1189 = vrot.lane.b32.xlu1 %v4825_v11, %s4380_s25  ;;  %s5208_s25 = sld [smem:[#allocation31_spill]] }
 0x413   : > { %1022 = vrot.lane.b32.xlu0 %v4825_v11, %s4381_s22  ;;  %s5212_s22 = smov 104  }
 0x416   : > { %1413 = vrot.lane.b32.xlu1 %v4825_v11, %s5169_s27 }
 0x417   : > { %1411 = vrot.lane.b32.xlu0 %v4825_v11, %s5173_s3 }
 0x418   : > { %v3522_v38 = vld [vmem:[%s5208_s25] ss:$0 sm:$0xff]  ;;  %s5216_s25 = sld [smem:[#allocation35_spill]] }
 0x48a   : > { %v1019_v40 = vpop.xlane.xlu0 %1018 }
 0x48b   : > { %3989 = vrcp.f32 %v1019_v40 }
 0x48e   : > { %v1186_v41 = vpop.xlane.xlu1 %1185  ;;  %v1023_v42 = vpop.permute.xlu0 %1022 }
 0x48f   : > { %3991 = vrcp.f32 %v1186_v41  ;;  %3650 = vmatpush3.msra.mxu1 %v1023_v42 }
 0x490   : > { %3659 = vmatprep.subr.mxu1 %v4376_v1 }
 0x492   : > { %v1190_v45 = vpop.permute.xlu1 %1189  ;;  %v1412_v54 = vpop.permute.xlu0 %1411 }
 0x495   : > { %v3990_v43 = vpop.eup %3989 }
 0x496   : > { %v1021_v44 = vmul.f32 %v3990_v43, %v3986_v35  ;;  %v1414_v52 = vpop.permute.xlu1 %1413 }
 0x498   : > { %3652 = vmatmul.mubr.msk.f32.vlgmr.msra.gmra.mrb[0].mxu1 %vm929_vm2, %v1021_v44 }
 0x499   : > { %v3992_v46 = vpop.eup %3991  ;;  %3660 = vmatpush3.msra.mxu1 %v1190_v45  ;;  %3661 = vmatprep.mubr.msk.f32.mxu1 %vm4375_vm0, %v4376_v1 }
 0x49a   : > { %v1188_v47 = vmul.f32 %v3992_v46, %v3988_v37  ;;  %3669 = vmatprep.subr.mxu1 %v4376_v1 }
 0x49c   : > { %3662 = vmatmul.mubr.msk.f32.vlgmr.msra.gmra.mrb[2].mxu1 %vm929_vm2, %v1188_v47 }
 0x49d   : > { %3671 = vmatprep.mubr.msk.f32.mxu1 %vm4375_vm0, %v4376_v1  ;;  %3670 = vmatpush3.msra.mxu1 %v921_v48 }
 0x49e   : > { %3679 = vmatprep.subr.mxu1 %v4376_v1 }
 0x56b   : > { %v1094_v49 = vpop.f32.mrb[0].mxu1 }
 0x56c   : > { %v3653_v50 = vpop.f32.mrb[1].mxu1  ;;  %3672 = vmatmul.mubr.msk.f32.vlgmr.msra.gmra.mrb[4].mxu1 %vm929_vm2, %v1094_v49 }
 0x56d   : > { %3681 = vmatprep.mubr.msk.f32.mxu1 %vm4375_vm0, %v4376_v1  ;;  %v2015_v50 = vld [vmem:[%s5148_s10] sm:$0xff] }
 0x56f   : > { %v1261_v51 = vpop.f32.mrb[2].mxu1 }
 0x570   : > { %v3663_v53 = vpop.f32.mrb[3].mxu1  ;;  %3667 = vmatmul.mubr.msk.f32.vlgmr.msra.gmra.mrb[6].mxu0 %vm929_vm2, %v1261_v51  ;;  %v2016_v51 = vld [vmem:[%s5148_s10 + $0x8] sm:$0xff] }
 0x571   : > { %3675 = vmatpush3.xpose.msk.msra.mxu0 %vm929_vm2, %v1414_v52  ;;  %3676 = vmatprep.mubr.msk.f32.mxu0 %vm4375_vm0, %v4376_v1  ;;  %v1931_v52 = vld [vmem:[%s5146_s8] sm:$0xff]  ;;  %v1932_v53 = vld [vmem:[%s5146_s8 + $0x8] sm:$0xff] }
 0x572   : > { %3684 = vmatprep.subr.mxu0 %v4376_v1 }
 0x574   : > { %3677 = vmatmul.mubr.msk.f32.vlgmr.msra.gmra.mrb[8].mxu0 %vm929_vm2, %v1412_v54  ;;  %v2017_v54 = vld [vmem:[%s5148_s10 + $0x10] sm:$0xff] }
 0x575   : > { %3686 = vmatprep.mubr.msk.f32.mxu0 %vm4375_vm0, %v4376_v1  ;;  %3685 = vmatpush3.msra.mxu0 %v923_v16 }
 0x576   : > { %3694 = vmatprep.subr.mxu0 %v4376_v1 }
 0x63f   : > { %v1407_v55 = vpop.f32.mrb[4].mxu1 }
 0x640   : > { %v3673_v56 = vpop.f32.mrb[5].mxu1 }
 0x641   : > { %v2018_v56 = vld [vmem:[%s5148_s10 + $0x18] sm:$0xff] }
 0x643   : > { %v1334_v57 = vpop.f32.mrb[6].mxu0 }
 0x644   : > { %v4893_v58 = vadd.f32 %v1407_v55, %v1334_v57  ;;  %v3668_v59 = vpop.f32.mrb[7].mxu0  ;;  %v3823_v55 = vpack.c.bf16 %v1932_v53, %v1931_v52  ;;  %v3832_v57 = vpack.c.bf16 %v2018_v56, %v2017_v54 }
 0x645   : > { %v1934_v59 = vld [vmem:[%s5146_s8 + $0x18] sm:$0xff] }
 0x647   : > { %v1485_v60 = vpop.f32.mrb[8].mxu0 }
 0x648   : > { %v1489_v61 = vmul.f32 0.35355338, %v1485_v60  ;;  %v3678_v62 = vpop.f32.mrb[9].mxu0  ;;  %v835_v60 = vld [vmem:[%s829_s7] sm:$0xff]  ;;  %s5214_s7 = smov 72  }
 0x64a   : > { %v1490_v63 = vsel %vm1009_vm3, -1e+30, %v1489_v61 }
 0x64b   : > { %v1491_v2 = vsel %vm929_vm2, %v1490_v63, -inf }
 0x64c   : > { %1492 = vmax.xlane.f32.xlu1 %v1491_v2 }
 0x65d   : > { %1654 = vrot.lane.b32.xlu1 %v4825_v11, %s5168_s30 }
 0x661   : > { %1652 = vrot.lane.b32.xlu1 %v4825_v11, %s5170_s6 }
 0x6d9   : > { %v1493_v3 = vpop.xlane.xlu1 %1492 }
 0x6da   : > { %v1494_v4 = vsub.f32 %v1490_v63, %v1493_v3 }
 0x6dc   : > { %v1495_v5 = vmul.f32 1.442695, %v1494_v4  ;;  %v3523_v4 = vld [vmem:[#allocation2] ss:$0 sm:$0xff] }
 0x6dd   : > { %v1655_v13 = vpop.permute.xlu1 %1654 }
 0x6de   : > { %3993 = vpow2.f32 %v1495_v5 }
 0x6e1   : > { %v1653_v15 = vpop.permute.xlu1 %1652 }
 0x6e8   : > { %v3994_v6 = vpop.eup %3993 }
 0x6e9   : > { %v1497_v7 = vsel %vm929_vm2, %v3994_v6, 0.0 }
 0x6ea   : > { %1498 = vadd.xlane.f32.xlu0 %v1497_v7 }
 0x700   : > { %1502 = vrot.lane.b32.xlu0 %v4825_v11, %s4386_s29 }
 0x777   : > { %v1499_v9 = vpop.xlane.xlu0 %1498 }
 0x778   : > { %3995 = vrcp.f32 %v1499_v9 }
 0x77b   : > { %v1503_v10 = vpop.permute.xlu0 %1502 }
 0x77c   : > { %3680 = vmatpush3.msra.mxu1 %v1503_v10  ;;  %v3527_v10 = vld [vmem:[#allocation7] ss:$0 sm:$0xff] }
 0x77d   : > { %3689 = vmatprep.subr.mxu1 %v4376_v1 }
 0x782   : > { %v3996_v12 = vpop.eup %3995 }
 0x783   : > { %v1501_v14 = vmul.f32 %v3996_v12, %v3994_v6  ;;  %v3524_v6 = vld [vmem:[#allocation4] ss:$0 sm:$0xff] }
 0x785   : > { %3682 = vmatmul.mubr.msk.f32.vlgmr.msra.gmra.mrb[6].mxu1 %vm929_vm2, %v1501_v14 }
 0x786   : > { %3690 = vmatpush3.xpose.msk.msra.mxu1 %vm929_vm2, %v1655_v13  ;;  %3691 = vmatprep.mubr.msk.f32.mxu1 %vm4375_vm0, %v4376_v1 }
 0x787   : > { %3699 = vmatprep.subr.mxu1 %v4376_v1 }
 0x789   : > { %3692 = vmatmul.mubr.msk.f32.vlgmr.msra.gmra.mrb[8].mxu1 %vm929_vm2, %v1653_v15  ;;  %v3525_v15 = vld [vmem:[#allocation6] ss:$0 sm:$0xff] }
 0x78a   : > { %3701 = vmatprep.mubr.msk.f32.mxu1 %vm4375_vm0, %v4376_v1  ;;  %3700 = vmatpush3.msra.mxu1 %v924_v17 }
 0x78b   : > { %3828 = vmatprep.subr.bf16.mxu1 %v4374_v0 }
 0x858   : > { %v1574_v19 = vpop.f32.mrb[6].mxu1 }
 0x859   : > { %v3683_v20 = vpop.f32.mrb[7].mxu1  ;;  %3687 = vmatmul.mubr.msk.f32.vlgmr.msra.gmra.mrb[10].mxu0 %vm929_vm2, %v1574_v19 }
 0x85a   : > { %3696 = vmatprep.mubr.msk.f32.mxu0 %vm4375_vm0, %v4376_v1 }
 0x85c   : > { %v1726_v21 = vpop.f32.mrb[8].mxu1 }
 0x85d   : > { %v1730_v22 = vmul.f32 0.35355338, %v1726_v21  ;;  %v3693_v23 = vpop.f32.mrb[9].mxu1 }
 0x85f   : > { %v1731_v24 = vsel %vm1009_vm3, -1e+30, %v1730_v22 }
 0x860   : > { %v1732_v25 = vsel %vm929_vm2, %v1731_v24, -inf }
 0x861   : > { %1733 = vmax.xlane.f32.xlu0 %v1732_v25 }
 0x877   : > { %1743 = vrot.lane.b32.xlu0 %v4825_v11, %s4387_s0  ;;  %s5213_s0 = smov 80  }
 0x8ee   : > { %v1734_v26 = vpop.xlane.xlu0 %1733 }
 0x8ef   : > { %v1735_v27 = vsub.f32 %v1731_v24, %v1734_v26 }
 0x8f1   : > { %v1736_v28 = vmul.f32 1.442695, %v1735_v27 }
 0x8f2   : > { %v1744_v29 = vpop.permute.xlu0 %1743 }
 0x8f3   : > { %3997 = vpow2.f32 %v1736_v28  ;;  %3695 = vmatpush3.msra.mxu0 %v1744_v29 }
 0x8f4   : > { %3822 = vmatprep.subr.bf16.mxu0 %v4374_v0 }
 0x8fd   : > { %v3998_v30 = vpop.eup %3997 }
 0x8fe   : > { %v1738_v31 = vsel %vm929_vm2, %v3998_v30, 0.0 }
 0x8ff   : > { %1739 = vadd.xlane.f32.xlu1 %v1738_v31 }
 0x92c   : > { %v1647_v11 = vpop.f32.mrb[10].mxu0 }
 0x92d   : > { %v1651_v18 = vadd.f32 %v1647_v11, %v4893_v58  ;;  %v3688_v32 = vpop.f32.mrb[11].mxu0  ;;  %v1933_v58 = vld [vmem:[%s5146_s8 + $0x10] sm:$0xff] }
 0x92e   : > { %v3826_v61 = vpack.c.bf16 %v1934_v59, %v1933_v58 }
 0x98c   : > { %v1740_v33 = vpop.xlane.xlu1 %1739 }
 0x98d   : > { %3999 = vrcp.f32 %v1740_v33 }
 0x997   : > { %v4000_v34 = vpop.eup %3999 }
 0x998   : > { %v1742_v35 = vmul.f32 %v4000_v34, %v3998_v30 }
 0x99a   : > { %3697 = vmatmul.mubr.msk.f32.vlgmr.msra.gmra.mrb[12].mxu0 %vm929_vm2, %v1742_v35 }
 0x99b   : > { %3712 = vmatprep.mubr.msk.f32.mxu0 %vm4375_vm0, %v4376_v1  ;;  %3824 = vmatpush3.bf16.msra.mxu0 %v3823_v55 }
 0x99c   : > { %3825 = vmatprep.subr.bf16.mxu0 %v4374_v0 }
 0x99f   : > { %3827 = vmatpush3.bf16.msra.mxu0 %v3826_v61 }
 0x9a0   : > { %3726 = vmatprep.subr.mxu0 %v4376_v1 }
 0xa6d   : > { %v1815_v36 = vpop.f32.mrb[12].mxu0 }
 0xa6e   : > { %v3698_v37 = vpop.f32.mrb[13].mxu0  ;;  %3702 = vmatmul.mubr.msk.f32.vlgmr.msra.gmra.mrb[10].mxu1 %vm929_vm2, %v1815_v36 }
 0xa6f   : > { %3723 = vmatprep.mubr.msk.f32.mxu1 %vm4375_vm0, %v4376_v1 }
 0xb41   : > { %v1888_v39 = vpop.f32.mrb[10].mxu1 }
 0xb42   : > { %v1892_v40 = vadd.f32 %v1888_v39, %v1651_v18  ;;  %v3703_v41 = vpop.f32.mrb[11].mxu1 }
 0xb44   : > { %v1899_v42 = vadd.f32 %v3522_v38, %v1892_v40 }
 0xb46   : > { %v1900_v43 = vadd.f32 %v1899_v42, %v4815_v8  ;;  %v3829_v8 = vpack.c.bf16 %v2016_v51, %v2015_v50 }
 0xb48   : > { %v1903_v44 = vsel %vm847_vm1, %v1900_v43, 0.0  ;;  %3830 = vmatpush3.bf16.msra.mxu1 %v3829_v8 }
 0xb49   : > { %1904 = vadd.xlane.f32.xlu1 %v1903_v44  ;;  %3831 = vmatprep.subr.bf16.mxu1 %v4374_v0 }
 0xb4c   : > { %3833 = vmatpush3.bf16.msra.mxu1 %v3832_v57 }
 0xb4d   : > { %3731 = vmatprep.subr.mxu1 %v4376_v1 }
 0xb4f   : > { %3724 = vmatmul.mubr.msk.f32.vlgmr.msra.gmra.mrb[12].mxu1 %vm847_vm1, %v835_v60 }
 0xb50   : > { %3733 = vmatprep.mubr.msk.f32.mxu1 %vm4375_vm0, %v4376_v1 }
 0xbd6   : > { %v1905_v45 = vpop.xlane.xlu1 %1904 }
 0xbd7   : > { %v1907_v46 = vmul.f32 0.03125, %v1905_v45 }
 0xbd9   : > { %v1908_v47 = vsub.f32 %v1900_v43, %v1907_v46  ;;  %v2099_v46 = vld [vmem:[%s5150_s12] sm:$0xff] }
 0xbdb   : > { %v1909_v48 = vmul.f32 %v1908_v47, %v1908_v47 }
 0xbdd   : > { %v1910_v49 = vsel %vm847_vm1, %v1909_v48, 0.0 }
 0xbde   : > { %1911 = vadd.xlane.f32.xlu1 %v1910_v49 }
 0xc22   : > { %v2095_v12 = vpop.f32.mrb[12].mxu1 }
 0xc23   : > { %v4986_v13 = vadd.f32 %v3527_v10, %v2095_v12  ;;  %v3725_v14 = vpop.f32.mrb[13].mxu1 }
 0xc25   : > { %2270 = vrot.lane.b32.xlu1 %v4986_v13, %s4377_s4 }
 0xc6b   : > { %v1912_v62 = vpop.xlane.xlu1 %1911 }
 0xc6c   : > { %v1913_v63 = vmul.f32 0.03125, %v1912_v62 }
 0xc6e   : > { %v1914_v2 = vadd.f32 1e-05, %v1913_v63 }
 0xc70   : > { %4001 = vrsqrt.f32 %v1914_v2 }
 0xc7a   : > { %v4002_v3 = vpop.eup %4001 }
 0xc7b   : > { %v1916_v5 = vmul.f32 %v4002_v3, %v1908_v47  ;;  %v2100_v47 = vld [vmem:[%s5150_s12 + $0x8] sm:$0xff] }
 0xc7d   : > { %v1923_v7 = vmul.f32 %v3523_v4, %v1916_v5 }
 0xc7f   : > { %v4980_v9 = vadd.f32 %v3524_v6, %v1923_v7 }
 0xc81   : > { %3713 = vmatmul.mubr.msk.f32.vlgmr.msra.gmra.mrb[14].mxu0 %vm847_vm1, %v4980_v9 }
 0xc82   : > { %3728 = vmatprep.mubr.msk.f32.mxu0 %vm4375_vm0, %v4376_v1  ;;  %3727 = vmatpush3.xpose.msk.msra.mxu0 %vm929_vm2, %v4986_v13 }
 0xc83   : > { %3736 = vmatprep.subr.mxu0 %v4376_v1 }
 0xc97   : > { %v2271_v21 = vpop.permute.xlu1 %2270 }
 0xd54   : > { %v2011_v16 = vpop.f32.mrb[14].mxu0 }
 0xd55   : > { %v4993_v19 = vadd.f32 %v3525_v15, %v2011_v16  ;;  %v3714_v20 = vpop.f32.mrb[15].mxu0  ;;  %v2101_v15 = vld [vmem:[%s5150_s12 + $0x10] sm:$0xff] }
 0xd57   : > { %2268 = vrot.lane.b32.xlu0 %v4993_v19, %s4377_s4  ;;  %3729 = vmatmul.mubr.msk.f32.vlgmr.msra.gmra.mrb[16].mxu0 %vm929_vm2, %v4993_v19  ;;  %s5210_s4 = smov 112  }
 0xd58   : > { %3737 = vmatpush3.xpose.msk.msra.mxu0 %vm929_vm2, %v2271_v21  ;;  %3738 = vmatprep.mubr.msk.f32.mxu0 %vm4375_vm0, %v4376_v1 }
 0xd59   : > { %3746 = vmatprep.subr.mxu0 %v4376_v1 }
 0xdc9   : > { %v2269_v22 = vpop.permute.xlu0 %2268 }
 0xdca   : > { %3739 = vmatmul.mubr.msk.f32.vlgmr.msra.gmra.mrb[18].mxu0 %vm929_vm2, %v2269_v22 }
 0xdcb   : > { %3748 = vmatprep.mubr.msk.f32.mxu0 %vm4375_vm0, %v4376_v1  ;;  %3747 = vmatpush3.msra.mxu0 %v2100_v47  ;;  %v3098_v47 = vld [vmem:[%s5154_s16 + $0x8] sm:$0xff] }
 0xdcc   : > { %3756 = vmatprep.subr.mxu0 %v4376_v1 }
 0xe2a   : > { %v2176_v23 = vpop.f32.mrb[16].mxu0 }
 0xe2b   : > { %v2180_v24 = vmul.f32 0.35355338, %v2176_v23  ;;  %v3730_v25 = vpop.f32.mrb[17].mxu0 }
 0xe2d   : > { %v2181_v26 = vsel %vm929_vm2, %v2180_v24, -inf }
 0xe2e   : > { %2182 = vmax.xlane.f32.xlu0 %v2181_v26 }
 0xe9d   : > { %v2342_v27 = vpop.f32.mrb[18].mxu0 }
 0xe9e   : > { %v2346_v28 = vmul.f32 0.35355338, %v2342_v27  ;;  %v3740_v29 = vpop.f32.mrb[19].mxu0 }
 0xea0   : > { %v2347_v30 = vsel %vm929_vm2, %v2346_v28, -inf }
 0xea1   : > { %2348 = vmax.xlane.f32.xlu1 %v2347_v30  ;;  %v2102_v30 = vld [vmem:[%s5150_s12 + $0x18] sm:$0xff] }
 0xeb2   : > { %2358 = vrot.lane.b32.xlu1 %v4986_v13, %s4379_s23 }
 0xeb6   : > { %2582 = vrot.lane.b32.xlu1 %v4986_v13, %s5210_s4 }
 0xebb   : > { %v2183_v31 = vpop.xlane.xlu0 %2182 }
 0xebc   : > { %v2184_v17 = vsub.f32 %v2180_v24, %v2183_v31 }
 0xebe   : > { %v2185_v11 = vmul.f32 1.442695, %v2184_v17 }
 0xec0   : > { %4003 = vpow2.f32 %v2185_v11 }
 0xeca   : > { %v4004_v18 = vpop.eup %4003 }
 0xecb   : > { %v2187_v32 = vsel %vm929_vm2, %v4004_v18, 0.0 }
 0xecc   : > { %2188 = vadd.xlane.f32.xlu0 %v2187_v32 }
 0xf2e   : > { %v2349_v33 = vpop.xlane.xlu1 %2348 }
 0xf2f   : > { %v2350_v34 = vsub.f32 %v2346_v28, %v2349_v33 }
 0xf31   : > { %v2351_v35 = vmul.f32 1.442695, %v2350_v34 }
 0xf32   : > { %v2359_v43 = vpop.permute.xlu1 %2358 }
 0xf33   : > { %4005 = vpow2.f32 %v2351_v35  ;;  %v3545_v35 = vld [vmem:[#allocation9] ss:$0 sm:$0xff] }
 0xf36   : > { %v2583_v51 = vpop.permute.xlu1 %2582 }
 0xf3d   : > { %v4006_v36 = vpop.eup %4005 }
 0xf3e   : > { %v2353_v37 = vsel %vm929_vm2, %v4006_v36, 0.0 }
 0xf3f   : > { %2354 = vadd.xlane.f32.xlu0 %v2353_v37 }
 0xf55   : > { %2192 = vrot.lane.b32.xlu0 %v4986_v13, %s5211_s24 }
 0xf59   : > { %2580 = vrot.lane.b32.xlu0 %v4993_v19, %s5210_s4  ;;  %v2189_v38 = vpop.xlane.xlu0 %2188  ;;  %s833_s4 = scalar_lea.vmem %s5216_s25, %s4808_s26 }
 0xf5a   : > { %4007 = vrcp.f32 %v2189_v38 }
 0xf64   : > { %v4008_v40 = vpop.eup %4007 }
 0xf65   : > { %v2191_v41 = vmul.f32 %v4008_v40, %v4004_v18 }
 0xfcc   : > { %v2355_v39 = vpop.xlane.xlu0 %2354 }
 0xfcd   : > { %4009 = vrcp.f32 %v2355_v39 }
 0xfd0   : > { %v2193_v42 = vpop.permute.xlu0 %2192 }
 0xfd1   : > { %3732 = vmatpush3.msra.mxu1 %v2193_v42 }
 0xfd2   : > { %3734 = vmatmul.mubr.msk.f32.vlgmr.msra.gmra.mrb[14].mxu1 %vm929_vm2, %v2191_v41  ;;  %3741 = vmatprep.subr.mxu1 %v4376_v1 }
 0xfd3   : > { %3742 = vmatpush3.msra.mxu1 %v2359_v43  ;;  %3743 = vmatprep.mubr.msk.f32.mxu1 %vm4375_vm0, %v4376_v1 }
 0xfd4   : > { %3751 = vmatprep.subr.mxu1 %v4376_v1  ;;  %v2581_v52 = vpop.permute.xlu0 %2580 }
 0xfd7   : > { %v4010_v44 = vpop.eup %4009 }
 0xfd8   : > { %v2357_v45 = vmul.f32 %v4010_v44, %v4006_v36 }
 0xfda   : > { %3744 = vmatmul.mubr.msk.f32.vlgmr.msra.gmra.mrb[16].mxu1 %vm929_vm2, %v2357_v45 }
 0xfdb   : > { %3753 = vmatprep.mubr.msk.f32.mxu1 %vm4375_vm0, %v4376_v1  ;;  %3752 = vmatpush3.msra.mxu1 %v2099_v46 }
 0xfdc   : > { %3761 = vmatprep.subr.mxu1 %v4376_v1 }
0x10a5   : > { %v2264_v48 = vpop.f32.mrb[14].mxu1 }
0x10a6   : > { %v3735_v49 = vpop.f32.mrb[15].mxu1  ;;  %3754 = vmatmul.mubr.msk.f32.vlgmr.msra.gmra.mrb[18].mxu1 %vm929_vm2, %v2264_v48 }
0x10a7   : > { %3763 = vmatprep.mubr.msk.f32.mxu1 %vm4375_vm0, %v4376_v1  ;;  %v3100_v49 = vld [vmem:[%s5154_s16 + $0x18] sm:$0xff] }
0x10ad   : > { %v2430_v50 = vpop.f32.mrb[16].mxu1 }
0x10ae   : > { %v3745_v8 = vpop.f32.mrb[17].mxu1  ;;  %3749 = vmatmul.mubr.msk.f32.vlgmr.msra.gmra.mrb[20].mxu0 %vm929_vm2, %v2430_v50 }
0x10af   : > { %3757 = vmatpush3.xpose.msk.msra.mxu0 %vm929_vm2, %v2583_v51  ;;  %3758 = vmatprep.mubr.msk.f32.mxu0 %vm4375_vm0, %v4376_v1  ;;  %v3182_v51 = vld [vmem:[%s5215_s18] sm:$0xff]  ;;  %v3183_v8 = vld [vmem:[%s5215_s18 + $0x8] sm:$0xff] }
0x10b0   : > { %3766 = vmatprep.subr.mxu0 %v4376_v1 }
0x10b2   : > { %3759 = vmatmul.mubr.msk.f32.vlgmr.msra.gmra.mrb[22].mxu0 %vm929_vm2, %v2581_v52  ;;  %v3184_v52 = vld [vmem:[%s5215_s18 + $0x10] sm:$0xff] }
0x10b3   : > { %3768 = vmatprep.mubr.msk.f32.mxu0 %vm4375_vm0, %v4376_v1  ;;  %3767 = vmatpush3.msra.mxu0 %v2101_v15 }
0x10b4   : > { %3776 = vmatprep.subr.mxu0 %v4376_v1 }
0x1179   : > { %v2576_v53 = vpop.f32.mrb[18].mxu1 }
0x117a   : > { %v3755_v54 = vpop.f32.mrb[19].mxu1 }
0x117b   : > { %v3185_v54 = vld [vmem:[%s5215_s18 + $0x18] sm:$0xff] }
0x1181   : > { %v2503_v55 = vpop.f32.mrb[20].mxu0 }
0x1182   : > { %v2577_v56 = vadd.f32 %v2576_v53, %v2503_v55  ;;  %v3750_v57 = vpop.f32.mrb[21].mxu0  ;;  %v3841_v53 = vpack.c.bf16 %v3183_v8, %v3182_v51  ;;  %v3844_v55 = vpack.c.bf16 %v3185_v54, %v3184_v52 }
0x1183   : > { %v3187_v57 = vld [vmem:[%s5215_s18 + $0x28] sm:$0xff] }
0x1185   : > { %v2654_v58 = vpop.f32.mrb[22].mxu0 }
0x1186   : > { %v2658_v59 = vmul.f32 0.35355338, %v2654_v58  ;;  %v3760_v60 = vpop.f32.mrb[23].mxu0 }
0x1188   : > { %v2659_v61 = vsel %vm929_vm2, %v2658_v59, -inf }
0x1189   : > { %2660 = vmax.xlane.f32.xlu1 %v2659_v61 }
0x119a   : > { %2822 = vrot.lane.b32.xlu1 %v4986_v13, %s5212_s22 }
0x119e   : > { %2820 = vrot.lane.b32.xlu1 %v4993_v19, %s5212_s22 }
0x1216   : > { %v2661_v62 = vpop.xlane.xlu1 %2660 }
0x1217   : > { %v2662_v63 = vsub.f32 %v2658_v59, %v2661_v62 }
0x1219   : > { %v2663_v2 = vmul.f32 1.442695, %v2662_v63  ;;  %v3546_v63 = vld [vmem:[#allocation10] ss:$0 sm:$0xff] }
0x121a   : > { %v2823_v10 = vpop.permute.xlu1 %2822 }
0x121b   : > { %4011 = vpow2.f32 %v2663_v2 }
0x121e   : > { %v2821_v14 = vpop.permute.xlu1 %2820 }
0x1225   : > { %v4012_v3 = vpop.eup %4011 }
0x1226   : > { %v2665_v4 = vsel %vm929_vm2, %v4012_v3, 0.0 }
0x1227   : > { %2666 = vadd.xlane.f32.xlu0 %v2665_v4 }
0x123d   : > { %2670 = vrot.lane.b32.xlu0 %v4986_v13, %s5213_s0 }
0x12b4   : > { %v2667_v5 = vpop.xlane.xlu0 %2666 }
0x12b5   : > { %4013 = vrcp.f32 %v2667_v5 }
0x12b8   : > { %v2671_v6 = vpop.permute.xlu0 %2670 }
0x12b9   : > { %3762 = vmatpush3.msra.mxu1 %v2671_v6  ;;  %v3188_v6 = vld [vmem:[%s5215_s18 + $0x30] sm:$0xff] }
0x12ba   : > { %3771 = vmatprep.subr.mxu1 %v4376_v1 }
0x12bf   : > { %v4014_v7 = vpop.eup %4013 }
0x12c0   : > { %v2669_v12 = vmul.f32 %v4014_v7, %v4012_v3  ;;  %v3547_v3 = vld [vmem:[#allocation12] ss:$0 sm:$0xff] }
0x12c2   : > { %3764 = vmatmul.mubr.msk.f32.vlgmr.msra.gmra.mrb[20].mxu1 %vm929_vm2, %v2669_v12 }
0x12c3   : > { %3772 = vmatpush3.xpose.msk.msra.mxu1 %vm929_vm2, %v2823_v10  ;;  %3773 = vmatprep.mubr.msk.f32.mxu1 %vm4375_vm0, %v4376_v1  ;;  %v3548_v10 = vld [vmem:[#allocation13] ss:$0 sm:$0xff] }
0x12c4   : > { %3781 = vmatprep.subr.mxu1 %v4376_v1 }
0x12c6   : > { %3774 = vmatmul.mubr.msk.f32.vlgmr.msra.gmra.mrb[22].mxu1 %vm929_vm2, %v2821_v14 }
0x12c7   : > { %3783 = vmatprep.mubr.msk.f32.mxu1 %vm4375_vm0, %v4376_v1  ;;  %3782 = vmatpush3.msra.mxu1 %v2102_v30 }
0x12c8   : > { %3840 = vmatprep.subr.bf16.mxu1 %v4374_v0 }
0x1395   : > { %v2742_v16 = vpop.f32.mrb[20].mxu1 }
0x1396   : > { %v3765_v19 = vpop.f32.mrb[21].mxu1  ;;  %3769 = vmatmul.mubr.msk.f32.vlgmr.msra.gmra.mrb[24].mxu0 %vm929_vm2, %v2742_v16 }
0x1397   : > { %3778 = vmatprep.mubr.msk.f32.mxu0 %vm4375_vm0, %v4376_v1  ;;  %v3550_v19 = vld [vmem:[#allocation15] ss:$0 sm:$0xff] }
0x1399   : > { %v2894_v20 = vpop.f32.mrb[22].mxu1 }
0x139a   : > { %v2898_v21 = vmul.f32 0.35355338, %v2894_v20  ;;  %v3775_v22 = vpop.f32.mrb[23].mxu1 }
0x139c   : > { %v2899_v23 = vsel %vm929_vm2, %v2898_v21, -inf }
0x139d   : > { %2900 = vmax.xlane.f32.xlu0 %v2899_v23 }
0x13b3   : > { %2910 = vrot.lane.b32.xlu0 %v4986_v13, %s5214_s7 }
0x142a   : > { %v2901_v24 = vpop.xlane.xlu0 %2900 }
0x142b   : > { %v2902_v25 = vsub.f32 %v2898_v21, %v2901_v24 }
0x142d   : > { %v2903_v26 = vmul.f32 1.442695, %v2902_v25 }
0x142e   : > { %v2911_v27 = vpop.permute.xlu0 %2910 }
0x142f   : > { %4015 = vpow2.f32 %v2903_v26  ;;  %3777 = vmatpush3.msra.mxu0 %v2911_v27 }
0x1430   : > { %3834 = vmatprep.subr.bf16.mxu0 %v4374_v0 }
0x1439   : > { %v4016_v28 = vpop.eup %4015 }
0x143a   : > { %v2905_v29 = vsel %vm929_vm2, %v4016_v28, 0.0 }
0x143b   : > { %2906 = vadd.xlane.f32.xlu1 %v2905_v29 }
0x1469   : > { %v2815_v13 = vpop.f32.mrb[24].mxu0 }
0x146a   : > { %v2819_v31 = vadd.f32 %v2815_v13, %v2577_v56  ;;  %v3770_v17 = vpop.f32.mrb[25].mxu0  ;;  %v3186_v56 = vld [vmem:[%s5215_s18 + $0x20] sm:$0xff] }
0x146b   : > { %v3847_v58 = vpack.c.bf16 %v3187_v57, %v3186_v56 }
0x14c8   : > { %v2907_v11 = vpop.xlane.xlu1 %2906 }
0x14c9   : > { %4017 = vrcp.f32 %v2907_v11  ;;  %v3552_v11 = vld [vmem:[#allocation16] ss:$0 sm:$0xff] }
0x14d3   : > { %v4018_v18 = vpop.eup %4017 }
0x14d4   : > { %v2909_v32 = vmul.f32 %v4018_v18, %v4016_v28 }
0x14d6   : > { %3779 = vmatmul.mubr.msk.f32.vlgmr.msra.gmra.mrb[26].mxu0 %vm929_vm2, %v2909_v32  ;;  %v3553_v32 = vld [vmem:[#allocation18] ss:$0 sm:$0xff] }
0x14d7   : > { %3794 = vmatprep.mubr.msk.f32.mxu0 %vm4375_vm0, %v4376_v1 }
0x15a9   : > { %v2982_v33 = vpop.f32.mrb[26].mxu0 }
0x15aa   : > { %v3780_v34 = vpop.f32.mrb[27].mxu0  ;;  %3784 = vmatmul.mubr.msk.f32.vlgmr.msra.gmra.mrb[24].mxu1 %vm929_vm2, %v2982_v33 }
0x15ab   : > { %3813 = vmatprep.mubr.msk.f32.mxu1 %vm4375_vm0, %v4376_v1  ;;  %v3097_v1 = vld [vmem:[%s5154_s16] sm:$0xff]  ;;  %3842 = vmatpush3.bf16.msra.mxu1 %v3841_v53 }
0x15ac   : > { %v3835_v48 = vpack.c.bf16 %v3098_v47, %v3097_v1  ;;  %3843 = vmatprep.subr.bf16.mxu1 %v4374_v0 }
0x15ae   : > { %3836 = vmatpush3.bf16.msra.mxu0 %v3835_v48 }
0x15af   : > { %3837 = vmatprep.subr.bf16.mxu0 %v4374_v0  ;;  %3845 = vmatpush3.bf16.msra.mxu1 %v3844_v55 }
0x15b0   : > { %3846 = vmatprep.subr.bf16.mxu1 %v4374_v0 }
0x15b3   : > { %3848 = vmatpush3.bf16.msra.mxu1 %v3847_v58 }
0x15b4   : > { %3849 = vmatprep.subr.bf16.mxu1 %v4374_v0  ;;  %v3189_v0 = vld [vmem:[%s5215_s18 + $0x38] sm:$0xff] }
0x15b5   : > { %v3850_v7 = vpack.c.bf16 %v3189_v0, %v3188_v6 }
0x15b7   : > { %3851 = vmatpush3.bf16.msra.mxu1 %v3850_v7 }
0x167d   : > { %v3055_v36 = vpop.f32.mrb[24].mxu1 }
0x167e   : > { %v3059_v37 = vadd.f32 %v3055_v36, %v2819_v31  ;;  %v3785_v38 = vpop.f32.mrb[25].mxu1 }
0x1680   : > { %v3066_v39 = vadd.f32 %v3545_v35, %v3059_v37 }
0x1682   : > { %v3067_v40 = vadd.f32 %v3066_v39, %v4980_v9  ;;  %v3099_v9 = vld [vmem:[%s5154_s16 + $0x10] sm:$0xff] }
0x1683   : > { %v3838_v50 = vpack.c.bf16 %v3100_v49, %v3099_v9 }
0x1684   : > { %v3070_v41 = vsel %vm847_vm1, %v3067_v40, 0.0 }
0x1685   : > { %3071 = vadd.xlane.f32.xlu1 %v3070_v41  ;;  %3839 = vmatpush3.bf16.msra.mxu0 %v3838_v50 }
0x1712   : > { %v3072_v42 = vpop.xlane.xlu1 %3071 }
0x1713   : > { %v3073_v43 = vmul.f32 0.03125, %v3072_v42 }
0x1715   : > { %v3074_v44 = vsub.f32 %v3067_v40, %v3073_v43 }
0x1717   : > { %v3075_v45 = vmul.f32 %v3074_v44, %v3074_v44 }
0x1719   : > { %v3076_v46 = vsel %vm847_vm1, %v3075_v45, 0.0 }
0x171a   : > { %3077 = vadd.xlane.f32.xlu1 %v3076_v46 }
0x17a7   : > { %v3078_v59 = vpop.xlane.xlu1 %3077 }
0x17a8   : > { %v3079_v60 = vmul.f32 0.03125, %v3078_v59 }
0x17aa   : > { %v3080_v61 = vadd.f32 1e-05, %v3079_v60 }
0x17ac   : > { %4019 = vrsqrt.f32 %v3080_v61 }
0x17b6   : > { %v4020_v62 = vpop.eup %4019 }
0x17b7   : > { %v3082_v2 = vmul.f32 %v4020_v62, %v3074_v44 }
0x17b9   : > { %v3089_v4 = vmul.f32 %v3546_v63, %v3082_v2 }
0x17bb   : > { %v3096_v5 = vadd.f32 %v3547_v3, %v3089_v4 }
0x17bd   : > { %3795 = vmatmul.mubr.msk.f32.vlgmr.msra.gmra.mrb[28].mxu0 %vm847_vm1, %v3096_v5 }
0x1890   : > { %v3177_v12 = vpop.f32.mrb[28].mxu0 }
0x1891   : > { %v3178_v14 = vadd.f32 %v3548_v10, %v3177_v12  ;;  %v3796_v15 = vpop.f32.mrb[29].mxu0 }
0x1893   : > { %v3181_v16 = vmax.f32 %v3178_v14, 0.0 }
0x1895   : > { %3814 = vmatmul.mubr.msk.f32.vlgmr.msra.gmra.mrb[26].mxu1 %vm3197_vm4, %v3181_v16 }
0x1968   : > { %v3267_v20 = vpop.f32.mrb[26].mxu1 }
0x1969   : > { %v3268_v21 = vadd.f32 %v3550_v19, %v3267_v20  ;;  %v3815_v22 = vpop.f32.mrb[27].mxu1 }
0x196b   : > { %v3271_v23 = vadd.f32 %v3268_v21, %v3096_v5 }
0x196d   : > { %v3274_v24 = vsel %vm847_vm1, %v3271_v23, 0.0 }
0x196e   : > { %3275 = vadd.xlane.f32.xlu1 %v3274_v24 }
0x19fb   : > { %v3276_v25 = vpop.xlane.xlu1 %3275 }
0x19fc   : > { %v3277_v26 = vmul.f32 0.03125, %v3276_v25 }
0x19fe   : > { %v3278_v27 = vsub.f32 %v3271_v23, %v3277_v26 }
0x1a00   : > { %v3279_v28 = vmul.f32 %v3278_v27, %v3278_v27 }
0x1a02   : > { %v3280_v29 = vsel %vm847_vm1, %v3279_v28, 0.0 }
0x1a03   : > { %3281 = vadd.xlane.f32.xlu1 %v3280_v29 }
0x1a90   : > { %v3282_v30 = vpop.xlane.xlu1 %3281 }
0x1a91   : > { %v3283_v13 = vmul.f32 0.03125, %v3282_v30 }
0x1a93   : > { %v3284_v31 = vadd.f32 1e-05, %v3283_v13 }
0x1a95   : > { %4021 = vrsqrt.f32 %v3284_v31 }
0x1a9f   : > { %v4022_v17 = vpop.eup %4021 }
0x1aa0   : > { %v3286_v18 = vmul.f32 %v4022_v17, %v3278_v27 }
0x1aa2   : > { %v3293_v33 = vmul.f32 %v3552_v11, %v3286_v18 }
0x1aa4   : > { %v3300_v34 = vadd.f32 %v3553_v32, %v3293_v33 }
0x1aa6   : > { %3301 = vst.msk [vmem:[%s833_s4] sm:$0xff] %vm847_vm1, %v3300_v34 }
0x1aa7 PF: > { %s5217_s24 = sld [smem:[#allocation25_spill]] }
0x1aad   : > { %s38_s3 = sadd.s32 1, %s5217_s24  }
0x1aae   : > { %p35_p1 = scmp.ge.s32.totalorder %s38_s3, 4  }
0x1ab0   :  { %37 = sbr.rel (!%p35_p1) target bundleno = 17 (0x11), region = 186 }
0x1ab7   :  { %3321 = vsyncpa [#allocation3], 1 }
0x1ab8   :  { %3323 = vsyncpa [#allocation3 + $0x1], 1 }
0x1ab9   :  { %3324 = vsyncpa [#allocation5], 1 }
0x1aba   :  { %3325 = vsyncpa [#allocation8], 1 }
0x1abb   :  { %3326 = vsyncpa [#allocation11], 1 }
0x1abc   :  { %3327 = vsyncpa [#allocation14], 1 }
0x1abd   :  { %3328 = vsyncpa [#allocation17], 1 }

// kernel: _lambda_.11
= control target key start
LH: loop header
LB: loop body
LE: loop exit
PB: predicated region body
PF: predicated region fallthrough
CT: control target
= control target key end

     0   :  { %9 = vsyncpa [#allocation3], 0  ;;  %s348_s0 = inlined_call_operand.vmem [shape: f32[16,32], index: 0, kind: input, shape index: {}]   ;;  %s349_s1 = inlined_call_operand.vmem [shape: f32[1,32], index: 1, kind: input, shape index: {}]   ;;  %s350_s2 = inlined_call_operand.hbm [shape: f32[1,32], index: 2, kind: input, shape index: {}]   ;;  %s351_s3 = inlined_call_operand.vmem [shape: f32[32,64], index: 3, kind: input, shape index: {}]   ;;  %s352_s4 = inlined_call_operand.hbm [shape: f32[16,64], index: 4, kind: output, shape index: {}]  }
   0x1   :  { %10 = vsyncpa [#allocation4], 0  ;;  %s268_s15 = smov [#allocation2]   ;;  %s220_s19 = scalar_lea.hbm %s350_s2, 16 }
   0x2   :  { %s21_s16 = sshll.u32 %s268_s15, 4  ;;  %p221_p0 = scmp.ne.s32.totalorder %s350_s2, %s220_s19  ;;  %s22_s16 = int_to_ptr.vmem [resolvable:$true] %s21_s16 }
   0x3   :  { %p224_p1 = scmp.lt.u32.totalorder %s220_s19, %s350_s2 }
   0x5   :  { %p226_p2 = pnand %p224_p1, %p221_p0 }
   0x7   :  { %229 = shalt.err (!%p226_p2)
}
   0x8   :  { %s230_s24 = scalar_lea.vmem %s22_s16, 16  ;;  %s234_s25 = scalar_lea.vmem %s22_s16, 32 }
   0x9   :  { %p231_p3 = scmp.ne.s32.totalorder %s22_s16, %s230_s24  ;;  %p235_p4 = scmp.lt.s32.totalorder %s22_s16, %s22_s16 }
   0xa   :  { %p236_p5 = scmp.lt.s32.totalorder %s234_s25, %s230_s24 }
   0xc   :  { %p237_p6 = por %p236_p5, %p235_p4 }
   0xe   :  { %p238_p7 = pnand %p237_p6, %p231_p3 }
  0x10   :  { %241 = shalt.err (!%p238_p7)
}
  0x11   :  { %24 = dma.hbm_to_vmem [thread:$0]  %s350_s2, 16, %s22_s16, [#allocation3]  }
  0x12   :  { %264 = dma.done.wait [#allocation3], 16  }
  0x13   :  { %265 = vsyncadd [#allocation3], 4294967280  ;;  %vm34_vm0 = vcmask 261120   ;;  %v30_v0 = vld [vmem:[%s348_s0] sm:$0xff]  ;;  %v31_v1 = vld [vmem:[%s348_s0 + $0x8] sm:$0xff]  ;;  %vm163_vm1 = vcmask 523264  }
  0x14   :  { %v35_v2 = vsel %vm34_vm0, %v30_v0, 0.0  ;;  %v38_v3 = vsel %vm34_vm0, %v31_v1, 0.0  ;;  %v78_v14 = vld [vmem:[%s351_s3] sm:$0xff]  ;;  %v79_v15 = vld [vmem:[%s351_s3 + $0x8] sm:$0xff]  ;;  %v80_v16 = vld [vmem:[%s351_s3 + $0x10] sm:$0xff] }
  0x15   :  { %36 = vadd.xlane.f32.xlu0 %v35_v2  ;;  %v204_v17 = vpack.c.bf16 %v79_v15, %v78_v14  ;;  %v81_v18 = vld [vmem:[%s351_s3 + $0x18] sm:$0xff]  ;;  %v183_v27 = vld [vmem:[%s349_s1] ss:$0 sm:$0xff]  ;;  %s269_s3 = smov [#allocation5]  }
  0x16   :  { %v208_v19 = vpack.c.bf16 %v81_v18, %v80_v16  ;;  %v184_v29 = vld [vmem:[#allocation2] ss:$0 sm:$0xff]  ;;  %s171_s14 = sshll.u32 %s269_s3, 4  ;;  %s172_s14 = int_to_ptr.vmem [resolvable:$true] %s171_s14 }
  0x17   :  { %205 = vmatprep.subr.bf16.mxu0 %v204_v17  ;;  %s242_s1 = scalar_lea.vmem %s172_s14, 256  ;;  %p247_p9 = scmp.lt.s32.totalorder %s172_s14, %s172_s14 }
  0x18   :  { %207 = vmatpush3.bf16.msra.mxu0 %v204_v17  ;;  %p243_p8 = scmp.ne.s32.totalorder %s172_s14, %s242_s1  ;;  %p248_p10 = scmp.lt.s32.totalorder %s242_s1, %s242_s1 }
  0x19   :  { %39 = vadd.xlane.f32.xlu0 %v38_v3  ;;  %209 = vmatprep.subr.bf16.mxu0 %v208_v19 }
  0x1a   :  { %p249_p11 = por %p248_p10, %p247_p9 }
  0x1c   :  { %211 = vmatpush3.bf16.msra.mxu0 %v208_v19  ;;  %p250_p12 = pnand %p249_p11, %p243_p8 }
  0xa2   :  { %v37_v4 = vpop.xlane.xlu0 %36 }
  0xa3   :  { %v42_v5 = vmul.f32 0.03125, %v37_v4 }
  0xa5   :  { %v44_v6 = vsub.f32 %v30_v0, %v42_v5 }
  0xa6   :  { %v40_v7 = vpop.xlane.xlu0 %39 }
  0xa7   :  { %v43_v8 = vmul.f32 0.03125, %v40_v7  ;;  %v46_v9 = vmul.f32 %v44_v6, %v44_v6 }
  0xa9   :  { %v45_v10 = vsub.f32 %v31_v1, %v43_v8  ;;  %v48_v11 = vsel %vm34_vm0, %v46_v9, 0.0 }
  0xaa   :  { %49 = vadd.xlane.f32.xlu1 %v48_v11 }
  0xab   :  { %v47_v12 = vmul.f32 %v45_v10, %v45_v10 }
  0xad   :  { %v51_v13 = vsel %vm34_vm0, %v47_v12, 0.0 }
  0xae   :  { %52 = vadd.xlane.f32.xlu1 %v51_v13 }
 0x137   :  { %v50_v20 = vpop.xlane.xlu1 %49 }
 0x138   :  { %v54_v21 = vmul.f32 0.03125, %v50_v20 }
 0x13a   :  { %v56_v22 = vadd.f32 1e-05, %v54_v21 }
 0x13b   :  { %v53_v23 = vpop.xlane.xlu1 %52 }
 0x13c   :  { %216 = vrsqrt.f32 %v56_v22  ;;  %v55_v24 = vmul.f32 0.03125, %v53_v23 }
 0x13e   :  { %v57_v25 = vadd.f32 1e-05, %v55_v24 }
 0x140   :  { %218 = vrsqrt.f32 %v57_v25 }
 0x146   :  { %v217_v26 = vpop.eup %216 }
 0x147   :  { %v60_v28 = vmul.f32 %v217_v26, %v44_v6 }
 0x149   :  { %v68_v30 = vmul.f32 %v183_v27, %v60_v28 }
 0x14a   :  { %v219_v31 = vpop.eup %218 }
 0x14b   :  { %v61_v32 = vmul.f32 %v219_v31, %v45_v10  ;;  %v76_v33 = vadd.f32 %v184_v29, %v68_v30 }
 0x14d   :  { %v69_v34 = vmul.f32 %v183_v27, %v61_v32  ;;  %201 = vmatprep.mubr.msk.f32.mxu0 %vm34_vm0, %v76_v33 }
 0x14f   :  { %v77_v35 = vadd.f32 %v184_v29, %v69_v34 }
 0x151   :  { %202 = vmatmul.mubr.msk.f32.vlgmr.msra.gmra.mrb[0].mxu0 %vm34_vm0, %v77_v35 }
 0x224   :  { %v203_v36 = vpop.f32.mrb[0].mxu0 }
 0x225   :  { %165 = vst.msk [vmem:[#allocation5 + $0x8] sm:$0xff] %vm163_vm1, %v203_v36  ;;  %v154_v37 = vpop.f32.mrb[1].mxu0 }
 0x226   :  { %164 = vst.msk [vmem:[#allocation5] sm:$0xff] %vm163_vm1, %v154_v37 }
 0x227   :  { %253 = shalt.err (!%p250_p12)
}
 0x228   :  { %s254_s17 = scalar_lea.hbm %s352_s4, 256 }
 0x229   :  { %p255_p13 = scmp.ne.s32.totalorder %s352_s4, %s254_s17  ;;  %p258_p0 = scmp.lt.u32.totalorder %s254_s17, %s352_s4 }
 0x22b   :  { %p260_p1 = pnand %p258_p0, %p255_p13 }
 0x22d   :  { %263 = shalt.err (!%p260_p1)
}
 0x22e   :  { %s270_s22 = smov 128   ;;  %s271_s23 = smov 8  }
 0x22f   :  { %177 = dma.vmem_to_hbm [thread:$0]  %s172_s14, 256, %s352_s4, [#allocation4], %s270_s22, %s270_s22, %s271_s23  }
 0x230   :  { %266 = dma.done.wait [#allocation4], 256  }
 0x231   :  { %267 = vsyncadd [#allocation4], 4294967040 }
 0x232   :  { %181 = vsyncpa [#allocation3], 1 }
 0x233   :  { %182 = vsyncpa [#allocation4], 1 }

</bundles_post_ra>
